<compile_context>
chip_gen: v6e
topology: v6e:2x2x1
jax: 0.10.0
libtpu: 0.0.40
codegen_flags: <defaults>
</compile_context>

<pallas_src>
import jax
import jax.numpy as jnp
from jax.experimental import pallas as pl
from jax.experimental.pallas import tpu as pltpu

# ---- scaled-down config (original: model_dim=128, n_samples=2**15, filter_size=256,
#      n_events=8) -------------------------------------------------------------------
MODEL_DIM = 32
N_SAMPLES = 2048
N_EVENTS = 4
BATCH = 2
N_FILTERS = 32
FILTER_SIZE = 64
N_HIDDEN = 3            # LinearOutputStack(model_dim, 3, out_channels=n_filters)
LEAK = 0.2
SAMPLE_TILE = 1024      # lane-dense output tile (multiple of 128); retune per chip gen
                        # for the full-size config (v7x <=2048, v6e 2048-4096, v5e 512).


def leaky(x):
    return jax.nn.leaky_relu(x, LEAK)


# ====================== kernel 1: latents -> combined per-event filters ======================

def _mixture_comb_kernel(lat_ref, wh_ref, bh_ref, wf_ref, bf_ref, filt_ref, comb_ref):
    # lat_ref:  (BE, D) f32      wh/bh: (H, D, D)/(H, 1, D)   wf/bf: (D, NF)/(1, NF)
    # filt_ref: (NF, FS) f32     comb_ref: (BE, FS) f32
    # TODO(synk): LinearOutputStack norm-layer details are not visible; modeled as
    #             Linear+bias+leaky hidden blocks followed by a plain final Linear.
    h = lat_ref[...]
    for i in range(wh_ref.shape[0]):                 # fused Linear + bias + leaky stack
        h = leaky(jnp.dot(h, wh_ref[i], preferred_element_type=jnp.float32) + bh_ref[i])
    mx = jnp.dot(h, wf_ref[...], preferred_element_type=jnp.float32) + bf_ref[...]
    mx = mx * mx                                     # (BE, NF)
    # conv is linear in the filter bank -> one combined FIR per event
    comb_ref[...] = jnp.dot(mx, filt_ref[...], preferred_element_type=jnp.float32)


# ====================== kernel 2: tiled convolution with the combined filter =================

def _resonance_conv_kernel(comb_ref, chunk_ref, out_ref):
    # comb_ref:  (BE, FS)          f32   resident across all grid steps (same block index)
    # chunk_ref: (1, BE, TILE+FS)  bf16  raw padded-signal chunk for this sample tile
    # out_ref:   (BE, TILE)        f32   lane-dense output tile
    fs = comb_ref.shape[1]
    ts = out_ref.shape[1]
    comb = comb_ref[...]                              # f32
    chunk = chunk_ref[0].astype(jnp.float32)          # (BE, TILE+FS) f32
    acc = jnp.zeros(out_ref.shape, jnp.float32)
    # out[e, t] = sum_k comb[e, k] * sig_pad[e, t + k]   (cross-correlation == F.conv1d)
    # FS shifted-AXPY steps: unaligned lane slice (XLU slot) + broadcast mul-add (VPU).
    # K = FS per event -- no BE-fold redundant MACs, no im2col slab in HBM or VMEM.
    for k in range(fs):                               # static unroll
        acc = acc + comb[:, k:k + 1] * chunk[:, k:k + ts]
    out_ref[...] = acc


# ====================================== wrapper ==============================================

def resonance_forward(signal, latents, params, *, sample_tile=SAMPLE_TILE):
    """signal: (B, E, 1, S) f32, latents: (B, E, D) f32  ->  (B, E, 1, S) f32."""
    B, E, _, S = signal.shape
    BE = B * E
    D = latents.shape[-1]
    NF, FS = params['filters'].shape
    assert S % sample_tile == 0 and sample_tile % 128 == 0
    nt = S // sample_tile

    lat = latents.reshape(BE, D).astype(jnp.float32)

    # ---- one-shot mixture/comb kernel (tiny, everything resident in VMEM, no grid) --------
    comb = pl.pallas_call(
        _mixture_comb_kernel,
        out_shape=jax.ShapeDtypeStruct((BE, FS), jnp.float32),
    )(lat, params['wh'], params['bh'], params['wf'], params['bf'],
      params['filters'].astype(jnp.float32))

    # ---- raw padded-signal chunks: one contiguous (BE, TILE+FS) block per grid step.
    # Symmetric pad FS//2 + keep first S outputs + no filter flip == exact semantics of
    # F.conv1d(signal, filters, padding=FS//2)[..., :S].  Only ~FS/TILE (6%) duplication.
    pad = FS // 2
    sig_pad = jnp.pad(signal.reshape(BE, S), ((0, 0), (pad, pad)))            # (BE, S+FS)
    chunks = jnp.stack(
        [sig_pad[:, t * sample_tile: t * sample_tile + sample_tile + FS] for t in range(nt)],
        axis=0).astype(jnp.bfloat16)                                          # (nt, BE, TILE+FS)

    out = pl.pallas_call(
        _resonance_conv_kernel,
        out_shape=jax.ShapeDtypeStruct((BE, S), jnp.float32),
        grid=(nt,),
        in_specs=[
            pl.BlockSpec((BE, FS), lambda t: (0, 0)),                         # comb, resident
            pl.BlockSpec((1, BE, sample_tile + FS), lambda t: (t, 0, 0)),     # signal chunk
        ],
        out_specs=pl.BlockSpec((BE, sample_tile), lambda t: (0, t)),
        compiler_params=pltpu.CompilerParams(
            dimension_semantics=("parallel",)),   # independent sample tiles -> both v7x TCs
    )(comb, chunks)

    return out.reshape(B, E, 1, S)


# ================================ params / reference =========================================

def sinusoid_bank(n_filters, size):
    # TODO(synk): zounds morlet_filter_bank unavailable; deterministic Hann-windowed
    #             unit-norm sinusoid bank stands in for the real-valued morlet bank.
    t = jnp.arange(size, dtype=jnp.float32)
    freqs = jnp.geomspace(0.01, 0.45, n_filters)[:, None]
    win = 0.5 - 0.5 * jnp.cos(2.0 * jnp.pi * t / (size - 1))
    bank = jnp.cos(2.0 * jnp.pi * freqs * t[None, :]) * win[None, :]
    return (bank / (jnp.linalg.norm(bank, axis=-1, keepdims=True) + 1e-8)).astype(jnp.float32)


def init_params(key):
    kh, kb, kf, kfb = jax.random.split(key, 4)
    D, NF, FS, H = MODEL_DIM, N_FILTERS, FILTER_SIZE, N_HIDDEN
    return {
        # weights stored (in, out) so neither wrapper nor kernel ever transposes
        'wh': 0.1 * jax.random.normal(kh, (H, D, D), jnp.float32),
        'bh': 0.1 * jax.random.normal(kb, (H, 1, D), jnp.float32),
        'wf': 0.1 * jax.random.normal(kf, (D, NF), jnp.float32),
        'bf': 0.1 * jax.random.normal(kfb, (1, NF), jnp.float32),
        'filters': sinusoid_bank(NF, FS),
    }


def resonance_ref(signal, latents, params):
    # Pure-JAX mirror of the PyTorch forward (filter-then-mix order, f32 throughout).
    B, E, _, S = signal.shape
    BE = B * E
    FS = params['filters'].shape[1]
    hp = jax.lax.Precision.HIGHEST
    sig = signal.reshape(BE, 1, S)
    filtered = jax.lax.conv_general_dilated(
        sig, params['filters'][:, None, :], window_strides=(1,),
        padding=[(FS // 2, FS // 2)],
        dimension_numbers=('NCH', 'OIH', 'NCH'),
        precision=hp)[..., :S]                                        # (BE, NF, S)
    h = latents.reshape(BE, -1)
    for i in range(params['wh'].shape[0]):
        h = leaky(jnp.dot(h, params['wh'][i], precision=hp) + params['bh'][i])
    mx = (jnp.dot(h, params['wf'], precision=hp) + params['bf']) ** 2  # (BE, NF)
    out = jnp.sum(filtered * mx[:, :, None], axis=1)                   # (BE, S)
    return out.reshape(B, E, 1, S)


# ====================================== main =================================================

if __name__ == "__main__":
    key = jax.random.PRNGKey(0)
    kp, ks, kl = jax.random.split(key, 3)
    params = init_params(kp)
    signal = jax.random.normal(ks, (BATCH, N_EVENTS, 1, N_SAMPLES), jnp.float32)
    latents = jax.random.normal(kl, (BATCH, N_EVENTS, MODEL_DIM), jnp.float32)

    fwd = jax.jit(resonance_forward)
    out = jax.block_until_ready(fwd(signal, latents, params))

    assert out.shape == (BATCH, N_EVENTS, 1, N_SAMPLES), out.shape
    assert bool(jnp.all(jnp.isfinite(out)))

    ref = resonance_ref(signal, latents, params)
    rel = float(jnp.linalg.norm(out - ref) / (jnp.linalg.norm(ref) + 1e-8))
    assert rel < 3e-2, f"relative L2 error too high: {rel}"

    print("KERNEL_OK")
</pallas_src>

<mosaic_0001>
module attributes {stable_mosaic.version = 11 : i64} {
  func.func @_mixture_comb_kernel(%arg0: memref<8x32xf32, #tpu.memory_space<vmem>>, %arg1: memref<3x32x32xf32, #tpu.memory_space<vmem>>, %arg2: memref<3x1x32xf32, #tpu.memory_space<vmem>>, %arg3: memref<32x32xf32, #tpu.memory_space<vmem>>, %arg4: memref<1x32xf32, #tpu.memory_space<vmem>>, %arg5: memref<32x64xf32, #tpu.memory_space<vmem>>, %arg6: memref<8x64xf32, #tpu.memory_space<vmem>>) attributes {dimension_semantics = [], scalar_prefetch = 0 : i64, scratch_operands = 0 : i64, tpu.core_type = #tpu.core_type<tc>} {
    %c0 = arith.constant 0 : index
    %c0_0 = arith.constant 0 : index
    %0 = vector.load %arg0[%c0, %c0_0] : memref<8x32xf32, #tpu.memory_space<vmem>>, vector<8x32xf32>
    %c0_1 = arith.constant 0 : index
    %c0_2 = arith.constant 0 : index
    %c0_3 = arith.constant 0 : index
    %1 = vector.load %arg1[%c0_1, %c0_2, %c0_3] : memref<3x32x32xf32, #tpu.memory_space<vmem>>, vector<1x32x32xf32>
    %2 = vector.shape_cast %1 : vector<1x32x32xf32> to vector<32x32xf32>
    %cst = arith.constant dense<0.000000e+00> : vector<8x32xf32>
    %3 = tpu.matmul %0, %2, %cst {dimension_numbers = #tpu.dot_dimension_numbers<[1], [0], [0], [1], [0, 0, 1, 1], [], []>} : vector<8x32xf32>, vector<32x32xf32>, vector<8x32xf32> -> vector<8x32xf32>
    %c0_4 = arith.constant 0 : index
    %c0_5 = arith.constant 0 : index
    %c0_6 = arith.constant 0 : index
    %4 = vector.load %arg2[%c0_4, %c0_5, %c0_6] : memref<3x1x32xf32, #tpu.memory_space<vmem>>, vector<1x1x32xf32>
    %5 = vector.shape_cast %4 : vector<1x1x32xf32> to vector<1x32xf32>
    %6 = vector.broadcast %5 : vector<1x32xf32> to vector<8x32xf32>
    %7 = arith.addf %3, %6 : vector<8x32xf32>
    %cst_7 = arith.constant 2.000000e-01 : f32
    %cst_8 = arith.constant 0.000000e+00 : f32
    %8 = vector.broadcast %cst_8 : f32 to vector<8x32xf32>
    %9 = arith.cmpf oge, %7, %8 : vector<8x32xf32>
    %10 = vector.broadcast %cst_7 : f32 to vector<8x32xf32>
    %11 = arith.mulf %10, %7 : vector<8x32xf32>
    %12 = arith.select %9, %7, %11 : vector<8x32xi1>, vector<8x32xf32>
    %c1 = arith.constant 1 : index
    %c0_9 = arith.constant 0 : index
    %c0_10 = arith.constant 0 : index
    %13 = vector.load %arg1[%c1, %c0_9, %c0_10] : memref<3x32x32xf32, #tpu.memory_space<vmem>>, vector<1x32x32xf32>
    %14 = vector.shape_cast %13 : vector<1x32x32xf32> to vector<32x32xf32>
    %cst_11 = arith.constant dense<0.000000e+00> : vector<8x32xf32>
    %15 = tpu.matmul %12, %14, %cst_11 {dimension_numbers = #tpu.dot_dimension_numbers<[1], [0], [0], [1], [0, 0, 1, 1], [], []>} : vector<8x32xf32>, vector<32x32xf32>, vector<8x32xf32> -> vector<8x32xf32>
    %c1_12 = arith.constant 1 : index
    %c0_13 = arith.constant 0 : index
    %c0_14 = arith.constant 0 : index
    %16 = vector.load %arg2[%c1_12, %c0_13, %c0_14] : memref<3x1x32xf32, #tpu.memory_space<vmem>>, vector<1x1x32xf32>
    %17 = vector.shape_cast %16 : vector<1x1x32xf32> to vector<1x32xf32>
    %18 = vector.broadcast %17 : vector<1x32xf32> to vector<8x32xf32>
    %19 = arith.addf %15, %18 : vector<8x32xf32>
    %cst_15 = arith.constant 2.000000e-01 : f32
    %cst_16 = arith.constant 0.000000e+00 : f32
    %20 = vector.broadcast %cst_16 : f32 to vector<8x32xf32>
    %21 = arith.cmpf oge, %19, %20 : vector<8x32xf32>
    %22 = vector.broadcast %cst_15 : f32 to vector<8x32xf32>
    %23 = arith.mulf %22, %19 : vector<8x32xf32>
    %24 = arith.select %21, %19, %23 : vector<8x32xi1>, vector<8x32xf32>
    %c2 = arith.constant 2 : index
    %c0_17 = arith.constant 0 : index
    %c0_18 = arith.constant 0 : index
    %25 = vector.load %arg1[%c2, %c0_17, %c0_18] : memref<3x32x32xf32, #tpu.memory_space<vmem>>, vector<1x32x32xf32>
    %26 = vector.shape_cast %25 : vector<1x32x32xf32> to vector<32x32xf32>
    %cst_19 = arith.constant dense<0.000000e+00> : vector<8x32xf32>
    %27 = tpu.matmul %24, %26, %cst_19 {dimension_numbers = #tpu.dot_dimension_numbers<[1], [0], [0], [1], [0, 0, 1, 1], [], []>} : vector<8x32xf32>, vector<32x32xf32>, vector<8x32xf32> -> vector<8x32xf32>
    %c2_20 = arith.constant 2 : index
    %c0_21 = arith.constant 0 : index
    %c0_22 = arith.constant 0 : index
    %28 = vector.load %arg2[%c2_20, %c0_21, %c0_22] : memref<3x1x32xf32, #tpu.memory_space<vmem>>, vector<1x1x32xf32>
    %29 = vector.shape_cast %28 : vector<1x1x32xf32> to vector<1x32xf32>
    %30 = vector.broadcast %29 : vector<1x32xf32> to vector<8x32xf32>
    %31 = arith.addf %27, %30 : vector<8x32xf32>
    %cst_23 = arith.constant 2.000000e-01 : f32
    %cst_24 = arith.constant 0.000000e+00 : f32
    %32 = vector.broadcast %cst_24 : f32 to vector<8x32xf32>
    %33 = arith.cmpf oge, %31, %32 : vector<8x32xf32>
    %34 = vector.broadcast %cst_23 : f32 to vector<8x32xf32>
    %35 = arith.mulf %34, %31 : vector<8x32xf32>
    %36 = arith.select %33, %31, %35 : vector<8x32xi1>, vector<8x32xf32>
    %c0_25 = arith.constant 0 : index
    %c0_26 = arith.constant 0 : index
    %37 = vector.load %arg3[%c0_25, %c0_26] : memref<32x32xf32, #tpu.memory_space<vmem>>, vector<32x32xf32>
    %cst_27 = arith.constant dense<0.000000e+00> : vector<8x32xf32>
    %38 = tpu.matmul %36, %37, %cst_27 {dimension_numbers = #tpu.dot_dimension_numbers<[1], [0], [0], [1], [0, 0, 1, 1], [], []>} : vector<8x32xf32>, vector<32x32xf32>, vector<8x32xf32> -> vector<8x32xf32>
    %c0_28 = arith.constant 0 : index
    %c0_29 = arith.constant 0 : index
    %39 = vector.load %arg4[%c0_28, %c0_29] : memref<1x32xf32, #tpu.memory_space<vmem>>, vector<1x32xf32>
    %40 = vector.broadcast %39 : vector<1x32xf32> to vector<8x32xf32>
    %41 = arith.addf %38, %40 : vector<8x32xf32>
    %42 = arith.mulf %41, %41 : vector<8x32xf32>
    %c0_30 = arith.constant 0 : index
    %c0_31 = arith.constant 0 : index
    %43 = vector.load %arg5[%c0_30, %c0_31] : memref<32x64xf32, #tpu.memory_space<vmem>>, vector<32x64xf32>
    %cst_32 = arith.constant dense<0.000000e+00> : vector<8x64xf32>
    %44 = tpu.matmul %42, %43, %cst_32 {dimension_numbers = #tpu.dot_dimension_numbers<[1], [0], [0], [1], [0, 0, 1, 1], [], []>} : vector<8x32xf32>, vector<32x64xf32>, vector<8x64xf32> -> vector<8x64xf32>
    %c0_33 = arith.constant 0 : index
    %c0_34 = arith.constant 0 : index
    %45 = vector.load %arg6[%c0_33, %c0_34] : memref<8x64xf32, #tpu.memory_space<vmem>>, vector<8x64xf32>
    tpu.vector_store %arg6[%c0_33, %c0_34], %44 {strides = array<i32>} : memref<8x64xf32, #tpu.memory_space<vmem>>, vector<8x64xf32>,
    return
  }
}

module attributes {stable_mosaic.version = 11 : i64} {
  func.func @_resonance_conv_kernel(%arg0: i32, %arg1: memref<8x64xf32, #tpu.memory_space<vmem>>, %arg2: memref<1x8x1088xbf16, #tpu.memory_space<vmem>>, %arg3: memref<8x1024xf32, #tpu.memory_space<vmem>>) attributes {dimension_semantics = [#tpu.dimension_semantics<parallel>], iteration_bounds = array<i64: 2>, scalar_prefetch = 0 : i64, scratch_operands = 0 : i64, tpu.core_type = #tpu.core_type<tc>, window_params = [{pipeline_mode = #tpu.pipeline_mode<synchronous>, transform_indices = @transform_0, window_bounds = array<i64: 8, 64>}, {transform_indices = @transform_1, window_bounds = array<i64: 1, 8, 1088>}, {transform_indices = @transform_2, window_bounds = array<i64: 8, 1024>}]} {
    %c0 = arith.constant 0 : index
    %c0_0 = arith.constant 0 : index
    %0 = vector.load %arg1[%c0, %c0_0] : memref<8x64xf32, #tpu.memory_space<vmem>>, vector<8x64xf32>
    %c0_1 = arith.constant 0 : index
    %c0_2 = arith.constant 0 : index
    %c0_3 = arith.constant 0 : index
    %1 = vector.load %arg2[%c0_1, %c0_2, %c0_3] : memref<1x8x1088xbf16, #tpu.memory_space<vmem>>, vector<1x8x1088xbf16>
    %2 = vector.shape_cast %1 : vector<1x8x1088xbf16> to vector<8x1088xbf16>
    %3 = arith.extf %2 : vector<8x1088xbf16> to vector<8x1088xf32>
    %cst = arith.constant 0.000000e+00 : f32
    %4 = vector.broadcast %cst : f32 to vector<8x1024xf32>
    %5 = vector.extract_strided_slice %0 {offsets = [0, 0], sizes = [8, 1], strides = [1, 1]} : vector<8x64xf32> to vector<8x1xf32>
    %6 = vector.extract_strided_slice %3 {offsets = [0, 0], sizes = [8, 1024], strides = [1, 1]} : vector<8x1088xf32> to vector<8x1024xf32>
    %7 = vector.broadcast %5 : vector<8x1xf32> to vector<8x1024xf32>
    %8 = arith.mulf %7, %6 : vector<8x1024xf32>
    %9 = arith.addf %4, %8 : vector<8x1024xf32>
    %10 = vector.extract_strided_slice %0 {offsets = [0, 1], sizes = [8, 1], strides = [1, 1]} : vector<8x64xf32> to vector<8x1xf32>
    %11 = vector.extract_strided_slice %3 {offsets = [0, 1], sizes = [8, 1024], strides = [1, 1]} : vector<8x1088xf32> to vector<8x1024xf32>
    %12 = vector.broadcast %10 : vector<8x1xf32> to vector<8x1024xf32>
    %13 = arith.mulf %12, %11 : vector<8x1024xf32>
    %14 = arith.addf %9, %13 : vector<8x1024xf32>
    %15 = vector.extract_strided_slice %0 {offsets = [0, 2], sizes = [8, 1], strides = [1, 1]} : vector<8x64xf32> to vector<8x1xf32>
    %16 = vector.extract_strided_slice %3 {offsets = [0, 2], sizes = [8, 1024], strides = [1, 1]} : vector<8x1088xf32> to vector<8x1024xf32>
    %17 = vector.broadcast %15 : vector<8x1xf32> to vector<8x1024xf32>
    %18 = arith.mulf %17, %16 : vector<8x1024xf32>
    %19 = arith.addf %14, %18 : vector<8x1024xf32>
    %20 = vector.extract_strided_slice %0 {offsets = [0, 3], sizes = [8, 1], strides = [1, 1]} : vector<8x64xf32> to vector<8x1xf32>
    %21 = vector.extract_strided_slice %3 {offsets = [0, 3], sizes = [8, 1024], strides = [1, 1]} : vector<8x1088xf32> to vector<8x1024xf32>
    %22 = vector.broadcast %20 : vector<8x1xf32> to vector<8x1024xf32>
    %23 = arith.mulf %22, %21 : vector<8x1024xf32>
    %24 = arith.addf %19, %23 : vector<8x1024xf32>
    %25 = vector.extract_strided_slice %0 {offsets = [0, 4], sizes = [8, 1], strides = [1, 1]} : vector<8x64xf32> to vector<8x1xf32>
    %26 = vector.extract_strided_slice %3 {offsets = [0, 4], sizes = [8, 1024], strides = [1, 1]} : vector<8x1088xf32> to vector<8x1024xf32>
    %27 = vector.broadcast %25 : vector<8x1xf32> to vector<8x1024xf32>
    %28 = arith.mulf %27, %26 : vector<8x1024xf32>
    %29 = arith.addf %24, %28 : vector<8x1024xf32>
    %30 = vector.extract_strided_slice %0 {offsets = [0, 5], sizes = [8, 1], strides = [1, 1]} : vector<8x64xf32> to vector<8x1xf32>
    %31 = vector.extract_strided_slice %3 {offsets = [0, 5], sizes = [8, 1024], strides = [1, 1]} : vector<8x1088xf32> to vector<8x1024xf32>
    %32 = vector.broadcast %30 : vector<8x1xf32> to vector<8x1024xf32>
    %33 = arith.mulf %32, %31 : vector<8x1024xf32>
    %34 = arith.addf %29, %33 : vector<8x1024xf32>
    %35 = vector.extract_strided_slice %0 {offsets = [0, 6], sizes = [8, 1], strides = [1, 1]} : vector<8x64xf32> to vector<8x1xf32>
    %36 = vector.extract_strided_slice %3 {offsets = [0, 6], sizes = [8, 1024], strides = [1, 1]} : vector<8x1088xf32> to vector<8x1024xf32>
    %37 = vector.broadcast %35 : vector<8x1xf32> to vector<8x1024xf32>
    %38 = arith.mulf %37, %36 : vector<8x1024xf32>
    %39 = arith.addf %34, %38 : vector<8x1024xf32>
    %40 = vector.extract_strided_slice %0 {offsets = [0, 7], sizes = [8, 1], strides = [1, 1]} : vector<8x64xf32> to vector<8x1xf32>
    %41 = vector.extract_strided_slice %3 {offsets = [0, 7], sizes = [8, 1024], strides = [1, 1]} : vector<8x1088xf32> to vector<8x1024xf32>
    %42 = vector.broadcast %40 : vector<8x1xf32> to vector<8x1024xf32>
    %43 = arith.mulf %42, %41 : vector<8x1024xf32>
    %44 = arith.addf %39, %43 : vector<8x1024xf32>
    %45 = vector.extract_strided_slice %0 {offsets = [0, 8], sizes = [8, 1], strides = [1, 1]} : vector<8x64xf32> to vector<8x1xf32>
    %46 = vector.extract_strided_slice %3 {offsets = [0, 8], sizes = [8, 1024], strides = [1, 1]} : vector<8x1088xf32> to vector<8x1024xf32>
    %47 = vector.broadcast %45 : vector<8x1xf32> to vector<8x1024xf32>
    %48 = arith.mulf %47, %46 : vector<8x1024xf32>
    %49 = arith.addf %44, %48 : vector<8x1024xf32>
    %50 = vector.extract_strided_slice %0 {offsets = [0, 9], sizes = [8, 1], strides = [1, 1]} : vector<8x64xf32> to vector<8x1xf32>
    %51 = vector.extract_strided_slice %3 {offsets = [0, 9], sizes = [8, 1024], strides = [1, 1]} : vector<8x1088xf32> to vector<8x1024xf32>
    %52 = vector.broadcast %50 : vector<8x1xf32> to vector<8x1024xf32>
    %53 = arith.mulf %52, %51 : vector<8x1024xf32>
    %54 = arith.addf %49, %53 : vector<8x1024xf32>
    %55 = vector.extract_strided_slice %0 {offsets = [0, 10], sizes = [8, 1], strides = [1, 1]} : vector<8x64xf32> to vector<8x1xf32>
    %56 = vector.extract_strided_slice %3 {offsets = [0, 10], sizes = [8, 1024], strides = [1, 1]} : vector<8x1088xf32> to vector<8x1024xf32>
    %57 = vector.broadcast %55 : vector<8x1xf32> to vector<8x1024xf32>
    %58 = arith.mulf %57, %56 : vector<8x1024xf32>
    %59 = arith.addf %54, %58 : vector<8x1024xf32>
    %60 = vector.extract_strided_slice %0 {offsets = [0, 11], sizes = [8, 1], strides = [1, 1]} : vector<8x64xf32> to vector<8x1xf32>
    %61 = vector.extract_strided_slice %3 {offsets = [0, 11], sizes = [8, 1024], strides = [1, 1]} : vector<8x1088xf32> to vector<8x1024xf32>
    %62 = vector.broadcast %60 : vector<8x1xf32> to vector<8x1024xf32>
    %63 = arith.mulf %62, %61 : vector<8x1024xf32>
    %64 = arith.addf %59, %63 : vector<8x1024xf32>
    %65 = vector.extract_strided_slice %0 {offsets = [0, 12], sizes = [8, 1], strides = [1, 1]} : vector<8x64xf32> to vector<8x1xf32>
    %66 = vector.extract_strided_slice %3 {offsets = [0, 12], sizes = [8, 1024], strides = [1, 1]} : vector<8x1088xf32> to vector<8x1024xf32>
    %67 = vector.broadcast %65 : vector<8x1xf32> to vector<8x1024xf32>
    %68 = arith.mulf %67, %66 : vector<8x1024xf32>
    %69 = arith.addf %64, %68 : vector<8x1024xf32>
    %70 = vector.extract_strided_slice %0 {offsets = [0, 13], sizes = [8, 1], strides = [1, 1]} : vector<8x64xf32> to vector<8x1xf32>
    %71 = vector.extract_strided_slice %3 {offsets = [0, 13], sizes = [8, 1024], strides = [1, 1]} : vector<8x1088xf32> to vector<8x1024xf32>
    %72 = vector.broadcast %70 : vector<8x1xf32> to vector<8x1024xf32>
    %73 = arith.mulf %72, %71 : vector<8x1024xf32>
    %74 = arith.addf %69, %73 : vector<8x1024xf32>
    %75 = vector.extract_strided_slice %0 {offsets = [0, 14], sizes = [8, 1], strides = [1, 1]} : vector<8x64xf32> to vector<8x1xf32>
    %76 = vector.extract_strided_slice %3 {offsets = [0, 14], sizes = [8, 1024], strides = [1, 1]} : vector<8x1088xf32> to vector<8x1024xf32>
    %77 = vector.broadcast %75 : vector<8x1xf32> to vector<8x1024xf32>
    %78 = arith.mulf %77, %76 : vector<8x1024xf32>
    %79 = arith.addf %74, %78 : vector<8x1024xf32>
    %80 = vector.extract_strided_slice %0 {offsets = [0, 15], sizes = [8, 1], strides = [1, 1]} : vector<8x64xf32> to vector<8x1xf32>
    %81 = vector.extract_strided_slice %3 {offsets = [0, 15], sizes = [8, 1024], strides = [1, 1]} : vector<8x1088xf32> to vector<8x1024xf32>
    %82 = vector.broadcast %80 : vector<8x1xf32> to vector<8x1024xf32>
    %83 = arith.mulf %82, %81 : vector<8x1024xf32>
    %84 = arith.addf %79, %83 : vector<8x1024xf32>
    %85 = vector.extract_strided_slice %0 {offsets = [0, 16], sizes = [8, 1], strides = [1, 1]} : vector<8x64xf32> to vector<8x1xf32>
    %86 = vector.extract_strided_slice %3 {offsets = [0, 16], sizes = [8, 1024], strides = [1, 1]} : vector<8x1088xf32> to vector<8x1024xf32>
    %87 = vector.broadcast %85 : vector<8x1xf32> to vector<8x1024xf32>
    %88 = arith.mulf %87, %86 : vector<8x1024xf32>
    %89 = arith.addf %84, %88 : vector<8x1024xf32>
    %90 = vector.extract_strided_slice %0 {offsets = [0, 17], sizes = [8, 1], strides = [1, 1]} : vector<8x64xf32> to vector<8x1xf32>
    %91 = vector.extract_strided_slice %3 {offsets = [0, 17], sizes = [8, 1024], strides = [1, 1]} : vector<8x1088xf32> to vector<8x1024xf32>
    %92 = vector.broadcast %90 : vector<8x1xf32> to vector<8x1024xf32>
    %93 = arith.mulf %92, %91 : vector<8x1024xf32>
    %94 = arith.addf %89, %93 : vector<8x1024xf32>
    %95 = vector.extract_strided_slice %0 {offsets = [0, 18], sizes = [8, 1], strides = [1, 1]} : vector<8x64xf32> to vector<8x1xf32>
    %96 = vector.extract_strided_slice %3 {offsets = [0, 18], sizes = [8, 1024], strides = [1, 1]} : vector<8x1088xf32> to vector<8x1024xf32>
    %97 = vector.broadcast %95 : vector<8x1xf32> to vector<8x1024xf32>
    %98 = arith.mulf %97, %96 : vector<8x1024xf32>
    %99 = arith.addf %94, %98 : vector<8x1024xf32>
    %100 = vector.extract_strided_slice %0 {offsets = [0, 19], sizes = [8, 1], strides = [1, 1]} : vector<8x64xf32> to vector<8x1xf32>
    %101 = vector.extract_strided_slice %3 {offsets = [0, 19], sizes = [8, 1024], strides = [1, 1]} : vector<8x1088xf32> to vector<8x1024xf32>
    %102 = vector.broadcast %100 : vector<8x1xf32> to vector<8x1024xf32>
    %103 = arith.mulf %102, %101 : vector<8x1024xf32>
    %104 = arith.addf %99, %103 : vector<8x1024xf32>
    %105 = vector.extract_strided_slice %0 {offsets = [0, 20], sizes = [8, 1], strides = [1, 1]} : vector<8x64xf32> to vector<8x1xf32>
    %106 = vector.extract_strided_slice %3 {offsets = [0, 20], sizes = [8, 1024], strides = [1, 1]} : vector<8x1088xf32> to vector<8x1024xf32>
    %107 = vector.broadcast %105 : vector<8x1xf32> to vector<8x1024xf32>
    %108 = arith.mulf %107, %106 : vector<8x1024xf32>
    %109 = arith.addf %104, %108 : vector<8x1024xf32>
    %110 = vector.extract_strided_slice %0 {offsets = [0, 21], sizes = [8, 1], strides = [1, 1]} : vector<8x64xf32> to vector<8x1xf32>
    %111 = vector.extract_strided_slice %3 {offsets = [0, 21], sizes = [8, 1024], strides = [1, 1]} : vector<8x1088xf32> to vector<8x1024xf32>
    %112 = vector.broadcast %110 : vector<8x1xf32> to vector<8x1024xf32>
    %113 = arith.mulf %112, %111 : vector<8x1024xf32>
    %114 = arith.addf %109, %113 : vector<8x1024xf32>
    %115 = vector.extract_strided_slice %0 {offsets = [0, 22], sizes = [8, 1], strides = [1, 1]} : vector<8x64xf32> to vector<8x1xf32>
    %116 = vector.extract_strided_slice %3 {offsets = [0, 22], sizes = [8, 1024], strides = [1, 1]} : vector<8x1088xf32> to vector<8x1024xf32>
    %117 = vector.broadcast %115 : vector<8x1xf32> to vector<8x1024xf32>
    %118 = arith.mulf %117, %116 : vector<8x1024xf32>
    %119 = arith.addf %114, %118 : vector<8x1024xf32>
    %120 = vector.extract_strided_slice %0 {offsets = [0, 23], sizes = [8, 1], strides = [1, 1]} : vector<8x64xf32> to vector<8x1xf32>
    %121 = vector.extract_strided_slice %3 {offsets = [0, 23], sizes = [8, 1024], strides = [1, 1]} : vector<8x1088xf32> to vector<8x1024xf32>
    %122 = vector.broadcast %120 : vector<8x1xf32> to vector<8x1024xf32>
    %123 = arith.mulf %122, %121 : vector<8x1024xf32>
    %124 = arith.addf %119, %123 : vector<8x1024xf32>
    %125 = vector.extract_strided_slice %0 {offsets = [0, 24], sizes = [8, 1], strides = [1, 1]} : vector<8x64xf32> to vector<8x1xf32>
    %126 = vector.extract_strided_slice %3 {offsets = [0, 24], sizes = [8, 1024], strides = [1, 1]} : vector<8x1088xf32> to vector<8x1024xf32>
    %127 = vector.broadcast %125 : vector<8x1xf32> to vector<8x1024xf32>
    %128 = arith.mulf %127, %126 : vector<8x1024xf32>
    %129 = arith.addf %124, %128 : vector<8x1024xf32>
    %130 = vector.extract_strided_slice %0 {offsets = [0, 25], sizes = [8, 1], strides = [1, 1]} : vector<8x64xf32> to vector<8x1xf32>
    %131 = vector.extract_strided_slice %3 {offsets = [0, 25], sizes = [8, 1024], strides = [1, 1]} : vector<8x1088xf32> to vector<8x1024xf32>
    %132 = vector.broadcast %130 : vector<8x1xf32> to vector<8x1024xf32>
    %133 = arith.mulf %132, %131 : vector<8x1024xf32>
    %134 = arith.addf %129, %133 : vector<8x1024xf32>
    %135 = vector.extract_strided_slice %0 {offsets = [0, 26], sizes = [8, 1], strides = [1, 1]} : vector<8x64xf32> to vector<8x1xf32>
    %136 = vector.extract_strided_slice %3 {offsets = [0, 26], sizes = [8, 1024], strides = [1, 1]} : vector<8x1088xf32> to vector<8x1024xf32>
    %137 = vector.broadcast %135 : vector<8x1xf32> to vector<8x1024xf32>
    %138 = arith.mulf %137, %136 : vector<8x1024xf32>
    %139 = arith.addf %134, %138 : vector<8x1024xf32>
    %140 = vector.extract_strided_slice %0 {offsets = [0, 27], sizes = [8, 1], strides = [1, 1]} : vector<8x64xf32> to vector<8x1xf32>
    %141 = vector.extract_strided_slice %3 {offsets = [0, 27], sizes = [8, 1024], strides = [1, 1]} : vector<8x1088xf32> to vector<8x1024xf32>
    %142 = vector.broadcast %140 : vector<8x1xf32> to vector<8x1024xf32>
    %143 = arith.mulf %142, %141 : vector<8x1024xf32>
    %144 = arith.addf %139, %143 : vector<8x1024xf32>
    %145 = vector.extract_strided_slice %0 {offsets = [0, 28], sizes = [8, 1], strides = [1, 1]} : vector<8x64xf32> to vector<8x1xf32>
    %146 = vector.extract_strided_slice %3 {offsets = [0, 28], sizes = [8, 1024], strides = [1, 1]} : vector<8x1088xf32> to vector<8x1024xf32>
    %147 = vector.broadcast %145 : vector<8x1xf32> to vector<8x1024xf32>
    %148 = arith.mulf %147, %146 : vector<8x1024xf32>
    %149 = arith.addf %144, %148 : vector<8x1024xf32>
    %150 = vector.extract_strided_slice %0 {offsets = [0, 29], sizes = [8, 1], strides = [1, 1]} : vector<8x64xf32> to vector<8x1xf32>
    %151 = vector.extract_strided_slice %3 {offsets = [0, 29], sizes = [8, 1024], strides = [1, 1]} : vector<8x1088xf32> to vector<8x1024xf32>
    %152 = vector.broadcast %150 : vector<8x1xf32> to vector<8x1024xf32>
    %153 = arith.mulf %152, %151 : vector<8x1024xf32>
    %154 = arith.addf %149, %153 : vector<8x1024xf32>
    %155 = vector.extract_strided_slice %0 {offsets = [0, 30], sizes = [8, 1], strides = [1, 1]} : vector<8x64xf32> to vector<8x1xf32>
    %156 = vector.extract_strided_slice %3 {offsets = [0, 30], sizes = [8, 1024], strides = [1, 1]} : vector<8x1088xf32> to vector<8x1024xf32>
    %157 = vector.broadcast %155 : vector<8x1xf32> to vector<8x1024xf32>
    %158 = arith.mulf %157, %156 : vector<8x1024xf32>
    %159 = arith.addf %154, %158 : vector<8x1024xf32>
    %160 = vector.extract_strided_slice %0 {offsets = [0, 31], sizes = [8, 1], strides = [1, 1]} : vector<8x64xf32> to vector<8x1xf32>
    %161 = vector.extract_strided_slice %3 {offsets = [0, 31], sizes = [8, 1024], strides = [1, 1]} : vector<8x1088xf32> to vector<8x1024xf32>
    %162 = vector.broadcast %160 : vector<8x1xf32> to vector<8x1024xf32>
    %163 = arith.mulf %162, %161 : vector<8x1024xf32>
    %164 = arith.addf %159, %163 : vector<8x1024xf32>
    %165 = vector.extract_strided_slice %0 {offsets = [0, 32], sizes = [8, 1], strides = [1, 1]} : vector<8x64xf32> to vector<8x1xf32>
    %166 = vector.extract_strided_slice %3 {offsets = [0, 32], sizes = [8, 1024], strides = [1, 1]} : vector<8x1088xf32> to vector<8x1024xf32>
    %167 = vector.broadcast %165 : vector<8x1xf32> to vector<8x1024xf32>
    %168 = arith.mulf %167, %166 : vector<8x1024xf32>
    %169 = arith.addf %164, %168 : vector<8x1024xf32>
    %170 = vector.extract_strided_slice %0 {offsets = [0, 33], sizes = [8, 1], strides = [1, 1]} : vector<8x64xf32> to vector<8x1xf32>
    %171 = vector.extract_strided_slice %3 {offsets = [0, 33], sizes = [8, 1024], strides = [1, 1]} : vector<8x1088xf32> to vector<8x1024xf32>
    %172 = vector.broadcast %170 : vector<8x1xf32> to vector<8x1024xf32>
    %173 = arith.mulf %172, %171 : vector<8x1024xf32>
    %174 = arith.addf %169, %173 : vector<8x1024xf32>
    %175 = vector.extract_strided_slice %0 {offsets = [0, 34], sizes = [8, 1], strides = [1, 1]} : vector<8x64xf32> to vector<8x1xf32>
    %176 = vector.extract_strided_slice %3 {offsets = [0, 34], sizes = [8, 1024], strides = [1, 1]} : vector<8x1088xf32> to vector<8x1024xf32>
    %177 = vector.broadcast %175 : vector<8x1xf32> to vector<8x1024xf32>
    %178 = arith.mulf %177, %176 : vector<8x1024xf32>
    %179 = arith.addf %174, %178 : vector<8x1024xf32>
    %180 = vector.extract_strided_slice %0 {offsets = [0, 35], sizes = [8, 1], strides = [1, 1]} : vector<8x64xf32> to vector<8x1xf32>
    %181 = vector.extract_strided_slice %3 {offsets = [0, 35], sizes = [8, 1024], strides = [1, 1]} : vector<8x1088xf32> to vector<8x1024xf32>
    %182 = vector.broadcast %180 : vector<8x1xf32> to vector<8x1024xf32>
    %183 = arith.mulf %182, %181 : vector<8x1024xf32>
    %184 = arith.addf %179, %183 : vector<8x1024xf32>
    %185 = vector.extract_strided_slice %0 {offsets = [0, 36], sizes = [8, 1], strides = [1, 1]} : vector<8x64xf32> to vector<8x1xf32>
    %186 = vector.extract_strided_slice %3 {offsets = [0, 36], sizes = [8, 1024], strides = [1, 1]} : vector<8x1088xf32> to vector<8x1024xf32>
    %187 = vector.broadcast %185 : vector<8x1xf32> to vector<8x1024xf32>
    %188 = arith.mulf %187, %186 : vector<8x1024xf32>
    %189 = arith.addf %184, %188 : vector<8x1024xf32>
    %190 = vector.extract_strided_slice %0 {offsets = [0, 37], sizes = [8, 1], strides = [1, 1]} : vector<8x64xf32> to vector<8x1xf32>
    %191 = vector.extract_strided_slice %3 {offsets = [0, 37], sizes = [8, 1024], strides = [1, 1]} : vector<8x1088xf32> to vector<8x1024xf32>
    %192 = vector.broadcast %190 : vector<8x1xf32> to vector<8x1024xf32>
    %193 = arith.mulf %192, %191 : vector<8x1024xf32>
    %194 = arith.addf %189, %193 : vector<8x1024xf32>
    %195 = vector.extract_strided_slice %0 {offsets = [0, 38], sizes = [8, 1], strides = [1, 1]} : vector<8x64xf32> to vector<8x1xf32>
    %196 = vector.extract_strided_slice %3 {offsets = [0, 38], sizes = [8, 1024], strides = [1, 1]} : vector<8x1088xf32> to vector<8x1024xf32>
    %197 = vector.broadcast %195 : vector<8x1xf32> to vector<8x1024xf32>
    %198 = arith.mulf %197, %196 : vector<8x1024xf32>
    %199 = arith.addf %194, %198 : vector<8x1024xf32>
    %200 = vector.extract_strided_slice %0 {offsets = [0, 39], sizes = [8, 1], strides = [1, 1]} : vector<8x64xf32> to vector<8x1xf32>
    %201 = vector.extract_strided_slice %3 {offsets = [0, 39], sizes = [8, 1024], strides = [1, 1]} : vector<8x1088xf32> to vector<8x1024xf32>
    %202 = vector.broadcast %200 : vector<8x1xf32> to vector<8x1024xf32>
    %203 = arith.mulf %202, %201 : vector<8x1024xf32>
    %204 = arith.addf %199, %203 : vector<8x1024xf32>
    %205 = vector.extract_strided_slice %0 {offsets = [0, 40], sizes = [8, 1], strides = [1, 1]} : vector<8x64xf32> to vector<8x1xf32>
    %206 = vector.extract_strided_slice %3 {offsets = [0, 40], sizes = [8, 1024], strides = [1, 1]} : vector<8x1088xf32> to vector<8x1024xf32>
    %207 = vector.broadcast %205 : vector<8x1xf32> to vector<8x1024xf32>
    %208 = arith.mulf %207, %206 : vector<8x1024xf32>
    %209 = arith.addf %204, %208 : vector<8x1024xf32>
    %210 = vector.extract_strided_slice %0 {offsets = [0, 41], sizes = [8, 1], strides = [1, 1]} : vector<8x64xf32> to vector<8x1xf32>
    %211 = vector.extract_strided_slice %3 {offsets = [0, 41], sizes = [8, 1024], strides = [1, 1]} : vector<8x1088xf32> to vector<8x1024xf32>
    %212 = vector.broadcast %210 : vector<8x1xf32> to vector<8x1024xf32>
    %213 = arith.mulf %212, %211 : vector<8x1024xf32>
    %214 = arith.addf %209, %213 : vector<8x1024xf32>
    %215 = vector.extract_strided_slice %0 {offsets = [0, 42], sizes = [8, 1], strides = [1, 1]} : vector<8x64xf32> to vector<8x1xf32>
    %216 = vector.extract_strided_slice %3 {offsets = [0, 42], sizes = [8, 1024], strides = [1, 1]} : vector<8x1088xf32> to vector<8x1024xf32>
    %217 = vector.broadcast %215 : vector<8x1xf32> to vector<8x1024xf32>
    %218 = arith.mulf %217, %216 : vector<8x1024xf32>
    %219 = arith.addf %214, %218 : vector<8x1024xf32>
    %220 = vector.extract_strided_slice %0 {offsets = [0, 43], sizes = [8, 1], strides = [1, 1]} : vector<8x64xf32> to vector<8x1xf32>
    %221 = vector.extract_strided_slice %3 {offsets = [0, 43], sizes = [8, 1024], strides = [1, 1]} : vector<8x1088xf32> to vector<8x1024xf32>
    %222 = vector.broadcast %220 : vector<8x1xf32> to vector<8x1024xf32>
    %223 = arith.mulf %222, %221 : vector<8x1024xf32>
    %224 = arith.addf %219, %223 : vector<8x1024xf32>
    %225 = vector.extract_strided_slice %0 {offsets = [0, 44], sizes = [8, 1], strides = [1, 1]} : vector<8x64xf32> to vector<8x1xf32>
    %226 = vector.extract_strided_slice %3 {offsets = [0, 44], sizes = [8, 1024], strides = [1, 1]} : vector<8x1088xf32> to vector<8x1024xf32>
    %227 = vector.broadcast %225 : vector<8x1xf32> to vector<8x1024xf32>
    %228 = arith.mulf %227, %226 : vector<8x1024xf32>
    %229 = arith.addf %224, %228 : vector<8x1024xf32>
    %230 = vector.extract_strided_slice %0 {offsets = [0, 45], sizes = [8, 1], strides = [1, 1]} : vector<8x64xf32> to vector<8x1xf32>
    %231 = vector.extract_strided_slice %3 {offsets = [0, 45], sizes = [8, 1024], strides = [1, 1]} : vector<8x1088xf32> to vector<8x1024xf32>
    %232 = vector.broadcast %230 : vector<8x1xf32> to vector<8x1024xf32>
    %233 = arith.mulf %232, %231 : vector<8x1024xf32>
    %234 = arith.addf %229, %233 : vector<8x1024xf32>
    %235 = vector.extract_strided_slice %0 {offsets = [0, 46], sizes = [8, 1], strides = [1, 1]} : vector<8x64xf32> to vector<8x1xf32>
    %236 = vector.extract_strided_slice %3 {offsets = [0, 46], sizes = [8, 1024], strides = [1, 1]} : vector<8x1088xf32> to vector<8x1024xf32>
    %237 = vector.broadcast %235 : vector<8x1xf32> to vector<8x1024xf32>
    %238 = arith.mulf %237, %236 : vector<8x1024xf32>
    %239 = arith.addf %234, %238 : vector<8x1024xf32>
    %240 = vector.extract_strided_slice %0 {offsets = [0, 47], sizes = [8, 1], strides = [1, 1]} : vector<8x64xf32> to vector<8x1xf32>
    %241 = vector.extract_strided_slice %3 {offsets = [0, 47], sizes = [8, 1024], strides = [1, 1]} : vector<8x1088xf32> to vector<8x1024xf32>
    %242 = vector.broadcast %240 : vector<8x1xf32> to vector<8x1024xf32>
    %243 = arith.mulf %242, %241 : vector<8x1024xf32>
    %244 = arith.addf %239, %243 : vector<8x1024xf32>
    %245 = vector.extract_strided_slice %0 {offsets = [0, 48], sizes = [8, 1], strides = [1, 1]} : vector<8x64xf32> to vector<8x1xf32>
    %246 = vector.extract_strided_slice %3 {offsets = [0, 48], sizes = [8, 1024], strides = [1, 1]} : vector<8x1088xf32> to vector<8x1024xf32>
    %247 = vector.broadcast %245 : vector<8x1xf32> to vector<8x1024xf32>
    %248 = arith.mulf %247, %246 : vector<8x1024xf32>
    %249 = arith.addf %244, %248 : vector<8x1024xf32>
    %250 = vector.extract_strided_slice %0 {offsets = [0, 49], sizes = [8, 1], strides = [1, 1]} : vector<8x64xf32> to vector<8x1xf32>
    %251 = vector.extract_strided_slice %3 {offsets = [0, 49], sizes = [8, 1024], strides = [1, 1]} : vector<8x1088xf32> to vector<8x1024xf32>
    %252 = vector.broadcast %250 : vector<8x1xf32> to vector<8x1024xf32>
    %253 = arith.mulf %252, %251 : vector<8x1024xf32>
    %254 = arith.addf %249, %253 : vector<8x1024xf32>
    %255 = vector.extract_strided_slice %0 {offsets = [0, 50], sizes = [8, 1], strides = [1, 1]} : vector<8x64xf32> to vector<8x1xf32>
    %256 = vector.extract_strided_slice %3 {offsets = [0, 50], sizes = [8, 1024], strides = [1, 1]} : vector<8x1088xf32> to vector<8x1024xf32>
    %257 = vector.broadcast %255 : vector<8x1xf32> to vector<8x1024xf32>
    %258 = arith.mulf %257, %256 : vector<8x1024xf32>
    %259 = arith.addf %254, %258 : vector<8x1024xf32>
    %260 = vector.extract_strided_slice %0 {offsets = [0, 51], sizes = [8, 1], strides = [1, 1]} : vector<8x64xf32> to vector<8x1xf32>
    %261 = vector.extract_strided_slice %3 {offsets = [0, 51], sizes = [8, 1024], strides = [1, 1]} : vector<8x1088xf32> to vector<8x1024xf32>
    %262 = vector.broadcast %260 : vector<8x1xf32> to vector<8x1024xf32>
    %263 = arith.mulf %262, %261 : vector<8x1024xf32>
    %264 = arith.addf %259, %263 : vector<8x1024xf32>
    %265 = vector.extract_strided_slice %0 {offsets = [0, 52], sizes = [8, 1], strides = [1, 1]} : vector<8x64xf32> to vector<8x1xf32>
    %266 = vector.extract_strided_slice %3 {offsets = [0, 52], sizes = [8, 1024], strides = [1, 1]} : vector<8x1088xf32> to vector<8x1024xf32>
    %267 = vector.broadcast %265 : vector<8x1xf32> to vector<8x1024xf32>
    %268 = arith.mulf %267, %266 : vector<8x1024xf32>
    %269 = arith.addf %264, %268 : vector<8x1024xf32>
    %270 = vector.extract_strided_slice %0 {offsets = [0, 53], sizes = [8, 1], strides = [1, 1]} : vector<8x64xf32> to vector<8x1xf32>
    %271 = vector.extract_strided_slice %3 {offsets = [0, 53], sizes = [8, 1024], strides = [1, 1]} : vector<8x1088xf32> to vector<8x1024xf32>
    %272 = vector.broadcast %270 : vector<8x1xf32> to vector<8x1024xf32>
    %273 = arith.mulf %272, %271 : vector<8x1024xf32>
    %274 = arith.addf %269, %273 : vector<8x1024xf32>
    %275 = vector.extract_strided_slice %0 {offsets = [0, 54], sizes = [8, 1], strides = [1, 1]} : vector<8x64xf32> to vector<8x1xf32>
    %276 = vector.extract_strided_slice %3 {offsets = [0, 54], sizes = [8, 1024], strides = [1, 1]} : vector<8x1088xf32> to vector<8x1024xf32>
    %277 = vector.broadcast %275 : vector<8x1xf32> to vector<8x1024xf32>
    %278 = arith.mulf %277, %276 : vector<8x1024xf32>
    %279 = arith.addf %274, %278 : vector<8x1024xf32>
    %280 = vector.extract_strided_slice %0 {offsets = [0, 55], sizes = [8, 1], strides = [1, 1]} : vector<8x64xf32> to vector<8x1xf32>
    %281 = vector.extract_strided_slice %3 {offsets = [0, 55], sizes = [8, 1024], strides = [1, 1]} : vector<8x1088xf32> to vector<8x1024xf32>
    %282 = vector.broadcast %280 : vector<8x1xf32> to vector<8x1024xf32>
    %283 = arith.mulf %282, %281 : vector<8x1024xf32>
    %284 = arith.addf %279, %283 : vector<8x1024xf32>
    %285 = vector.extract_strided_slice %0 {offsets = [0, 56], sizes = [8, 1], strides = [1, 1]} : vector<8x64xf32> to vector<8x1xf32>
    %286 = vector.extract_strided_slice %3 {offsets = [0, 56], sizes = [8, 1024], strides = [1, 1]} : vector<8x1088xf32> to vector<8x1024xf32>
    %287 = vector.broadcast %285 : vector<8x1xf32> to vector<8x1024xf32>
    %288 = arith.mulf %287, %286 : vector<8x1024xf32>
    %289 = arith.addf %284, %288 : vector<8x1024xf32>
    %290 = vector.extract_strided_slice %0 {offsets = [0, 57], sizes = [8, 1], strides = [1, 1]} : vector<8x64xf32> to vector<8x1xf32>
    %291 = vector.extract_strided_slice %3 {offsets = [0, 57], sizes = [8, 1024], strides = [1, 1]} : vector<8x1088xf32> to vector<8x1024xf32>
    %292 = vector.broadcast %290 : vector<8x1xf32> to vector<8x1024xf32>
    %293 = arith.mulf %292, %291 : vector<8x1024xf32>
    %294 = arith.addf %289, %293 : vector<8x1024xf32>
    %295 = vector.extract_strided_slice %0 {offsets = [0, 58], sizes = [8, 1], strides = [1, 1]} : vector<8x64xf32> to vector<8x1xf32>
    %296 = vector.extract_strided_slice %3 {offsets = [0, 58], sizes = [8, 1024], strides = [1, 1]} : vector<8x1088xf32> to vector<8x1024xf32>
    %297 = vector.broadcast %295 : vector<8x1xf32> to vector<8x1024xf32>
    %298 = arith.mulf %297, %296 : vector<8x1024xf32>
    %299 = arith.addf %294, %298 : vector<8x1024xf32>
    %300 = vector.extract_strided_slice %0 {offsets = [0, 59], sizes = [8, 1], strides = [1, 1]} : vector<8x64xf32> to vector<8x1xf32>
    %301 = vector.extract_strided_slice %3 {offsets = [0, 59], sizes = [8, 1024], strides = [1, 1]} : vector<8x1088xf32> to vector<8x1024xf32>
    %302 = vector.broadcast %300 : vector<8x1xf32> to vector<8x1024xf32>
    %303 = arith.mulf %302, %301 : vector<8x1024xf32>
    %304 = arith.addf %299, %303 : vector<8x1024xf32>
    %305 = vector.extract_strided_slice %0 {offsets = [0, 60], sizes = [8, 1], strides = [1, 1]} : vector<8x64xf32> to vector<8x1xf32>
    %306 = vector.extract_strided_slice %3 {offsets = [0, 60], sizes = [8, 1024], strides = [1, 1]} : vector<8x1088xf32> to vector<8x1024xf32>
    %307 = vector.broadcast %305 : vector<8x1xf32> to vector<8x1024xf32>
    %308 = arith.mulf %307, %306 : vector<8x1024xf32>
    %309 = arith.addf %304, %308 : vector<8x1024xf32>
    %310 = vector.extract_strided_slice %0 {offsets = [0, 61], sizes = [8, 1], strides = [1, 1]} : vector<8x64xf32> to vector<8x1xf32>
    %311 = vector.extract_strided_slice %3 {offsets = [0, 61], sizes = [8, 1024], strides = [1, 1]} : vector<8x1088xf32> to vector<8x1024xf32>
    %312 = vector.broadcast %310 : vector<8x1xf32> to vector<8x1024xf32>
    %313 = arith.mulf %312, %311 : vector<8x1024xf32>
    %314 = arith.addf %309, %313 : vector<8x1024xf32>
    %315 = vector.extract_strided_slice %0 {offsets = [0, 62], sizes = [8, 1], strides = [1, 1]} : vector<8x64xf32> to vector<8x1xf32>
    %316 = vector.extract_strided_slice %3 {offsets = [0, 62], sizes = [8, 1024], strides = [1, 1]} : vector<8x1088xf32> to vector<8x1024xf32>
    %317 = vector.broadcast %315 : vector<8x1xf32> to vector<8x1024xf32>
    %318 = arith.mulf %317, %316 : vector<8x1024xf32>
    %319 = arith.addf %314, %318 : vector<8x1024xf32>
    %320 = vector.extract_strided_slice %0 {offsets = [0, 63], sizes = [8, 1], strides = [1, 1]} : vector<8x64xf32> to vector<8x1xf32>
    %321 = vector.extract_strided_slice %3 {offsets = [0, 63], sizes = [8, 1024], strides = [1, 1]} : vector<8x1088xf32> to vector<8x1024xf32>
    %322 = vector.broadcast %320 : vector<8x1xf32> to vector<8x1024xf32>
    %323 = arith.mulf %322, %321 : vector<8x1024xf32>
    %324 = arith.addf %319, %323 : vector<8x1024xf32>
    %c0_4 = arith.constant 0 : index
    %c0_5 = arith.constant 0 : index
    %325 = vector.load %arg3[%c0_4, %c0_5] : memref<8x1024xf32, #tpu.memory_space<vmem>>, vector<8x1024xf32>
    tpu.vector_store %arg3[%c0_4, %c0_5], %324 {strides = array<i32>} : memref<8x1024xf32, #tpu.memory_space<vmem>>, vector<8x1024xf32>,
    return
  }
  func.func @transform_0(%arg0: i32) -> (i32, i32) {
    %c0_i32 = arith.constant 0 : i32
    %c0_i32_0 = arith.constant 0 : i32
    %c0_i32_1 = arith.constant 0 : i32
    return %c0_i32, %c0_i32_0 : i32, i32
  }
  func.func @transform_1(%arg0: i32) -> (i32, i32, i32) {
    %c0_i32 = arith.constant 0 : i32
    %c0_i32_0 = arith.constant 0 : i32
    %c0_i32_1 = arith.constant 0 : i32
    return %arg0, %c0_i32, %c0_i32_0 : i32, i32, i32
  }
  func.func @transform_2(%arg0: i32) -> (i32, i32) {
    %c0_i32 = arith.constant 0 : i32
    %c0_i32_0 = arith.constant 0 : i32
    return %c0_i32, %arg0 : i32, i32
  }
}

</mosaic_0001>

<bundles_post_ra>
// kernel: resonance_forward.2
= control target key start
LH: loop header
LB: loop body
LE: loop exit
PB: predicated region body
PF: predicated region fallthrough
CT: control target
= control target key end

     0   :  { %11 = vsyncpa [#allocation3], 0  ;;  %s813_s0 = inlined_call_operand.hbm [shape: f32[8,32], index: 0, kind: input, shape index: {}]   ;;  %s814_s1 = inlined_call_operand.hbm [shape: f32[3,32,32], index: 1, kind: input, shape index: {}]   ;;  %s815_s2 = inlined_call_operand.vmem [shape: f32[3,1,32], index: 2, kind: input, shape index: {}]   ;;  %s816_s3 = inlined_call_operand.hbm [shape: f32[32,32], index: 3, kind: input, shape index: {}]   ;;  %s817_s4 = inlined_call_operand.vmem [shape: f32[1,32], index: 4, kind: input, shape index: {}]   ;;  %s818_s5 = inlined_call_operand.hbm [shape: f32[32,64], index: 5, kind: input, shape index: {}]   ;;  %s819_s6 = inlined_call_operand.vmem [shape: f32[8,64], index: 6, kind: output, shape index: {}]  }
   0x1   :  { %12 = vsyncpa [#allocation5], 0 }
   0x2   :  { %13 = vsyncpa [#allocation8], 0  ;;  %s699_s21 = smov [#allocation4]  }
   0x3   :  { %s29_s22 = sshll.u32 %s699_s21, 4  ;;  %s30_s22 = int_to_ptr.vmem [resolvable:$true] %s29_s22 }
   0x4   :  { %s621_s23 = scalar_lea.vmem %s30_s22, 1536  ;;  %p626_p1 = scmp.lt.s32.totalorder %s30_s22, %s30_s22 }
   0x5   :  { %p622_p0 = scmp.ne.s32.totalorder %s30_s22, %s621_s23  ;;  %p627_p2 = scmp.lt.s32.totalorder %s621_s23, %s621_s23 }
   0x7   :  { %p628_p3 = por %p627_p2, %p626_p1 }
   0x9   :  { %p629_p4 = pnand %p628_p3, %p622_p0 }
   0xb   :  { %632 = shalt.err (!%p629_p4)
}
   0xc   :  { %s700_s24 = smov 128   ;;  %s701_s25 = smov 8  }
   0xd   :  { %35 = dma.hbm_to_vmem [thread:$0]  %s814_s1, 1536, %s30_s22, [#allocation5], %s700_s24, %s700_s24, %s701_s25  }
   0xe   :  { %s702_s28 = smov [#allocation2]   ;;  %s703_s30 = smov [#allocation6]  }
   0xf   :  { %s20_s29 = sshll.u32 %s702_s28, 4  ;;  %s43_s7 = sshll.u32 %s703_s30, 4  ;;  %s21_s29 = int_to_ptr.vmem [resolvable:$true] %s20_s29  ;;  %s44_s7 = int_to_ptr.vmem [resolvable:$true] %s43_s7 }
  0x10   :  { %s641_s8 = scalar_lea.vmem %s21_s29, 128  ;;  %p646_p6 = scmp.lt.s32.totalorder %s21_s29, %s21_s29 }
  0x11   :  { %p642_p5 = scmp.ne.s32.totalorder %s21_s29, %s641_s8  ;;  %p647_p7 = scmp.lt.s32.totalorder %s641_s8, %s641_s8 }
  0x13   :  { %p648_p8 = por %p647_p7, %p646_p6 }
  0x15   :  { %p649_p9 = pnand %p648_p8, %p642_p5 }
  0x17   :  { %652 = shalt.err (!%p649_p9)
}
  0x18   :  { %23 = dma.hbm_to_vmem [thread:$0]  %s813_s0, 128, %s21_s29, [#allocation3]  }
  0x19   :  { %s661_s11 = scalar_lea.vmem %s44_s7, 512  ;;  %p666_p11 = scmp.lt.s32.totalorder %s44_s7, %s44_s7 }
  0x1a   :  { %p662_p10 = scmp.ne.s32.totalorder %s44_s7, %s661_s11  ;;  %p667_p12 = scmp.lt.s32.totalorder %s661_s11, %s661_s11 }
  0x1c   :  { %p668_p13 = por %p667_p12, %p666_p11 }
  0x1e   :  { %p669_p0 = pnand %p668_p13, %p662_p10 }
  0x20   :  { %672 = shalt.err (!%p669_p0)
}
  0x21   :  { %49 = dma.hbm_to_vmem [thread:$0]  %s816_s3, 512, %s44_s7, [#allocation5], %s700_s24, %s700_s24, %s701_s25  }
  0x22   :  { %s704_s13 = smov [#allocation7]  }
  0x23   :  { %s57_s14 = sshll.u32 %s704_s13, 4  ;;  %s58_s14 = int_to_ptr.vmem [resolvable:$true] %s57_s14 }
  0x24   :  { %s681_s15 = scalar_lea.vmem %s58_s14, 512  ;;  %p686_p2 = scmp.lt.s32.totalorder %s58_s14, %s58_s14 }
  0x25   :  { %p682_p1 = scmp.ne.s32.totalorder %s58_s14, %s681_s15  ;;  %p687_p3 = scmp.lt.s32.totalorder %s681_s15, %s681_s15 }
  0x27   :  { %p688_p4 = por %p687_p3, %p686_p2 }
  0x29   :  { %p689_p5 = pnand %p688_p4, %p682_p1 }
  0x2b   :  { %692 = shalt.err (!%p689_p5)
}
  0x2c   :  { %63 = dma.hbm_to_vmem [thread:$0]  %s818_s5, 512, %s58_s14, [#allocation8], %s700_s24, %s700_s24, %s701_s25  }
  0x2d   :  { %693 = dma.done.wait [#allocation3], 128  }
  0x2e   :  { %694 = vsyncadd [#allocation3], 4294967168 }
  0x2f   :  { %695 = dma.done.wait [#allocation5], 2048  }
  0x30   :  { %696 = vsyncadd [#allocation5], 4294965248 }
  0x31   :  { %697 = dma.done.wait [#allocation8], 512  }
  0x32   :  { %698 = vsyncadd [#allocation8], 4294966784  ;;  %v705_v0 = vmov 0.0   ;;  %vm706_vm0 = vmmov 0   ;;  %v80_v1 = vld [vmem:[#allocation4 + $0x18] sm:$0xff]  ;;  %v79_v2 = vld [vmem:[#allocation4 + $0x10] sm:$0xff] }
  0x33   :  { %550 = vmatprep.subr.mxu0 %v705_v0  ;;  %558 = vmatprep.mubr.msk.f32.mxu0 %vm706_vm0, %v705_v0  ;;  %v169_v3 = vld [vmem:[#allocation4 + $0x38] sm:$0xff]  ;;  %v78_v4 = vld [vmem:[#allocation4 + $0x8] sm:$0xff]  ;;  %v77_v5 = vld [vmem:[#allocation4] sm:$0xff]  ;;  %vm88_vm1 = vcmask 261120   ;;  %vm505_vm5 = vcmask 523264  }
  0x34   :  { %561 = vmatprep.subr.mxu1 %v705_v0  ;;  %569 = vmatprep.mubr.msk.f32.mxu1 %vm706_vm0, %v705_v0  ;;  %v76_v6 = vld [vmem:[#allocation2] sm:$0xff]  ;;  %v168_v7 = vld [vmem:[#allocation4 + $0x30] sm:$0xff]  ;;  %v167_v8 = vld [vmem:[#allocation4 + $0x28] sm:$0xff] }
  0x35   :  { %551 = vmatpush3.msra.mxu0 %v80_v1  ;;  %562 = vmatpush3.msra.mxu1 %v169_v3  ;;  %v166_v9 = vld [vmem:[#allocation4 + $0x20] sm:$0xff]  ;;  %v258_v10 = vld [vmem:[#allocation4 + $0x58] sm:$0xff]  ;;  %v257_v17 = vld [vmem:[#allocation4 + $0x50] sm:$0xff] }
  0x36   :  { %552 = vmatprep.subr.mxu0 %v705_v0  ;;  %563 = vmatprep.subr.mxu1 %v705_v0  ;;  %v514_v11 = vld [vmem:[%s815_s2] ss:$0 sm:$0xff]  ;;  %v256_v18 = vld [vmem:[#allocation4 + $0x48] sm:$0xff]  ;;  %v255_v19 = vld [vmem:[#allocation4 + $0x40] sm:$0xff] }
  0x37   :  { %553 = vmatpush3.msra.mxu0 %v79_v2  ;;  %564 = vmatpush3.msra.mxu1 %v168_v7  ;;  %v346_v20 = vld [vmem:[#allocation6 + $0x18] sm:$0xff]  ;;  %v345_v27 = vld [vmem:[#allocation6 + $0x10] sm:$0xff]  ;;  %v344_v28 = vld [vmem:[#allocation6 + $0x8] sm:$0xff] }
  0x38   :  { %554 = vmatprep.subr.mxu0 %v705_v0  ;;  %565 = vmatprep.subr.mxu1 %v705_v0  ;;  %v517_v21 = vld [vmem:[%s815_s2 + $0x1] ss:$0 sm:$0xff]  ;;  %v343_v29 = vld [vmem:[#allocation6] sm:$0xff]  ;;  %v520_v31 = vld [vmem:[%s815_s2 + $0x2] ss:$0 sm:$0xff] }
  0x39   :  { %555 = vmatpush3.msra.mxu0 %v78_v4  ;;  %566 = vmatpush3.msra.mxu1 %v167_v8  ;;  %v431_v30 = vld [vmem:[#allocation7 + $0x18] sm:$0xff]  ;;  %v430_v37 = vld [vmem:[#allocation7 + $0x10] sm:$0xff]  ;;  %v429_v38 = vld [vmem:[#allocation7 + $0x8] sm:$0xff] }
  0x3a   :  { %556 = vmatprep.subr.mxu0 %v705_v0  ;;  %567 = vmatprep.subr.mxu1 %v705_v0  ;;  %v428_v39 = vld [vmem:[#allocation7] sm:$0xff]  ;;  %v522_v40 = vld [vmem:[%s817_s4] ss:$0 sm:$0xff] }
  0x3b   :  { %557 = vmatpush3.msra.mxu0 %v77_v5  ;;  %568 = vmatpush3.msra.mxu1 %v166_v9 }
  0x3c   :  { %559 = vmatmul.mubr.msk.f32.vlgmr.msra.gmra.mxu0 %vm88_vm1, %v76_v6  ;;  %572 = vmatprep.subr.mxu0 %v705_v0 }
  0x3d   :  { %580 = vmatprep.mubr.msk.f32.mxu0 %vm706_vm0, %v705_v0  ;;  %583 = vmatprep.subr.mxu1 %v705_v0 }
  0x3e   :  { %573 = vmatpush3.msra.mxu0 %v258_v10 }
  0x3f   :  { %574 = vmatprep.subr.mxu0 %v705_v0 }
  0x40   :  { %575 = vmatpush3.msra.mxu0 %v257_v17 }
  0x41   :  { %576 = vmatprep.subr.mxu0 %v705_v0 }
  0x42   :  { %577 = vmatpush3.msra.mxu0 %v256_v18 }
  0x43   :  { %578 = vmatprep.subr.mxu0 %v705_v0 }
  0x44   :  { %579 = vmatpush3.msra.mxu0 %v255_v19 }
  0x45   :  { %594 = vmatprep.subr.mxu0 %v705_v0 }
  0xfc   :  { %v158_v12 = vpop.f32.mrf.mxu0 }
  0xfd   :  { %v159_v13 = vadd.f32 %v514_v11, %v158_v12 }
  0xfe   :  { %v560_v14 = vpop.f32.mrf.mxu0 }
  0xff   :  { %vm162_vm2 = vcmp.ge.f32.partialorder %v159_v13, 0.0  ;;  %v163_v15 = vmul.f32 0.2, %v159_v13 }
 0x101   :  { %v164_v16 = vsel %vm162_vm2, %v159_v13, %v163_v15 }
 0x102   :  { %570 = vmatmul.mubr.msk.f32.vlgmr.msra.gmra.mxu1 %vm88_vm1, %v164_v16 }
 0x103   :  { %591 = vmatprep.mubr.msk.f32.mxu1 %vm706_vm0, %v705_v0  ;;  %584 = vmatpush3.msra.mxu1 %v346_v20 }
 0x104   :  { %585 = vmatprep.subr.mxu1 %v705_v0 }
 0x105   :  { %586 = vmatpush3.msra.mxu1 %v345_v27 }
 0x106   :  { %587 = vmatprep.subr.mxu1 %v705_v0 }
 0x107   :  { %588 = vmatpush3.msra.mxu1 %v344_v28 }
 0x108   :  { %589 = vmatprep.subr.mxu1 %v705_v0 }
 0x109   :  { %590 = vmatpush3.msra.mxu1 %v343_v29 }
 0x1c2   :  { %v247_v22 = vpop.f32.mrf.mxu1 }
 0x1c3   :  { %v248_v23 = vadd.f32 %v517_v21, %v247_v22 }
 0x1c4   :  { %v571_v24 = vpop.f32.mrf.mxu1 }
 0x1c5   :  { %vm251_vm3 = vcmp.ge.f32.partialorder %v248_v23, 0.0  ;;  %v252_v25 = vmul.f32 0.2, %v248_v23 }
 0x1c7   :  { %v253_v26 = vsel %vm251_vm3, %v248_v23, %v252_v25 }
 0x1c8   :  { %581 = vmatmul.mubr.msk.f32.vlgmr.msra.gmra.mxu0 %vm88_vm1, %v253_v26 }
 0x1c9   :  { %602 = vmatprep.mubr.msk.f32.mxu0 %vm706_vm0, %v705_v0  ;;  %595 = vmatpush3.msra.mxu0 %v431_v30 }
 0x1ca   :  { %596 = vmatprep.subr.mxu0 %v705_v0 }
 0x1cb   :  { %597 = vmatpush3.msra.mxu0 %v430_v37 }
 0x1cc   :  { %598 = vmatprep.subr.mxu0 %v705_v0 }
 0x1cd   :  { %599 = vmatpush3.msra.mxu0 %v429_v38 }
 0x1ce   :  { %600 = vmatprep.subr.mxu0 %v705_v0 }
 0x1cf   :  { %601 = vmatpush3.msra.mxu0 %v428_v39 }
 0x288   :  { %v336_v32 = vpop.f32.mrf.mxu0 }
 0x289   :  { %v337_v33 = vadd.f32 %v520_v31, %v336_v32 }
 0x28a   :  { %v582_v34 = vpop.f32.mrf.mxu0 }
 0x28b   :  { %vm340_vm4 = vcmp.ge.f32.partialorder %v337_v33, 0.0  ;;  %v341_v35 = vmul.f32 0.2, %v337_v33 }
 0x28d   :  { %v342_v36 = vsel %vm340_vm4, %v337_v33, %v341_v35 }
 0x28e   :  { %592 = vmatmul.mubr.msk.f32.vlgmr.msra.gmra.mxu1 %vm88_vm1, %v342_v36 }
 0x34e   :  { %v423_v41 = vpop.f32.mrf.mxu1 }
 0x34f   :  { %v424_v42 = vadd.f32 %v522_v40, %v423_v41 }
 0x350   :  { %v593_v43 = vpop.f32.mrf.mxu1 }
 0x351   :  { %v427_v44 = vmul.f32 %v424_v42, %v424_v42 }
 0x353   :  { %603 = vmatmul.mubr.msk.f32.vlgmr.msra.gmra.mxu0 %vm88_vm1, %v427_v44 }
 0x413   :  { %v501_v45 = vpop.f32.mrf.mxu0 }
 0x414   :  { %506 = vst.msk [vmem:[%s819_s6] sm:$0xff] %vm505_vm5, %v501_v45 }
 0x415   :  { %v604_v46 = vpop.f32.mrf.mxu0 }
 0x416   :  { %511 = vsyncpa [#allocation3], 1 }
 0x417   :  { %512 = vsyncpa [#allocation5], 1 }
 0x418   :  { %513 = vsyncpa [#allocation8], 1 }

// kernel: resonance_forward.3
= control target key start
LH: loop header
LB: loop body
LE: loop exit
PB: predicated region body
PF: predicated region fallthrough
CT: control target
= control target key end

     0   :  { %s4706_s9 = smov 0   ;;  %s7948_s0 = inlined_call_operand.vmem [shape: f32[8,64], index: 0, kind: input, shape index: {}]   ;;  %s7949_s1 = inlined_call_operand.vmem [shape: bf16[2,8,1088], index: 1, kind: input, shape index: {}]   ;;  %s7950_s2 = inlined_call_operand.vmem [shape: f32[8,2048], index: 2, kind: output, shape index: {}]  }
   0x1 LB: > { %s4712_s10 = sadd.s32 4294967295, %s4562_s9   ;;  %p4344_p0 = scmp.ge.s32.totalorder %s4562_s9, 1  ;;  %s4562_s9 = sphi %s4706_s9, %s12_s9  }
   0x2   : > { %p112_p1 = scmp.lt.s32.totalorder %s4562_s9, 3 }
   0x4   : > { %p113_p2 = pnand %p4344_p0, %p112_p1 }
   0x6   : > { %116 = sbr.rel (%p113_p2) target bundleno = 7713 (0x1e21), region = 28 }
   0xb   : > { %v4719_v0 = vld [vmem:[%s7948_s0] sm:$0xff]  ;;  %v4564_v1 = vmov 0   ;;  %v4565_v2 = vmov 3   ;;  %v4566_v3 = vmov 1   ;;  %v4567_v4 = vmov 4   ;;  %p134_p3 = scmp.lt.s32.totalorder %s4712_s10, 1 }
   0xc   : > { %4486 = vset.pattern.permute.xlu0 %v4564_v1  ;;  %4489 = vset.pattern.permute.xlu1 %v4565_v2  ;;  %v4568_v5 = vmov 2   ;;  %v4569_v6 = vmov 5   ;;  %v4570_v7 = vmov 6   ;;  %v4571_v8 = vmov 7   ;;  %s4573_s18 = smov 127   ;;  %s4574_s19 = smov 126  }
   0xd   : > { %162 = vperm.xlu0 %4486, %v4719_v0   ;;  %312 = vperm.xlu1 %4489, %v4719_v0   ;;  %s135_s13 = scalar_select %p134_p3, %s4712_s10, 1  ;;  %v4572_v18 = vmov 8   ;;  %vm221_vm0 = vcmask 1039360   ;;  %vm286_vm1 = vcmask 1031168   ;;  %vm351_vm2 = vcmask 1022976  }
   0xe   : > { %s4575_s20 = smov 125   ;;  %s4576_s21 = smov 124   ;;  %vm416_vm3 = vcmask 1014784   ;;  %vm481_vm4 = vcmask 1006592   ;;  %vm546_vm5 = vcmask 998400   ;;  %vm611_vm6 = vcmask 990208  }
   0xf   : > { %s4350_s14 = smul.u32 36, %s135_s13  ;;  %s4577_s22 = smov 123   ;;  %vm676_vm7 = vcmask 982016   ;;  %vm741_vm8 = vcmask 973824   ;;  %vm806_vm9 = vcmask 965632   ;;  %vm871_vm10 = vcmask 957440  }
  0x10   : > { %s4578_s23 = smov 122   ;;  %s4579_s24 = smov 121   ;;  %vm936_vm11 = vcmask 949248   ;;  %vm1001_vm12 = vcmask 941056   ;;  %vm1066_vm13 = vcmask 932864   ;;  %vm1131_vm14 = vcmask 924672  }
  0x11   : > { %4487 = vset.pattern.permute.xlu0 %v4566_v3  ;;  %4490 = vset.pattern.permute.xlu1 %v4567_v4  ;;  %s4734_s17 = scalar_lea.vmem %s7949_s1, %s4350_s14  ;;  %s4581_s25 = smov 120   ;;  %vm1196_vm15 = vcmask 916480  }
  0x12   : > { %182 = vperm.xlu0 %4487, %v4719_v0   ;;  %377 = vperm.xlu1 %4490, %v4719_v0   ;;  %v146_v10 = vld [vmem:[%s4734_s17] sm:$0xff]  ;;  %v147_v11 = vld [vmem:[%s4734_s17 + $0x8] sm:$0xff]  ;;  %v148_v14 = vld [vmem:[%s4734_s17 + $0x10] sm:$0xff]  ;;  %s4583_s26 = smov 119   ;;  %s4585_s27 = smov 118  }
  0x13   : > { %v4740_v12 = vunpack.c.l.bf16 %v146_v10  ;;  %v4742_v13 = vunpack.c.h.bf16 %v147_v11  ;;  %v4747_v19 = vunpack.c.h.bf16 %v146_v10  ;;  %v4749_v20 = vunpack.c.h.bf16 %v148_v14  ;;  %v149_v21 = vld [vmem:[%s4734_s17 + $0x18] sm:$0xff]  ;;  %v150_v32 = vld [vmem:[%s4734_s17 + $0x20] sm:$0xf]  ;;  %s4587_s28 = smov 117   ;;  %s4589_s29 = smov 116  }
  0x14   : > { %v4756_v24 = vunpack.c.l.bf16 %v147_v11  ;;  %v4758_v25 = vunpack.c.h.bf16 %v149_v21  ;;  %v4764_v29 = vunpack.c.l.bf16 %v148_v14  ;;  %v4771_v33 = vunpack.c.l.bf16 %v149_v21  ;;  %s4591_s30 = smov 115   ;;  %s4593_s3 = smov 114  }
  0x15   : > { %v4777_v36 = vunpack.c.l.bf16 %v150_v32  ;;  %s4595_s4 = smov 113   ;;  %s4597_s5 = smov 112  }
  0x16   : > { %4488 = vset.pattern.permute.xlu0 %v4568_v5  ;;  %4491 = vset.pattern.permute.xlu1 %v4569_v6  ;;  %8288 = vst [vmem:[#allocation2_spill] sm:$0xff] %v4758_v25  ;;  %8289 = vst [vmem:[#allocation3_spill] sm:$0xff] %v4764_v29  ;;  %s4599_s6 = smov 111   ;;  %s4601_s11 = smov 110  }
  0x17   : > { %247 = vperm.xlu0 %4488, %v4719_v0   ;;  %442 = vperm.xlu1 %4491, %v4719_v0   ;;  %8290 = vst [vmem:[#allocation4_spill] sm:$0xff] %v4771_v33  ;;  %8291 = vst [vmem:[#allocation5_spill] sm:$0xff] %v4777_v36  ;;  %s4603_s12 = smov 109   ;;  %s4605_s13 = smov 108  }
  0x18   : > { %s4607_s14 = smov 107   ;;  %s4609_s15 = smov 106  }
  0x19   : > { %s4611_s16 = smov 105   ;;  %s4613_s17 = smov 104  }
  0x1a   : > { %s4645_s7 = smov 88   ;;  %s4647_s8 = smov 87  }
  0x1b   : > { %4492 = vset.pattern.permute.xlu1 %v4570_v7 }
  0x1c   : > { %507 = vperm.xlu1 %4492, %v4719_v0  }
  0x20   : > { %4493 = vset.pattern.permute.xlu1 %v4571_v8 }
  0x21   : > { %572 = vperm.xlu1 %4493, %v4719_v0  }
  0x25   : > { %4494 = vset.pattern.permute.xlu1 %v4572_v18 }
  0x88   : > { %v4736_v9 = vpop.permute.xlu0 %162  ;;  %v313_v41 = vpop.permute.xlu1 %312 }
  0x89   : > { %v315_v42 = vmul.f32 %v313_v41, %v4740_v12  ;;  %v317_v44 = vmul.f32 %v313_v41, %v4756_v24  ;;  %v319_v46 = vmul.f32 %v313_v41, %v4764_v29  ;;  %v321_v48 = vmul.f32 %v313_v41, %v4771_v33 }
  0x8a   : > { %v323_v50 = vmul.f32 %v313_v41, %v4777_v36  ;;  %v316_v51 = vmul.f32 %v313_v41, %v4747_v19  ;;  %v318_v54 = vmul.f32 %v313_v41, %v4742_v13  ;;  %v320_v56 = vmul.f32 %v313_v41, %v4749_v20 }
  0x8b   : > { %v322_v58 = vmul.f32 %v313_v41, %v4758_v25 }
  0x8d   : > { %v183_v15 = vpop.permute.xlu0 %182  ;;  %v378_v52 = vpop.permute.xlu1 %377 }
  0x8e   : > { %v188_v16 = vmul.f32 %v183_v15, %v4742_v13  ;;  %v185_v17 = vmul.f32 %v183_v15, %v4740_v12  ;;  %v190_v22 = vmul.f32 %v183_v15, %v4749_v20  ;;  %v186_v23 = vmul.f32 %v183_v15, %v4747_v19 }
  0x8f   : > { %v192_v27 = vmul.f32 %v183_v15, %v4758_v25  ;;  %v187_v28 = vmul.f32 %v183_v15, %v4756_v24  ;;  %v189_v31 = vmul.f32 %v183_v15, %v4764_v29  ;;  %v191_v35 = vmul.f32 %v183_v15, %v4771_v33 }
  0x90   : > { %209 = vrot.lane.b32.xlu0 %v188_v16, %s4573_s18  ;;  %203 = vrot.lane.b32.xlu1 %v185_v17, %s4573_s18  ;;  %v193_v38 = vmul.f32 %v183_v15, %v4777_v36  ;;  %v380_v53 = vmul.f32 %v378_v52, %v4740_v12  ;;  %v382_v55 = vmul.f32 %v378_v52, %v4756_v24 }
  0x91   : > { %v384_v57 = vmul.f32 %v378_v52, %v4764_v29  ;;  %v386_v59 = vmul.f32 %v378_v52, %v4771_v33  ;;  %v381_v60 = vmul.f32 %v378_v52, %v4747_v19  ;;  %v388_v62 = vmul.f32 %v378_v52, %v4777_v36 }
  0x92   : > { %v248_v26 = vpop.permute.xlu0 %247  ;;  %v443_v61 = vpop.permute.xlu1 %442  ;;  %v383_v63 = vmul.f32 %v378_v52, %v4742_v13  ;;  %v385_v2 = vmul.f32 %v378_v52, %v4749_v20  ;;  %v387_v4 = vmul.f32 %v378_v52, %v4758_v25 }
  0x93   : > { %v252_v30 = vmul.f32 %v248_v26, %v4756_v24  ;;  %v254_v34 = vmul.f32 %v248_v26, %v4764_v29  ;;  %v256_v37 = vmul.f32 %v248_v26, %v4771_v33  ;;  %v258_v39 = vmul.f32 %v248_v26, %v4777_v36 }
  0x94   : > { %213 = vrot.lane.b32.xlu0 %v190_v22, %s4573_s18  ;;  %205 = vrot.lane.b32.xlu1 %v186_v23, %s4573_s18  ;;  %v250_v40 = vmul.f32 %v248_v26, %v4740_v12  ;;  %v251_v43 = vmul.f32 %v248_v26, %v4747_v19  ;;  %v253_v45 = vmul.f32 %v248_v26, %v4742_v13 }
  0x95   : > { %v255_v47 = vmul.f32 %v248_v26, %v4749_v20  ;;  %v257_v49 = vmul.f32 %v248_v26, %v4758_v25  ;;  %v445_v1 = vmul.f32 %v443_v61, %v4740_v12  ;;  %v447_v3 = vmul.f32 %v443_v61, %v4756_v24 }
  0x96   : > { %v449_v5 = vmul.f32 %v443_v61, %v4764_v29  ;;  %v446_v6 = vmul.f32 %v443_v61, %v4747_v19  ;;  %v451_v7 = vmul.f32 %v443_v61, %v4771_v33  ;;  %v448_v8 = vmul.f32 %v443_v61, %v4742_v13 }
  0x97   : > { %v508_v10 = vpop.permute.xlu1 %507  ;;  %v453_v11 = vmul.f32 %v443_v61, %v4777_v36  ;;  %v450_v14 = vmul.f32 %v443_v61, %v4749_v20  ;;  %v452_v16 = vmul.f32 %v443_v61, %v4758_v25 }
  0x98   : > { %217 = vrot.lane.b32.xlu0 %v192_v27, %s4573_s18  ;;  %207 = vrot.lane.b32.xlu1 %v187_v28, %s4573_s18  ;;  %v510_v15 = vmul.f32 %v508_v10, %v4740_v12  ;;  %v512_v17 = vmul.f32 %v508_v10, %v4756_v24  ;;  %v511_v18 = vmul.f32 %v508_v10, %v4747_v19 }
  0x99   : > { %v514_v21 = vmul.f32 %v508_v10, %v4764_v29  ;;  %v513_v22 = vmul.f32 %v508_v10, %v4742_v13  ;;  %v516_v23 = vmul.f32 %v508_v10, %v4771_v33  ;;  %v515_v26 = vmul.f32 %v508_v10, %v4749_v20 }
  0x9a   : > { %v518_v28 = vmul.f32 %v508_v10, %v4777_v36 }
  0x9c   : > { %272 = vrot.lane.b32.xlu0 %v252_v30, %s4574_s19  ;;  %211 = vrot.lane.b32.xlu1 %v189_v31, %s4573_s18  ;;  %v573_v27 = vpop.permute.xlu1 %572  ;;  %v517_v30 = vmul.f32 %v508_v10, %v4758_v25 }
  0x9d   : > { %v575_v31 = vmul.f32 %v573_v27, %v4740_v12  ;;  %v576_v32 = vmul.f32 %v573_v27, %v4747_v19  ;;  %v581_v41 = vmul.f32 %v573_v27, %v4771_v33 }
  0xa0   : > { %276 = vrot.lane.b32.xlu0 %v254_v34, %s4574_s19  ;;  %215 = vrot.lane.b32.xlu1 %v191_v35, %s4573_s18  ;;  %v577_v34 = vmul.f32 %v573_v27, %v4756_v24  ;;  %v578_v35 = vmul.f32 %v573_v27, %v4742_v13 }
  0xa4   : > { %280 = vrot.lane.b32.xlu0 %v256_v37, %s4574_s19  ;;  %219 = vrot.lane.b32.xlu1 %v193_v38, %s4573_s18  ;;  %v579_v38 = vmul.f32 %v573_v27, %v4764_v29  ;;  %s4615_s18 = smov 103  }
  0xa8   : > { %284 = vrot.lane.b32.xlu0 %v258_v39, %s4574_s19  ;;  %268 = vrot.lane.b32.xlu1 %v250_v40, %s4574_s19  ;;  %v580_v39 = vmul.f32 %v573_v27, %v4749_v20 }
  0xac   : > { %333 = vrot.lane.b32.xlu0 %v315_v42, %s4575_s20  ;;  %270 = vrot.lane.b32.xlu1 %v251_v43, %s4574_s19  ;;  %v582_v42 = vmul.f32 %v573_v27, %v4758_v25 }
  0xb0   : > { %337 = vrot.lane.b32.xlu0 %v317_v44, %s4575_s20  ;;  %274 = vrot.lane.b32.xlu1 %v253_v45, %s4574_s19  ;;  %v583_v44 = vmul.f32 %v573_v27, %v4777_v36 }
  0xb4   : > { %341 = vrot.lane.b32.xlu0 %v319_v46, %s4575_s20  ;;  %278 = vrot.lane.b32.xlu1 %v255_v47, %s4574_s19 }
  0xb8   : > { %345 = vrot.lane.b32.xlu0 %v321_v48, %s4575_s20  ;;  %282 = vrot.lane.b32.xlu1 %v257_v49, %s4574_s19  ;;  %v4580_v48 = vmov 9   ;;  %s4617_s19 = smov 102  }
  0xbc   : > { %349 = vrot.lane.b32.xlu0 %v323_v50, %s4575_s20  ;;  %335 = vrot.lane.b32.xlu1 %v316_v51, %s4575_s20 }
  0xc0   : > { %398 = vrot.lane.b32.xlu0 %v380_v53, %s4576_s21  ;;  %339 = vrot.lane.b32.xlu1 %v318_v54, %s4575_s20 }
  0xc4   : > { %402 = vrot.lane.b32.xlu0 %v382_v55, %s4576_s21  ;;  %343 = vrot.lane.b32.xlu1 %v320_v56, %s4575_s20 }
  0xc8   : > { %406 = vrot.lane.b32.xlu0 %v384_v57, %s4576_s21  ;;  %347 = vrot.lane.b32.xlu1 %v322_v58, %s4575_s20  ;;  %s4619_s20 = smov 101  }
  0xcc   : > { %410 = vrot.lane.b32.xlu0 %v386_v59, %s4576_s21  ;;  %400 = vrot.lane.b32.xlu1 %v381_v60, %s4576_s21 }
  0xd0   : > { %414 = vrot.lane.b32.xlu0 %v388_v62, %s4576_s21  ;;  %404 = vrot.lane.b32.xlu1 %v383_v63, %s4576_s21 }
  0xd4   : > { %463 = vrot.lane.b32.xlu0 %v445_v1, %s4577_s22  ;;  %408 = vrot.lane.b32.xlu1 %v385_v2, %s4576_s21 }
  0xd8   : > { %467 = vrot.lane.b32.xlu0 %v447_v3, %s4577_s22  ;;  %412 = vrot.lane.b32.xlu1 %v387_v4, %s4576_s21  ;;  %s4621_s21 = smov 100  }
  0xdc   : > { %471 = vrot.lane.b32.xlu0 %v449_v5, %s4577_s22  ;;  %465 = vrot.lane.b32.xlu1 %v446_v6, %s4577_s22 }
  0xe0   : > { %475 = vrot.lane.b32.xlu0 %v451_v7, %s4577_s22  ;;  %469 = vrot.lane.b32.xlu1 %v448_v8, %s4577_s22 }
  0xe4   : > { %479 = vrot.lane.b32.xlu0 %v453_v11, %s4577_s22  ;;  %473 = vrot.lane.b32.xlu1 %v450_v14, %s4577_s22 }
  0xe8   : > { %528 = vrot.lane.b32.xlu0 %v510_v15, %s4578_s23  ;;  %477 = vrot.lane.b32.xlu1 %v452_v16, %s4577_s22  ;;  %s4623_s22 = smov 99  }
  0xec   : > { %532 = vrot.lane.b32.xlu0 %v512_v17, %s4578_s23  ;;  %530 = vrot.lane.b32.xlu1 %v511_v18, %s4578_s23 }
  0xf0   : > { %536 = vrot.lane.b32.xlu0 %v514_v21, %s4578_s23  ;;  %534 = vrot.lane.b32.xlu1 %v513_v22, %s4578_s23 }
  0xf4   : > { %540 = vrot.lane.b32.xlu0 %v516_v23, %s4578_s23  ;;  %538 = vrot.lane.b32.xlu1 %v515_v26, %s4578_s23 }
  0xf8   : > { %544 = vrot.lane.b32.xlu0 %v518_v28, %s4578_s23  ;;  %542 = vrot.lane.b32.xlu1 %v517_v30, %s4578_s23  ;;  %v4582_v28 = vmov 10   ;;  %s4625_s23 = smov 98  }
  0xfc   : > { %593 = vrot.lane.b32.xlu0 %v575_v31, %s4579_s24  ;;  %595 = vrot.lane.b32.xlu1 %v576_v32, %s4579_s24 }
 0x100   : > { %597 = vrot.lane.b32.xlu0 %v577_v34, %s4579_s24  ;;  %599 = vrot.lane.b32.xlu1 %v578_v35, %s4579_s24 }
 0x102   : > { %v4846_v37 = vpop.permute.xlu1 %203 }
 0x104   : > { %601 = vrot.lane.b32.xlu0 %v579_v38, %s4579_s24  ;;  %603 = vrot.lane.b32.xlu1 %v580_v39, %s4579_s24 }
 0x106   : > { %v4850_v40 = vpop.permute.xlu1 %205 }
 0x108   : > { %605 = vrot.lane.b32.xlu0 %v581_v41, %s4579_s24  ;;  %607 = vrot.lane.b32.xlu1 %v582_v42, %s4579_s24 }
 0x10a   : > { %v4854_v43 = vpop.permute.xlu1 %207 }
 0x10c   : > { %609 = vrot.lane.b32.xlu0 %v583_v44, %s4579_s24  ;;  %637 = vperm.xlu1 %4494, %v4719_v0   ;;  %s4627_s24 = smov 97  }
 0x10e   : > { %v4858_v45 = vpop.permute.xlu1 %211 }
 0x110   : > { %4495 = vset.pattern.permute.xlu1 %v4580_v48 }
 0x112   : > { %v4860_v46 = vpop.permute.xlu1 %215 }
 0x116   : > { %v4862_v47 = vpop.permute.xlu1 %219 }
 0x11a   : > { %v4864_v49 = vpop.permute.xlu1 %268 }
 0x11e   : > { %v4866_v50 = vpop.permute.xlu1 %270 }
 0x122   : > { %v4868_v51 = vpop.permute.xlu1 %274 }
 0x126   : > { %v4870_v52 = vpop.permute.xlu1 %278 }
 0x12a   : > { %v4872_v53 = vpop.permute.xlu1 %282 }
 0x12e   : > { %v4874_v54 = vpop.permute.xlu1 %335 }
 0x132   : > { %v4876_v55 = vpop.permute.xlu1 %339 }
 0x136   : > { %v4878_v56 = vpop.permute.xlu1 %343 }
 0x13a   : > { %v4880_v57 = vpop.permute.xlu1 %347 }
 0x13e   : > { %v4882_v58 = vpop.permute.xlu1 %400 }
 0x142   : > { %v4884_v59 = vpop.permute.xlu1 %404 }
 0x146   : > { %v4886_v60 = vpop.permute.xlu1 %408 }
 0x14a   : > { %v4888_v61 = vpop.permute.xlu1 %412 }
 0x14e   : > { %v4890_v62 = vpop.permute.xlu1 %465 }
 0x152   : > { %v4892_v63 = vpop.permute.xlu1 %469 }
 0x156   : > { %v4894_v1 = vpop.permute.xlu1 %473 }
 0x15a   : > { %v4896_v2 = vpop.permute.xlu1 %477 }
 0x15b   : > { %8292 = vst [vmem:[#allocation6_spill] sm:$0xff] %v4896_v2 }
 0x15e   : > { %v4898_v3 = vpop.permute.xlu1 %530 }
 0x15f   : > { %8293 = vst [vmem:[#allocation7_spill] sm:$0xff] %v4898_v3 }
 0x162   : > { %v4900_v4 = vpop.permute.xlu1 %534 }
 0x163   : > { %8294 = vst [vmem:[#allocation8_spill] sm:$0xff] %v4900_v4 }
 0x166   : > { %v4902_v5 = vpop.permute.xlu1 %538 }
 0x167   : > { %8295 = vst [vmem:[#allocation9_spill] sm:$0xff] %v4902_v5 }
 0x16a   : > { %v4904_v6 = vpop.permute.xlu1 %542 }
 0x16b   : > { %8296 = vst [vmem:[#allocation10_spill] sm:$0xff] %v4904_v6 }
 0x16e   : > { %v4906_v7 = vpop.permute.xlu1 %595 }
 0x16f   : > { %8297 = vst [vmem:[#allocation11_spill] sm:$0xff] %v4906_v7 }
 0x172   : > { %v4908_v8 = vpop.permute.xlu1 %599 }
 0x173   : > { %8298 = vst [vmem:[#allocation12_spill] sm:$0xff] %v4908_v8 }
 0x176   : > { %v4910_v10 = vpop.permute.xlu1 %603 }
 0x177   : > { %8299 = vst [vmem:[#allocation13_spill] sm:$0xff] %v4910_v10 }
 0x17a   : > { %v4912_v11 = vpop.permute.xlu1 %607 }
 0x17b   : > { %8300 = vst [vmem:[#allocation14_spill] sm:$0xff] %v4912_v11 }
 0x187   : > { %v638_v14 = vpop.permute.xlu1 %637 }
 0x188   : > { %v641_v15 = vmul.f32 %v638_v14, %v4747_v19  ;;  %v640_v16 = vmul.f32 %v638_v14, %v4740_v12  ;;  %v643_v17 = vmul.f32 %v638_v14, %v4742_v13  ;;  %v642_v18 = vmul.f32 %v638_v14, %v4756_v24 }
 0x189   : > { %v645_v21 = vmul.f32 %v638_v14, %v4749_v20  ;;  %v644_v22 = vmul.f32 %v638_v14, %v4764_v29  ;;  %v647_v23 = vmul.f32 %v638_v14, %v4758_v25  ;;  %v646_v26 = vmul.f32 %v638_v14, %v4771_v33 }
 0x18a   : > { %660 = vrot.lane.b32.xlu1 %v641_v15, %s4581_s25  ;;  %658 = vrot.lane.b32.xlu0 %v640_v16, %s4581_s25  ;;  %v648_v27 = vmul.f32 %v638_v14, %v4777_v36 }
 0x18e   : > { %664 = vrot.lane.b32.xlu1 %v643_v17, %s4581_s25  ;;  %662 = vrot.lane.b32.xlu0 %v642_v18, %s4581_s25  ;;  %v4584_v17 = vmov 11  }
 0x192   : > { %668 = vrot.lane.b32.xlu1 %v645_v21, %s4581_s25  ;;  %666 = vrot.lane.b32.xlu0 %v644_v22, %s4581_s25 }
 0x196   : > { %672 = vrot.lane.b32.xlu1 %v647_v23, %s4581_s25  ;;  %670 = vrot.lane.b32.xlu0 %v646_v26, %s4581_s25 }
 0x19a   : > { %702 = vperm.xlu1 %4495, %v4719_v0   ;;  %674 = vrot.lane.b32.xlu0 %v648_v27, %s4581_s25  ;;  %s4629_s25 = smov 96  }
 0x19e   : > { %4496 = vset.pattern.permute.xlu1 %v4582_v28 }
 0x1fc   : > { %v4924_v30 = vpop.permute.xlu1 %660 }
 0x1fd   : > { %8301 = vst [vmem:[#allocation15_spill] sm:$0xff] %v4924_v30 }
 0x200   : > { %v4926_v31 = vpop.permute.xlu1 %664 }
 0x201   : > { %8302 = vst [vmem:[#allocation16_spill] sm:$0xff] %v4926_v31 }
 0x204   : > { %v4928_v32 = vpop.permute.xlu1 %668 }
 0x205   : > { %8303 = vst [vmem:[#allocation17_spill] sm:$0xff] %v4928_v32 }
 0x208   : > { %v4930_v34 = vpop.permute.xlu1 %672 }
 0x209   : > { %8304 = vst [vmem:[#allocation18_spill] sm:$0xff] %v4930_v34 }
 0x215   : > { %v703_v35 = vpop.permute.xlu1 %702 }
 0x216   : > { %v706_v38 = vmul.f32 %v703_v35, %v4747_v19  ;;  %v705_v39 = vmul.f32 %v703_v35, %v4740_v12  ;;  %v708_v41 = vmul.f32 %v703_v35, %v4742_v13  ;;  %v707_v42 = vmul.f32 %v703_v35, %v4756_v24 }
 0x217   : > { %v710_v44 = vmul.f32 %v703_v35, %v4749_v20  ;;  %v709_v48 = vmul.f32 %v703_v35, %v4764_v29  ;;  %v712_v14 = vmul.f32 %v703_v35, %v4758_v25  ;;  %v711_v15 = vmul.f32 %v703_v35, %v4771_v33 }
 0x218   : > { %725 = vrot.lane.b32.xlu1 %v706_v38, %s4583_s26  ;;  %723 = vrot.lane.b32.xlu0 %v705_v39, %s4583_s26  ;;  %v713_v16 = vmul.f32 %v703_v35, %v4777_v36 }
 0x21c   : > { %729 = vrot.lane.b32.xlu1 %v708_v41, %s4583_s26  ;;  %727 = vrot.lane.b32.xlu0 %v707_v42, %s4583_s26 }
 0x220   : > { %733 = vrot.lane.b32.xlu1 %v710_v44, %s4583_s26  ;;  %731 = vrot.lane.b32.xlu0 %v709_v48, %s4583_s26 }
 0x224   : > { %737 = vrot.lane.b32.xlu1 %v712_v14, %s4583_s26  ;;  %735 = vrot.lane.b32.xlu0 %v711_v15, %s4583_s26  ;;  %v4586_v14 = vmov 12  }
 0x228   : > { %767 = vperm.xlu1 %4496, %v4719_v0   ;;  %739 = vrot.lane.b32.xlu0 %v713_v16, %s4583_s26  ;;  %s4631_s26 = smov 95  }
 0x22c   : > { %4497 = vset.pattern.permute.xlu1 %v4584_v17 }
 0x28a   : > { %v4942_v18 = vpop.permute.xlu1 %725 }
 0x28b   : > { %8305 = vst [vmem:[#allocation19_spill] sm:$0xff] %v4942_v18 }
 0x28e   : > { %v4944_v21 = vpop.permute.xlu1 %729 }
 0x28f   : > { %8306 = vst [vmem:[#allocation20_spill] sm:$0xff] %v4944_v21 }
 0x292   : > { %v4946_v22 = vpop.permute.xlu1 %733 }
 0x293   : > { %8307 = vst [vmem:[#allocation21_spill] sm:$0xff] %v4946_v22 }
 0x296   : > { %v4948_v23 = vpop.permute.xlu1 %737 }
 0x297   : > { %8308 = vst [vmem:[#allocation22_spill] sm:$0xff] %v4948_v23 }
 0x2a3   : > { %v768_v26 = vpop.permute.xlu1 %767 }
 0x2a4   : > { %v771_v27 = vmul.f32 %v768_v26, %v4747_v19  ;;  %v770_v28 = vmul.f32 %v768_v26, %v4740_v12  ;;  %v773_v35 = vmul.f32 %v768_v26, %v4742_v13  ;;  %v772_v38 = vmul.f32 %v768_v26, %v4756_v24 }
 0x2a5   : > { %v775_v39 = vmul.f32 %v768_v26, %v4749_v20  ;;  %v774_v41 = vmul.f32 %v768_v26, %v4764_v29  ;;  %v777_v42 = vmul.f32 %v768_v26, %v4758_v25  ;;  %v776_v44 = vmul.f32 %v768_v26, %v4771_v33 }
 0x2a6   : > { %790 = vrot.lane.b32.xlu1 %v771_v27, %s4585_s27  ;;  %788 = vrot.lane.b32.xlu0 %v770_v28, %s4585_s27  ;;  %v778_v48 = vmul.f32 %v768_v26, %v4777_v36 }
 0x2aa   : > { %794 = vrot.lane.b32.xlu1 %v773_v35, %s4585_s27  ;;  %792 = vrot.lane.b32.xlu0 %v772_v38, %s4585_s27 }
 0x2ae   : > { %798 = vrot.lane.b32.xlu1 %v775_v39, %s4585_s27  ;;  %796 = vrot.lane.b32.xlu0 %v774_v41, %s4585_s27  ;;  %v4972_v41 = vpop.permute.xlu0 %209 }
 0x2b2   : > { %802 = vrot.lane.b32.xlu1 %v777_v42, %s4585_s27  ;;  %800 = vrot.lane.b32.xlu0 %v776_v44, %s4585_s27 }
 0x2b6   : > { %832 = vperm.xlu1 %4497, %v4719_v0   ;;  %804 = vrot.lane.b32.xlu0 %v778_v48, %s4585_s27  ;;  %v4976_v48 = vpop.permute.xlu0 %213 }
 0x2ba   : > { %4498 = vset.pattern.permute.xlu1 %v4586_v14 }
 0x318   : > { %v4960_v15 = vpop.permute.xlu1 %790 }
 0x319   : > { %8309 = vst [vmem:[#allocation23_spill] sm:$0xff] %v4960_v15 }
 0x31c   : > { %v4962_v16 = vpop.permute.xlu1 %794 }
 0x31d   : > { %8310 = vst [vmem:[#allocation24_spill] sm:$0xff] %v4962_v16 }
 0x320   : > { %v4964_v17 = vpop.permute.xlu1 %798 }
 0x321   : > { %8311 = vst [vmem:[#allocation25_spill] sm:$0xff] %v4964_v17 }
 0x324   : > { %v4966_v27 = vpop.permute.xlu1 %802 }
 0x325   : > { %8312 = vst [vmem:[#allocation26_spill] sm:$0xff] %v4966_v27  ;;  %v4981_v27 = vpop.permute.xlu0 %217 }
 0x329   : > { %v4990_v17 = vpop.permute.xlu0 %272 }
 0x331   : > { %v833_v28 = vpop.permute.xlu1 %832 }
 0x332   : > { %v836_v35 = vmul.f32 %v833_v28, %v4747_v19  ;;  %v835_v38 = vmul.f32 %v833_v28, %v4740_v12  ;;  %v838_v26 = vmul.f32 %v833_v28, %v4742_v13  ;;  %v837_v39 = vmul.f32 %v833_v28, %v4756_v24 }
 0x333   : > { %v840_v42 = vmul.f32 %v833_v28, %v4749_v20  ;;  %v839_v44 = vmul.f32 %v833_v28, %v4764_v29  ;;  %v842_v14 = vmul.f32 %v833_v28, %v4758_v25 }
 0x334   : > { %855 = vrot.lane.b32.xlu1 %v836_v35, %s4587_s28  ;;  %853 = vrot.lane.b32.xlu0 %v835_v38, %s4587_s28  ;;  %v841_v35 = vmul.f32 %v833_v28, %v4771_v33  ;;  %v843_v38 = vmul.f32 %v833_v28, %v4777_v36 }
 0x338   : > { %859 = vrot.lane.b32.xlu1 %v838_v26, %s4587_s28  ;;  %857 = vrot.lane.b32.xlu0 %v837_v39, %s4587_s28  ;;  %v4588_v26 = vmov 13  }
 0x33c   : > { %863 = vrot.lane.b32.xlu1 %v840_v42, %s4587_s28  ;;  %861 = vrot.lane.b32.xlu0 %v839_v44, %s4587_s28 }
 0x340   : > { %867 = vrot.lane.b32.xlu1 %v842_v14, %s4587_s28  ;;  %865 = vrot.lane.b32.xlu0 %v841_v35, %s4587_s28  ;;  %v4994_v35 = vpop.permute.xlu0 %276 }
 0x344   : > { %897 = vperm.xlu1 %4498, %v4719_v0   ;;  %869 = vrot.lane.b32.xlu0 %v843_v38, %s4587_s28 }
 0x348   : > { %4499 = vset.pattern.permute.xlu1 %v4588_v26 }
 0x3a6   : > { %v4984_v39 = vpop.permute.xlu1 %855 }
 0x3a7   : > { %8313 = vst [vmem:[#allocation27_spill] sm:$0xff] %v4984_v39 }
 0x3aa   : > { %v4986_v42 = vpop.permute.xlu1 %859 }
 0x3ab   : > { %8314 = vst [vmem:[#allocation28_spill] sm:$0xff] %v4986_v42  ;;  %v5000_v42 = vpop.permute.xlu0 %280 }
 0x3ae   : > { %v4988_v44 = vpop.permute.xlu1 %863 }
 0x3af   : > { %8315 = vst [vmem:[#allocation29_spill] sm:$0xff] %v4988_v44  ;;  %v5004_v39 = vpop.permute.xlu0 %284 }
 0x3b2   : > { %v4992_v16 = vpop.permute.xlu1 %867 }
 0x3b3   : > { %8316 = vst [vmem:[#allocation30_spill] sm:$0xff] %v4992_v16  ;;  %v5009_v22 = vpop.permute.xlu0 %333 }
 0x3b7   : > { %v5018_v21 = vpop.permute.xlu0 %337 }
 0x3bf   : > { %v898_v14 = vpop.permute.xlu1 %897 }
 0x3c0   : > { %v901_v28 = vmul.f32 %v898_v14, %v4747_v19  ;;  %v900_v15 = vmul.f32 %v898_v14, %v4740_v12  ;;  %v903_v38 = vmul.f32 %v898_v14, %v4742_v13  ;;  %v902_v26 = vmul.f32 %v898_v14, %v4756_v24 }
 0x3c1   : > { %v905_v16 = vmul.f32 %v898_v14, %v4749_v20  ;;  %v904_v44 = vmul.f32 %v898_v14, %v4764_v29  ;;  %v907_v23 = vmul.f32 %v898_v14, %v4758_v25 }
 0x3c2   : > { %920 = vrot.lane.b32.xlu1 %v901_v28, %s4589_s29  ;;  %918 = vrot.lane.b32.xlu0 %v900_v15, %s4589_s29  ;;  %v906_v15 = vmul.f32 %v898_v14, %v4771_v33  ;;  %v908_v28 = vmul.f32 %v898_v14, %v4777_v36 }
 0x3c6   : > { %924 = vrot.lane.b32.xlu1 %v903_v38, %s4589_s29  ;;  %922 = vrot.lane.b32.xlu0 %v902_v26, %s4589_s29  ;;  %v4590_v38 = vmov 14  }
 0x3ca   : > { %928 = vrot.lane.b32.xlu1 %v905_v16, %s4589_s29  ;;  %926 = vrot.lane.b32.xlu0 %v904_v44, %s4589_s29 }
 0x3ce   : > { %932 = vrot.lane.b32.xlu1 %v907_v23, %s4589_s29  ;;  %930 = vrot.lane.b32.xlu0 %v906_v15, %s4589_s29  ;;  %v5022_v15 = vpop.permute.xlu0 %341 }
 0x3d2   : > { %962 = vperm.xlu1 %4499, %v4719_v0   ;;  %934 = vrot.lane.b32.xlu0 %v908_v28, %s4589_s29  ;;  %s4633_s29 = smov 94  }
 0x3d6   : > { %4500 = vset.pattern.permute.xlu1 %v4590_v38 }
 0x434   : > { %v5012_v26 = vpop.permute.xlu1 %920 }
 0x435   : > { %8317 = vst [vmem:[#allocation31_spill] sm:$0xff] %v5012_v26 }
 0x438   : > { %v5014_v16 = vpop.permute.xlu1 %924 }
 0x439   : > { %8318 = vst [vmem:[#allocation32_spill] sm:$0xff] %v5014_v16  ;;  %v5028_v16 = vpop.permute.xlu0 %345 }
 0x43c   : > { %v5016_v44 = vpop.permute.xlu1 %928 }
 0x43d   : > { %8319 = vst [vmem:[#allocation33_spill] sm:$0xff] %v5016_v44  ;;  %v5032_v26 = vpop.permute.xlu0 %349 }
 0x440   : > { %v5020_v18 = vpop.permute.xlu1 %932 }
 0x441   : > { %8320 = vst [vmem:[#allocation34_spill] sm:$0xff] %v5020_v18  ;;  %v5037_v31 = vpop.permute.xlu0 %398 }
 0x445   : > { %v5046_v30 = vpop.permute.xlu0 %402 }
 0x44d   : > { %v963_v23 = vpop.permute.xlu1 %962 }
 0x44e   : > { %v966_v14 = vmul.f32 %v963_v23, %v4747_v19  ;;  %v965_v34 = vmul.f32 %v963_v23, %v4740_v12  ;;  %v968_v28 = vmul.f32 %v963_v23, %v4742_v13  ;;  %v967_v38 = vmul.f32 %v963_v23, %v4756_v24 }
 0x44f   : > { %v970_v18 = vmul.f32 %v963_v23, %v4749_v20  ;;  %v969_v44 = vmul.f32 %v963_v23, %v4764_v29  ;;  %v972_v32 = vmul.f32 %v963_v23, %v4758_v25 }
 0x450   : > { %985 = vrot.lane.b32.xlu1 %v966_v14, %s4591_s30  ;;  %983 = vrot.lane.b32.xlu0 %v965_v34, %s4591_s30  ;;  %v971_v34 = vmul.f32 %v963_v23, %v4771_v33  ;;  %v973_v14 = vmul.f32 %v963_v23, %v4777_v36 }
 0x454   : > { %989 = vrot.lane.b32.xlu1 %v968_v28, %s4591_s30  ;;  %987 = vrot.lane.b32.xlu0 %v967_v38, %s4591_s30  ;;  %v4592_v28 = vmov 15  }
 0x458   : > { %993 = vrot.lane.b32.xlu1 %v970_v18, %s4591_s30  ;;  %991 = vrot.lane.b32.xlu0 %v969_v44, %s4591_s30 }
 0x45c   : > { %997 = vrot.lane.b32.xlu1 %v972_v32, %s4591_s30  ;;  %995 = vrot.lane.b32.xlu0 %v971_v34, %s4591_s30  ;;  %v5050_v34 = vpop.permute.xlu0 %406 }
 0x460   : > { %1027 = vperm.xlu1 %4500, %v4719_v0   ;;  %999 = vrot.lane.b32.xlu0 %v973_v14, %s4591_s30  ;;  %s4635_s30 = smov 93  }
 0x464   : > { %4501 = vset.pattern.permute.xlu1 %v4592_v28 }
 0x4c2   : > { %v5040_v38 = vpop.permute.xlu1 %985 }
 0x4c3   : > { %8321 = vst [vmem:[#allocation35_spill] sm:$0xff] %v5040_v38 }
 0x4c6   : > { %v5042_v18 = vpop.permute.xlu1 %989 }
 0x4c7   : > { %8322 = vst [vmem:[#allocation36_spill] sm:$0xff] %v5042_v18  ;;  %v5056_v18 = vpop.permute.xlu0 %410 }
 0x4ca   : > { %v5044_v44 = vpop.permute.xlu1 %993 }
 0x4cb   : > { %8323 = vst [vmem:[#allocation37_spill] sm:$0xff] %v5044_v44  ;;  %v5060_v38 = vpop.permute.xlu0 %414 }
 0x4ce   : > { %v5048_v11 = vpop.permute.xlu1 %997 }
 0x4cf   : > { %8324 = vst [vmem:[#allocation38_spill] sm:$0xff] %v5048_v11  ;;  %v5065_v7 = vpop.permute.xlu0 %463 }
 0x4d3   : > { %v5074_v6 = vpop.permute.xlu0 %467 }
 0x4db   : > { %v1028_v32 = vpop.permute.xlu1 %1027 }
 0x4dc   : > { %v1031_v23 = vmul.f32 %v1028_v32, %v4747_v19  ;;  %v1030_v10 = vmul.f32 %v1028_v32, %v4740_v12  ;;  %v1033_v14 = vmul.f32 %v1028_v32, %v4742_v13  ;;  %v1032_v28 = vmul.f32 %v1028_v32, %v4756_v24 }
 0x4dd   : > { %v1035_v11 = vmul.f32 %v1028_v32, %v4749_v20  ;;  %v1034_v44 = vmul.f32 %v1028_v32, %v4764_v29  ;;  %v1037_v8 = vmul.f32 %v1028_v32, %v4758_v25 }
 0x4de   : > { %1050 = vrot.lane.b32.xlu1 %v1031_v23, %s4593_s3  ;;  %1048 = vrot.lane.b32.xlu0 %v1030_v10, %s4593_s3  ;;  %v1036_v10 = vmul.f32 %v1028_v32, %v4771_v33  ;;  %v1038_v23 = vmul.f32 %v1028_v32, %v4777_v36 }
 0x4e2   : > { %1054 = vrot.lane.b32.xlu1 %v1033_v14, %s4593_s3  ;;  %1052 = vrot.lane.b32.xlu0 %v1032_v28, %s4593_s3  ;;  %v4594_v14 = vmov 16  }
 0x4e6   : > { %1058 = vrot.lane.b32.xlu1 %v1035_v11, %s4593_s3  ;;  %1056 = vrot.lane.b32.xlu0 %v1034_v44, %s4593_s3 }
 0x4ea   : > { %1062 = vrot.lane.b32.xlu1 %v1037_v8, %s4593_s3  ;;  %1060 = vrot.lane.b32.xlu0 %v1036_v10, %s4593_s3  ;;  %v5078_v10 = vpop.permute.xlu0 %471 }
 0x4ee   : > { %1092 = vperm.xlu1 %4501, %v4719_v0   ;;  %1064 = vrot.lane.b32.xlu0 %v1038_v23, %s4593_s3  ;;  %s4637_s3 = smov 92  }
 0x4f2   : > { %4502 = vset.pattern.permute.xlu1 %v4594_v14 }
 0x550   : > { %v5068_v28 = vpop.permute.xlu1 %1050 }
 0x551   : > { %8325 = vst [vmem:[#allocation39_spill] sm:$0xff] %v5068_v28 }
 0x554   : > { %v5070_v11 = vpop.permute.xlu1 %1054 }
 0x555   : > { %8326 = vst [vmem:[#allocation40_spill] sm:$0xff] %v5070_v11  ;;  %v5084_v11 = vpop.permute.xlu0 %475 }
 0x556   : > { %8329 = vst [vmem:[#allocation43_spill] sm:$0xff] %v5084_v11 }
 0x558   : > { %v5072_v44 = vpop.permute.xlu1 %1058 }
 0x559   : > { %8327 = vst [vmem:[#allocation41_spill] sm:$0xff] %v5072_v44  ;;  %v5088_v28 = vpop.permute.xlu0 %479 }
 0x55a   : > { %8330 = vst [vmem:[#allocation44_spill] sm:$0xff] %v5088_v28 }
 0x55c   : > { %v5076_v5 = vpop.permute.xlu1 %1062 }
 0x55d   : > { %8328 = vst [vmem:[#allocation42_spill] sm:$0xff] %v5076_v5  ;;  %v5093_v2 = vpop.permute.xlu0 %528 }
 0x55e   : > { %8331 = vst [vmem:[#allocation45_spill] sm:$0xff] %v5093_v2 }
 0x561   : > { %v5102_v28 = vpop.permute.xlu0 %532 }
 0x562   : > { %8335 = vst [vmem:[#allocation49_spill] sm:$0xff] %v5102_v28 }
 0x569   : > { %v1093_v8 = vpop.permute.xlu1 %1092 }
 0x56a   : > { %v1096_v32 = vmul.f32 %v1093_v8, %v4747_v19  ;;  %v1095_v4 = vmul.f32 %v1093_v8, %v4740_v12  ;;  %v1098_v23 = vmul.f32 %v1093_v8, %v4742_v13  ;;  %v1097_v14 = vmul.f32 %v1093_v8, %v4756_v24 }
 0x56b   : > { %v1100_v5 = vmul.f32 %v1093_v8, %v4749_v20  ;;  %v1099_v44 = vmul.f32 %v1093_v8, %v4764_v29  ;;  %v1102_v3 = vmul.f32 %v1093_v8, %v4758_v25 }
 0x56c   : > { %1115 = vrot.lane.b32.xlu1 %v1096_v32, %s4595_s4  ;;  %1113 = vrot.lane.b32.xlu0 %v1095_v4, %s4595_s4  ;;  %v1101_v4 = vmul.f32 %v1093_v8, %v4771_v33  ;;  %v1103_v32 = vmul.f32 %v1093_v8, %v4777_v36 }
 0x570   : > { %1119 = vrot.lane.b32.xlu1 %v1098_v23, %s4595_s4  ;;  %1117 = vrot.lane.b32.xlu0 %v1097_v14, %s4595_s4  ;;  %v4596_v23 = vmov 17  }
 0x574   : > { %1123 = vrot.lane.b32.xlu1 %v1100_v5, %s4595_s4  ;;  %1121 = vrot.lane.b32.xlu0 %v1099_v44, %s4595_s4 }
 0x578   : > { %1127 = vrot.lane.b32.xlu1 %v1102_v3, %s4595_s4  ;;  %1125 = vrot.lane.b32.xlu0 %v1101_v4, %s4595_s4  ;;  %v5106_v4 = vpop.permute.xlu0 %536 }
 0x579   : > { %8337 = vst [vmem:[#allocation51_spill] sm:$0xff] %v5106_v4 }
 0x57c   : > { %1157 = vperm.xlu1 %4502, %v4719_v0   ;;  %1129 = vrot.lane.b32.xlu0 %v1103_v32, %s4595_s4  ;;  %s4639_s4 = smov 91  }
 0x580   : > { %4503 = vset.pattern.permute.xlu1 %v4596_v23 }
 0x5de   : > { %v5096_v14 = vpop.permute.xlu1 %1115 }
 0x5df   : > { %8332 = vst [vmem:[#allocation46_spill] sm:$0xff] %v5096_v14 }
 0x5e2   : > { %v5098_v5 = vpop.permute.xlu1 %1119 }
 0x5e3   : > { %8333 = vst [vmem:[#allocation47_spill] sm:$0xff] %v5098_v5  ;;  %v5112_v5 = vpop.permute.xlu0 %540 }
 0x5e4   : > { %8338 = vst [vmem:[#allocation52_spill] sm:$0xff] %v5112_v5 }
 0x5e6   : > { %v5100_v44 = vpop.permute.xlu1 %1123 }
 0x5e7   : > { %8334 = vst [vmem:[#allocation48_spill] sm:$0xff] %v5100_v44  ;;  %v5116_v14 = vpop.permute.xlu0 %544 }
 0x5e8   : > { %8339 = vst [vmem:[#allocation53_spill] sm:$0xff] %v5116_v14 }
 0x5ea   : > { %v5104_v11 = vpop.permute.xlu1 %1127 }
 0x5eb   : > { %8336 = vst [vmem:[#allocation50_spill] sm:$0xff] %v5104_v11  ;;  %v5121_v28 = vpop.permute.xlu0 %593 }
 0x5ec   : > { %8340 = vst [vmem:[#allocation54_spill] sm:$0xff] %v5121_v28 }
 0x5ef   : > { %v5132_v5 = vpop.permute.xlu0 %597 }
 0x5f0   : > { %8345 = vst [vmem:[#allocation59_spill] sm:$0xff] %v5132_v5 }
 0x5f3   : > { %v5136_v28 = vpop.permute.xlu0 %601 }
 0x5f4   : > { %8346 = vst [vmem:[#allocation60_spill] sm:$0xff] %v5136_v28 }
 0x5f7   : > { %v1158_v3 = vpop.permute.xlu1 %1157 }
 0x5f8   : > { %v1161_v8 = vmul.f32 %v1158_v3, %v4747_v19  ;;  %v1160_v2 = vmul.f32 %v1158_v3, %v4740_v12  ;;  %v1163_v32 = vmul.f32 %v1158_v3, %v4742_v13  ;;  %v1162_v23 = vmul.f32 %v1158_v3, %v4756_v24 }
 0x5f9   : > { %v1165_v11 = vmul.f32 %v1158_v3, %v4749_v20  ;;  %v1164_v44 = vmul.f32 %v1158_v3, %v4764_v29  ;;  %v1167_v4 = vmul.f32 %v1158_v3, %v4758_v25 }
 0x5fa   : > { %1180 = vrot.lane.b32.xlu1 %v1161_v8, %s4597_s5  ;;  %1178 = vrot.lane.b32.xlu0 %v1160_v2, %s4597_s5  ;;  %v1166_v2 = vmul.f32 %v1158_v3, %v4771_v33  ;;  %v1168_v8 = vmul.f32 %v1158_v3, %v4777_v36 }
 0x5fe   : > { %1184 = vrot.lane.b32.xlu1 %v1163_v32, %s4597_s5  ;;  %1182 = vrot.lane.b32.xlu0 %v1162_v23, %s4597_s5  ;;  %v4598_v32 = vmov 18  }
 0x602   : > { %1188 = vrot.lane.b32.xlu1 %v1165_v11, %s4597_s5  ;;  %1186 = vrot.lane.b32.xlu0 %v1164_v44, %s4597_s5 }
 0x606   : > { %1192 = vrot.lane.b32.xlu1 %v1167_v4, %s4597_s5  ;;  %1190 = vrot.lane.b32.xlu0 %v1166_v2, %s4597_s5 }
 0x60a   : > { %1222 = vperm.xlu1 %4503, %v4719_v0   ;;  %1194 = vrot.lane.b32.xlu0 %v1168_v8, %s4597_s5  ;;  %s4641_s5 = smov 90  }
 0x60e   : > { %4504 = vset.pattern.permute.xlu1 %v4598_v32  ;;  %v5140_v32 = vpop.permute.xlu0 %605 }
 0x60f   : > { %8347 = vst [vmem:[#allocation61_spill] sm:$0xff] %v5140_v32 }
 0x66c   : > { %v5124_v23 = vpop.permute.xlu1 %1180 }
 0x66d   : > { %8341 = vst [vmem:[#allocation55_spill] sm:$0xff] %v5124_v23 }
 0x670   : > { %v5126_v11 = vpop.permute.xlu1 %1184 }
 0x671   : > { %8342 = vst [vmem:[#allocation56_spill] sm:$0xff] %v5126_v11 }
 0x674   : > { %v5128_v44 = vpop.permute.xlu1 %1188 }
 0x675   : > { %8343 = vst [vmem:[#allocation57_spill] sm:$0xff] %v5128_v44 }
 0x678   : > { %v5130_v14 = vpop.permute.xlu1 %1192 }
 0x679   : > { %8344 = vst [vmem:[#allocation58_spill] sm:$0xff] %v5130_v14 }
 0x685   : > { %v1223_v4 = vpop.permute.xlu1 %1222 }
 0x686   : > { %v1226_v3 = vmul.f32 %v1223_v4, %v4747_v19  ;;  %v1225_v2 = vmul.f32 %v1223_v4, %v4740_v12  ;;  %v1228_v0 = vmul.f32 %v1223_v4, %v4742_v13  ;;  %v1227_v8 = vmul.f32 %v1223_v4, %v4756_v24 }
 0x687   : > { %v1230_v14 = vmul.f32 %v1223_v4, %v4749_v20  ;;  %v1229_v44 = vmul.f32 %v1223_v4, %v4764_v29  ;;  %v1232_v11 = vmul.f32 %v1223_v4, %v4758_v25  ;;  %v1231_v23 = vmul.f32 %v1223_v4, %v4771_v33 }
 0x688   : > { %1245 = vrot.lane.b32.xlu1 %v1226_v3, %s4599_s6  ;;  %1243 = vrot.lane.b32.xlu0 %v1225_v2, %s4599_s6  ;;  %v5146_v3 = vpop.permute.xlu0 %609  ;;  %v1233_v2 = vmul.f32 %v1223_v4, %v4777_v36 }
 0x689   : > { %8348 = vst [vmem:[#allocation62_spill] sm:$0xff] %v5146_v3 }
 0x68c   : > { %1249 = vrot.lane.b32.xlu1 %v1228_v0, %s4599_s6  ;;  %1247 = vrot.lane.b32.xlu0 %v1227_v8, %s4599_s6  ;;  %v5149_v0 = vpop.permute.xlu0 %658  ;;  %v5154_v8 = vld [vmem:[%s7948_s0] sm:$0xff] }
 0x68d   : > { %8349 = vst [vmem:[#allocation63_spill] sm:$0xff] %v5149_v0 }
 0x690   : > { %1253 = vrot.lane.b32.xlu1 %v1230_v14, %s4599_s6  ;;  %1251 = vrot.lane.b32.xlu0 %v1229_v44, %s4599_s6  ;;  %v4600_v14 = vmov 19   ;;  %v5165_v4 = vpop.permute.xlu0 %662 }
 0x691   : > { %8354 = vst [vmem:[#allocation68_spill] sm:$0xff] %v5165_v4 }
 0x694   : > { %1257 = vrot.lane.b32.xlu1 %v1232_v11, %s4599_s6  ;;  %1255 = vrot.lane.b32.xlu0 %v1231_v23, %s4599_s6  ;;  %v5169_v5 = vpop.permute.xlu0 %666 }
 0x695   : > { %8355 = vst [vmem:[#allocation69_spill] sm:$0xff] %v5169_v5 }
 0x698   : > { %1287 = vperm.xlu1 %4504, %v5154_v8   ;;  %1259 = vrot.lane.b32.xlu0 %v1233_v2, %s4599_s6  ;;  %s4643_s6 = smov 89  }
 0x69c   : > { %4505 = vset.pattern.permute.xlu1 %v4600_v14 }
 0x6fa   : > { %v5157_v44 = vpop.permute.xlu1 %1245 }
 0x6fb   : > { %8350 = vst [vmem:[#allocation64_spill] sm:$0xff] %v5157_v44 }
 0x6fe   : > { %v5159_v32 = vpop.permute.xlu1 %1249 }
 0x6ff   : > { %8351 = vst [vmem:[#allocation65_spill] sm:$0xff] %v5159_v32 }
 0x702   : > { %v5161_v11 = vpop.permute.xlu1 %1253 }
 0x703   : > { %8352 = vst [vmem:[#allocation66_spill] sm:$0xff] %v5161_v11  ;;  %v5173_v11 = vpop.permute.xlu0 %670 }
 0x704   : > { %8356 = vst [vmem:[#allocation70_spill] sm:$0xff] %v5173_v11 }
 0x706   : > { %v5163_v23 = vpop.permute.xlu1 %1257 }
 0x707   : > { %8353 = vst [vmem:[#allocation67_spill] sm:$0xff] %v5163_v23 }
 0x713   : > { %v1288_v0 = vpop.permute.xlu1 %1287 }
 0x714   : > { %v1291_v3 = vmul.f32 %v1288_v0, %v4747_v19  ;;  %v1290_v28 = vmul.f32 %v1288_v0, %v4740_v12  ;;  %v1293_v2 = vmul.f32 %v1288_v0, %v4742_v13  ;;  %v1292_v14 = vmul.f32 %v1288_v0, %v4756_v24 }
 0x715   : > { %v1295_v23 = vmul.f32 %v1288_v0, %v4749_v20  ;;  %v1294_v32 = vmul.f32 %v1288_v0, %v4764_v29  ;;  %v1297_v44 = vmul.f32 %v1288_v0, %v4758_v25  ;;  %v1296_v5 = vmul.f32 %v1288_v0, %v4771_v33 }
 0x716   : > { %1310 = vrot.lane.b32.xlu1 %v1291_v3, %s4601_s11  ;;  %1308 = vrot.lane.b32.xlu0 %v1290_v28, %s4601_s11  ;;  %v5179_v3 = vpop.permute.xlu0 %674  ;;  %v1298_v28 = vmul.f32 %v1288_v0, %v4777_v36 }
 0x717   : > { %8357 = vst [vmem:[#allocation71_spill] sm:$0xff] %v5179_v3 }
 0x71a   : > { %1314 = vrot.lane.b32.xlu1 %v1293_v2, %s4601_s11  ;;  %1312 = vrot.lane.b32.xlu0 %v1292_v14, %s4601_s11  ;;  %v5182_v2 = vpop.permute.xlu0 %723  ;;  %v4602_v14 = vmov 20  }
 0x71b   : > { %8358 = vst [vmem:[#allocation72_spill] sm:$0xff] %v5182_v2 }
 0x71e   : > { %1318 = vrot.lane.b32.xlu1 %v1295_v23, %s4601_s11  ;;  %1316 = vrot.lane.b32.xlu0 %v1294_v32, %s4601_s11  ;;  %v5193_v3 = vpop.permute.xlu0 %727 }
 0x71f   : > { %8363 = vst [vmem:[#allocation77_spill] sm:$0xff] %v5193_v3 }
 0x722   : > { %1322 = vrot.lane.b32.xlu1 %v1297_v44, %s4601_s11  ;;  %1320 = vrot.lane.b32.xlu0 %v1296_v5, %s4601_s11  ;;  %v5197_v2 = vpop.permute.xlu0 %731 }
 0x723   : > { %8364 = vst [vmem:[#allocation78_spill] sm:$0xff] %v5197_v2 }
 0x726   : > { %1352 = vperm.xlu1 %4505, %v5154_v8   ;;  %1324 = vrot.lane.b32.xlu0 %v1298_v28, %s4601_s11  ;;  %s4649_s11 = smov 86  }
 0x72a   : > { %4506 = vset.pattern.permute.xlu1 %v4602_v14 }
 0x788   : > { %v5185_v11 = vpop.permute.xlu1 %1310 }
 0x789   : > { %8359 = vst [vmem:[#allocation73_spill] sm:$0xff] %v5185_v11 }
 0x78c   : > { %v5187_v32 = vpop.permute.xlu1 %1314 }
 0x78d   : > { %8360 = vst [vmem:[#allocation74_spill] sm:$0xff] %v5187_v32 }
 0x790   : > { %v5189_v23 = vpop.permute.xlu1 %1318 }
 0x791   : > { %8361 = vst [vmem:[#allocation75_spill] sm:$0xff] %v5189_v23  ;;  %v5201_v23 = vpop.permute.xlu0 %735 }
 0x792   : > { %8365 = vst [vmem:[#allocation79_spill] sm:$0xff] %v5201_v23 }
 0x794   : > { %v5191_v4 = vpop.permute.xlu1 %1322 }
 0x795   : > { %8362 = vst [vmem:[#allocation76_spill] sm:$0xff] %v5191_v4 }
 0x7a1   : > { %v1353_v5 = vpop.permute.xlu1 %1352 }
 0x7a2   : > { %v1356_v0 = vmul.f32 %v1353_v5, %v4747_v19  ;;  %v1355_v44 = vmul.f32 %v1353_v5, %v4740_v12  ;;  %v1358_v28 = vmul.f32 %v1353_v5, %v4742_v13  ;;  %v1357_v14 = vmul.f32 %v1353_v5, %v4756_v24 }
 0x7a3   : > { %v1360_v4 = vmul.f32 %v1353_v5, %v4749_v20  ;;  %v1359_v32 = vmul.f32 %v1353_v5, %v4764_v29  ;;  %v1362_v11 = vmul.f32 %v1353_v5, %v4758_v25  ;;  %v1361_v2 = vmul.f32 %v1353_v5, %v4771_v33 }
 0x7a4   : > { %1375 = vrot.lane.b32.xlu1 %v1356_v0, %s4603_s12  ;;  %1373 = vrot.lane.b32.xlu0 %v1355_v44, %s4603_s12  ;;  %v5207_v0 = vpop.permute.xlu0 %739  ;;  %v1363_v44 = vmul.f32 %v1353_v5, %v4777_v36 }
 0x7a5   : > { %8366 = vst [vmem:[#allocation80_spill] sm:$0xff] %v5207_v0 }
 0x7a8   : > { %1379 = vrot.lane.b32.xlu1 %v1358_v28, %s4603_s12  ;;  %1377 = vrot.lane.b32.xlu0 %v1357_v14, %s4603_s12  ;;  %v5210_v28 = vpop.permute.xlu0 %788  ;;  %v4604_v14 = vmov 21  }
 0x7a9   : > { %8367 = vst [vmem:[#allocation81_spill] sm:$0xff] %v5210_v28 }
 0x7ac   : > { %1383 = vrot.lane.b32.xlu1 %v1360_v4, %s4603_s12  ;;  %1381 = vrot.lane.b32.xlu0 %v1359_v32, %s4603_s12  ;;  %v5221_v0 = vpop.permute.xlu0 %792 }
 0x7ad   : > { %8372 = vst [vmem:[#allocation86_spill] sm:$0xff] %v5221_v0 }
 0x7b0   : > { %1387 = vrot.lane.b32.xlu1 %v1362_v11, %s4603_s12  ;;  %1385 = vrot.lane.b32.xlu0 %v1361_v2, %s4603_s12  ;;  %v5225_v28 = vpop.permute.xlu0 %796 }
 0x7b1   : > { %8373 = vst [vmem:[#allocation87_spill] sm:$0xff] %v5225_v28 }
 0x7b4   : > { %1417 = vperm.xlu1 %4506, %v5154_v8   ;;  %1389 = vrot.lane.b32.xlu0 %v1363_v44, %s4603_s12  ;;  %s4651_s12 = smov 85  }
 0x7b8   : > { %4507 = vset.pattern.permute.xlu1 %v4604_v14 }
 0x816   : > { %v5213_v23 = vpop.permute.xlu1 %1375 }
 0x817   : > { %8368 = vst [vmem:[#allocation82_spill] sm:$0xff] %v5213_v23 }
 0x81a   : > { %v5215_v4 = vpop.permute.xlu1 %1379 }
 0x81b   : > { %8369 = vst [vmem:[#allocation83_spill] sm:$0xff] %v5215_v4 }
 0x81e   : > { %v5217_v32 = vpop.permute.xlu1 %1383 }
 0x81f   : > { %8370 = vst [vmem:[#allocation84_spill] sm:$0xff] %v5217_v32  ;;  %v5229_v32 = vpop.permute.xlu0 %800 }
 0x820   : > { %8374 = vst [vmem:[#allocation88_spill] sm:$0xff] %v5229_v32 }
 0x822   : > { %v5219_v3 = vpop.permute.xlu1 %1387 }
 0x823   : > { %8371 = vst [vmem:[#allocation85_spill] sm:$0xff] %v5219_v3 }
 0x82f   : > { %v1418_v11 = vpop.permute.xlu1 %1417 }
 0x830   : > { %v1421_v2 = vmul.f32 %v1418_v11, %v4747_v19  ;;  %v1420_v5 = vmul.f32 %v1418_v11, %v4740_v12  ;;  %v1423_v44 = vmul.f32 %v1418_v11, %v4742_v13  ;;  %v1422_v14 = vmul.f32 %v1418_v11, %v4756_v24 }
 0x831   : > { %v1425_v3 = vmul.f32 %v1418_v11, %v4749_v20  ;;  %v1424_v4 = vmul.f32 %v1418_v11, %v4764_v29  ;;  %v1427_v23 = vmul.f32 %v1418_v11, %v4758_v25  ;;  %v1426_v28 = vmul.f32 %v1418_v11, %v4771_v33 }
 0x832   : > { %1440 = vrot.lane.b32.xlu1 %v1421_v2, %s4605_s13  ;;  %1438 = vrot.lane.b32.xlu0 %v1420_v5, %s4605_s13  ;;  %v5235_v2 = vpop.permute.xlu0 %804  ;;  %v1428_v5 = vmul.f32 %v1418_v11, %v4777_v36 }
 0x833   : > { %8375 = vst [vmem:[#allocation89_spill] sm:$0xff] %v5235_v2 }
 0x836   : > { %1444 = vrot.lane.b32.xlu1 %v1423_v44, %s4605_s13  ;;  %1442 = vrot.lane.b32.xlu0 %v1422_v14, %s4605_s13  ;;  %v5238_v44 = vpop.permute.xlu0 %853  ;;  %v4606_v14 = vmov 22  }
 0x837   : > { %8376 = vst [vmem:[#allocation90_spill] sm:$0xff] %v5238_v44 }
 0x83a   : > { %1448 = vrot.lane.b32.xlu1 %v1425_v3, %s4605_s13  ;;  %1446 = vrot.lane.b32.xlu0 %v1424_v4, %s4605_s13  ;;  %v5249_v2 = vpop.permute.xlu0 %857 }
 0x83b   : > { %8381 = vst [vmem:[#allocation95_spill] sm:$0xff] %v5249_v2 }
 0x83e   : > { %1452 = vrot.lane.b32.xlu1 %v1427_v23, %s4605_s13  ;;  %1450 = vrot.lane.b32.xlu0 %v1426_v28, %s4605_s13  ;;  %v5253_v44 = vpop.permute.xlu0 %861 }
 0x83f   : > { %8382 = vst [vmem:[#allocation96_spill] sm:$0xff] %v5253_v44 }
 0x842   : > { %1482 = vperm.xlu1 %4507, %v5154_v8   ;;  %1454 = vrot.lane.b32.xlu0 %v1428_v5, %s4605_s13  ;;  %s4653_s13 = smov 84  }
 0x846   : > { %4508 = vset.pattern.permute.xlu1 %v4606_v14 }
 0x8a4   : > { %v5241_v32 = vpop.permute.xlu1 %1440 }
 0x8a5   : > { %8377 = vst [vmem:[#allocation91_spill] sm:$0xff] %v5241_v32 }
 0x8a8   : > { %v5243_v3 = vpop.permute.xlu1 %1444 }
 0x8a9   : > { %8378 = vst [vmem:[#allocation92_spill] sm:$0xff] %v5243_v3 }
 0x8ac   : > { %v5245_v4 = vpop.permute.xlu1 %1448 }
 0x8ad   : > { %8379 = vst [vmem:[#allocation93_spill] sm:$0xff] %v5245_v4  ;;  %v5257_v4 = vpop.permute.xlu0 %865 }
 0x8ae   : > { %8383 = vst [vmem:[#allocation97_spill] sm:$0xff] %v5257_v4 }
 0x8b0   : > { %v5247_v0 = vpop.permute.xlu1 %1452 }
 0x8b1   : > { %8380 = vst [vmem:[#allocation94_spill] sm:$0xff] %v5247_v0 }
 0x8bd   : > { %v1483_v23 = vpop.permute.xlu1 %1482 }
 0x8be   : > { %v1486_v28 = vmul.f32 %v1483_v23, %v4747_v19  ;;  %v1485_v11 = vmul.f32 %v1483_v23, %v4740_v12  ;;  %v1488_v5 = vmul.f32 %v1483_v23, %v4742_v13  ;;  %v1487_v14 = vmul.f32 %v1483_v23, %v4756_v24 }
 0x8bf   : > { %v1490_v0 = vmul.f32 %v1483_v23, %v4749_v20  ;;  %v1489_v3 = vmul.f32 %v1483_v23, %v4764_v29  ;;  %v1492_v32 = vmul.f32 %v1483_v23, %v4758_v25  ;;  %v1491_v44 = vmul.f32 %v1483_v23, %v4771_v33 }
 0x8c0   : > { %1505 = vrot.lane.b32.xlu1 %v1486_v28, %s4607_s14  ;;  %1503 = vrot.lane.b32.xlu0 %v1485_v11, %s4607_s14  ;;  %v5263_v28 = vpop.permute.xlu0 %869  ;;  %v1493_v11 = vmul.f32 %v1483_v23, %v4777_v36 }
 0x8c1   : > { %8384 = vst [vmem:[#allocation98_spill] sm:$0xff] %v5263_v28 }
 0x8c4   : > { %1509 = vrot.lane.b32.xlu1 %v1488_v5, %s4607_s14  ;;  %1507 = vrot.lane.b32.xlu0 %v1487_v14, %s4607_s14  ;;  %v5266_v5 = vpop.permute.xlu0 %918  ;;  %v4608_v14 = vmov 23  }
 0x8c5   : > { %8385 = vst [vmem:[#allocation99_spill] sm:$0xff] %v5266_v5 }
 0x8c8   : > { %1513 = vrot.lane.b32.xlu1 %v1490_v0, %s4607_s14  ;;  %1511 = vrot.lane.b32.xlu0 %v1489_v3, %s4607_s14  ;;  %v5277_v28 = vpop.permute.xlu0 %922 }
 0x8c9   : > { %8390 = vst [vmem:[#allocation104_spill] sm:$0xff] %v5277_v28 }
 0x8cc   : > { %1517 = vrot.lane.b32.xlu1 %v1492_v32, %s4607_s14  ;;  %1515 = vrot.lane.b32.xlu0 %v1491_v44, %s4607_s14  ;;  %v5281_v5 = vpop.permute.xlu0 %926 }
 0x8cd   : > { %8391 = vst [vmem:[#allocation105_spill] sm:$0xff] %v5281_v5 }
 0x8d0   : > { %1547 = vperm.xlu1 %4508, %v5154_v8   ;;  %1519 = vrot.lane.b32.xlu0 %v1493_v11, %s4607_s14  ;;  %s4655_s14 = smov 83  }
 0x8d4   : > { %4509 = vset.pattern.permute.xlu1 %v4608_v14 }
 0x932   : > { %v5269_v4 = vpop.permute.xlu1 %1505 }
 0x933   : > { %8386 = vst [vmem:[#allocation100_spill] sm:$0xff] %v5269_v4 }
 0x936   : > { %v5271_v0 = vpop.permute.xlu1 %1509 }
 0x937   : > { %8387 = vst [vmem:[#allocation101_spill] sm:$0xff] %v5271_v0 }
 0x93a   : > { %v5273_v3 = vpop.permute.xlu1 %1513 }
 0x93b   : > { %8388 = vst [vmem:[#allocation102_spill] sm:$0xff] %v5273_v3  ;;  %v5285_v3 = vpop.permute.xlu0 %930 }
 0x93c   : > { %8392 = vst [vmem:[#allocation106_spill] sm:$0xff] %v5285_v3 }
 0x93e   : > { %v5275_v2 = vpop.permute.xlu1 %1517 }
 0x93f   : > { %8389 = vst [vmem:[#allocation103_spill] sm:$0xff] %v5275_v2 }
 0x94b   : > { %v1548_v32 = vpop.permute.xlu1 %1547 }
 0x94c   : > { %v1551_v44 = vmul.f32 %v1548_v32, %v4747_v19  ;;  %v1550_v23 = vmul.f32 %v1548_v32, %v4740_v12  ;;  %v1553_v11 = vmul.f32 %v1548_v32, %v4742_v13  ;;  %v1552_v14 = vmul.f32 %v1548_v32, %v4756_v24 }
 0x94d   : > { %v1555_v2 = vmul.f32 %v1548_v32, %v4749_v20  ;;  %v1554_v0 = vmul.f32 %v1548_v32, %v4764_v29  ;;  %v1557_v4 = vmul.f32 %v1548_v32, %v4758_v25  ;;  %v1556_v5 = vmul.f32 %v1548_v32, %v4771_v33 }
 0x94e   : > { %1570 = vrot.lane.b32.xlu1 %v1551_v44, %s4609_s15  ;;  %1568 = vrot.lane.b32.xlu0 %v1550_v23, %s4609_s15  ;;  %v5291_v44 = vpop.permute.xlu0 %934  ;;  %v1558_v23 = vmul.f32 %v1548_v32, %v4777_v36 }
 0x94f   : > { %8393 = vst [vmem:[#allocation107_spill] sm:$0xff] %v5291_v44 }
 0x952   : > { %1574 = vrot.lane.b32.xlu1 %v1553_v11, %s4609_s15  ;;  %1572 = vrot.lane.b32.xlu0 %v1552_v14, %s4609_s15  ;;  %v5294_v11 = vpop.permute.xlu0 %983  ;;  %v4610_v14 = vmov 24  }
 0x953   : > { %8394 = vst [vmem:[#allocation108_spill] sm:$0xff] %v5294_v11 }
 0x956   : > { %1578 = vrot.lane.b32.xlu1 %v1555_v2, %s4609_s15  ;;  %1576 = vrot.lane.b32.xlu0 %v1554_v0, %s4609_s15  ;;  %v5305_v44 = vpop.permute.xlu0 %987 }
 0x957   : > { %8399 = vst [vmem:[#allocation113_spill] sm:$0xff] %v5305_v44 }
 0x95a   : > { %1582 = vrot.lane.b32.xlu1 %v1557_v4, %s4609_s15  ;;  %1580 = vrot.lane.b32.xlu0 %v1556_v5, %s4609_s15  ;;  %v5309_v11 = vpop.permute.xlu0 %991 }
 0x95b   : > { %8400 = vst [vmem:[#allocation114_spill] sm:$0xff] %v5309_v11 }
 0x95e   : > { %1612 = vperm.xlu1 %4509, %v5154_v8   ;;  %1584 = vrot.lane.b32.xlu0 %v1558_v23, %s4609_s15  ;;  %s4657_s15 = smov 82  }
 0x962   : > { %4510 = vset.pattern.permute.xlu1 %v4610_v14 }
 0x9c0   : > { %v5297_v3 = vpop.permute.xlu1 %1570 }
 0x9c1   : > { %8395 = vst [vmem:[#allocation109_spill] sm:$0xff] %v5297_v3 }
 0x9c4   : > { %v5299_v2 = vpop.permute.xlu1 %1574 }
 0x9c5   : > { %8396 = vst [vmem:[#allocation110_spill] sm:$0xff] %v5299_v2 }
 0x9c8   : > { %v5301_v0 = vpop.permute.xlu1 %1578 }
 0x9c9   : > { %8397 = vst [vmem:[#allocation111_spill] sm:$0xff] %v5301_v0  ;;  %v5313_v0 = vpop.permute.xlu0 %995 }
 0x9ca   : > { %8401 = vst [vmem:[#allocation115_spill] sm:$0xff] %v5313_v0 }
 0x9cc   : > { %v5303_v28 = vpop.permute.xlu1 %1582 }
 0x9cd   : > { %8398 = vst [vmem:[#allocation112_spill] sm:$0xff] %v5303_v28 }
 0x9d9   : > { %v1613_v4 = vpop.permute.xlu1 %1612 }
 0x9da   : > { %v1616_v5 = vmul.f32 %v1613_v4, %v4747_v19  ;;  %v1615_v32 = vmul.f32 %v1613_v4, %v4740_v12  ;;  %v1618_v23 = vmul.f32 %v1613_v4, %v4742_v13  ;;  %v1617_v14 = vmul.f32 %v1613_v4, %v4756_v24 }
 0x9db   : > { %v1620_v28 = vmul.f32 %v1613_v4, %v4749_v20  ;;  %v1619_v2 = vmul.f32 %v1613_v4, %v4764_v29  ;;  %v1622_v3 = vmul.f32 %v1613_v4, %v4758_v25  ;;  %v1621_v11 = vmul.f32 %v1613_v4, %v4771_v33 }
 0x9dc   : > { %1635 = vrot.lane.b32.xlu1 %v1616_v5, %s4611_s16  ;;  %1633 = vrot.lane.b32.xlu0 %v1615_v32, %s4611_s16  ;;  %v5319_v5 = vpop.permute.xlu0 %999  ;;  %v1623_v32 = vmul.f32 %v1613_v4, %v4777_v36 }
 0x9dd   : > { %8402 = vst [vmem:[#allocation116_spill] sm:$0xff] %v5319_v5 }
 0x9e0   : > { %1639 = vrot.lane.b32.xlu1 %v1618_v23, %s4611_s16  ;;  %1637 = vrot.lane.b32.xlu0 %v1617_v14, %s4611_s16  ;;  %v5322_v23 = vpop.permute.xlu0 %1048  ;;  %v4612_v14 = vmov 25  }
 0x9e1   : > { %8403 = vst [vmem:[#allocation117_spill] sm:$0xff] %v5322_v23 }
 0x9e4   : > { %1643 = vrot.lane.b32.xlu1 %v1620_v28, %s4611_s16  ;;  %1641 = vrot.lane.b32.xlu0 %v1619_v2, %s4611_s16  ;;  %v5333_v5 = vpop.permute.xlu0 %1052 }
 0x9e5   : > { %8408 = vst [vmem:[#allocation122_spill] sm:$0xff] %v5333_v5 }
 0x9e8   : > { %1647 = vrot.lane.b32.xlu1 %v1622_v3, %s4611_s16  ;;  %1645 = vrot.lane.b32.xlu0 %v1621_v11, %s4611_s16  ;;  %v5337_v23 = vpop.permute.xlu0 %1056 }
 0x9e9   : > { %8409 = vst [vmem:[#allocation123_spill] sm:$0xff] %v5337_v23 }
 0x9ec   : > { %1677 = vperm.xlu1 %4510, %v5154_v8   ;;  %1649 = vrot.lane.b32.xlu0 %v1623_v32, %s4611_s16  ;;  %s4659_s16 = smov 81  }
 0x9f0   : > { %4511 = vset.pattern.permute.xlu1 %v4612_v14 }
 0xa4e   : > { %v5325_v0 = vpop.permute.xlu1 %1635 }
 0xa4f   : > { %8404 = vst [vmem:[#allocation118_spill] sm:$0xff] %v5325_v0 }
 0xa52   : > { %v5327_v28 = vpop.permute.xlu1 %1639 }
 0xa53   : > { %8405 = vst [vmem:[#allocation119_spill] sm:$0xff] %v5327_v28 }
 0xa56   : > { %v5329_v2 = vpop.permute.xlu1 %1643 }
 0xa57   : > { %8406 = vst [vmem:[#allocation120_spill] sm:$0xff] %v5329_v2  ;;  %v5341_v2 = vpop.permute.xlu0 %1060 }
 0xa58   : > { %8410 = vst [vmem:[#allocation124_spill] sm:$0xff] %v5341_v2 }
 0xa5a   : > { %v5331_v44 = vpop.permute.xlu1 %1647 }
 0xa5b   : > { %8407 = vst [vmem:[#allocation121_spill] sm:$0xff] %v5331_v44 }
 0xa67   : > { %v1678_v3 = vpop.permute.xlu1 %1677 }
 0xa68   : > { %v1681_v11 = vmul.f32 %v1678_v3, %v4747_v19  ;;  %v1680_v4 = vmul.f32 %v1678_v3, %v4740_v12  ;;  %v1683_v32 = vmul.f32 %v1678_v3, %v4742_v13  ;;  %v1682_v14 = vmul.f32 %v1678_v3, %v4756_v24 }
 0xa69   : > { %v1685_v44 = vmul.f32 %v1678_v3, %v4749_v20  ;;  %v1684_v28 = vmul.f32 %v1678_v3, %v4764_v29  ;;  %v1687_v0 = vmul.f32 %v1678_v3, %v4758_v25  ;;  %v1686_v23 = vmul.f32 %v1678_v3, %v4771_v33 }
 0xa6a   : > { %1700 = vrot.lane.b32.xlu1 %v1681_v11, %s4613_s17  ;;  %1698 = vrot.lane.b32.xlu0 %v1680_v4, %s4613_s17  ;;  %v5347_v11 = vpop.permute.xlu0 %1064  ;;  %v1688_v4 = vmul.f32 %v1678_v3, %v4777_v36 }
 0xa6b   : > { %8411 = vst [vmem:[#allocation125_spill] sm:$0xff] %v5347_v11 }
 0xa6e   : > { %1704 = vrot.lane.b32.xlu1 %v1683_v32, %s4613_s17  ;;  %1702 = vrot.lane.b32.xlu0 %v1682_v14, %s4613_s17  ;;  %v5350_v32 = vpop.permute.xlu0 %1113  ;;  %v4614_v14 = vmov 26  }
 0xa6f   : > { %8412 = vst [vmem:[#allocation126_spill] sm:$0xff] %v5350_v32 }
 0xa72   : > { %1708 = vrot.lane.b32.xlu1 %v1685_v44, %s4613_s17  ;;  %1706 = vrot.lane.b32.xlu0 %v1684_v28, %s4613_s17  ;;  %v5361_v11 = vpop.permute.xlu0 %1117 }
 0xa73   : > { %8417 = vst [vmem:[#allocation131_spill] sm:$0xff] %v5361_v11 }
 0xa76   : > { %1712 = vrot.lane.b32.xlu1 %v1687_v0, %s4613_s17  ;;  %1710 = vrot.lane.b32.xlu0 %v1686_v23, %s4613_s17  ;;  %v5365_v32 = vpop.permute.xlu0 %1121 }
 0xa77   : > { %8418 = vst [vmem:[#allocation132_spill] sm:$0xff] %v5365_v32 }
 0xa7a   : > { %1742 = vperm.xlu1 %4511, %v5154_v8   ;;  %1714 = vrot.lane.b32.xlu0 %v1688_v4, %s4613_s17  ;;  %s4661_s17 = smov 80  }
 0xa7e   : > { %4512 = vset.pattern.permute.xlu1 %v4614_v14 }
 0xadc   : > { %v5353_v2 = vpop.permute.xlu1 %1700 }
 0xadd   : > { %8413 = vst [vmem:[#allocation127_spill] sm:$0xff] %v5353_v2 }
 0xae0   : > { %v5355_v44 = vpop.permute.xlu1 %1704 }
 0xae1   : > { %8414 = vst [vmem:[#allocation128_spill] sm:$0xff] %v5355_v44 }
 0xae4   : > { %v5357_v28 = vpop.permute.xlu1 %1708 }
 0xae5   : > { %8415 = vst [vmem:[#allocation129_spill] sm:$0xff] %v5357_v28  ;;  %v5369_v28 = vpop.permute.xlu0 %1125 }
 0xae6   : > { %8419 = vst [vmem:[#allocation133_spill] sm:$0xff] %v5369_v28 }
 0xae8   : > { %v5359_v5 = vpop.permute.xlu1 %1712 }
 0xae9   : > { %8416 = vst [vmem:[#allocation130_spill] sm:$0xff] %v5359_v5 }
 0xaf5   : > { %v1743_v0 = vpop.permute.xlu1 %1742 }
 0xaf6   : > { %v1746_v23 = vmul.f32 %v1743_v0, %v4747_v19  ;;  %v1745_v3 = vmul.f32 %v1743_v0, %v4740_v12  ;;  %v1748_v4 = vmul.f32 %v1743_v0, %v4742_v13  ;;  %v1747_v14 = vmul.f32 %v1743_v0, %v4756_v24 }
 0xaf7   : > { %v1750_v5 = vmul.f32 %v1743_v0, %v4749_v20  ;;  %v1749_v44 = vmul.f32 %v1743_v0, %v4764_v29  ;;  %v1752_v2 = vmul.f32 %v1743_v0, %v4758_v25  ;;  %v1751_v32 = vmul.f32 %v1743_v0, %v4771_v33 }
 0xaf8   : > { %1765 = vrot.lane.b32.xlu1 %v1746_v23, %s4615_s18  ;;  %1763 = vrot.lane.b32.xlu0 %v1745_v3, %s4615_s18  ;;  %v5375_v23 = vpop.permute.xlu0 %1129  ;;  %v1753_v3 = vmul.f32 %v1743_v0, %v4777_v36 }
 0xaf9   : > { %8420 = vst [vmem:[#allocation134_spill] sm:$0xff] %v5375_v23 }
 0xafc   : > { %1769 = vrot.lane.b32.xlu1 %v1748_v4, %s4615_s18  ;;  %1767 = vrot.lane.b32.xlu0 %v1747_v14, %s4615_s18  ;;  %v5378_v4 = vpop.permute.xlu0 %1178  ;;  %v4616_v14 = vmov 27  }
 0xafd   : > { %8421 = vst [vmem:[#allocation135_spill] sm:$0xff] %v5378_v4 }
 0xb00   : > { %1773 = vrot.lane.b32.xlu1 %v1750_v5, %s4615_s18  ;;  %1771 = vrot.lane.b32.xlu0 %v1749_v44, %s4615_s18  ;;  %v5389_v23 = vpop.permute.xlu0 %1182 }
 0xb01   : > { %8426 = vst [vmem:[#allocation140_spill] sm:$0xff] %v5389_v23 }
 0xb04   : > { %1777 = vrot.lane.b32.xlu1 %v1752_v2, %s4615_s18  ;;  %1775 = vrot.lane.b32.xlu0 %v1751_v32, %s4615_s18  ;;  %v5393_v4 = vpop.permute.xlu0 %1186 }
 0xb05   : > { %8427 = vst [vmem:[#allocation141_spill] sm:$0xff] %v5393_v4 }
 0xb08   : > { %1807 = vperm.xlu1 %4512, %v5154_v8   ;;  %1779 = vrot.lane.b32.xlu0 %v1753_v3, %s4615_s18  ;;  %s4663_s18 = smov 79  }
 0xb0c   : > { %4513 = vset.pattern.permute.xlu1 %v4616_v14 }
 0xb6a   : > { %v5381_v28 = vpop.permute.xlu1 %1765 }
 0xb6b   : > { %8422 = vst [vmem:[#allocation136_spill] sm:$0xff] %v5381_v28 }
 0xb6e   : > { %v5383_v5 = vpop.permute.xlu1 %1769 }
 0xb6f   : > { %8423 = vst [vmem:[#allocation137_spill] sm:$0xff] %v5383_v5 }
 0xb72   : > { %v5385_v44 = vpop.permute.xlu1 %1773 }
 0xb73   : > { %8424 = vst [vmem:[#allocation138_spill] sm:$0xff] %v5385_v44  ;;  %v5397_v44 = vpop.permute.xlu0 %1190 }
 0xb74   : > { %8428 = vst [vmem:[#allocation142_spill] sm:$0xff] %v5397_v44 }
 0xb76   : > { %v5387_v11 = vpop.permute.xlu1 %1777 }
 0xb77   : > { %8425 = vst [vmem:[#allocation139_spill] sm:$0xff] %v5387_v11 }
 0xb83   : > { %v1808_v2 = vpop.permute.xlu1 %1807 }
 0xb84   : > { %v1811_v32 = vmul.f32 %v1808_v2, %v4747_v19  ;;  %v1810_v0 = vmul.f32 %v1808_v2, %v4740_v12  ;;  %v1813_v3 = vmul.f32 %v1808_v2, %v4742_v13  ;;  %v1812_v14 = vmul.f32 %v1808_v2, %v4756_v24 }
 0xb85   : > { %v1815_v11 = vmul.f32 %v1808_v2, %v4749_v20  ;;  %v1814_v5 = vmul.f32 %v1808_v2, %v4764_v29  ;;  %v1817_v28 = vmul.f32 %v1808_v2, %v4758_v25  ;;  %v1816_v4 = vmul.f32 %v1808_v2, %v4771_v33 }
 0xb86   : > { %1830 = vrot.lane.b32.xlu1 %v1811_v32, %s4617_s19  ;;  %1828 = vrot.lane.b32.xlu0 %v1810_v0, %s4617_s19  ;;  %v5403_v32 = vpop.permute.xlu0 %1194  ;;  %v1818_v0 = vmul.f32 %v1808_v2, %v4777_v36 }
 0xb87   : > { %8429 = vst [vmem:[#allocation143_spill] sm:$0xff] %v5403_v32 }
 0xb8a   : > { %1834 = vrot.lane.b32.xlu1 %v1813_v3, %s4617_s19  ;;  %1832 = vrot.lane.b32.xlu0 %v1812_v14, %s4617_s19  ;;  %v5406_v3 = vpop.permute.xlu0 %1243  ;;  %v4618_v14 = vmov 28  }
 0xb8b   : > { %8430 = vst [vmem:[#allocation144_spill] sm:$0xff] %v5406_v3 }
 0xb8e   : > { %1838 = vrot.lane.b32.xlu1 %v1815_v11, %s4617_s19  ;;  %1836 = vrot.lane.b32.xlu0 %v1814_v5, %s4617_s19  ;;  %v5417_v32 = vpop.permute.xlu0 %1247 }
 0xb8f   : > { %8435 = vst [vmem:[#allocation149_spill] sm:$0xff] %v5417_v32 }
 0xb92   : > { %1842 = vrot.lane.b32.xlu1 %v1817_v28, %s4617_s19  ;;  %1840 = vrot.lane.b32.xlu0 %v1816_v4, %s4617_s19  ;;  %v5421_v3 = vpop.permute.xlu0 %1251 }
 0xb93   : > { %8436 = vst [vmem:[#allocation150_spill] sm:$0xff] %v5421_v3 }
 0xb96   : > { %1872 = vperm.xlu1 %4513, %v5154_v8   ;;  %1844 = vrot.lane.b32.xlu0 %v1818_v0, %s4617_s19 }
 0xb9a   : > { %4514 = vset.pattern.permute.xlu1 %v4618_v14 }
 0xbf8   : > { %v5409_v44 = vpop.permute.xlu1 %1830 }
 0xbf9   : > { %8431 = vst [vmem:[#allocation145_spill] sm:$0xff] %v5409_v44 }
 0xbfc   : > { %v5411_v11 = vpop.permute.xlu1 %1834 }
 0xbfd   : > { %8432 = vst [vmem:[#allocation146_spill] sm:$0xff] %v5411_v11 }
 0xc00   : > { %v5413_v5 = vpop.permute.xlu1 %1838 }
 0xc01   : > { %8433 = vst [vmem:[#allocation147_spill] sm:$0xff] %v5413_v5  ;;  %v5425_v5 = vpop.permute.xlu0 %1255 }
 0xc02   : > { %8437 = vst [vmem:[#allocation151_spill] sm:$0xff] %v5425_v5 }
 0xc04   : > { %v5415_v23 = vpop.permute.xlu1 %1842 }
 0xc05   : > { %8434 = vst [vmem:[#allocation148_spill] sm:$0xff] %v5415_v23 }
 0xc11   : > { %v1873_v28 = vpop.permute.xlu1 %1872 }
 0xc12   : > { %v1876_v4 = vmul.f32 %v1873_v28, %v4747_v19  ;;  %v1875_v2 = vmul.f32 %v1873_v28, %v4740_v12  ;;  %v1878_v0 = vmul.f32 %v1873_v28, %v4742_v13  ;;  %v1877_v14 = vmul.f32 %v1873_v28, %v4756_v24 }
 0xc13   : > { %v1880_v23 = vmul.f32 %v1873_v28, %v4749_v20  ;;  %v1879_v11 = vmul.f32 %v1873_v28, %v4764_v29  ;;  %v1882_v44 = vmul.f32 %v1873_v28, %v4758_v25  ;;  %v1881_v3 = vmul.f32 %v1873_v28, %v4771_v33 }
 0xc14   : > { %1895 = vrot.lane.b32.xlu1 %v1876_v4, %s4619_s20  ;;  %1893 = vrot.lane.b32.xlu0 %v1875_v2, %s4619_s20  ;;  %v5431_v4 = vpop.permute.xlu0 %1259  ;;  %v1883_v2 = vmul.f32 %v1873_v28, %v4777_v36 }
 0xc15   : > { %8438 = vst [vmem:[#allocation152_spill] sm:$0xff] %v5431_v4 }
 0xc18   : > { %1899 = vrot.lane.b32.xlu1 %v1878_v0, %s4619_s20  ;;  %1897 = vrot.lane.b32.xlu0 %v1877_v14, %s4619_s20  ;;  %v5434_v0 = vpop.permute.xlu0 %1308  ;;  %v4620_v14 = vmov 29  }
 0xc19   : > { %8439 = vst [vmem:[#allocation153_spill] sm:$0xff] %v5434_v0 }
 0xc1c   : > { %1903 = vrot.lane.b32.xlu1 %v1880_v23, %s4619_s20  ;;  %1901 = vrot.lane.b32.xlu0 %v1879_v11, %s4619_s20  ;;  %v5445_v4 = vpop.permute.xlu0 %1312 }
 0xc1d   : > { %8444 = vst [vmem:[#allocation158_spill] sm:$0xff] %v5445_v4 }
 0xc20   : > { %1907 = vrot.lane.b32.xlu1 %v1882_v44, %s4619_s20  ;;  %1905 = vrot.lane.b32.xlu0 %v1881_v3, %s4619_s20  ;;  %v5449_v0 = vpop.permute.xlu0 %1316 }
 0xc21   : > { %8445 = vst [vmem:[#allocation159_spill] sm:$0xff] %v5449_v0 }
 0xc24   : > { %1937 = vperm.xlu1 %4514, %v5154_v8   ;;  %1909 = vrot.lane.b32.xlu0 %v1883_v2, %s4619_s20 }
 0xc28   : > { %4515 = vset.pattern.permute.xlu1 %v4620_v14 }
 0xc86   : > { %v5437_v5 = vpop.permute.xlu1 %1895 }
 0xc87   : > { %8440 = vst [vmem:[#allocation154_spill] sm:$0xff] %v5437_v5 }
 0xc8a   : > { %v5439_v23 = vpop.permute.xlu1 %1899 }
 0xc8b   : > { %8441 = vst [vmem:[#allocation155_spill] sm:$0xff] %v5439_v23 }
 0xc8e   : > { %v5441_v11 = vpop.permute.xlu1 %1903 }
 0xc8f   : > { %8442 = vst [vmem:[#allocation156_spill] sm:$0xff] %v5441_v11  ;;  %v5453_v11 = vpop.permute.xlu0 %1320 }
 0xc90   : > { %8446 = vst [vmem:[#allocation160_spill] sm:$0xff] %v5453_v11 }
 0xc92   : > { %v5443_v32 = vpop.permute.xlu1 %1907 }
 0xc93   : > { %8443 = vst [vmem:[#allocation157_spill] sm:$0xff] %v5443_v32 }
 0xc9f   : > { %v1938_v44 = vpop.permute.xlu1 %1937 }
 0xca0   : > { %v1941_v3 = vmul.f32 %v1938_v44, %v4747_v19  ;;  %v1940_v28 = vmul.f32 %v1938_v44, %v4740_v12  ;;  %v1943_v2 = vmul.f32 %v1938_v44, %v4742_v13  ;;  %v1942_v14 = vmul.f32 %v1938_v44, %v4756_v24 }
 0xca1   : > { %v1945_v32 = vmul.f32 %v1938_v44, %v4749_v20  ;;  %v1944_v23 = vmul.f32 %v1938_v44, %v4764_v29  ;;  %v1947_v5 = vmul.f32 %v1938_v44, %v4758_v25  ;;  %v1946_v0 = vmul.f32 %v1938_v44, %v4771_v33 }
 0xca2   : > { %1960 = vrot.lane.b32.xlu1 %v1941_v3, %s4621_s21  ;;  %1958 = vrot.lane.b32.xlu0 %v1940_v28, %s4621_s21  ;;  %v5459_v3 = vpop.permute.xlu0 %1324  ;;  %v1948_v28 = vmul.f32 %v1938_v44, %v4777_v36 }
 0xca3   : > { %8447 = vst [vmem:[#allocation161_spill] sm:$0xff] %v5459_v3 }
 0xca6   : > { %1964 = vrot.lane.b32.xlu1 %v1943_v2, %s4621_s21  ;;  %1962 = vrot.lane.b32.xlu0 %v1942_v14, %s4621_s21  ;;  %v5462_v2 = vpop.permute.xlu0 %1373  ;;  %v4622_v14 = vmov 30  }
 0xca7   : > { %8448 = vst [vmem:[#allocation162_spill] sm:$0xff] %v5462_v2 }
 0xcaa   : > { %1968 = vrot.lane.b32.xlu1 %v1945_v32, %s4621_s21  ;;  %1966 = vrot.lane.b32.xlu0 %v1944_v23, %s4621_s21  ;;  %v5473_v3 = vpop.permute.xlu0 %1377 }
 0xcab   : > { %8453 = vst [vmem:[#allocation167_spill] sm:$0xff] %v5473_v3 }
 0xcae   : > { %1972 = vrot.lane.b32.xlu1 %v1947_v5, %s4621_s21  ;;  %1970 = vrot.lane.b32.xlu0 %v1946_v0, %s4621_s21  ;;  %v5477_v2 = vpop.permute.xlu0 %1381 }
 0xcaf   : > { %8454 = vst [vmem:[#allocation168_spill] sm:$0xff] %v5477_v2 }
 0xcb2   : > { %2002 = vperm.xlu1 %4515, %v5154_v8   ;;  %1974 = vrot.lane.b32.xlu0 %v1948_v28, %s4621_s21  ;;  %s4665_s21 = smov 78  }
 0xcb6   : > { %4516 = vset.pattern.permute.xlu1 %v4622_v14 }
 0xd14   : > { %v5465_v11 = vpop.permute.xlu1 %1960 }
 0xd15   : > { %8449 = vst [vmem:[#allocation163_spill] sm:$0xff] %v5465_v11 }
 0xd18   : > { %v5467_v32 = vpop.permute.xlu1 %1964 }
 0xd19   : > { %8450 = vst [vmem:[#allocation164_spill] sm:$0xff] %v5467_v32 }
 0xd1c   : > { %v5469_v23 = vpop.permute.xlu1 %1968 }
 0xd1d   : > { %8451 = vst [vmem:[#allocation165_spill] sm:$0xff] %v5469_v23  ;;  %v5481_v23 = vpop.permute.xlu0 %1385 }
 0xd1e   : > { %8455 = vst [vmem:[#allocation169_spill] sm:$0xff] %v5481_v23 }
 0xd20   : > { %v5471_v4 = vpop.permute.xlu1 %1972 }
 0xd21   : > { %8452 = vst [vmem:[#allocation166_spill] sm:$0xff] %v5471_v4 }
 0xd2d   : > { %v2003_v5 = vpop.permute.xlu1 %2002 }
 0xd2e   : > { %v2006_v0 = vmul.f32 %v2003_v5, %v4747_v19  ;;  %v2005_v44 = vmul.f32 %v2003_v5, %v4740_v12  ;;  %v2008_v28 = vmul.f32 %v2003_v5, %v4742_v13  ;;  %v2007_v14 = vmul.f32 %v2003_v5, %v4756_v24 }
 0xd2f   : > { %v2010_v4 = vmul.f32 %v2003_v5, %v4749_v20  ;;  %v2009_v32 = vmul.f32 %v2003_v5, %v4764_v29  ;;  %v2012_v11 = vmul.f32 %v2003_v5, %v4758_v25  ;;  %v2011_v2 = vmul.f32 %v2003_v5, %v4771_v33 }
 0xd30   : > { %2025 = vrot.lane.b32.xlu1 %v2006_v0, %s4623_s22  ;;  %2023 = vrot.lane.b32.xlu0 %v2005_v44, %s4623_s22  ;;  %v5487_v0 = vpop.permute.xlu0 %1389  ;;  %v2013_v44 = vmul.f32 %v2003_v5, %v4777_v36 }
 0xd31   : > { %8456 = vst [vmem:[#allocation170_spill] sm:$0xff] %v5487_v0 }
 0xd34   : > { %2029 = vrot.lane.b32.xlu1 %v2008_v28, %s4623_s22  ;;  %2027 = vrot.lane.b32.xlu0 %v2007_v14, %s4623_s22  ;;  %v5490_v28 = vpop.permute.xlu0 %1438  ;;  %v4624_v14 = vmov 31  }
 0xd35   : > { %8457 = vst [vmem:[#allocation171_spill] sm:$0xff] %v5490_v28 }
 0xd38   : > { %2033 = vrot.lane.b32.xlu1 %v2010_v4, %s4623_s22  ;;  %2031 = vrot.lane.b32.xlu0 %v2009_v32, %s4623_s22  ;;  %v5501_v0 = vpop.permute.xlu0 %1442 }
 0xd39   : > { %8462 = vst [vmem:[#allocation176_spill] sm:$0xff] %v5501_v0 }
 0xd3c   : > { %2037 = vrot.lane.b32.xlu1 %v2012_v11, %s4623_s22  ;;  %2035 = vrot.lane.b32.xlu0 %v2011_v2, %s4623_s22  ;;  %v5505_v28 = vpop.permute.xlu0 %1446 }
 0xd3d   : > { %8463 = vst [vmem:[#allocation177_spill] sm:$0xff] %v5505_v28 }
 0xd40   : > { %2067 = vperm.xlu1 %4516, %v5154_v8   ;;  %2039 = vrot.lane.b32.xlu0 %v2013_v44, %s4623_s22  ;;  %s4667_s22 = smov 77  }
 0xd44   : > { %4517 = vset.pattern.permute.xlu1 %v4624_v14 }
 0xda2   : > { %v5493_v23 = vpop.permute.xlu1 %2025 }
 0xda3   : > { %8458 = vst [vmem:[#allocation172_spill] sm:$0xff] %v5493_v23 }
 0xda6   : > { %v5495_v4 = vpop.permute.xlu1 %2029 }
 0xda7   : > { %8459 = vst [vmem:[#allocation173_spill] sm:$0xff] %v5495_v4 }
 0xdaa   : > { %v5497_v32 = vpop.permute.xlu1 %2033 }
 0xdab   : > { %8460 = vst [vmem:[#allocation174_spill] sm:$0xff] %v5497_v32  ;;  %v5509_v32 = vpop.permute.xlu0 %1450 }
 0xdac   : > { %8464 = vst [vmem:[#allocation178_spill] sm:$0xff] %v5509_v32 }
 0xdae   : > { %v5499_v3 = vpop.permute.xlu1 %2037 }
 0xdaf   : > { %8461 = vst [vmem:[#allocation175_spill] sm:$0xff] %v5499_v3 }
 0xdbb   : > { %v2068_v11 = vpop.permute.xlu1 %2067 }
 0xdbc   : > { %v2071_v2 = vmul.f32 %v2068_v11, %v4747_v19  ;;  %v2070_v5 = vmul.f32 %v2068_v11, %v4740_v12  ;;  %v2073_v44 = vmul.f32 %v2068_v11, %v4742_v13  ;;  %v2072_v14 = vmul.f32 %v2068_v11, %v4756_v24 }
 0xdbd   : > { %v2075_v3 = vmul.f32 %v2068_v11, %v4749_v20  ;;  %v2074_v4 = vmul.f32 %v2068_v11, %v4764_v29  ;;  %v2077_v23 = vmul.f32 %v2068_v11, %v4758_v25  ;;  %v2076_v28 = vmul.f32 %v2068_v11, %v4771_v33 }
 0xdbe   : > { %2090 = vrot.lane.b32.xlu1 %v2071_v2, %s4625_s23  ;;  %2088 = vrot.lane.b32.xlu0 %v2070_v5, %s4625_s23  ;;  %v5515_v2 = vpop.permute.xlu0 %1454  ;;  %v2078_v5 = vmul.f32 %v2068_v11, %v4777_v36 }
 0xdbf   : > { %8465 = vst [vmem:[#allocation179_spill] sm:$0xff] %v5515_v2 }
 0xdc2   : > { %2094 = vrot.lane.b32.xlu1 %v2073_v44, %s4625_s23  ;;  %2092 = vrot.lane.b32.xlu0 %v2072_v14, %s4625_s23  ;;  %v5518_v44 = vpop.permute.xlu0 %1503  ;;  %v4626_v14 = vmov 32  }
 0xdc3   : > { %8466 = vst [vmem:[#allocation180_spill] sm:$0xff] %v5518_v44 }
 0xdc6   : > { %2098 = vrot.lane.b32.xlu1 %v2075_v3, %s4625_s23  ;;  %2096 = vrot.lane.b32.xlu0 %v2074_v4, %s4625_s23  ;;  %v5529_v2 = vpop.permute.xlu0 %1507 }
 0xdc7   : > { %8471 = vst [vmem:[#allocation185_spill] sm:$0xff] %v5529_v2 }
 0xdca   : > { %2102 = vrot.lane.b32.xlu1 %v2077_v23, %s4625_s23  ;;  %2100 = vrot.lane.b32.xlu0 %v2076_v28, %s4625_s23  ;;  %v5533_v44 = vpop.permute.xlu0 %1511 }
 0xdcb   : > { %8472 = vst [vmem:[#allocation186_spill] sm:$0xff] %v5533_v44 }
 0xdce   : > { %2132 = vperm.xlu1 %4517, %v5154_v8   ;;  %2104 = vrot.lane.b32.xlu0 %v2078_v5, %s4625_s23  ;;  %s4669_s23 = smov 76  }
 0xdd2   : > { %4518 = vset.pattern.permute.xlu1 %v4626_v14 }
 0xe30   : > { %v5521_v32 = vpop.permute.xlu1 %2090 }
 0xe31   : > { %8467 = vst [vmem:[#allocation181_spill] sm:$0xff] %v5521_v32 }
 0xe34   : > { %v5523_v3 = vpop.permute.xlu1 %2094 }
 0xe35   : > { %8468 = vst [vmem:[#allocation182_spill] sm:$0xff] %v5523_v3 }
 0xe38   : > { %v5525_v4 = vpop.permute.xlu1 %2098 }
 0xe39   : > { %8469 = vst [vmem:[#allocation183_spill] sm:$0xff] %v5525_v4  ;;  %v5537_v4 = vpop.permute.xlu0 %1515 }
 0xe3a   : > { %8473 = vst [vmem:[#allocation187_spill] sm:$0xff] %v5537_v4 }
 0xe3c   : > { %v5527_v0 = vpop.permute.xlu1 %2102 }
 0xe3d   : > { %8470 = vst [vmem:[#allocation184_spill] sm:$0xff] %v5527_v0 }
 0xe49   : > { %v2133_v23 = vpop.permute.xlu1 %2132 }
 0xe4a   : > { %v2136_v28 = vmul.f32 %v2133_v23, %v4747_v19  ;;  %v2135_v11 = vmul.f32 %v2133_v23, %v4740_v12  ;;  %v2138_v5 = vmul.f32 %v2133_v23, %v4742_v13  ;;  %v2137_v14 = vmul.f32 %v2133_v23, %v4756_v24 }
 0xe4b   : > { %v2140_v0 = vmul.f32 %v2133_v23, %v4749_v20  ;;  %v2139_v3 = vmul.f32 %v2133_v23, %v4764_v29  ;;  %v2142_v32 = vmul.f32 %v2133_v23, %v4758_v25  ;;  %v2141_v44 = vmul.f32 %v2133_v23, %v4771_v33 }
 0xe4c   : > { %2155 = vrot.lane.b32.xlu1 %v2136_v28, %s4627_s24  ;;  %2153 = vrot.lane.b32.xlu0 %v2135_v11, %s4627_s24  ;;  %v5543_v28 = vpop.permute.xlu0 %1519  ;;  %v2143_v11 = vmul.f32 %v2133_v23, %v4777_v36 }
 0xe4d   : > { %8474 = vst [vmem:[#allocation188_spill] sm:$0xff] %v5543_v28 }
 0xe50   : > { %2159 = vrot.lane.b32.xlu1 %v2138_v5, %s4627_s24  ;;  %2157 = vrot.lane.b32.xlu0 %v2137_v14, %s4627_s24  ;;  %v5546_v5 = vpop.permute.xlu0 %1568  ;;  %v4628_v14 = vmov 33  }
 0xe51   : > { %8475 = vst [vmem:[#allocation189_spill] sm:$0xff] %v5546_v5 }
 0xe54   : > { %2163 = vrot.lane.b32.xlu1 %v2140_v0, %s4627_s24  ;;  %2161 = vrot.lane.b32.xlu0 %v2139_v3, %s4627_s24  ;;  %v5557_v28 = vpop.permute.xlu0 %1572 }
 0xe55   : > { %8480 = vst [vmem:[#allocation194_spill] sm:$0xff] %v5557_v28 }
 0xe58   : > { %2167 = vrot.lane.b32.xlu1 %v2142_v32, %s4627_s24  ;;  %2165 = vrot.lane.b32.xlu0 %v2141_v44, %s4627_s24  ;;  %v5561_v5 = vpop.permute.xlu0 %1576 }
 0xe59   : > { %8481 = vst [vmem:[#allocation195_spill] sm:$0xff] %v5561_v5 }
 0xe5c   : > { %2197 = vperm.xlu1 %4518, %v5154_v8   ;;  %2169 = vrot.lane.b32.xlu0 %v2143_v11, %s4627_s24  ;;  %s4671_s24 = smov 75  }
 0xe60   : > { %4519 = vset.pattern.permute.xlu1 %v4628_v14 }
 0xebe   : > { %v5549_v4 = vpop.permute.xlu1 %2155 }
 0xebf   : > { %8476 = vst [vmem:[#allocation190_spill] sm:$0xff] %v5549_v4 }
 0xec2   : > { %v5551_v0 = vpop.permute.xlu1 %2159 }
 0xec3   : > { %8477 = vst [vmem:[#allocation191_spill] sm:$0xff] %v5551_v0 }
 0xec6   : > { %v5553_v3 = vpop.permute.xlu1 %2163 }
 0xec7   : > { %8478 = vst [vmem:[#allocation192_spill] sm:$0xff] %v5553_v3  ;;  %v5565_v3 = vpop.permute.xlu0 %1580 }
 0xec8   : > { %8482 = vst [vmem:[#allocation196_spill] sm:$0xff] %v5565_v3 }
 0xeca   : > { %v5555_v2 = vpop.permute.xlu1 %2167 }
 0xecb   : > { %8479 = vst [vmem:[#allocation193_spill] sm:$0xff] %v5555_v2 }
 0xed7   : > { %v2198_v32 = vpop.permute.xlu1 %2197 }
 0xed8   : > { %v2201_v44 = vmul.f32 %v2198_v32, %v4747_v19  ;;  %v2200_v23 = vmul.f32 %v2198_v32, %v4740_v12  ;;  %v2203_v11 = vmul.f32 %v2198_v32, %v4742_v13  ;;  %v2202_v14 = vmul.f32 %v2198_v32, %v4756_v24 }
 0xed9   : > { %v2205_v2 = vmul.f32 %v2198_v32, %v4749_v20  ;;  %v2204_v0 = vmul.f32 %v2198_v32, %v4764_v29  ;;  %v2207_v4 = vmul.f32 %v2198_v32, %v4758_v25  ;;  %v2206_v5 = vmul.f32 %v2198_v32, %v4771_v33 }
 0xeda   : > { %2220 = vrot.lane.b32.xlu1 %v2201_v44, %s4629_s25  ;;  %2218 = vrot.lane.b32.xlu0 %v2200_v23, %s4629_s25  ;;  %v5571_v44 = vpop.permute.xlu0 %1584  ;;  %v2208_v23 = vmul.f32 %v2198_v32, %v4777_v36 }
 0xedb   : > { %8483 = vst [vmem:[#allocation197_spill] sm:$0xff] %v5571_v44 }
 0xede   : > { %2224 = vrot.lane.b32.xlu1 %v2203_v11, %s4629_s25  ;;  %2222 = vrot.lane.b32.xlu0 %v2202_v14, %s4629_s25  ;;  %v5574_v11 = vpop.permute.xlu0 %1633  ;;  %v4630_v14 = vmov 34  }
 0xedf   : > { %8484 = vst [vmem:[#allocation198_spill] sm:$0xff] %v5574_v11 }
 0xee2   : > { %2228 = vrot.lane.b32.xlu1 %v2205_v2, %s4629_s25  ;;  %2226 = vrot.lane.b32.xlu0 %v2204_v0, %s4629_s25  ;;  %v5585_v44 = vpop.permute.xlu0 %1637 }
 0xee3   : > { %8489 = vst [vmem:[#allocation203_spill] sm:$0xff] %v5585_v44 }
 0xee6   : > { %2232 = vrot.lane.b32.xlu1 %v2207_v4, %s4629_s25  ;;  %2230 = vrot.lane.b32.xlu0 %v2206_v5, %s4629_s25  ;;  %v5589_v11 = vpop.permute.xlu0 %1641 }
 0xee7   : > { %8490 = vst [vmem:[#allocation204_spill] sm:$0xff] %v5589_v11 }
 0xeea   : > { %2262 = vperm.xlu1 %4519, %v5154_v8   ;;  %2234 = vrot.lane.b32.xlu0 %v2208_v23, %s4629_s25  ;;  %s4673_s25 = smov 74  }
 0xeee   : > { %4520 = vset.pattern.permute.xlu1 %v4630_v14  ;;  %v5593_v14 = vpop.permute.xlu0 %1645 }
 0xeef   : > { %8491 = vst [vmem:[#allocation205_spill] sm:$0xff] %v5593_v14 }
 0xf4c   : > { %v5577_v3 = vpop.permute.xlu1 %2220 }
 0xf4d   : > { %8485 = vst [vmem:[#allocation199_spill] sm:$0xff] %v5577_v3 }
 0xf50   : > { %v5579_v2 = vpop.permute.xlu1 %2224 }
 0xf51   : > { %8486 = vst [vmem:[#allocation200_spill] sm:$0xff] %v5579_v2 }
 0xf54   : > { %v5581_v0 = vpop.permute.xlu1 %2228 }
 0xf55   : > { %8487 = vst [vmem:[#allocation201_spill] sm:$0xff] %v5581_v0 }
 0xf58   : > { %v5583_v28 = vpop.permute.xlu1 %2232 }
 0xf59   : > { %8488 = vst [vmem:[#allocation202_spill] sm:$0xff] %v5583_v28 }
 0xf65   : > { %v2263_v4 = vpop.permute.xlu1 %2262 }
 0xf66   : > { %v2266_v5 = vmul.f32 %v2263_v4, %v4747_v19  ;;  %v2265_v32 = vmul.f32 %v2263_v4, %v4740_v12  ;;  %v2268_v8 = vmul.f32 %v2263_v4, %v4742_v13  ;;  %v2267_v23 = vmul.f32 %v2263_v4, %v4756_v24 }
 0xf67   : > { %v2270_v28 = vmul.f32 %v2263_v4, %v4749_v20  ;;  %v2269_v0 = vmul.f32 %v2263_v4, %v4764_v29  ;;  %v2272_v2 = vmul.f32 %v2263_v4, %v4758_v25  ;;  %v2271_v3 = vmul.f32 %v2263_v4, %v4771_v33 }
 0xf68   : > { %2285 = vrot.lane.b32.xlu1 %v2266_v5, %s4631_s26  ;;  %2283 = vrot.lane.b32.xlu0 %v2265_v32, %s4631_s26  ;;  %v5599_v5 = vpop.permute.xlu0 %1649  ;;  %v2273_v32 = vmul.f32 %v2263_v4, %v4777_v36 }
 0xf69   : > { %8492 = vst [vmem:[#allocation206_spill] sm:$0xff] %v5599_v5 }
 0xf6c   : > { %2289 = vrot.lane.b32.xlu1 %v2268_v8, %s4631_s26  ;;  %2287 = vrot.lane.b32.xlu0 %v2267_v23, %s4631_s26  ;;  %v5602_v8 = vpop.permute.xlu0 %1698  ;;  %v5607_v23 = vld [vmem:[%s7948_s0] sm:$0xff] }
 0xf6d   : > { %8493 = vst [vmem:[#allocation207_spill] sm:$0xff] %v5602_v8 }
 0xf70   : > { %2293 = vrot.lane.b32.xlu1 %v2270_v28, %s4631_s26  ;;  %2291 = vrot.lane.b32.xlu0 %v2269_v0, %s4631_s26  ;;  %v4632_v28 = vmov 35   ;;  %v5618_v4 = vpop.permute.xlu0 %1702 }
 0xf71   : > { %8498 = vst [vmem:[#allocation212_spill] sm:$0xff] %v5618_v4 }
 0xf74   : > { %2297 = vrot.lane.b32.xlu1 %v2272_v2, %s4631_s26  ;;  %2295 = vrot.lane.b32.xlu0 %v2271_v3, %s4631_s26  ;;  %v5622_v44 = vpop.permute.xlu0 %1706 }
 0xf75   : > { %8499 = vst [vmem:[#allocation213_spill] sm:$0xff] %v5622_v44 }
 0xf78   : > { %2327 = vperm.xlu1 %4520, %v5607_v23   ;;  %2299 = vrot.lane.b32.xlu0 %v2273_v32, %s4631_s26  ;;  %s4675_s26 = smov 73  }
 0xf7c   : > { %4521 = vset.pattern.permute.xlu1 %v4632_v28 }
 0xfda   : > { %v5610_v0 = vpop.permute.xlu1 %2285 }
 0xfdb   : > { %8494 = vst [vmem:[#allocation208_spill] sm:$0xff] %v5610_v0 }
 0xfde   : > { %v5612_v14 = vpop.permute.xlu1 %2289 }
 0xfdf   : > { %8495 = vst [vmem:[#allocation209_spill] sm:$0xff] %v5612_v14 }
 0xfe2   : > { %v5614_v2 = vpop.permute.xlu1 %2293 }
 0xfe3   : > { %8496 = vst [vmem:[#allocation210_spill] sm:$0xff] %v5614_v2  ;;  %v5626_v2 = vpop.permute.xlu0 %1710 }
 0xfe4   : > { %8500 = vst [vmem:[#allocation214_spill] sm:$0xff] %v5626_v2 }
 0xfe6   : > { %v5616_v3 = vpop.permute.xlu1 %2297 }
 0xfe7   : > { %8497 = vst [vmem:[#allocation211_spill] sm:$0xff] %v5616_v3 }
 0xff3   : > { %v2328_v8 = vpop.permute.xlu1 %2327 }
 0xff4   : > { %v2331_v5 = vmul.f32 %v2328_v8, %v4747_v19  ;;  %v2330_v11 = vmul.f32 %v2328_v8, %v4740_v12  ;;  %v2333_v32 = vmul.f32 %v2328_v8, %v4742_v13  ;;  %v2332_v28 = vmul.f32 %v2328_v8, %v4756_v24 }
 0xff5   : > { %v2335_v3 = vmul.f32 %v2328_v8, %v4749_v20  ;;  %v2334_v14 = vmul.f32 %v2328_v8, %v4764_v29  ;;  %v2337_v0 = vmul.f32 %v2328_v8, %v4758_v25  ;;  %v2336_v44 = vmul.f32 %v2328_v8, %v4771_v33 }
 0xff6   : > { %2350 = vrot.lane.b32.xlu1 %v2331_v5, %s4633_s29  ;;  %2348 = vrot.lane.b32.xlu0 %v2330_v11, %s4633_s29  ;;  %v5632_v5 = vpop.permute.xlu0 %1714  ;;  %v2338_v11 = vmul.f32 %v2328_v8, %v4777_v36 }
 0xff7   : > { %8501 = vst [vmem:[#allocation215_spill] sm:$0xff] %v5632_v5 }
 0xffa   : > { %2354 = vrot.lane.b32.xlu1 %v2333_v32, %s4633_s29  ;;  %2352 = vrot.lane.b32.xlu0 %v2332_v28, %s4633_s29  ;;  %v5635_v32 = vpop.permute.xlu0 %1763  ;;  %v4634_v28 = vmov 36  }
 0xffb   : > { %8502 = vst [vmem:[#allocation216_spill] sm:$0xff] %v5635_v32 }
 0xffe   : > { %2358 = vrot.lane.b32.xlu1 %v2335_v3, %s4633_s29  ;;  %2356 = vrot.lane.b32.xlu0 %v2334_v14, %s4633_s29  ;;  %v5646_v5 = vpop.permute.xlu0 %1767 }
 0xfff   : > { %8507 = vst [vmem:[#allocation221_spill] sm:$0xff] %v5646_v5 }
0x1002   : > { %2362 = vrot.lane.b32.xlu1 %v2337_v0, %s4633_s29  ;;  %2360 = vrot.lane.b32.xlu0 %v2336_v44, %s4633_s29  ;;  %v5650_v32 = vpop.permute.xlu0 %1771 }
0x1003   : > { %8508 = vst [vmem:[#allocation222_spill] sm:$0xff] %v5650_v32 }
0x1006   : > { %2392 = vperm.xlu1 %4521, %v5607_v23   ;;  %2364 = vrot.lane.b32.xlu0 %v2338_v11, %s4633_s29  ;;  %s4677_s29 = smov 72  }
0x100a   : > { %4522 = vset.pattern.permute.xlu1 %v4634_v28 }
0x1068   : > { %v5638_v2 = vpop.permute.xlu1 %2350 }
0x1069   : > { %8503 = vst [vmem:[#allocation217_spill] sm:$0xff] %v5638_v2 }
0x106c   : > { %v5640_v14 = vpop.permute.xlu1 %2354 }
0x106d   : > { %8504 = vst [vmem:[#allocation218_spill] sm:$0xff] %v5640_v14 }
0x1070   : > { %v5642_v3 = vpop.permute.xlu1 %2358 }
0x1071   : > { %8505 = vst [vmem:[#allocation219_spill] sm:$0xff] %v5642_v3  ;;  %v5654_v3 = vpop.permute.xlu0 %1775 }
0x1072   : > { %8509 = vst [vmem:[#allocation223_spill] sm:$0xff] %v5654_v3 }
0x1074   : > { %v5644_v4 = vpop.permute.xlu1 %2362 }
0x1075   : > { %8506 = vst [vmem:[#allocation220_spill] sm:$0xff] %v5644_v4 }
0x1081   : > { %v2393_v44 = vpop.permute.xlu1 %2392 }
0x1082   : > { %v2396_v8 = vmul.f32 %v2393_v44, %v4747_v19  ;;  %v2395_v0 = vmul.f32 %v2393_v44, %v4740_v12  ;;  %v2398_v11 = vmul.f32 %v2393_v44, %v4742_v13  ;;  %v2397_v28 = vmul.f32 %v2393_v44, %v4756_v24 }
0x1083   : > { %v2400_v4 = vmul.f32 %v2393_v44, %v4749_v20  ;;  %v2399_v14 = vmul.f32 %v2393_v44, %v4764_v29  ;;  %v2402_v2 = vmul.f32 %v2393_v44, %v4758_v25  ;;  %v2401_v32 = vmul.f32 %v2393_v44, %v4771_v33 }
0x1084   : > { %2415 = vrot.lane.b32.xlu1 %v2396_v8, %s4635_s30  ;;  %2413 = vrot.lane.b32.xlu0 %v2395_v0, %s4635_s30  ;;  %v5660_v8 = vpop.permute.xlu0 %1779  ;;  %v2403_v0 = vmul.f32 %v2393_v44, %v4777_v36 }
0x1085   : > { %8510 = vst [vmem:[#allocation224_spill] sm:$0xff] %v5660_v8 }
0x1088   : > { %2419 = vrot.lane.b32.xlu1 %v2398_v11, %s4635_s30  ;;  %2417 = vrot.lane.b32.xlu0 %v2397_v28, %s4635_s30  ;;  %v5663_v11 = vpop.permute.xlu0 %1828  ;;  %v4636_v28 = vmov 37  }
0x1089   : > { %8511 = vst [vmem:[#allocation225_spill] sm:$0xff] %v5663_v11 }
0x108c   : > { %2423 = vrot.lane.b32.xlu1 %v2400_v4, %s4635_s30  ;;  %2421 = vrot.lane.b32.xlu0 %v2399_v14, %s4635_s30  ;;  %v5674_v8 = vpop.permute.xlu0 %1832 }
0x108d   : > { %8516 = vst [vmem:[#allocation230_spill] sm:$0xff] %v5674_v8 }
0x1090   : > { %2427 = vrot.lane.b32.xlu1 %v2402_v2, %s4635_s30  ;;  %2425 = vrot.lane.b32.xlu0 %v2401_v32, %s4635_s30  ;;  %v5678_v11 = vpop.permute.xlu0 %1836 }
0x1091   : > { %8517 = vst [vmem:[#allocation231_spill] sm:$0xff] %v5678_v11 }
0x1094   : > { %2457 = vperm.xlu1 %4522, %v5607_v23   ;;  %2429 = vrot.lane.b32.xlu0 %v2403_v0, %s4635_s30  ;;  %s4680_s30 = smov 71  }
0x1098   : > { %4523 = vset.pattern.permute.xlu1 %v4636_v28 }
0x10f6   : > { %v5666_v3 = vpop.permute.xlu1 %2415 }
0x10f7   : > { %8512 = vst [vmem:[#allocation226_spill] sm:$0xff] %v5666_v3 }
0x10fa   : > { %v5668_v4 = vpop.permute.xlu1 %2419 }
0x10fb   : > { %8513 = vst [vmem:[#allocation227_spill] sm:$0xff] %v5668_v4 }
0x10fe   : > { %v5670_v14 = vpop.permute.xlu1 %2423 }
0x10ff   : > { %8514 = vst [vmem:[#allocation228_spill] sm:$0xff] %v5670_v14  ;;  %v5682_v14 = vpop.permute.xlu0 %1840 }
0x1100   : > { %8518 = vst [vmem:[#allocation232_spill] sm:$0xff] %v5682_v14 }
0x1102   : > { %v5672_v5 = vpop.permute.xlu1 %2427 }
0x1103   : > { %8515 = vst [vmem:[#allocation229_spill] sm:$0xff] %v5672_v5 }
0x110f   : > { %v2458_v2 = vpop.permute.xlu1 %2457 }
0x1110   : > { %v2461_v32 = vmul.f32 %v2458_v2, %v4747_v19  ;;  %v2460_v44 = vmul.f32 %v2458_v2, %v4740_v12  ;;  %v2463_v0 = vmul.f32 %v2458_v2, %v4742_v13  ;;  %v2462_v28 = vmul.f32 %v2458_v2, %v4756_v24 }
0x1111   : > { %v2465_v5 = vmul.f32 %v2458_v2, %v4749_v20  ;;  %v2464_v4 = vmul.f32 %v2458_v2, %v4764_v29  ;;  %v2467_v3 = vmul.f32 %v2458_v2, %v4758_v25  ;;  %v2466_v11 = vmul.f32 %v2458_v2, %v4771_v33 }
0x1112   : > { %2480 = vrot.lane.b32.xlu1 %v2461_v32, %s4637_s3  ;;  %2478 = vrot.lane.b32.xlu0 %v2460_v44, %s4637_s3  ;;  %v5688_v32 = vpop.permute.xlu0 %1844  ;;  %v2468_v44 = vmul.f32 %v2458_v2, %v4777_v36 }
0x1113   : > { %8519 = vst [vmem:[#allocation233_spill] sm:$0xff] %v5688_v32 }
0x1116   : > { %2484 = vrot.lane.b32.xlu1 %v2463_v0, %s4637_s3  ;;  %2482 = vrot.lane.b32.xlu0 %v2462_v28, %s4637_s3  ;;  %v5691_v0 = vpop.permute.xlu0 %1893  ;;  %v4638_v28 = vmov 38  }
0x1117   : > { %8520 = vst [vmem:[#allocation234_spill] sm:$0xff] %v5691_v0 }
0x111a   : > { %2488 = vrot.lane.b32.xlu1 %v2465_v5, %s4637_s3  ;;  %2486 = vrot.lane.b32.xlu0 %v2464_v4, %s4637_s3  ;;  %v5702_v32 = vpop.permute.xlu0 %1897 }
0x111b   : > { %8525 = vst [vmem:[#allocation239_spill] sm:$0xff] %v5702_v32 }
0x111e   : > { %2492 = vrot.lane.b32.xlu1 %v2467_v3, %s4637_s3  ;;  %2490 = vrot.lane.b32.xlu0 %v2466_v11, %s4637_s3  ;;  %v5706_v0 = vpop.permute.xlu0 %1901 }
0x111f   : > { %8526 = vst [vmem:[#allocation240_spill] sm:$0xff] %v5706_v0 }
0x1122   : > { %2522 = vperm.xlu1 %4523, %v5607_v23   ;;  %2494 = vrot.lane.b32.xlu0 %v2468_v44, %s4637_s3 }
0x1126   : > { %4524 = vset.pattern.permute.xlu1 %v4638_v28 }
0x1184   : > { %v5694_v14 = vpop.permute.xlu1 %2480 }
0x1185   : > { %8521 = vst [vmem:[#allocation235_spill] sm:$0xff] %v5694_v14 }
0x1188   : > { %v5696_v5 = vpop.permute.xlu1 %2484 }
0x1189   : > { %8522 = vst [vmem:[#allocation236_spill] sm:$0xff] %v5696_v5 }
0x118c   : > { %v5698_v4 = vpop.permute.xlu1 %2488 }
0x118d   : > { %8523 = vst [vmem:[#allocation237_spill] sm:$0xff] %v5698_v4  ;;  %v5710_v4 = vpop.permute.xlu0 %1905 }
0x118e   : > { %8527 = vst [vmem:[#allocation241_spill] sm:$0xff] %v5710_v4 }
0x1190   : > { %v5700_v8 = vpop.permute.xlu1 %2492 }
0x1191   : > { %8524 = vst [vmem:[#allocation238_spill] sm:$0xff] %v5700_v8 }
0x119d   : > { %v2523_v3 = vpop.permute.xlu1 %2522 }
0x119e   : > { %v2526_v11 = vmul.f32 %v2523_v3, %v4747_v19  ;;  %v2525_v2 = vmul.f32 %v2523_v3, %v4740_v12  ;;  %v2528_v44 = vmul.f32 %v2523_v3, %v4742_v13  ;;  %v2527_v28 = vmul.f32 %v2523_v3, %v4756_v24 }
0x119f   : > { %v2530_v8 = vmul.f32 %v2523_v3, %v4749_v20  ;;  %v2529_v5 = vmul.f32 %v2523_v3, %v4764_v29  ;;  %v2532_v14 = vmul.f32 %v2523_v3, %v4758_v25  ;;  %v2531_v0 = vmul.f32 %v2523_v3, %v4771_v33 }
0x11a0   : > { %2545 = vrot.lane.b32.xlu1 %v2526_v11, %s4639_s4  ;;  %2543 = vrot.lane.b32.xlu0 %v2525_v2, %s4639_s4  ;;  %v5716_v11 = vpop.permute.xlu0 %1909  ;;  %v2533_v2 = vmul.f32 %v2523_v3, %v4777_v36 }
0x11a1   : > { %8528 = vst [vmem:[#allocation242_spill] sm:$0xff] %v5716_v11 }
0x11a4   : > { %2549 = vrot.lane.b32.xlu1 %v2528_v44, %s4639_s4  ;;  %2547 = vrot.lane.b32.xlu0 %v2527_v28, %s4639_s4  ;;  %v5719_v44 = vpop.permute.xlu0 %1958  ;;  %v4640_v28 = vmov 39  }
0x11a5   : > { %8529 = vst [vmem:[#allocation243_spill] sm:$0xff] %v5719_v44 }
0x11a8   : > { %2553 = vrot.lane.b32.xlu1 %v2530_v8, %s4639_s4  ;;  %2551 = vrot.lane.b32.xlu0 %v2529_v5, %s4639_s4  ;;  %v5730_v11 = vpop.permute.xlu0 %1962 }
0x11a9   : > { %8534 = vst [vmem:[#allocation248_spill] sm:$0xff] %v5730_v11 }
0x11ac   : > { %2557 = vrot.lane.b32.xlu1 %v2532_v14, %s4639_s4  ;;  %2555 = vrot.lane.b32.xlu0 %v2531_v0, %s4639_s4  ;;  %v5734_v44 = vpop.permute.xlu0 %1966 }
0x11ad   : > { %8535 = vst [vmem:[#allocation249_spill] sm:$0xff] %v5734_v44 }
0x11b0   : > { %2587 = vperm.xlu1 %4524, %v5607_v23   ;;  %2559 = vrot.lane.b32.xlu0 %v2533_v2, %s4639_s4 }
0x11b4   : > { %4525 = vset.pattern.permute.xlu1 %v4640_v28 }
0x1212   : > { %v5722_v4 = vpop.permute.xlu1 %2545 }
0x1213   : > { %8530 = vst [vmem:[#allocation244_spill] sm:$0xff] %v5722_v4 }
0x1216   : > { %v5724_v8 = vpop.permute.xlu1 %2549 }
0x1217   : > { %8531 = vst [vmem:[#allocation245_spill] sm:$0xff] %v5724_v8 }
0x121a   : > { %v5726_v5 = vpop.permute.xlu1 %2553 }
0x121b   : > { %8532 = vst [vmem:[#allocation246_spill] sm:$0xff] %v5726_v5  ;;  %v5738_v5 = vpop.permute.xlu0 %1970 }
0x121c   : > { %8536 = vst [vmem:[#allocation250_spill] sm:$0xff] %v5738_v5 }
0x121e   : > { %v5728_v32 = vpop.permute.xlu1 %2557 }
0x121f   : > { %8533 = vst [vmem:[#allocation247_spill] sm:$0xff] %v5728_v32 }
0x122b   : > { %v2588_v14 = vpop.permute.xlu1 %2587 }
0x122c   : > { %v2591_v0 = vmul.f32 %v2588_v14, %v4747_v19  ;;  %v2590_v3 = vmul.f32 %v2588_v14, %v4740_v12  ;;  %v2593_v2 = vmul.f32 %v2588_v14, %v4742_v13  ;;  %v2592_v28 = vmul.f32 %v2588_v14, %v4756_v24 }
0x122d   : > { %v2595_v32 = vmul.f32 %v2588_v14, %v4749_v20  ;;  %v2594_v8 = vmul.f32 %v2588_v14, %v4764_v29  ;;  %v2597_v4 = vmul.f32 %v2588_v14, %v4758_v25  ;;  %v2596_v44 = vmul.f32 %v2588_v14, %v4771_v33 }
0x122e   : > { %2610 = vrot.lane.b32.xlu1 %v2591_v0, %s4641_s5  ;;  %2608 = vrot.lane.b32.xlu0 %v2590_v3, %s4641_s5  ;;  %v5744_v0 = vpop.permute.xlu0 %1974  ;;  %v2598_v3 = vmul.f32 %v2588_v14, %v4777_v36 }
0x122f   : > { %8537 = vst [vmem:[#allocation251_spill] sm:$0xff] %v5744_v0 }
0x1232   : > { %2614 = vrot.lane.b32.xlu1 %v2593_v2, %s4641_s5  ;;  %2612 = vrot.lane.b32.xlu0 %v2592_v28, %s4641_s5  ;;  %v5747_v2 = vpop.permute.xlu0 %2023  ;;  %v4642_v28 = vmov 40  }
0x1233   : > { %8538 = vst [vmem:[#allocation252_spill] sm:$0xff] %v5747_v2 }
0x1236   : > { %2618 = vrot.lane.b32.xlu1 %v2595_v32, %s4641_s5  ;;  %2616 = vrot.lane.b32.xlu0 %v2594_v8, %s4641_s5  ;;  %v5758_v0 = vpop.permute.xlu0 %2027 }
0x1237   : > { %8543 = vst [vmem:[#allocation257_spill] sm:$0xff] %v5758_v0 }
0x123a   : > { %2622 = vrot.lane.b32.xlu1 %v2597_v4, %s4641_s5  ;;  %2620 = vrot.lane.b32.xlu0 %v2596_v44, %s4641_s5  ;;  %v5762_v2 = vpop.permute.xlu0 %2031 }
0x123b   : > { %8544 = vst [vmem:[#allocation258_spill] sm:$0xff] %v5762_v2 }
0x123e   : > { %2652 = vperm.xlu1 %4525, %v5607_v23   ;;  %2624 = vrot.lane.b32.xlu0 %v2598_v3, %s4641_s5  ;;  %s4685_s5 = smov 70  }
0x1242   : > { %4526 = vset.pattern.permute.xlu1 %v4642_v28 }
0x12a0   : > { %v5750_v5 = vpop.permute.xlu1 %2610 }
0x12a1   : > { %8539 = vst [vmem:[#allocation253_spill] sm:$0xff] %v5750_v5 }
0x12a4   : > { %v5752_v32 = vpop.permute.xlu1 %2614 }
0x12a5   : > { %8540 = vst [vmem:[#allocation254_spill] sm:$0xff] %v5752_v32 }
0x12a8   : > { %v5754_v8 = vpop.permute.xlu1 %2618 }
0x12a9   : > { %8541 = vst [vmem:[#allocation255_spill] sm:$0xff] %v5754_v8  ;;  %v5766_v8 = vpop.permute.xlu0 %2035 }
0x12aa   : > { %8545 = vst [vmem:[#allocation259_spill] sm:$0xff] %v5766_v8 }
0x12ac   : > { %v5756_v11 = vpop.permute.xlu1 %2622 }
0x12ad   : > { %8542 = vst [vmem:[#allocation256_spill] sm:$0xff] %v5756_v11 }
0x12b9   : > { %v2653_v4 = vpop.permute.xlu1 %2652 }
0x12ba   : > { %v2656_v44 = vmul.f32 %v2653_v4, %v4747_v19  ;;  %v2655_v14 = vmul.f32 %v2653_v4, %v4740_v12  ;;  %v2658_v3 = vmul.f32 %v2653_v4, %v4742_v13  ;;  %v2657_v28 = vmul.f32 %v2653_v4, %v4756_v24 }
0x12bb   : > { %v2660_v11 = vmul.f32 %v2653_v4, %v4749_v20  ;;  %v2659_v32 = vmul.f32 %v2653_v4, %v4764_v29  ;;  %v2662_v5 = vmul.f32 %v2653_v4, %v4758_v25  ;;  %v2661_v2 = vmul.f32 %v2653_v4, %v4771_v33 }
0x12bc   : > { %2675 = vrot.lane.b32.xlu1 %v2656_v44, %s4643_s6  ;;  %2673 = vrot.lane.b32.xlu0 %v2655_v14, %s4643_s6  ;;  %v5772_v44 = vpop.permute.xlu0 %2039  ;;  %v2663_v14 = vmul.f32 %v2653_v4, %v4777_v36 }
0x12bd   : > { %8546 = vst [vmem:[#allocation260_spill] sm:$0xff] %v5772_v44 }
0x12c0   : > { %2679 = vrot.lane.b32.xlu1 %v2658_v3, %s4643_s6  ;;  %2677 = vrot.lane.b32.xlu0 %v2657_v28, %s4643_s6  ;;  %v5775_v3 = vpop.permute.xlu0 %2088  ;;  %v4644_v28 = vmov 41  }
0x12c1   : > { %8547 = vst [vmem:[#allocation261_spill] sm:$0xff] %v5775_v3 }
0x12c4   : > { %2683 = vrot.lane.b32.xlu1 %v2660_v11, %s4643_s6  ;;  %2681 = vrot.lane.b32.xlu0 %v2659_v32, %s4643_s6  ;;  %v5786_v44 = vpop.permute.xlu0 %2092 }
0x12c5   : > { %8552 = vst [vmem:[#allocation266_spill] sm:$0xff] %v5786_v44 }
0x12c8   : > { %2687 = vrot.lane.b32.xlu1 %v2662_v5, %s4643_s6  ;;  %2685 = vrot.lane.b32.xlu0 %v2661_v2, %s4643_s6  ;;  %v5790_v3 = vpop.permute.xlu0 %2096 }
0x12c9   : > { %8553 = vst [vmem:[#allocation267_spill] sm:$0xff] %v5790_v3 }
0x12cc   : > { %2717 = vperm.xlu1 %4526, %v5607_v23   ;;  %2689 = vrot.lane.b32.xlu0 %v2663_v14, %s4643_s6  ;;  %s4686_s6 = smov 69  }
0x12d0   : > { %4527 = vset.pattern.permute.xlu1 %v4644_v28 }
0x132e   : > { %v5778_v8 = vpop.permute.xlu1 %2675 }
0x132f   : > { %8548 = vst [vmem:[#allocation262_spill] sm:$0xff] %v5778_v8 }
0x1332   : > { %v5780_v11 = vpop.permute.xlu1 %2679 }
0x1333   : > { %8549 = vst [vmem:[#allocation263_spill] sm:$0xff] %v5780_v11 }
0x1336   : > { %v5782_v32 = vpop.permute.xlu1 %2683 }
0x1337   : > { %8550 = vst [vmem:[#allocation264_spill] sm:$0xff] %v5782_v32  ;;  %v5794_v32 = vpop.permute.xlu0 %2100 }
0x1338   : > { %8554 = vst [vmem:[#allocation268_spill] sm:$0xff] %v5794_v32 }
0x133a   : > { %v5784_v0 = vpop.permute.xlu1 %2687 }
0x133b   : > { %8551 = vst [vmem:[#allocation265_spill] sm:$0xff] %v5784_v0 }
0x1347   : > { %v2718_v5 = vpop.permute.xlu1 %2717 }
0x1348   : > { %v2721_v2 = vmul.f32 %v2718_v5, %v4747_v19  ;;  %v2720_v4 = vmul.f32 %v2718_v5, %v4740_v12  ;;  %v2723_v14 = vmul.f32 %v2718_v5, %v4742_v13  ;;  %v2722_v28 = vmul.f32 %v2718_v5, %v4756_v24 }
0x1349   : > { %v2725_v0 = vmul.f32 %v2718_v5, %v4749_v20  ;;  %v2724_v11 = vmul.f32 %v2718_v5, %v4764_v29  ;;  %v2727_v8 = vmul.f32 %v2718_v5, %v4758_v25  ;;  %v2726_v3 = vmul.f32 %v2718_v5, %v4771_v33 }
0x134a   : > { %2740 = vrot.lane.b32.xlu1 %v2721_v2, %s4645_s7  ;;  %2738 = vrot.lane.b32.xlu0 %v2720_v4, %s4645_s7  ;;  %v5800_v2 = vpop.permute.xlu0 %2104  ;;  %v2728_v4 = vmul.f32 %v2718_v5, %v4777_v36 }
0x134b   : > { %8555 = vst [vmem:[#allocation269_spill] sm:$0xff] %v5800_v2 }
0x134e   : > { %2744 = vrot.lane.b32.xlu1 %v2723_v14, %s4645_s7  ;;  %2742 = vrot.lane.b32.xlu0 %v2722_v28, %s4645_s7  ;;  %v5803_v14 = vpop.permute.xlu0 %2153  ;;  %v4646_v28 = vmov 42  }
0x134f   : > { %8556 = vst [vmem:[#allocation270_spill] sm:$0xff] %v5803_v14 }
0x1352   : > { %2748 = vrot.lane.b32.xlu1 %v2725_v0, %s4645_s7  ;;  %2746 = vrot.lane.b32.xlu0 %v2724_v11, %s4645_s7  ;;  %v5814_v2 = vpop.permute.xlu0 %2157 }
0x1353   : > { %8561 = vst [vmem:[#allocation275_spill] sm:$0xff] %v5814_v2 }
0x1356   : > { %2752 = vrot.lane.b32.xlu1 %v2727_v8, %s4645_s7  ;;  %2750 = vrot.lane.b32.xlu0 %v2726_v3, %s4645_s7  ;;  %v5818_v14 = vpop.permute.xlu0 %2161 }
0x1357   : > { %8562 = vst [vmem:[#allocation276_spill] sm:$0xff] %v5818_v14 }
0x135a   : > { %2782 = vperm.xlu1 %4527, %v5607_v23   ;;  %2754 = vrot.lane.b32.xlu0 %v2728_v4, %s4645_s7  ;;  %s4687_s7 = smov 68  }
0x135e   : > { %4528 = vset.pattern.permute.xlu1 %v4646_v28 }
0x13bc   : > { %v5806_v32 = vpop.permute.xlu1 %2740 }
0x13bd   : > { %8557 = vst [vmem:[#allocation271_spill] sm:$0xff] %v5806_v32 }
0x13c0   : > { %v5808_v0 = vpop.permute.xlu1 %2744 }
0x13c1   : > { %8558 = vst [vmem:[#allocation272_spill] sm:$0xff] %v5808_v0 }
0x13c4   : > { %v5810_v11 = vpop.permute.xlu1 %2748 }
0x13c5   : > { %8559 = vst [vmem:[#allocation273_spill] sm:$0xff] %v5810_v11  ;;  %v5822_v11 = vpop.permute.xlu0 %2165 }
0x13c6   : > { %8563 = vst [vmem:[#allocation277_spill] sm:$0xff] %v5822_v11 }
0x13c8   : > { %v5812_v44 = vpop.permute.xlu1 %2752 }
0x13c9   : > { %8560 = vst [vmem:[#allocation274_spill] sm:$0xff] %v5812_v44 }
0x13d5   : > { %v2783_v8 = vpop.permute.xlu1 %2782 }
0x13d6   : > { %v2786_v3 = vmul.f32 %v2783_v8, %v4747_v19  ;;  %v2785_v5 = vmul.f32 %v2783_v8, %v4740_v12  ;;  %v2788_v4 = vmul.f32 %v2783_v8, %v4742_v13  ;;  %v2787_v28 = vmul.f32 %v2783_v8, %v4756_v24 }
0x13d7   : > { %v2790_v44 = vmul.f32 %v2783_v8, %v4749_v20  ;;  %v2789_v0 = vmul.f32 %v2783_v8, %v4764_v29  ;;  %v2792_v32 = vmul.f32 %v2783_v8, %v4758_v25  ;;  %v2791_v14 = vmul.f32 %v2783_v8, %v4771_v33 }
0x13d8   : > { %2805 = vrot.lane.b32.xlu1 %v2786_v3, %s4647_s8  ;;  %2803 = vrot.lane.b32.xlu0 %v2785_v5, %s4647_s8  ;;  %v5828_v3 = vpop.permute.xlu0 %2169  ;;  %v2793_v5 = vmul.f32 %v2783_v8, %v4777_v36 }
0x13d9   : > { %8564 = vst [vmem:[#allocation278_spill] sm:$0xff] %v5828_v3 }
0x13dc   : > { %2809 = vrot.lane.b32.xlu1 %v2788_v4, %s4647_s8  ;;  %2807 = vrot.lane.b32.xlu0 %v2787_v28, %s4647_s8  ;;  %v5831_v4 = vpop.permute.xlu0 %2218  ;;  %v4648_v28 = vmov 43  }
0x13dd   : > { %8565 = vst [vmem:[#allocation279_spill] sm:$0xff] %v5831_v4 }
0x13e0   : > { %2813 = vrot.lane.b32.xlu1 %v2790_v44, %s4647_s8  ;;  %2811 = vrot.lane.b32.xlu0 %v2789_v0, %s4647_s8  ;;  %v5842_v3 = vpop.permute.xlu0 %2222 }
0x13e1   : > { %8570 = vst [vmem:[#allocation284_spill] sm:$0xff] %v5842_v3 }
0x13e4   : > { %2817 = vrot.lane.b32.xlu1 %v2792_v32, %s4647_s8  ;;  %2815 = vrot.lane.b32.xlu0 %v2791_v14, %s4647_s8  ;;  %v5846_v4 = vpop.permute.xlu0 %2226 }
0x13e5   : > { %8571 = vst [vmem:[#allocation285_spill] sm:$0xff] %v5846_v4 }
0x13e8   : > { %2847 = vperm.xlu1 %4528, %v5607_v23   ;;  %2819 = vrot.lane.b32.xlu0 %v2793_v5, %s4647_s8  ;;  %s4688_s8 = smov 67  }
0x13ec   : > { %4529 = vset.pattern.permute.xlu1 %v4648_v28 }
0x144a   : > { %v5834_v11 = vpop.permute.xlu1 %2805 }
0x144b   : > { %8566 = vst [vmem:[#allocation280_spill] sm:$0xff] %v5834_v11 }
0x144e   : > { %v5836_v44 = vpop.permute.xlu1 %2809 }
0x144f   : > { %8567 = vst [vmem:[#allocation281_spill] sm:$0xff] %v5836_v44 }
0x1452   : > { %v5838_v0 = vpop.permute.xlu1 %2813 }
0x1453   : > { %8568 = vst [vmem:[#allocation282_spill] sm:$0xff] %v5838_v0  ;;  %v5850_v0 = vpop.permute.xlu0 %2230 }
0x1454   : > { %8572 = vst [vmem:[#allocation286_spill] sm:$0xff] %v5850_v0 }
0x1456   : > { %v5840_v2 = vpop.permute.xlu1 %2817 }
0x1457   : > { %8569 = vst [vmem:[#allocation283_spill] sm:$0xff] %v5840_v2 }
0x1463   : > { %v2848_v32 = vpop.permute.xlu1 %2847 }
0x1464   : > { %v2851_v14 = vmul.f32 %v2848_v32, %v4747_v19  ;;  %v2850_v8 = vmul.f32 %v2848_v32, %v4740_v12  ;;  %v2853_v5 = vmul.f32 %v2848_v32, %v4742_v13  ;;  %v2852_v28 = vmul.f32 %v2848_v32, %v4756_v24 }
0x1465   : > { %v2855_v2 = vmul.f32 %v2848_v32, %v4749_v20  ;;  %v2854_v44 = vmul.f32 %v2848_v32, %v4764_v29  ;;  %v2857_v11 = vmul.f32 %v2848_v32, %v4758_v25  ;;  %v2856_v4 = vmul.f32 %v2848_v32, %v4771_v33 }
0x1466   : > { %2870 = vrot.lane.b32.xlu1 %v2851_v14, %s4649_s11  ;;  %2868 = vrot.lane.b32.xlu0 %v2850_v8, %s4649_s11  ;;  %v5856_v14 = vpop.permute.xlu0 %2234  ;;  %v2858_v8 = vmul.f32 %v2848_v32, %v4777_v36 }
0x1467   : > { %8573 = vst [vmem:[#allocation287_spill] sm:$0xff] %v5856_v14 }
0x146a   : > { %2874 = vrot.lane.b32.xlu1 %v2853_v5, %s4649_s11  ;;  %2872 = vrot.lane.b32.xlu0 %v2852_v28, %s4649_s11  ;;  %v5859_v5 = vpop.permute.xlu0 %2283  ;;  %v4650_v28 = vmov 44  }
0x146b   : > { %8574 = vst [vmem:[#allocation288_spill] sm:$0xff] %v5859_v5 }
0x146e   : > { %2878 = vrot.lane.b32.xlu1 %v2855_v2, %s4649_s11  ;;  %2876 = vrot.lane.b32.xlu0 %v2854_v44, %s4649_s11  ;;  %v5870_v14 = vpop.permute.xlu0 %2287 }
0x146f   : > { %8579 = vst [vmem:[#allocation293_spill] sm:$0xff] %v5870_v14 }
0x1472   : > { %2882 = vrot.lane.b32.xlu1 %v2857_v11, %s4649_s11  ;;  %2880 = vrot.lane.b32.xlu0 %v2856_v4, %s4649_s11  ;;  %v5874_v5 = vpop.permute.xlu0 %2291 }
0x1473   : > { %8580 = vst [vmem:[#allocation294_spill] sm:$0xff] %v5874_v5 }
0x1476   : > { %2912 = vperm.xlu1 %4529, %v5607_v23   ;;  %2884 = vrot.lane.b32.xlu0 %v2858_v8, %s4649_s11  ;;  %s4689_s11 = smov 66  }
0x147a   : > { %4530 = vset.pattern.permute.xlu1 %v4650_v28 }
0x14d8   : > { %v5862_v0 = vpop.permute.xlu1 %2870 }
0x14d9   : > { %8575 = vst [vmem:[#allocation289_spill] sm:$0xff] %v5862_v0 }
0x14dc   : > { %v5864_v2 = vpop.permute.xlu1 %2874 }
0x14dd   : > { %8576 = vst [vmem:[#allocation290_spill] sm:$0xff] %v5864_v2 }
0x14e0   : > { %v5866_v44 = vpop.permute.xlu1 %2878 }
0x14e1   : > { %8577 = vst [vmem:[#allocation291_spill] sm:$0xff] %v5866_v44  ;;  %v5878_v44 = vpop.permute.xlu0 %2295 }
0x14e2   : > { %8581 = vst [vmem:[#allocation295_spill] sm:$0xff] %v5878_v44 }
0x14e4   : > { %v5868_v3 = vpop.permute.xlu1 %2882 }
0x14e5   : > { %8578 = vst [vmem:[#allocation292_spill] sm:$0xff] %v5868_v3 }
0x14f1   : > { %v2913_v11 = vpop.permute.xlu1 %2912 }
0x14f2   : > { %v2916_v4 = vmul.f32 %v2913_v11, %v4747_v19  ;;  %v2915_v32 = vmul.f32 %v2913_v11, %v4740_v12  ;;  %v2918_v8 = vmul.f32 %v2913_v11, %v4742_v13  ;;  %v2917_v28 = vmul.f32 %v2913_v11, %v4756_v24 }
0x14f3   : > { %v2920_v3 = vmul.f32 %v2913_v11, %v4749_v20  ;;  %v2919_v2 = vmul.f32 %v2913_v11, %v4764_v29  ;;  %v2922_v0 = vmul.f32 %v2913_v11, %v4758_v25  ;;  %v2921_v5 = vmul.f32 %v2913_v11, %v4771_v33 }
0x14f4   : > { %2935 = vrot.lane.b32.xlu1 %v2916_v4, %s4651_s12  ;;  %2933 = vrot.lane.b32.xlu0 %v2915_v32, %s4651_s12  ;;  %v5884_v4 = vpop.permute.xlu0 %2299  ;;  %v2923_v32 = vmul.f32 %v2913_v11, %v4777_v36 }
0x14f5   : > { %8582 = vst [vmem:[#allocation296_spill] sm:$0xff] %v5884_v4 }
0x14f8   : > { %2939 = vrot.lane.b32.xlu1 %v2918_v8, %s4651_s12  ;;  %2937 = vrot.lane.b32.xlu0 %v2917_v28, %s4651_s12  ;;  %v5887_v8 = vpop.permute.xlu0 %2348  ;;  %v4652_v28 = vmov 45  }
0x14f9   : > { %8583 = vst [vmem:[#allocation297_spill] sm:$0xff] %v5887_v8 }
0x14fc   : > { %2943 = vrot.lane.b32.xlu1 %v2920_v3, %s4651_s12  ;;  %2941 = vrot.lane.b32.xlu0 %v2919_v2, %s4651_s12  ;;  %v5898_v4 = vpop.permute.xlu0 %2352 }
0x14fd   : > { %8588 = vst [vmem:[#allocation302_spill] sm:$0xff] %v5898_v4 }
0x1500   : > { %2947 = vrot.lane.b32.xlu1 %v2922_v0, %s4651_s12  ;;  %2945 = vrot.lane.b32.xlu0 %v2921_v5, %s4651_s12  ;;  %v5902_v8 = vpop.permute.xlu0 %2356 }
0x1501   : > { %8589 = vst [vmem:[#allocation303_spill] sm:$0xff] %v5902_v8 }
0x1504   : > { %2977 = vperm.xlu1 %4530, %v5607_v23   ;;  %2949 = vrot.lane.b32.xlu0 %v2923_v32, %s4651_s12  ;;  %s4690_s12 = smov 65  }
0x1508   : > { %4531 = vset.pattern.permute.xlu1 %v4652_v28 }
0x1566   : > { %v5890_v44 = vpop.permute.xlu1 %2935 }
0x1567   : > { %8584 = vst [vmem:[#allocation298_spill] sm:$0xff] %v5890_v44 }
0x156a   : > { %v5892_v3 = vpop.permute.xlu1 %2939 }
0x156b   : > { %8585 = vst [vmem:[#allocation299_spill] sm:$0xff] %v5892_v3 }
0x156e   : > { %v5894_v2 = vpop.permute.xlu1 %2943 }
0x156f   : > { %8586 = vst [vmem:[#allocation300_spill] sm:$0xff] %v5894_v2  ;;  %v5906_v2 = vpop.permute.xlu0 %2360 }
0x1570   : > { %8590 = vst [vmem:[#allocation304_spill] sm:$0xff] %v5906_v2 }
0x1572   : > { %v5896_v14 = vpop.permute.xlu1 %2947 }
0x1573   : > { %8587 = vst [vmem:[#allocation301_spill] sm:$0xff] %v5896_v14 }
0x157f   : > { %v2978_v0 = vpop.permute.xlu1 %2977 }
0x1580   : > { %v2981_v5 = vmul.f32 %v2978_v0, %v4747_v19  ;;  %v2980_v11 = vmul.f32 %v2978_v0, %v4740_v12  ;;  %v2983_v32 = vmul.f32 %v2978_v0, %v4742_v13  ;;  %v2982_v28 = vmul.f32 %v2978_v0, %v4756_v24 }
0x1581   : > { %v2985_v14 = vmul.f32 %v2978_v0, %v4749_v20  ;;  %v2984_v3 = vmul.f32 %v2978_v0, %v4764_v29  ;;  %v2987_v44 = vmul.f32 %v2978_v0, %v4758_v25  ;;  %v2986_v8 = vmul.f32 %v2978_v0, %v4771_v33 }
0x1582   : > { %3000 = vrot.lane.b32.xlu1 %v2981_v5, %s4653_s13  ;;  %2998 = vrot.lane.b32.xlu0 %v2980_v11, %s4653_s13  ;;  %v5912_v5 = vpop.permute.xlu0 %2364  ;;  %v2988_v11 = vmul.f32 %v2978_v0, %v4777_v36 }
0x1583   : > { %8591 = vst [vmem:[#allocation305_spill] sm:$0xff] %v5912_v5 }
0x1586   : > { %3004 = vrot.lane.b32.xlu1 %v2983_v32, %s4653_s13  ;;  %3002 = vrot.lane.b32.xlu0 %v2982_v28, %s4653_s13  ;;  %v5915_v32 = vpop.permute.xlu0 %2413  ;;  %v4654_v28 = vmov 46  }
0x1587   : > { %8592 = vst [vmem:[#allocation306_spill] sm:$0xff] %v5915_v32 }
0x158a   : > { %3008 = vrot.lane.b32.xlu1 %v2985_v14, %s4653_s13  ;;  %3006 = vrot.lane.b32.xlu0 %v2984_v3, %s4653_s13  ;;  %v5926_v5 = vpop.permute.xlu0 %2417 }
0x158b   : > { %8597 = vst [vmem:[#allocation311_spill] sm:$0xff] %v5926_v5 }
0x158e   : > { %3012 = vrot.lane.b32.xlu1 %v2987_v44, %s4653_s13  ;;  %3010 = vrot.lane.b32.xlu0 %v2986_v8, %s4653_s13  ;;  %v5930_v32 = vpop.permute.xlu0 %2421 }
0x158f   : > { %8598 = vst [vmem:[#allocation312_spill] sm:$0xff] %v5930_v32 }
0x1592   : > { %3042 = vperm.xlu1 %4531, %v5607_v23   ;;  %3014 = vrot.lane.b32.xlu0 %v2988_v11, %s4653_s13  ;;  %s4346_s13 = sshll.u32 %s4712_s10, 3 }
0x1593   : > { %p140_p4 = scmp.lt.s32.totalorder %s4346_s13, 15 }
0x1595   : > { %s9139_s13 = smov (!%p140_p4, %s4346_s13), 15 }
0x1596   : > { %4532 = vset.pattern.permute.xlu1 %v4654_v28  ;;  %s4347_s10 = sshll.u32 %s9139_s13, 3 }
0x15f4   : > { %v5918_v2 = vpop.permute.xlu1 %3000 }
0x15f5   : > { %8593 = vst [vmem:[#allocation307_spill] sm:$0xff] %v5918_v2 }
0x15f8   : > { %v5920_v14 = vpop.permute.xlu1 %3004 }
0x15f9   : > { %8594 = vst [vmem:[#allocation308_spill] sm:$0xff] %v5920_v14 }
0x15fc   : > { %v5922_v3 = vpop.permute.xlu1 %3008 }
0x15fd   : > { %8595 = vst [vmem:[#allocation309_spill] sm:$0xff] %v5922_v3  ;;  %v5934_v3 = vpop.permute.xlu0 %2425 }
0x15fe   : > { %8599 = vst [vmem:[#allocation313_spill] sm:$0xff] %v5934_v3 }
0x1600   : > { %v5924_v4 = vpop.permute.xlu1 %3012 }
0x1601   : > { %8596 = vst [vmem:[#allocation310_spill] sm:$0xff] %v5924_v4 }
0x160d   : > { %v3043_v44 = vpop.permute.xlu1 %3042 }
0x160e   : > { %v3046_v8 = vmul.f32 %v3043_v44, %v4747_v19  ;;  %v3045_v0 = vmul.f32 %v3043_v44, %v4740_v12  ;;  %v3048_v11 = vmul.f32 %v3043_v44, %v4742_v13  ;;  %v3047_v28 = vmul.f32 %v3043_v44, %v4756_v24 }
0x160f   : > { %v3050_v4 = vmul.f32 %v3043_v44, %v4749_v20  ;;  %v3049_v14 = vmul.f32 %v3043_v44, %v4764_v29  ;;  %v3052_v2 = vmul.f32 %v3043_v44, %v4758_v25  ;;  %v3051_v32 = vmul.f32 %v3043_v44, %v4771_v33 }
0x1610   : > { %3065 = vrot.lane.b32.xlu1 %v3046_v8, %s4655_s14  ;;  %3063 = vrot.lane.b32.xlu0 %v3045_v0, %s4655_s14  ;;  %v5940_v8 = vpop.permute.xlu0 %2429  ;;  %v3053_v0 = vmul.f32 %v3043_v44, %v4777_v36 }
0x1611   : > { %8600 = vst [vmem:[#allocation314_spill] sm:$0xff] %v5940_v8 }
0x1614   : > { %3069 = vrot.lane.b32.xlu1 %v3048_v11, %s4655_s14  ;;  %3067 = vrot.lane.b32.xlu0 %v3047_v28, %s4655_s14  ;;  %v5943_v11 = vpop.permute.xlu0 %2478  ;;  %v4656_v28 = vmov 47  }
0x1615   : > { %8601 = vst [vmem:[#allocation315_spill] sm:$0xff] %v5943_v11 }
0x1618   : > { %3073 = vrot.lane.b32.xlu1 %v3050_v4, %s4655_s14  ;;  %3071 = vrot.lane.b32.xlu0 %v3049_v14, %s4655_s14  ;;  %v5954_v8 = vpop.permute.xlu0 %2482 }
0x1619   : > { %8606 = vst [vmem:[#allocation320_spill] sm:$0xff] %v5954_v8 }
0x161c   : > { %3077 = vrot.lane.b32.xlu1 %v3052_v2, %s4655_s14  ;;  %3075 = vrot.lane.b32.xlu0 %v3051_v32, %s4655_s14  ;;  %v5958_v11 = vpop.permute.xlu0 %2486 }
0x161d   : > { %8607 = vst [vmem:[#allocation321_spill] sm:$0xff] %v5958_v11 }
0x1620   : > { %3107 = vperm.xlu1 %4532, %v5607_v23   ;;  %3079 = vrot.lane.b32.xlu0 %v3053_v0, %s4655_s14 }
0x1624   : > { %4533 = vset.pattern.permute.xlu1 %v4656_v28 }
0x1682   : > { %v5946_v3 = vpop.permute.xlu1 %3065 }
0x1683   : > { %8602 = vst [vmem:[#allocation316_spill] sm:$0xff] %v5946_v3 }
0x1686   : > { %v5948_v4 = vpop.permute.xlu1 %3069 }
0x1687   : > { %8603 = vst [vmem:[#allocation317_spill] sm:$0xff] %v5948_v4 }
0x168a   : > { %v5950_v14 = vpop.permute.xlu1 %3073 }
0x168b   : > { %8604 = vst [vmem:[#allocation318_spill] sm:$0xff] %v5950_v14  ;;  %v5962_v14 = vpop.permute.xlu0 %2490 }
0x168c   : > { %8608 = vst [vmem:[#allocation322_spill] sm:$0xff] %v5962_v14 }
0x168e   : > { %v5952_v5 = vpop.permute.xlu1 %3077 }
0x168f   : > { %8605 = vst [vmem:[#allocation319_spill] sm:$0xff] %v5952_v5 }
0x169b   : > { %v3108_v2 = vpop.permute.xlu1 %3107 }
0x169c   : > { %v3111_v32 = vmul.f32 %v3108_v2, %v4747_v19  ;;  %v3110_v44 = vmul.f32 %v3108_v2, %v4740_v12  ;;  %v3113_v0 = vmul.f32 %v3108_v2, %v4742_v13  ;;  %v3112_v28 = vmul.f32 %v3108_v2, %v4756_v24 }
0x169d   : > { %v3115_v5 = vmul.f32 %v3108_v2, %v4749_v20  ;;  %v3114_v4 = vmul.f32 %v3108_v2, %v4764_v29  ;;  %v3117_v3 = vmul.f32 %v3108_v2, %v4758_v25  ;;  %v3116_v11 = vmul.f32 %v3108_v2, %v4771_v33 }
0x169e   : > { %3130 = vrot.lane.b32.xlu1 %v3111_v32, %s4657_s15  ;;  %3128 = vrot.lane.b32.xlu0 %v3110_v44, %s4657_s15  ;;  %v5968_v32 = vpop.permute.xlu0 %2494  ;;  %v3118_v44 = vmul.f32 %v3108_v2, %v4777_v36 }
0x169f   : > { %8609 = vst [vmem:[#allocation323_spill] sm:$0xff] %v5968_v32 }
0x16a2   : > { %3134 = vrot.lane.b32.xlu1 %v3113_v0, %s4657_s15  ;;  %3132 = vrot.lane.b32.xlu0 %v3112_v28, %s4657_s15  ;;  %v5971_v0 = vpop.permute.xlu0 %2543  ;;  %v4658_v28 = vmov 48  }
0x16a3   : > { %8610 = vst [vmem:[#allocation324_spill] sm:$0xff] %v5971_v0 }
0x16a6   : > { %3138 = vrot.lane.b32.xlu1 %v3115_v5, %s4657_s15  ;;  %3136 = vrot.lane.b32.xlu0 %v3114_v4, %s4657_s15  ;;  %v5982_v32 = vpop.permute.xlu0 %2547 }
0x16a7   : > { %8615 = vst [vmem:[#allocation329_spill] sm:$0xff] %v5982_v32 }
0x16aa   : > { %3142 = vrot.lane.b32.xlu1 %v3117_v3, %s4657_s15  ;;  %3140 = vrot.lane.b32.xlu0 %v3116_v11, %s4657_s15  ;;  %v5986_v0 = vpop.permute.xlu0 %2551 }
0x16ab   : > { %8616 = vst [vmem:[#allocation330_spill] sm:$0xff] %v5986_v0 }
0x16ae   : > { %3172 = vperm.xlu1 %4533, %v5607_v23   ;;  %3144 = vrot.lane.b32.xlu0 %v3118_v44, %s4657_s15 }
0x16b2   : > { %4534 = vset.pattern.permute.xlu1 %v4658_v28 }
0x1710   : > { %v5974_v14 = vpop.permute.xlu1 %3130 }
0x1711   : > { %8611 = vst [vmem:[#allocation325_spill] sm:$0xff] %v5974_v14 }
0x1714   : > { %v5976_v5 = vpop.permute.xlu1 %3134 }
0x1715   : > { %8612 = vst [vmem:[#allocation326_spill] sm:$0xff] %v5976_v5 }
0x1718   : > { %v5978_v4 = vpop.permute.xlu1 %3138 }
0x1719   : > { %8613 = vst [vmem:[#allocation327_spill] sm:$0xff] %v5978_v4  ;;  %v5990_v4 = vpop.permute.xlu0 %2555 }
0x171a   : > { %8617 = vst [vmem:[#allocation331_spill] sm:$0xff] %v5990_v4 }
0x171c   : > { %v5980_v8 = vpop.permute.xlu1 %3142 }
0x171d   : > { %8614 = vst [vmem:[#allocation328_spill] sm:$0xff] %v5980_v8 }
0x1729   : > { %v3173_v3 = vpop.permute.xlu1 %3172 }
0x172a   : > { %v3176_v11 = vmul.f32 %v3173_v3, %v4747_v19  ;;  %v3175_v2 = vmul.f32 %v3173_v3, %v4740_v12  ;;  %v3178_v44 = vmul.f32 %v3173_v3, %v4742_v13  ;;  %v3177_v28 = vmul.f32 %v3173_v3, %v4756_v24 }
0x172b   : > { %v3180_v8 = vmul.f32 %v3173_v3, %v4749_v20  ;;  %v3179_v5 = vmul.f32 %v3173_v3, %v4764_v29  ;;  %v3182_v14 = vmul.f32 %v3173_v3, %v4758_v25  ;;  %v3181_v0 = vmul.f32 %v3173_v3, %v4771_v33 }
0x172c   : > { %3195 = vrot.lane.b32.xlu1 %v3176_v11, %s4659_s16  ;;  %3193 = vrot.lane.b32.xlu0 %v3175_v2, %s4659_s16  ;;  %v5996_v11 = vpop.permute.xlu0 %2559  ;;  %v3183_v2 = vmul.f32 %v3173_v3, %v4777_v36 }
0x172d   : > { %8618 = vst [vmem:[#allocation332_spill] sm:$0xff] %v5996_v11 }
0x1730   : > { %3199 = vrot.lane.b32.xlu1 %v3178_v44, %s4659_s16  ;;  %3197 = vrot.lane.b32.xlu0 %v3177_v28, %s4659_s16  ;;  %v5999_v44 = vpop.permute.xlu0 %2608  ;;  %v4660_v28 = vmov 49  }
0x1731   : > { %8619 = vst [vmem:[#allocation333_spill] sm:$0xff] %v5999_v44 }
0x1734   : > { %3203 = vrot.lane.b32.xlu1 %v3180_v8, %s4659_s16  ;;  %3201 = vrot.lane.b32.xlu0 %v3179_v5, %s4659_s16  ;;  %v6010_v11 = vpop.permute.xlu0 %2612 }
0x1735   : > { %8624 = vst [vmem:[#allocation338_spill] sm:$0xff] %v6010_v11 }
0x1738   : > { %3207 = vrot.lane.b32.xlu1 %v3182_v14, %s4659_s16  ;;  %3205 = vrot.lane.b32.xlu0 %v3181_v0, %s4659_s16  ;;  %v6014_v44 = vpop.permute.xlu0 %2616 }
0x1739   : > { %8625 = vst [vmem:[#allocation339_spill] sm:$0xff] %v6014_v44 }
0x173c   : > { %3237 = vperm.xlu1 %4534, %v5607_v23   ;;  %3209 = vrot.lane.b32.xlu0 %v3183_v2, %s4659_s16  ;;  %s7900_s16 = scalar_lea.vmem %s7950_s2, %s4347_s10 }
0x1740   : > { %4535 = vset.pattern.permute.xlu1 %v4660_v28 }
0x179e   : > { %v6002_v4 = vpop.permute.xlu1 %3195 }
0x179f   : > { %8620 = vst [vmem:[#allocation334_spill] sm:$0xff] %v6002_v4 }
0x17a2   : > { %v6004_v8 = vpop.permute.xlu1 %3199 }
0x17a3   : > { %8621 = vst [vmem:[#allocation335_spill] sm:$0xff] %v6004_v8 }
0x17a6   : > { %v6006_v5 = vpop.permute.xlu1 %3203 }
0x17a7   : > { %8622 = vst [vmem:[#allocation336_spill] sm:$0xff] %v6006_v5  ;;  %v6018_v5 = vpop.permute.xlu0 %2620 }
0x17a8   : > { %8626 = vst [vmem:[#allocation340_spill] sm:$0xff] %v6018_v5 }
0x17aa   : > { %v6008_v32 = vpop.permute.xlu1 %3207 }
0x17ab   : > { %8623 = vst [vmem:[#allocation337_spill] sm:$0xff] %v6008_v32 }
0x17b7   : > { %v3238_v14 = vpop.permute.xlu1 %3237 }
0x17b8   : > { %v3241_v0 = vmul.f32 %v3238_v14, %v4747_v19  ;;  %v3240_v3 = vmul.f32 %v3238_v14, %v4740_v12  ;;  %v3243_v2 = vmul.f32 %v3238_v14, %v4742_v13  ;;  %v3242_v28 = vmul.f32 %v3238_v14, %v4756_v24 }
0x17b9   : > { %v3245_v32 = vmul.f32 %v3238_v14, %v4749_v20  ;;  %v3244_v8 = vmul.f32 %v3238_v14, %v4764_v29  ;;  %v3247_v4 = vmul.f32 %v3238_v14, %v4758_v25  ;;  %v3246_v44 = vmul.f32 %v3238_v14, %v4771_v33 }
0x17ba   : > { %3260 = vrot.lane.b32.xlu1 %v3241_v0, %s4661_s17  ;;  %3258 = vrot.lane.b32.xlu0 %v3240_v3, %s4661_s17  ;;  %v6024_v0 = vpop.permute.xlu0 %2624  ;;  %v3248_v3 = vmul.f32 %v3238_v14, %v4777_v36 }
0x17bb   : > { %8627 = vst [vmem:[#allocation341_spill] sm:$0xff] %v6024_v0 }
0x17be   : > { %3264 = vrot.lane.b32.xlu1 %v3243_v2, %s4661_s17  ;;  %3262 = vrot.lane.b32.xlu0 %v3242_v28, %s4661_s17  ;;  %v6027_v2 = vpop.permute.xlu0 %2673  ;;  %v4662_v28 = vmov 50  }
0x17bf   : > { %8628 = vst [vmem:[#allocation342_spill] sm:$0xff] %v6027_v2 }
0x17c2   : > { %3268 = vrot.lane.b32.xlu1 %v3245_v32, %s4661_s17  ;;  %3266 = vrot.lane.b32.xlu0 %v3244_v8, %s4661_s17  ;;  %v6038_v0 = vpop.permute.xlu0 %2677 }
0x17c3   : > { %8633 = vst [vmem:[#allocation347_spill] sm:$0xff] %v6038_v0 }
0x17c6   : > { %3272 = vrot.lane.b32.xlu1 %v3247_v4, %s4661_s17  ;;  %3270 = vrot.lane.b32.xlu0 %v3246_v44, %s4661_s17  ;;  %v6042_v2 = vpop.permute.xlu0 %2681 }
0x17c7   : > { %8634 = vst [vmem:[#allocation348_spill] sm:$0xff] %v6042_v2 }
0x17ca   : > { %3302 = vperm.xlu1 %4535, %v5607_v23   ;;  %3274 = vrot.lane.b32.xlu0 %v3248_v3, %s4661_s17 }
0x17ce   : > { %4536 = vset.pattern.permute.xlu1 %v4662_v28  ;;  %v6046_v28 = vpop.permute.xlu0 %2685 }
0x17cf   : > { %8635 = vst [vmem:[#allocation349_spill] sm:$0xff] %v6046_v28 }
0x182c   : > { %v6030_v5 = vpop.permute.xlu1 %3260 }
0x182d   : > { %8629 = vst [vmem:[#allocation343_spill] sm:$0xff] %v6030_v5 }
0x1830   : > { %v6032_v32 = vpop.permute.xlu1 %3264 }
0x1831   : > { %8630 = vst [vmem:[#allocation344_spill] sm:$0xff] %v6032_v32 }
0x1834   : > { %v6034_v8 = vpop.permute.xlu1 %3268 }
0x1835   : > { %8631 = vst [vmem:[#allocation345_spill] sm:$0xff] %v6034_v8 }
0x1838   : > { %v6036_v11 = vpop.permute.xlu1 %3272 }
0x1839   : > { %8632 = vst [vmem:[#allocation346_spill] sm:$0xff] %v6036_v11 }
0x1845   : > { %v3303_v4 = vpop.permute.xlu1 %3302 }
0x1846   : > { %v3306_v44 = vmul.f32 %v3303_v4, %v4747_v19  ;;  %v3305_v14 = vmul.f32 %v3303_v4, %v4740_v12  ;;  %v3308_v23 = vmul.f32 %v3303_v4, %v4742_v13  ;;  %v3307_v3 = vmul.f32 %v3303_v4, %v4756_v24 }
0x1847   : > { %v3310_v11 = vmul.f32 %v3303_v4, %v4749_v20  ;;  %v3309_v8 = vmul.f32 %v3303_v4, %v4764_v29  ;;  %v3312_v32 = vmul.f32 %v3303_v4, %v4758_v25  ;;  %v3311_v5 = vmul.f32 %v3303_v4, %v4771_v33 }
0x1848   : > { %3325 = vrot.lane.b32.xlu1 %v3306_v44, %s4663_s18  ;;  %3323 = vrot.lane.b32.xlu0 %v3305_v14, %s4663_s18  ;;  %v6052_v44 = vpop.permute.xlu0 %2689  ;;  %v3313_v14 = vmul.f32 %v3303_v4, %v4777_v36 }
0x1849   : > { %8636 = vst [vmem:[#allocation350_spill] sm:$0xff] %v6052_v44 }
0x184c   : > { %3329 = vrot.lane.b32.xlu1 %v3308_v23, %s4663_s18  ;;  %3327 = vrot.lane.b32.xlu0 %v3307_v3, %s4663_s18  ;;  %v6055_v23 = vpop.permute.xlu0 %2738  ;;  %v6060_v3 = vld [vmem:[%s7948_s0] sm:$0xff] }
0x184d   : > { %8637 = vst [vmem:[#allocation351_spill] sm:$0xff] %v6055_v23 }
0x1850   : > { %3333 = vrot.lane.b32.xlu1 %v3310_v11, %s4663_s18  ;;  %3331 = vrot.lane.b32.xlu0 %v3309_v8, %s4663_s18  ;;  %v4664_v11 = vmov 51   ;;  %v6071_v4 = vpop.permute.xlu0 %2742 }
0x1851   : > { %8642 = vst [vmem:[#allocation356_spill] sm:$0xff] %v6071_v4 }
0x1854   : > { %3337 = vrot.lane.b32.xlu1 %v3312_v32, %s4663_s18  ;;  %3335 = vrot.lane.b32.xlu0 %v3311_v5, %s4663_s18  ;;  %v6075_v0 = vpop.permute.xlu0 %2746 }
0x1855   : > { %8643 = vst [vmem:[#allocation357_spill] sm:$0xff] %v6075_v0 }
0x1858   : > { %3367 = vperm.xlu1 %4536, %v6060_v3   ;;  %3339 = vrot.lane.b32.xlu0 %v3313_v14, %s4663_s18 }
0x185c   : > { %4537 = vset.pattern.permute.xlu1 %v4664_v11 }
0x18ba   : > { %v6063_v8 = vpop.permute.xlu1 %3325 }
0x18bb   : > { %8638 = vst [vmem:[#allocation352_spill] sm:$0xff] %v6063_v8 }
0x18be   : > { %v6065_v28 = vpop.permute.xlu1 %3329 }
0x18bf   : > { %8639 = vst [vmem:[#allocation353_spill] sm:$0xff] %v6065_v28 }
0x18c2   : > { %v6067_v32 = vpop.permute.xlu1 %3333 }
0x18c3   : > { %8640 = vst [vmem:[#allocation354_spill] sm:$0xff] %v6067_v32  ;;  %v6079_v32 = vpop.permute.xlu0 %2750 }
0x18c4   : > { %8644 = vst [vmem:[#allocation358_spill] sm:$0xff] %v6079_v32 }
0x18c6   : > { %v6069_v5 = vpop.permute.xlu1 %3337 }
0x18c7   : > { %8641 = vst [vmem:[#allocation355_spill] sm:$0xff] %v6069_v5 }
0x18d3   : > { %v3368_v23 = vpop.permute.xlu1 %3367 }
0x18d4   : > { %v3371_v44 = vmul.f32 %v3368_v23, %v4747_v19  ;;  %v3370_v2 = vmul.f32 %v3368_v23, %v4740_v12  ;;  %v3373_v14 = vmul.f32 %v3368_v23, %v4742_v13  ;;  %v3372_v11 = vmul.f32 %v3368_v23, %v4756_v24 }
0x18d5   : > { %v3375_v5 = vmul.f32 %v3368_v23, %v4749_v20  ;;  %v3374_v28 = vmul.f32 %v3368_v23, %v4764_v29  ;;  %v3377_v8 = vmul.f32 %v3368_v23, %v4758_v25  ;;  %v3376_v0 = vmul.f32 %v3368_v23, %v4771_v33 }
0x18d6   : > { %3390 = vrot.lane.b32.xlu1 %v3371_v44, %s4665_s21  ;;  %3388 = vrot.lane.b32.xlu0 %v3370_v2, %s4665_s21  ;;  %v6085_v44 = vpop.permute.xlu0 %2754  ;;  %v3378_v2 = vmul.f32 %v3368_v23, %v4777_v36 }
0x18d7   : > { %8645 = vst [vmem:[#allocation359_spill] sm:$0xff] %v6085_v44 }
0x18da   : > { %3394 = vrot.lane.b32.xlu1 %v3373_v14, %s4665_s21  ;;  %3392 = vrot.lane.b32.xlu0 %v3372_v11, %s4665_s21  ;;  %v6088_v14 = vpop.permute.xlu0 %2803  ;;  %v4666_v11 = vmov 52  }
0x18db   : > { %8646 = vst [vmem:[#allocation360_spill] sm:$0xff] %v6088_v14 }
0x18de   : > { %3398 = vrot.lane.b32.xlu1 %v3375_v5, %s4665_s21  ;;  %3396 = vrot.lane.b32.xlu0 %v3374_v28, %s4665_s21  ;;  %v6099_v44 = vpop.permute.xlu0 %2807 }
0x18df   : > { %8651 = vst [vmem:[#allocation365_spill] sm:$0xff] %v6099_v44 }
0x18e2   : > { %3402 = vrot.lane.b32.xlu1 %v3377_v8, %s4665_s21  ;;  %3400 = vrot.lane.b32.xlu0 %v3376_v0, %s4665_s21  ;;  %v6103_v14 = vpop.permute.xlu0 %2811 }
0x18e3   : > { %8652 = vst [vmem:[#allocation366_spill] sm:$0xff] %v6103_v14 }
0x18e6   : > { %3432 = vperm.xlu1 %4537, %v6060_v3   ;;  %3404 = vrot.lane.b32.xlu0 %v3378_v2, %s4665_s21 }
0x18ea   : > { %4538 = vset.pattern.permute.xlu1 %v4666_v11 }
0x1948   : > { %v6091_v32 = vpop.permute.xlu1 %3390 }
0x1949   : > { %8647 = vst [vmem:[#allocation361_spill] sm:$0xff] %v6091_v32 }
0x194c   : > { %v6093_v28 = vpop.permute.xlu1 %3394 }
0x194d   : > { %8648 = vst [vmem:[#allocation362_spill] sm:$0xff] %v6093_v28 }
0x1950   : > { %v6095_v5 = vpop.permute.xlu1 %3398 }
0x1951   : > { %8649 = vst [vmem:[#allocation363_spill] sm:$0xff] %v6095_v5  ;;  %v6107_v5 = vpop.permute.xlu0 %2815 }
0x1952   : > { %8653 = vst [vmem:[#allocation367_spill] sm:$0xff] %v6107_v5 }
0x1954   : > { %v6097_v4 = vpop.permute.xlu1 %3402 }
0x1955   : > { %8650 = vst [vmem:[#allocation364_spill] sm:$0xff] %v6097_v4 }
0x1961   : > { %v3433_v0 = vpop.permute.xlu1 %3432 }
0x1962   : > { %v3436_v23 = vmul.f32 %v3433_v0, %v4747_v19  ;;  %v3435_v8 = vmul.f32 %v3433_v0, %v4740_v12  ;;  %v3438_v2 = vmul.f32 %v3433_v0, %v4742_v13  ;;  %v3437_v11 = vmul.f32 %v3433_v0, %v4756_v24 }
0x1963   : > { %v3440_v4 = vmul.f32 %v3433_v0, %v4749_v20  ;;  %v3439_v28 = vmul.f32 %v3433_v0, %v4764_v29  ;;  %v3442_v32 = vmul.f32 %v3433_v0, %v4758_v25  ;;  %v3441_v14 = vmul.f32 %v3433_v0, %v4771_v33 }
0x1964   : > { %3455 = vrot.lane.b32.xlu1 %v3436_v23, %s4667_s22  ;;  %3453 = vrot.lane.b32.xlu0 %v3435_v8, %s4667_s22  ;;  %v6113_v23 = vpop.permute.xlu0 %2819  ;;  %v3443_v8 = vmul.f32 %v3433_v0, %v4777_v36 }
0x1965   : > { %8654 = vst [vmem:[#allocation368_spill] sm:$0xff] %v6113_v23 }
0x1968   : > { %3459 = vrot.lane.b32.xlu1 %v3438_v2, %s4667_s22  ;;  %3457 = vrot.lane.b32.xlu0 %v3437_v11, %s4667_s22  ;;  %v6116_v2 = vpop.permute.xlu0 %2868  ;;  %v4668_v11 = vmov 53  }
0x1969   : > { %8655 = vst [vmem:[#allocation369_spill] sm:$0xff] %v6116_v2 }
0x196c   : > { %3463 = vrot.lane.b32.xlu1 %v3440_v4, %s4667_s22  ;;  %3461 = vrot.lane.b32.xlu0 %v3439_v28, %s4667_s22  ;;  %v6127_v23 = vpop.permute.xlu0 %2872 }
0x196d   : > { %8660 = vst [vmem:[#allocation374_spill] sm:$0xff] %v6127_v23 }
0x1970   : > { %3467 = vrot.lane.b32.xlu1 %v3442_v32, %s4667_s22  ;;  %3465 = vrot.lane.b32.xlu0 %v3441_v14, %s4667_s22  ;;  %v6131_v2 = vpop.permute.xlu0 %2876 }
0x1971   : > { %8661 = vst [vmem:[#allocation375_spill] sm:$0xff] %v6131_v2 }
0x1974   : > { %3497 = vperm.xlu1 %4538, %v6060_v3   ;;  %3469 = vrot.lane.b32.xlu0 %v3443_v8, %s4667_s22 }
0x1978   : > { %4539 = vset.pattern.permute.xlu1 %v4668_v11 }
0x19d6   : > { %v6119_v5 = vpop.permute.xlu1 %3455 }
0x19d7   : > { %8656 = vst [vmem:[#allocation370_spill] sm:$0xff] %v6119_v5 }
0x19da   : > { %v6121_v4 = vpop.permute.xlu1 %3459 }
0x19db   : > { %8657 = vst [vmem:[#allocation371_spill] sm:$0xff] %v6121_v4 }
0x19de   : > { %v6123_v28 = vpop.permute.xlu1 %3463 }
0x19df   : > { %8658 = vst [vmem:[#allocation372_spill] sm:$0xff] %v6123_v28  ;;  %v6135_v28 = vpop.permute.xlu0 %2880 }
0x19e0   : > { %8662 = vst [vmem:[#allocation376_spill] sm:$0xff] %v6135_v28 }
0x19e2   : > { %v6125_v44 = vpop.permute.xlu1 %3467 }
0x19e3   : > { %8659 = vst [vmem:[#allocation373_spill] sm:$0xff] %v6125_v44 }
0x19ef   : > { %v3498_v32 = vpop.permute.xlu1 %3497 }
0x19f0   : > { %v3501_v14 = vmul.f32 %v3498_v32, %v4747_v19  ;;  %v3500_v0 = vmul.f32 %v3498_v32, %v4740_v12  ;;  %v3503_v8 = vmul.f32 %v3498_v32, %v4742_v13  ;;  %v3502_v11 = vmul.f32 %v3498_v32, %v4756_v24 }
0x19f1   : > { %v3505_v44 = vmul.f32 %v3498_v32, %v4749_v20  ;;  %v3504_v4 = vmul.f32 %v3498_v32, %v4764_v29  ;;  %v3507_v5 = vmul.f32 %v3498_v32, %v4758_v25  ;;  %v3506_v2 = vmul.f32 %v3498_v32, %v4771_v33 }
0x19f2   : > { %3520 = vrot.lane.b32.xlu1 %v3501_v14, %s4669_s23  ;;  %3518 = vrot.lane.b32.xlu0 %v3500_v0, %s4669_s23  ;;  %v6141_v14 = vpop.permute.xlu0 %2884  ;;  %v3508_v0 = vmul.f32 %v3498_v32, %v4777_v36 }
0x19f3   : > { %8663 = vst [vmem:[#allocation377_spill] sm:$0xff] %v6141_v14 }
0x19f6   : > { %3524 = vrot.lane.b32.xlu1 %v3503_v8, %s4669_s23  ;;  %3522 = vrot.lane.b32.xlu0 %v3502_v11, %s4669_s23  ;;  %v6144_v8 = vpop.permute.xlu0 %2933  ;;  %v4670_v11 = vmov 54  }
0x19f7   : > { %8664 = vst [vmem:[#allocation378_spill] sm:$0xff] %v6144_v8 }
0x19fa   : > { %3528 = vrot.lane.b32.xlu1 %v3505_v44, %s4669_s23  ;;  %3526 = vrot.lane.b32.xlu0 %v3504_v4, %s4669_s23  ;;  %v6147_v28 = vpop.permute.xlu0 %2937 }
0x19fb   : > { %8665 = vst [vmem:[#allocation379_spill] sm:$0xff] %v6147_v28 }
0x19fe   : > { %3532 = vrot.lane.b32.xlu1 %v3507_v5, %s4669_s23  ;;  %3530 = vrot.lane.b32.xlu0 %v3506_v2, %s4669_s23  ;;  %v6149_v44 = vpop.permute.xlu0 %2941 }
0x19ff   : > { %8666 = vst [vmem:[#allocation380_spill] sm:$0xff] %v6149_v44 }
0x1a02   : > { %3562 = vperm.xlu1 %4539, %v6060_v3   ;;  %3534 = vrot.lane.b32.xlu0 %v3508_v0, %s4669_s23  ;;  %v6151_v4 = vpop.permute.xlu0 %2945 }
0x1a03   : > { %8667 = vst [vmem:[#allocation381_spill] sm:$0xff] %v6151_v4 }
0x1a06   : > { %4540 = vset.pattern.permute.xlu1 %v4670_v11  ;;  %v6153_v23 = vpop.permute.xlu0 %2949 }
0x1a07   : > { %8668 = vst [vmem:[#allocation382_spill] sm:$0xff] %v6153_v23 }
0x1a0a   : > { %v6157_v5 = vpop.permute.xlu0 %2998 }
0x1a0b   : > { %8670 = vst [vmem:[#allocation384_spill] sm:$0xff] %v6157_v5 }
0x1a0e   : > { %v6161_v32 = vpop.permute.xlu0 %3002 }
0x1a0f   : > { %8672 = vst [vmem:[#allocation386_spill] sm:$0xff] %v6161_v32 }
0x1a12   : > { %v6165_v0 = vpop.permute.xlu0 %3006 }
0x1a13   : > { %8674 = vst [vmem:[#allocation388_spill] sm:$0xff] %v6165_v0 }
0x1a16   : > { %v6169_v28 = vpop.permute.xlu0 %3010 }
0x1a17   : > { %8676 = vst [vmem:[#allocation390_spill] sm:$0xff] %v6169_v28 }
0x1a64   : > { %v6155_v14 = vpop.permute.xlu1 %3520 }
0x1a65   : > { %8669 = vst [vmem:[#allocation383_spill] sm:$0xff] %v6155_v14  ;;  %v6173_v14 = vpop.permute.xlu0 %3014 }
0x1a66   : > { %8677 = vst [vmem:[#allocation391_spill] sm:$0xff] %v6173_v14 }
0x1a68   : > { %v6159_v2 = vpop.permute.xlu1 %3524 }
0x1a69   : > { %8671 = vst [vmem:[#allocation385_spill] sm:$0xff] %v6159_v2  ;;  %v6177_v32 = vpop.permute.xlu0 %3063 }
0x1a6a   : > { %8678 = vst [vmem:[#allocation392_spill] sm:$0xff] %v6177_v32 }
0x1a6c   : > { %v6163_v8 = vpop.permute.xlu1 %3528 }
0x1a6d   : > { %8673 = vst [vmem:[#allocation387_spill] sm:$0xff] %v6163_v8  ;;  %v6181_v0 = vpop.permute.xlu0 %3067 }
0x1a6e   : > { %8679 = vst [vmem:[#allocation393_spill] sm:$0xff] %v6181_v0 }
0x1a70   : > { %v6167_v11 = vpop.permute.xlu1 %3532 }
0x1a71   : > { %8675 = vst [vmem:[#allocation389_spill] sm:$0xff] %v6167_v11  ;;  %v6186_v5 = vpop.permute.xlu0 %3071 }
0x1a72   : > { %8680 = vst [vmem:[#allocation394_spill] sm:$0xff] %v6186_v5 }
0x1a7d   : > { %v3563_v44 = vpop.permute.xlu1 %3562 }
0x1a7e   : > { %v3566_v4 = vmul.f32 %v3563_v44, %v4747_v19  ;;  %v3565_v23 = vmul.f32 %v3563_v44, %v4740_v12  ;;  %v3568_v2 = vmul.f32 %v3563_v44, %v4742_v13  ;;  %v3567_v8 = vmul.f32 %v3563_v44, %v4756_v24 }
0x1a7f   : > { %v3570_v11 = vmul.f32 %v3563_v44, %v4749_v20  ;;  %v3569_v28 = vmul.f32 %v3563_v44, %v4764_v29  ;;  %v3572_v14 = vmul.f32 %v3563_v44, %v4758_v25 }
0x1a80   : > { %3585 = vrot.lane.b32.xlu1 %v3566_v4, %s4671_s24  ;;  %3583 = vrot.lane.b32.xlu0 %v3565_v23, %s4671_s24  ;;  %v3571_v23 = vmul.f32 %v3563_v44, %v4771_v33  ;;  %v3573_v4 = vmul.f32 %v3563_v44, %v4777_v36 }
0x1a84   : > { %3589 = vrot.lane.b32.xlu1 %v3568_v2, %s4671_s24  ;;  %3587 = vrot.lane.b32.xlu0 %v3567_v8, %s4671_s24  ;;  %v6189_v8 = vpop.permute.xlu0 %3075  ;;  %v4672_v2 = vmov 55  }
0x1a85   : > { %8681 = vst [vmem:[#allocation395_spill] sm:$0xff] %v6189_v8 }
0x1a88   : > { %3593 = vrot.lane.b32.xlu1 %v3570_v11, %s4671_s24  ;;  %3591 = vrot.lane.b32.xlu0 %v3569_v28, %s4671_s24  ;;  %v6191_v28 = vpop.permute.xlu0 %3079 }
0x1a89   : > { %8682 = vst [vmem:[#allocation396_spill] sm:$0xff] %v6191_v28 }
0x1a8c   : > { %3597 = vrot.lane.b32.xlu1 %v3572_v14, %s4671_s24  ;;  %3595 = vrot.lane.b32.xlu0 %v3571_v23, %s4671_s24  ;;  %v6193_v11 = vpop.permute.xlu0 %3128 }
0x1a8d   : > { %8683 = vst [vmem:[#allocation397_spill] sm:$0xff] %v6193_v11 }
0x1a90   : > { %3627 = vperm.xlu1 %4540, %v6060_v3   ;;  %3599 = vrot.lane.b32.xlu0 %v3573_v4, %s4671_s24  ;;  %v6195_v0 = vpop.permute.xlu0 %3132 }
0x1a91   : > { %8684 = vst [vmem:[#allocation398_spill] sm:$0xff] %v6195_v0 }
0x1a94   : > { %4541 = vset.pattern.permute.xlu1 %v4672_v2  ;;  %v6197_v32 = vpop.permute.xlu0 %3136 }
0x1a95   : > { %8685 = vst [vmem:[#allocation399_spill] sm:$0xff] %v6197_v32 }
0x1a98   : > { %v6199_v14 = vpop.permute.xlu0 %3140 }
0x1a99   : > { %8686 = vst [vmem:[#allocation400_spill] sm:$0xff] %v6199_v14 }
0x1a9c   : > { %v6201_v44 = vpop.permute.xlu0 %3144 }
0x1a9d   : > { %8687 = vst [vmem:[#allocation401_spill] sm:$0xff] %v6201_v44 }
0x1aa0   : > { %v6203_v23 = vpop.permute.xlu0 %3193 }
0x1aa1   : > { %8688 = vst [vmem:[#allocation402_spill] sm:$0xff] %v6203_v23 }
0x1aa4   : > { %v6205_v5 = vpop.permute.xlu0 %3197 }
0x1aa5   : > { %8689 = vst [vmem:[#allocation403_spill] sm:$0xff] %v6205_v5 }
0x1aa8   : > { %v6207_v4 = vpop.permute.xlu0 %3201 }
0x1aa9   : > { %8690 = vst [vmem:[#allocation404_spill] sm:$0xff] %v6207_v4 }
0x1aac   : > { %v6209_v8 = vpop.permute.xlu0 %3205 }
0x1aad   : > { %8691 = vst [vmem:[#allocation405_spill] sm:$0xff] %v6209_v8 }
0x1ab0   : > { %v6211_v2 = vpop.permute.xlu0 %3209 }
0x1ab1   : > { %8692 = vst [vmem:[#allocation406_spill] sm:$0xff] %v6211_v2 }
0x1ab4   : > { %v6213_v28 = vpop.permute.xlu0 %3258 }
0x1ab5   : > { %8693 = vst [vmem:[#allocation407_spill] sm:$0xff] %v6213_v28 }
0x1ab8   : > { %v6215_v11 = vpop.permute.xlu0 %3262 }
0x1ab9   : > { %8694 = vst [vmem:[#allocation408_spill] sm:$0xff] %v6215_v11 }
0x1abc   : > { %v6217_v0 = vpop.permute.xlu0 %3266 }
0x1abd   : > { %8695 = vst [vmem:[#allocation409_spill] sm:$0xff] %v6217_v0 }
0x1ac0   : > { %v6219_v32 = vpop.permute.xlu0 %3270 }
0x1ac1   : > { %8696 = vst [vmem:[#allocation410_spill] sm:$0xff] %v6219_v32 }
0x1ac4   : > { %v6221_v14 = vpop.permute.xlu0 %3274 }
0x1ac5   : > { %8697 = vst [vmem:[#allocation411_spill] sm:$0xff] %v6221_v14 }
0x1ac8   : > { %v6223_v44 = vpop.permute.xlu0 %3323 }
0x1ac9   : > { %8698 = vst [vmem:[#allocation412_spill] sm:$0xff] %v6223_v44 }
0x1acc   : > { %v6227_v5 = vpop.permute.xlu0 %3327 }
0x1acd   : > { %8700 = vst [vmem:[#allocation414_spill] sm:$0xff] %v6227_v5  ;;  %v225_v5 = vsel %vm221_vm0, %v4972_v41, %v4858_v45 }
0x1ad0   : > { %v6231_v8 = vpop.permute.xlu0 %3331 }
0x1ad1   : > { %8702 = vst [vmem:[#allocation416_spill] sm:$0xff] %v6231_v8 }
0x1ad4   : > { %v6235_v28 = vpop.permute.xlu0 %3335 }
0x1ad5   : > { %8704 = vst [vmem:[#allocation418_spill] sm:$0xff] %v6235_v28 }
0x1ad8   : > { %v6239_v32 = vpop.permute.xlu0 %3339 }
0x1ad9   : > { %8706 = vst [vmem:[#allocation420_spill] sm:$0xff] %v6239_v32 }
0x1af2   : > { %v6225_v23 = vpop.permute.xlu1 %3585 }
0x1af3   : > { %8699 = vst [vmem:[#allocation413_spill] sm:$0xff] %v6225_v23  ;;  %v6243_v23 = vpop.permute.xlu0 %3388 }
0x1af4   : > { %8707 = vst [vmem:[#allocation421_spill] sm:$0xff] %v6243_v23 }
0x1af6   : > { %v6229_v4 = vpop.permute.xlu1 %3589 }
0x1af7   : > { %8701 = vst [vmem:[#allocation415_spill] sm:$0xff] %v6229_v4  ;;  %v6249_v32 = vpop.permute.xlu0 %3392 }
0x1af8   : > { %8708 = vst [vmem:[#allocation422_spill] sm:$0xff] %v6249_v32  ;;  %v4674_v32 = vmov 56  }
0x1afa   : > { %v6233_v2 = vpop.permute.xlu1 %3593 }
0x1afb   : > { %8703 = vst [vmem:[#allocation417_spill] sm:$0xff] %v6233_v2 }
0x1afe   : > { %v6237_v11 = vpop.permute.xlu1 %3597 }
0x1aff   : > { %8705 = vst [vmem:[#allocation419_spill] sm:$0xff] %v6237_v11 }
0x1b0b   : > { %v3628_v0 = vpop.permute.xlu1 %3627 }
0x1b0c   : > { %v3631_v14 = vmul.f32 %v3628_v0, %v4747_v19  ;;  %v3630_v44 = vmul.f32 %v3628_v0, %v4740_v12  ;;  %v3633_v4 = vmul.f32 %v3628_v0, %v4742_v13  ;;  %v3632_v2 = vmul.f32 %v3628_v0, %v4756_v24 }
0x1b0d   : > { %v3635_v11 = vmul.f32 %v3628_v0, %v4749_v20  ;;  %v3634_v28 = vmul.f32 %v3628_v0, %v4764_v29  ;;  %v3637_v8 = vmul.f32 %v3628_v0, %v4758_v25  ;;  %v3638_v23 = vmul.f32 %v3628_v0, %v4777_v36 }
0x1b0e   : > { %3650 = vrot.lane.b32.xlu1 %v3631_v14, %s4673_s25  ;;  %3648 = vrot.lane.b32.xlu0 %v3630_v44, %s4673_s25  ;;  %v3636_v14 = vmul.f32 %v3628_v0, %v4771_v33  ;;  %v6253_v44 = vpop.permute.xlu0 %3396  ;;  %v167_v0 = vmul.f32 %v4736_v9, %v4756_v24 }
0x1b0f   : > { %8709 = vst [vmem:[#allocation423_spill] sm:$0xff] %v6253_v44  ;;  %v224_v44 = vsel %vm221_vm0, %v4854_v43, %v4972_v41  ;;  %v229_v41 = vsel %vm221_vm0, %v4981_v27, %v4862_v47  ;;  %v289_v47 = vsel %vm286_vm1, %v4990_v17, %v4868_v51 }
0x1b12   : > { %3654 = vrot.lane.b32.xlu1 %v3633_v4, %s4673_s25  ;;  %3652 = vrot.lane.b32.xlu0 %v3632_v2, %s4673_s25  ;;  %v6257_v4 = vpop.permute.xlu0 %3400 }
0x1b13   : > { %8710 = vst [vmem:[#allocation424_spill] sm:$0xff] %v6257_v4  ;;  %v223_v4 = vsel %vm221_vm0, %v4850_v40, %v4854_v43 }
0x1b16   : > { %3658 = vrot.lane.b32.xlu1 %v3635_v11, %s4673_s25  ;;  %3656 = vrot.lane.b32.xlu0 %v3634_v28, %s4673_s25  ;;  %v6259_v2 = vpop.permute.xlu0 %3404  ;;  %v166_v11 = vmul.f32 %v4736_v9, %v4747_v19 }
0x1b17   : > { %8711 = vst [vmem:[#allocation425_spill] sm:$0xff] %v6259_v2  ;;  %v222_v2 = vsel %vm221_vm0, %v4846_v37, %v4850_v40  ;;  %v226_v37 = vsel %vm221_vm0, %v4858_v45, %v4976_v48  ;;  %v227_v40 = vsel %vm221_vm0, %v4976_v48, %v4860_v46  ;;  %v287_v45 = vsel %vm286_vm1, %v4864_v49, %v4866_v50 }
0x1b18   : > { %v239_v43 = vadd.f32 %v223_v4, %v166_v11  ;;  %v290_v49 = vsel %vm286_vm1, %v4868_v51, %v4994_v35  ;;  %v293_v11 = vsel %vm286_vm1, %v5000_v42, %v4872_v53 }
0x1b1a   : > { %3662 = vrot.lane.b32.xlu1 %v3637_v8, %s4673_s25  ;;  %3660 = vrot.lane.b32.xlu0 %v3636_v14, %s4673_s25  ;;  %v6261_v28 = vpop.permute.xlu0 %3453  ;;  %v165_v8 = vmul.f32 %v4736_v9, %v4740_v12  ;;  %v171_v14 = vmul.f32 %v4736_v9, %v4771_v33 }
0x1b1b   : > { %8712 = vst [vmem:[#allocation426_spill] sm:$0xff] %v6261_v28  ;;  %v172_v28 = vmul.f32 %v4736_v9, %v4758_v25  ;;  %v240_v25 = vadd.f32 %v224_v44, %v167_v0 }
0x1b1c   : > { %v238_v36 = vadd.f32 %v222_v2, %v165_v8 }
0x1b1d   : > { %v305_v51 = vadd.f32 %v289_v47, %v240_v25  ;;  %v356_v25 = vsel %vm351_vm2, %v5022_v15, %v4878_v56  ;;  %v484_v47 = vsel %vm481_vm4, %v5074_v6, %v4892_v63 }
0x1b1e   : > { %3692 = vperm.xlu1 %4541, %v6060_v3   ;;  %3664 = vrot.lane.b32.xlu0 %v3638_v23, %s4673_s25  ;;  %v168_v3 = vmul.f32 %v4736_v9, %v4742_v13  ;;  %v169_v23 = vmul.f32 %v4736_v9, %v4764_v29  ;;  %v6306_v33 = vpop.permute.xlu0 %3457  ;;  %v303_v8 = vadd.f32 %v287_v45, %v238_v36 }
0x1b1f   : > { %v352_v36 = vsel %vm351_vm2, %v5009_v22, %v4874_v54 }
0x1b20   : > { %v241_v48 = vadd.f32 %v225_v5, %v168_v3  ;;  %v242_v29 = vadd.f32 %v226_v37, %v169_v23  ;;  %v291_v5 = vsel %vm286_vm1, %v4994_v35, %v4870_v52  ;;  %v353_v35 = vsel %vm351_vm2, %v4874_v54, %v5018_v21 }
0x1b21   : > { %v368_v54 = vadd.f32 %v352_v36, %v303_v8  ;;  %v417_v37 = vsel %vm416_vm3, %v5037_v31, %v4882_v58 }
0x1b22   : > { %4542 = vset.pattern.permute.xlu1 %v4674_v32  ;;  %v170_v32 = vmul.f32 %v4736_v9, %v4749_v20  ;;  %v228_v9 = vsel %vm221_vm0, %v4860_v46, %v4981_v27  ;;  %v288_v46 = vsel %vm286_vm1, %v4866_v50, %v4990_v17  ;;  %v245_v27 = vadd.f32 %v229_v41, %v172_v28  ;;  %v6344_v22 = vpop.permute.xlu0 %3461 }
0x1b23   : > { %v244_v4 = vadd.f32 %v228_v9, %v171_v14  ;;  %v292_v50 = vsel %vm286_vm1, %v4870_v52, %v5000_v42  ;;  %v304_v44 = vadd.f32 %v288_v46, %v239_v43  ;;  %v294_v17 = vsel %vm286_vm1, %v4872_v53, %v5004_v39 }
0x1b24   : > { %v243_v2 = vadd.f32 %v227_v40, %v170_v32  ;;  %v306_v28 = vadd.f32 %v290_v49, %v241_v48  ;;  %v354_v52 = vsel %vm351_vm2, %v5018_v21, %v4876_v55  ;;  %v307_v42 = vadd.f32 %v291_v5, %v242_v29  ;;  %v8714_v5 = vld [vmem:[#allocation6_spill] sm:$0xff] }
0x1b25   : > { %v355_v53 = vsel %vm351_vm2, %v4876_v55, %v5022_v15  ;;  %v309_v39 = vadd.f32 %v293_v11, %v244_v4  ;;  %v310_v3 = vadd.f32 %v294_v17, %v245_v27  ;;  %v357_v21 = vsel %vm351_vm2, %v4878_v56, %v5028_v16  ;;  %v8713_v27 = vld [vmem:[#allocation43_spill] sm:$0xff]  ;;  %v8717_v11 = vld [vmem:[#allocation45_spill] sm:$0xff] }
0x1b26   : > { %v308_v0 = vadd.f32 %v292_v50, %v243_v2  ;;  %v369_v23 = vadd.f32 %v353_v35, %v304_v44  ;;  %v370_v29 = vadd.f32 %v354_v52, %v305_v51  ;;  %v358_v32 = vsel %vm351_vm2, %v5028_v16, %v4880_v57  ;;  %v6382_v45 = vpop.permute.xlu0 %3465 }
0x1b27   : > { %v359_v55 = vsel %vm351_vm2, %v4880_v57, %v5032_v26  ;;  %v371_v15 = vadd.f32 %v355_v53, %v306_v28  ;;  %v372_v14 = vadd.f32 %v356_v25, %v307_v42  ;;  %v418_v56 = vsel %vm416_vm3, %v4882_v58, %v5046_v30  ;;  %v8721_v25 = vld [vmem:[#allocation9_spill] sm:$0xff] }
0x1b28   : > { %v373_v40 = vadd.f32 %v357_v21, %v308_v0  ;;  %v419_v9 = vsel %vm416_vm3, %v5046_v30, %v4884_v59  ;;  %v420_v16 = vsel %vm416_vm3, %v4884_v59, %v5050_v34  ;;  %v421_v57 = vsel %vm416_vm3, %v5050_v34, %v4886_v60  ;;  %v8720_v0 = vld [vmem:[#allocation51_spill] sm:$0xff] }
0x1b29   : > { %v374_v26 = vadd.f32 %v358_v32, %v309_v39  ;;  %v375_v31 = vadd.f32 %v359_v55, %v310_v3  ;;  %v422_v58 = vsel %vm416_vm3, %v4886_v60, %v5056_v18  ;;  %v423_v43 = vsel %vm416_vm3, %v5056_v18, %v4888_v61 }
0x1b2a   : > { %v433_v30 = vadd.f32 %v417_v37, %v368_v54  ;;  %v434_v41 = vadd.f32 %v418_v56, %v369_v23  ;;  %v424_v59 = vsel %vm416_vm3, %v4888_v61, %v5060_v38  ;;  %v482_v34 = vsel %vm481_vm4, %v5065_v7, %v4890_v62  ;;  %v6420_v3 = vpop.permute.xlu0 %3469  ;;  %v8724_v56 = vld [vmem:[#allocation53_spill] sm:$0xff] }
0x1b2b   : > { %v435_v48 = vadd.f32 %v419_v9, %v370_v29  ;;  %v436_v46 = vadd.f32 %v420_v16, %v371_v15  ;;  %v437_v2 = vadd.f32 %v421_v57, %v372_v14  ;;  %v483_v60 = vsel %vm481_vm4, %v4890_v62, %v5074_v6  ;;  %v8715_v6 = vld [vmem:[#allocation44_spill] sm:$0xff]  ;;  %v8723_v14 = vld [vmem:[#allocation10_spill] sm:$0xff]  ;;  %v8725_v57 = vld [vmem:[#allocation11_spill] sm:$0xff] }
0x1b2c   : > { %v438_v18 = vadd.f32 %v422_v58, %v373_v40  ;;  %v439_v4 = vadd.f32 %v423_v43, %v374_v26  ;;  %v485_v61 = vsel %vm481_vm4, %v4892_v63, %v5078_v10  ;;  %v440_v7 = vadd.f32 %v424_v59, %v375_v31  ;;  %v8716_v63 = vld [vmem:[#allocation7_spill] sm:$0xff]  ;;  %v8722_v29 = vld [vmem:[#allocation52_spill] sm:$0xff]  ;;  %v8726_v26 = vld [vmem:[#allocation54_spill] sm:$0xff] }
0x1b2d   : > { %v498_v38 = vadd.f32 %v482_v34, %v433_v30  ;;  %v486_v49 = vsel %vm481_vm4, %v5078_v10, %v4894_v1  ;;  %v487_v62 = vsel %vm481_vm4, %v4894_v1, %v8713_v27  ;;  %v499_v8 = vadd.f32 %v483_v60, %v434_v41  ;;  %v8718_v10 = vld [vmem:[#allocation49_spill] sm:$0xff]  ;;  %v8719_v1 = vld [vmem:[#allocation8_spill] sm:$0xff]  ;;  %v8727_v58 = vld [vmem:[#allocation59_spill] sm:$0xff] }
0x1b2e   : > { %v488_v50 = vsel %vm481_vm4, %v8713_v27, %v8714_v5  ;;  %v489_v44 = vsel %vm481_vm4, %v8714_v5, %v8715_v6  ;;  %v547_v17 = vsel %vm546_vm5, %v8717_v11, %v8716_v63  ;;  %v500_v36 = vadd.f32 %v484_v47, %v435_v48  ;;  %v8728_v41 = vld [vmem:[#allocation12_spill] sm:$0xff]  ;;  %v8731_v47 = vld [vmem:[#allocation61_spill] sm:$0xff]  ;;  %v8734_v6 = vld [vmem:[#allocation15_spill] sm:$0xff] }
0x1b2f   : > { %v501_v51 = vadd.f32 %v485_v61, %v436_v46  ;;  %v548_v28 = vsel %vm546_vm5, %v8716_v63, %v8718_v10  ;;  %v549_v35 = vsel %vm546_vm5, %v8718_v10, %v8719_v1  ;;  %v502_v52 = vadd.f32 %v486_v49, %v437_v2  ;;  %v8729_v34 = vld [vmem:[#allocation60_spill] sm:$0xff]  ;;  %v6443_v46 = vpop.permute.xlu0 %3518  ;;  %v8732_v49 = vld [vmem:[#allocation14_spill] sm:$0xff] }
0x1b30   : > { %v503_v42 = vadd.f32 %v487_v62, %v438_v18  ;;  %v550_v53 = vsel %vm546_vm5, %v8719_v1, %v8720_v0  ;;  %v551_v39 = vsel %vm546_vm5, %v8720_v0, %v8721_v25  ;;  %v504_v54 = vadd.f32 %v488_v50, %v439_v4  ;;  %v8730_v18 = vld [vmem:[#allocation13_spill] sm:$0xff]  ;;  %v8733_v62 = vld [vmem:[#allocation62_spill] sm:$0xff]  ;;  %v8736_v11 = vld [vmem:[#allocation68_spill] sm:$0xff] }
0x1b31   : > { %v505_v21 = vadd.f32 %v489_v44, %v440_v7  ;;  %v563_v23 = vadd.f32 %v547_v17, %v498_v38  ;;  %v552_v32 = vsel %vm546_vm5, %v8721_v25, %v8722_v29  ;;  %v564_v55 = vadd.f32 %v548_v28, %v499_v8  ;;  %v8735_v44 = vld [vmem:[#allocation63_spill] sm:$0xff]  ;;  %v8737_v10 = vld [vmem:[#allocation16_spill] sm:$0xff]  ;;  %v8739_v0 = vld [vmem:[#allocation17_spill] sm:$0xff] }
0x1b32   : > { %v565_v15 = vadd.f32 %v549_v35, %v500_v36  ;;  %v553_v37 = vsel %vm546_vm5, %v8722_v29, %v8723_v14  ;;  %v554_v40 = vsel %vm546_vm5, %v8723_v14, %v8724_v56  ;;  %v566_v9 = vadd.f32 %v550_v53, %v501_v51  ;;  %v8744_v56 = vld [vmem:[#allocation72_spill] sm:$0xff] }
0x1b33   : > { %v567_v16 = vadd.f32 %v551_v39, %v502_v52  ;;  %v612_v31 = vsel %vm611_vm6, %v8726_v26, %v8725_v57  ;;  %v613_v43 = vsel %vm611_vm6, %v8725_v57, %v8727_v58  ;;  %v568_v30 = vadd.f32 %v552_v32, %v503_v42  ;;  %v8738_v52 = vld [vmem:[#allocation69_spill] sm:$0xff]  ;;  %v6478_v32 = vpop.permute.xlu0 %3522 }
0x1b34   : > { %v614_v59 = vsel %vm611_vm6, %v8727_v58, %v8728_v41  ;;  %v615_v48 = vsel %vm611_vm6, %v8728_v41, %v8729_v34  ;;  %v569_v2 = vadd.f32 %v553_v37, %v504_v54  ;;  %v570_v60 = vadd.f32 %v554_v40, %v505_v21  ;;  %v8740_v54 = vld [vmem:[#allocation70_spill] sm:$0xff]  ;;  %v8743_v37 = vld [vmem:[#allocation19_spill] sm:$0xff] }
0x1b35   : > { %v616_v4 = vsel %vm611_vm6, %v8729_v34, %v8730_v18  ;;  %v617_v61 = vsel %vm611_vm6, %v8730_v18, %v8731_v47  ;;  %v628_v7 = vadd.f32 %v612_v31, %v563_v23  ;;  %v629_v38 = vadd.f32 %v613_v43, %v564_v55  ;;  %v8741_v23 = vld [vmem:[#allocation18_spill] sm:$0xff]  ;;  %v8746_v31 = vld [vmem:[#allocation20_spill] sm:$0xff]  ;;  %v8748_v34 = vld [vmem:[#allocation21_spill] sm:$0xff] }
0x1b36   : > { %v618_v27 = vsel %vm611_vm6, %v8731_v47, %v8732_v49  ;;  %v619_v8 = vsel %vm611_vm6, %v8732_v49, %v8733_v62  ;;  %v630_v5 = vadd.f32 %v614_v59, %v565_v15  ;;  %v631_v50 = vadd.f32 %v615_v48, %v566_v9  ;;  %v8742_v15 = vld [vmem:[#allocation71_spill] sm:$0xff]  ;;  %v8745_v9 = vld [vmem:[#allocation77_spill] sm:$0xff]  ;;  %v8747_v41 = vld [vmem:[#allocation78_spill] sm:$0xff] }
0x1b37   : > { %v677_v63 = vsel %vm676_vm7, %v8735_v44, %v8734_v6  ;;  %v678_v17 = vsel %vm676_vm7, %v8734_v6, %v8736_v11  ;;  %v632_v36 = vadd.f32 %v616_v4, %v567_v16  ;;  %v633_v51 = vadd.f32 %v617_v61, %v568_v30  ;;  %v8749_v4 = vld [vmem:[#allocation79_spill] sm:$0xff]  ;;  %v8751_v49 = vld [vmem:[#allocation80_spill] sm:$0xff]  ;;  %v8754_v44 = vld [vmem:[#allocation86_spill] sm:$0xff] }
0x1b38   : > { %v679_v28 = vsel %vm676_vm7, %v8736_v11, %v8737_v10  ;;  %v634_v1 = vadd.f32 %v618_v27, %v569_v2  ;;  %v635_v35 = vadd.f32 %v619_v8, %v570_v60  ;;  %v680_v42 = vsel %vm676_vm7, %v8737_v10, %v8738_v52  ;;  %v8752_v62 = vld [vmem:[#allocation23_spill] sm:$0xff]  ;;  %v8753_v8 = vld [vmem:[#allocation81_spill] sm:$0xff]  ;;  %v8755_v11 = vld [vmem:[#allocation24_spill] sm:$0xff] }
0x1b39   : > { %v681_v53 = vsel %vm676_vm7, %v8738_v52, %v8739_v0  ;;  %v693_v25 = vadd.f32 %v677_v63, %v628_v7  ;;  %v694_v39 = vadd.f32 %v678_v17, %v629_v38  ;;  %v682_v21 = vsel %vm676_vm7, %v8739_v0, %v8740_v54  ;;  %v8750_v7 = vld [vmem:[#allocation22_spill] sm:$0xff]  ;;  %v8756_v10 = vld [vmem:[#allocation87_spill] sm:$0xff] }
0x1b3a   : > { %v683_v29 = vsel %vm676_vm7, %v8740_v54, %v8741_v23  ;;  %v695_v55 = vadd.f32 %v679_v28, %v630_v5  ;;  %v684_v14 = vsel %vm676_vm7, %v8741_v23, %v8742_v15  ;;  %v742_v40 = vsel %vm741_vm8, %v8744_v56, %v8743_v37  ;;  %v8762_v56 = vld [vmem:[#allocation90_spill] sm:$0xff] }
0x1b3b   : > { %v743_v16 = vsel %vm741_vm8, %v8743_v37, %v8745_v9  ;;  %v696_v57 = vadd.f32 %v680_v42, %v631_v50  ;;  %v697_v26 = vadd.f32 %v681_v53, %v632_v36  ;;  %v744_v58 = vsel %vm741_vm8, %v8745_v9, %v8746_v31  ;;  %v6516_v36 = vpop.permute.xlu0 %3526  ;;  %v8758_v53 = vld [vmem:[#allocation88_spill] sm:$0xff]  ;;  %v8761_v37 = vld [vmem:[#allocation27_spill] sm:$0xff] }
0x1b3c   : > { %v698_v43 = vadd.f32 %v682_v21, %v633_v51  ;;  %v699_v30 = vadd.f32 %v683_v29, %v634_v1  ;;  %v745_v59 = vsel %vm741_vm8, %v8746_v31, %v8747_v41  ;;  %v746_v48 = vsel %vm741_vm8, %v8747_v41, %v8748_v34  ;;  %v8757_v1 = vld [vmem:[#allocation25_spill] sm:$0xff]  ;;  %v8759_v21 = vld [vmem:[#allocation26_spill] sm:$0xff]  ;;  %v8763_v9 = vld [vmem:[#allocation95_spill] sm:$0xff] }
0x1b3d   : > { %v700_v2 = vadd.f32 %v684_v14, %v635_v35  ;;  %v758_v60 = vadd.f32 %v742_v40, %v693_v25  ;;  %v759_v18 = vadd.f32 %v743_v16, %v694_v39  ;;  %v747_v47 = vsel %vm741_vm8, %v8748_v34, %v8749_v4  ;;  %v8760_v29 = vld [vmem:[#allocation89_spill] sm:$0xff] }
0x1b3e   : > { %v760_v61 = vadd.f32 %v744_v58, %v695_v55  ;;  %v748_v38 = vsel %vm741_vm8, %v8749_v4, %v8750_v7  ;;  %v749_v27 = vsel %vm741_vm8, %v8750_v7, %v8751_v49  ;;  %v807_v5 = vsel %vm806_vm9, %v8753_v8, %v8752_v62  ;;  %v8765_v58 = vld [vmem:[#allocation96_spill] sm:$0xff]  ;;  %v8769_v7 = vld [vmem:[#allocation98_spill] sm:$0xff]  ;;  %v8771_v8 = vld [vmem:[#allocation99_spill] sm:$0xff] }
0x1b3f   : > { %v761_v50 = vadd.f32 %v745_v59, %v696_v57  ;;  %v762_v6 = vadd.f32 %v746_v48, %v697_v26  ;;  %v808_v63 = vsel %vm806_vm9, %v8752_v62, %v8754_v44  ;;  %v809_v17 = vsel %vm806_vm9, %v8754_v44, %v8755_v11  ;;  %v8764_v26 = vld [vmem:[#allocation28_spill] sm:$0xff]  ;;  %v8766_v59 = vld [vmem:[#allocation29_spill] sm:$0xff]  ;;  %v8770_v62 = vld [vmem:[#allocation31_spill] sm:$0xff] }
0x1b40   : > { %v763_v51 = vadd.f32 %v747_v47, %v698_v43  ;;  %v810_v28 = vsel %vm806_vm9, %v8755_v11, %v8756_v10  ;;  %v811_v35 = vsel %vm806_vm9, %v8756_v10, %v8757_v1  ;;  %v764_v52 = vadd.f32 %v748_v38, %v699_v30  ;;  %v8767_v48 = vld [vmem:[#allocation97_spill] sm:$0xff]  ;;  %v8768_v47 = vld [vmem:[#allocation30_spill] sm:$0xff]  ;;  %v8773_v11 = vld [vmem:[#allocation32_spill] sm:$0xff] }
0x1b41   : > { %v765_v42 = vadd.f32 %v749_v27, %v700_v2  ;;  %v823_v0 = vadd.f32 %v807_v5, %v758_v60  ;;  %v812_v25 = vsel %vm806_vm9, %v8757_v1, %v8758_v53  ;;  %v824_v39 = vadd.f32 %v808_v63, %v759_v18  ;;  %v6551_v60 = vpop.permute.xlu0 %3530 }
0x1b42   : > { %v825_v54 = vadd.f32 %v809_v17, %v760_v61  ;;  %v813_v23 = vsel %vm806_vm9, %v8758_v53, %v8759_v21  ;;  %v814_v55 = vsel %vm806_vm9, %v8759_v21, %v8760_v29  ;;  %v826_v15 = vadd.f32 %v810_v28, %v761_v50  ;;  %v8772_v50 = vld [vmem:[#allocation104_spill] sm:$0xff]  ;;  %v8774_v28 = vld [vmem:[#allocation105_spill] sm:$0xff]  ;;  %v8776_v53 = vld [vmem:[#allocation106_spill] sm:$0xff] }
0x1b43   : > { %v827_v14 = vadd.f32 %v811_v35, %v762_v6  ;;  %v872_v40 = vsel %vm871_vm10, %v8762_v56, %v8761_v37  ;;  %v873_v16 = vsel %vm871_vm10, %v8761_v37, %v8763_v9  ;;  %v828_v57 = vadd.f32 %v812_v25, %v763_v51  ;;  %v8775_v35 = vld [vmem:[#allocation33_spill] sm:$0xff] }
0x1b44   : > { %v874_v31 = vsel %vm871_vm10, %v8763_v9, %v8764_v26  ;;  %v875_v43 = vsel %vm871_vm10, %v8764_v26, %v8765_v58  ;;  %v829_v30 = vadd.f32 %v813_v23, %v764_v52  ;;  %v830_v41 = vadd.f32 %v814_v55, %v765_v42  ;;  %v8778_v23 = vld [vmem:[#allocation107_spill] sm:$0xff]  ;;  %v8781_v37 = vld [vmem:[#allocation113_spill] sm:$0xff] }
0x1b45   : > { %v876_v34 = vsel %vm871_vm10, %v8765_v58, %v8766_v59  ;;  %v877_v2 = vsel %vm871_vm10, %v8766_v59, %v8767_v48  ;;  %v888_v18 = vadd.f32 %v872_v40, %v823_v0  ;;  %v889_v4 = vadd.f32 %v873_v16, %v824_v39  ;;  %v8777_v39 = vld [vmem:[#allocation34_spill] sm:$0xff]  ;;  %v8779_v55 = vld [vmem:[#allocation35_spill] sm:$0xff]  ;;  %v6589_v40 = vpop.permute.xlu0 %3534 }
0x1b46   : > { %v878_v61 = vsel %vm871_vm10, %v8767_v48, %v8768_v47  ;;  %v879_v38 = vsel %vm871_vm10, %v8768_v47, %v8769_v7  ;;  %v890_v49 = vadd.f32 %v874_v31, %v825_v54  ;;  %v891_v27 = vadd.f32 %v875_v43, %v826_v15  ;;  %v8780_v15 = vld [vmem:[#allocation108_spill] sm:$0xff]  ;;  %v8783_v43 = vld [vmem:[#allocation114_spill] sm:$0xff] }
0x1b47   : > { %v937_v5 = vsel %vm936_vm11, %v8771_v8, %v8770_v62  ;;  %v938_v6 = vsel %vm936_vm11, %v8770_v62, %v8772_v50  ;;  %v892_v44 = vadd.f32 %v876_v34, %v827_v14  ;;  %v893_v63 = vadd.f32 %v877_v2, %v828_v57  ;;  %v8782_v57 = vld [vmem:[#allocation36_spill] sm:$0xff]  ;;  %v8789_v62 = vld [vmem:[#allocation117_spill] sm:$0xff] }
0x1b48   : > { %v939_v17 = vsel %vm936_vm11, %v8772_v50, %v8773_v11  ;;  %v894_v51 = vadd.f32 %v878_v61, %v829_v30  ;;  %v895_v10 = vadd.f32 %v879_v38, %v830_v41  ;;  %v940_v1 = vsel %vm936_vm11, %v8773_v11, %v8774_v28  ;;  %v8784_v41 = vld [vmem:[#allocation37_spill] sm:$0xff]  ;;  %v8786_v61 = vld [vmem:[#allocation38_spill] sm:$0xff]  ;;  %v8787_v38 = vld [vmem:[#allocation116_spill] sm:$0xff] }
0x1b49   : > { %v941_v52 = vsel %vm936_vm11, %v8774_v28, %v8775_v35  ;;  %v953_v42 = vadd.f32 %v937_v5, %v888_v18  ;;  %v954_v0 = vadd.f32 %v938_v6, %v889_v4  ;;  %v942_v25 = vsel %vm936_vm11, %v8775_v35, %v8776_v53  ;;  %v8785_v18 = vld [vmem:[#allocation115_spill] sm:$0xff]  ;;  %v6612_v5 = vpop.permute.xlu0 %3583  ;;  %v8791_v11 = vld [vmem:[#allocation40_spill] sm:$0xff] }
0x1b4a   : > { %v943_v54 = vsel %vm936_vm11, %v8776_v53, %v8777_v39  ;;  %v955_v21 = vadd.f32 %v939_v17, %v890_v49  ;;  %v944_v29 = vsel %vm936_vm11, %v8777_v39, %v8778_v23  ;;  %v1002_v14 = vsel %vm1001_vm12, %v8780_v15, %v8779_v55  ;;  %v8794_v53 = vld [vmem:[#allocation124_spill] sm:$0xff] }
0x1b4b   : > { %v1003_v56 = vsel %vm1001_vm12, %v8779_v55, %v8781_v37  ;;  %v956_v9 = vadd.f32 %v940_v1, %v891_v27  ;;  %v957_v16 = vadd.f32 %v941_v52, %v892_v44  ;;  %v1004_v26 = vsel %vm1001_vm12, %v8781_v37, %v8782_v57  ;;  %v8788_v27 = vld [vmem:[#allocation39_spill] sm:$0xff]  ;;  %v8790_v44 = vld [vmem:[#allocation122_spill] sm:$0xff]  ;;  %v8793_v1 = vld [vmem:[#allocation41_spill] sm:$0xff] }
0x1b4c   : > { %v958_v31 = vadd.f32 %v942_v25, %v893_v63  ;;  %v959_v58 = vadd.f32 %v943_v54, %v894_v51  ;;  %v1005_v30 = vsel %vm1001_vm12, %v8782_v57, %v8783_v43  ;;  %v1006_v59 = vsel %vm1001_vm12, %v8783_v43, %v8784_v41  ;;  %v8797_v37 = vld [vmem:[#allocation46_spill] sm:$0xff]  ;;  %v8801_v43 = vld [vmem:[#allocation132_spill] sm:$0xff] }
0x1b4d   : > { %v960_v34 = vadd.f32 %v944_v29, %v895_v10  ;;  %v1018_v48 = vadd.f32 %v1002_v14, %v953_v42  ;;  %v1019_v2 = vadd.f32 %v1003_v56, %v954_v0  ;;  %v1007_v4 = vsel %vm1001_vm12, %v8784_v41, %v8785_v18  ;;  %v8792_v10 = vld [vmem:[#allocation123_spill] sm:$0xff]  ;;  %v8796_v29 = vld [vmem:[#allocation125_spill] sm:$0xff]  ;;  %v8798_v56 = vld [vmem:[#allocation126_spill] sm:$0xff]  ;;  %v6647_v41 = vpop.permute.xlu0 %3587 }
0x1b4e   : > { %v1020_v47 = vadd.f32 %v1004_v26, %v955_v21  ;;  %v1008_v7 = vsel %vm1001_vm12, %v8785_v18, %v8786_v61  ;;  %v1009_v49 = vsel %vm1001_vm12, %v8786_v61, %v8787_v38  ;;  %v1067_v8 = vsel %vm1066_vm13, %v8789_v62, %v8788_v27  ;;  %v8795_v21 = vld [vmem:[#allocation42_spill] sm:$0xff]  ;;  %v8803_v18 = vld [vmem:[#allocation133_spill] sm:$0xff] }
0x1b4f   : > { %v1021_v50 = vadd.f32 %v1005_v30, %v956_v9  ;;  %v1022_v6 = vadd.f32 %v1006_v59, %v957_v16  ;;  %v1068_v63 = vsel %vm1066_vm13, %v8788_v27, %v8790_v44  ;;  %v1069_v17 = vsel %vm1066_vm13, %v8790_v44, %v8791_v11  ;;  %v8799_v16 = vld [vmem:[#allocation131_spill] sm:$0xff] }
0x1b50   : > { %v1023_v51 = vadd.f32 %v1007_v4, %v958_v31  ;;  %v1070_v28 = vsel %vm1066_vm13, %v8791_v11, %v8792_v10  ;;  %v1071_v35 = vsel %vm1066_vm13, %v8792_v10, %v8793_v1  ;;  %v1024_v52 = vadd.f32 %v1008_v7, %v959_v58  ;;  %v8800_v31 = vld [vmem:[#allocation47_spill] sm:$0xff]  ;;  %v8804_v7 = vld [vmem:[#allocation50_spill] sm:$0xff]  ;;  %v8809_v10 = vld [vmem:[#allocation56_spill] sm:$0xff] }
0x1b51   : > { %v1025_v42 = vadd.f32 %v1009_v49, %v960_v34  ;;  %v1083_v0 = vadd.f32 %v1067_v8, %v1018_v48  ;;  %v1072_v25 = vsel %vm1066_vm13, %v8793_v1, %v8794_v53  ;;  %v1084_v39 = vadd.f32 %v1068_v63, %v1019_v2  ;;  %v8802_v48 = vld [vmem:[#allocation48_spill] sm:$0xff]  ;;  %v8805_v49 = vld [vmem:[#allocation134_spill] sm:$0xff] }
0x1b52   : > { %v1085_v54 = vadd.f32 %v1069_v17, %v1020_v47  ;;  %v1073_v23 = vsel %vm1066_vm13, %v8794_v53, %v8795_v21  ;;  %v1074_v55 = vsel %vm1066_vm13, %v8795_v21, %v8796_v29  ;;  %v1086_v15 = vadd.f32 %v1070_v28, %v1021_v50  ;;  %v8806_v50 = vld [vmem:[#allocation55_spill] sm:$0xff]  ;;  %v8808_v63 = vld [vmem:[#allocation140_spill] sm:$0xff] }
0x1b53   : > { %v1087_v14 = vadd.f32 %v1071_v35, %v1022_v6  ;;  %v1132_v9 = vsel %vm1131_vm14, %v8798_v56, %v8797_v37  ;;  %v1133_v57 = vsel %vm1131_vm14, %v8797_v37, %v8799_v16  ;;  %v1088_v26 = vadd.f32 %v1072_v25, %v1023_v51  ;;  %v8807_v6 = vld [vmem:[#allocation135_spill] sm:$0xff]  ;;  %v8815_v56 = vld [vmem:[#allocation64_spill] sm:$0xff] }
0x1b54   : > { %v1134_v58 = vsel %vm1131_vm14, %v8799_v16, %v8800_v31  ;;  %v1135_v30 = vsel %vm1131_vm14, %v8800_v31, %v8801_v43  ;;  %v1089_v59 = vadd.f32 %v1073_v23, %v1024_v52  ;;  %v1090_v34 = vadd.f32 %v1074_v55, %v1025_v42  ;;  %v8810_v52 = vld [vmem:[#allocation141_spill] sm:$0xff]  ;;  %v8813_v23 = vld [vmem:[#allocation58_spill] sm:$0xff]  ;;  %v6682_v55 = vpop.permute.xlu0 %3591 }
0x1b55   : > { %v1136_v2 = vsel %vm1131_vm14, %v8801_v43, %v8802_v48  ;;  %v1137_v4 = vsel %vm1131_vm14, %v8802_v48, %v8803_v18  ;;  %v1148_v47 = vadd.f32 %v1132_v9, %v1083_v0  ;;  %v1149_v61 = vadd.f32 %v1133_v57, %v1084_v39  ;;  %v8811_v0 = vld [vmem:[#allocation57_spill] sm:$0xff]  ;;  %v8816_v9 = vld [vmem:[#allocation144_spill] sm:$0xff] }
0x1b56   : > { %v1138_v38 = vsel %vm1131_vm14, %v8803_v18, %v8804_v7  ;;  %v1139_v27 = vsel %vm1131_vm14, %v8804_v7, %v8805_v49  ;;  %v1150_v62 = vadd.f32 %v1134_v58, %v1085_v54  ;;  %v1151_v8 = vadd.f32 %v1135_v30, %v1086_v15  ;;  %v8812_v54 = vld [vmem:[#allocation142_spill] sm:$0xff]  ;;  %v8817_v57 = vld [vmem:[#allocation149_spill] sm:$0xff] }
0x1b57   : > { %v1197_v44 = vsel %vm1196_vm15, %v8807_v6, %v8806_v50  ;;  %v1198_v11 = vsel %vm1196_vm15, %v8806_v50, %v8808_v63  ;;  %v1152_v17 = vadd.f32 %v1136_v2, %v1087_v14  ;;  %v1153_v51 = vadd.f32 %v1137_v4, %v1088_v26  ;;  %v8814_v14 = vld [vmem:[#allocation143_spill] sm:$0xff]  ;;  %v8818_v43 = vld [vmem:[#allocation65_spill] sm:$0xff]  ;;  %v8820_v18 = vld [vmem:[#allocation66_spill] sm:$0xff] }
0x1b58   : > { %v1199_v28 = vsel %vm1196_vm15, %v8808_v63, %v8809_v10  ;;  %vm1261_vm0 = vcmask 908288   ;;  %v1154_v1 = vadd.f32 %v1138_v38, %v1089_v59  ;;  %v1155_v35 = vadd.f32 %v1139_v27, %v1090_v34  ;;  %v8819_v59 = vld [vmem:[#allocation150_spill] sm:$0xff]  ;;  %v8821_v38 = vld [vmem:[#allocation151_spill] sm:$0xff]  ;;  %v8823_v6 = vld [vmem:[#allocation152_spill] sm:$0xff] }
0x1b59   : > { %v1200_v42 = vsel %vm1196_vm15, %v8809_v10, %v8810_v52  ;;  %v1201_v53 = vsel %vm1196_vm15, %v8810_v52, %v8811_v0  ;;  %v1213_v25 = vadd.f32 %v1197_v44, %v1148_v47  ;;  %v1214_v39 = vadd.f32 %v1198_v11, %v1149_v61  ;;  %v8824_v11 = vld [vmem:[#allocation73_spill] sm:$0xff]  ;;  %v8826_v10 = vld [vmem:[#allocation158_spill] sm:$0xff] }
0x1b5a   : > { %v1202_v21 = vsel %vm1196_vm15, %v8811_v0, %v8812_v54  ;;  %v1203_v29 = vsel %vm1196_vm15, %v8812_v54, %v8813_v23  ;;  %v1215_v15 = vadd.f32 %v1199_v28, %v1150_v62  ;;  %v1204_v37 = vsel %vm1196_vm15, %v8813_v23, %v8814_v14  ;;  %v8827_v52 = vld [vmem:[#allocation74_spill] sm:$0xff]  ;;  %v8828_v0 = vld [vmem:[#allocation159_spill] sm:$0xff]  ;;  %v8830_v23 = vld [vmem:[#allocation160_spill] sm:$0xff] }
0x1b5b   : > { %v1262_v16 = vsel %vm1261_vm0, %v8816_v9, %v8815_v56  ;;  %v1263_v26 = vsel %vm1261_vm0, %v8815_v56, %v8817_v57  ;;  %v1216_v31 = vadd.f32 %v1200_v42, %v1151_v8  ;;  %v1217_v58 = vadd.f32 %v1201_v53, %v1152_v17  ;;  %v8822_v8 = vld [vmem:[#allocation67_spill] sm:$0xff]  ;;  %v8825_v17 = vld [vmem:[#allocation153_spill] sm:$0xff] }
0x1b5c   : > { %v1264_v30 = vsel %vm1261_vm0, %v8817_v57, %v8818_v43  ;;  %v1265_v34 = vsel %vm1261_vm0, %v8818_v43, %v8819_v59  ;;  %v1218_v48 = vadd.f32 %v1202_v21, %v1153_v51  ;;  %v1219_v2 = vadd.f32 %v1203_v29, %v1154_v1  ;;  %v6717_v1 = vpop.permute.xlu0 %3595  ;;  %v8832_v9 = vld [vmem:[#allocation161_spill] sm:$0xff]  ;;  %v8833_v57 = vld [vmem:[#allocation82_spill] sm:$0xff] }
0x1b5d   : > { %v1266_v4 = vsel %vm1261_vm0, %v8819_v59, %v8820_v18  ;;  %vm1326_vm1 = vcmask 900096   ;;  %v1220_v47 = vadd.f32 %v1204_v37, %v1155_v35  ;;  %v1278_v61 = vadd.f32 %v1262_v16, %v1213_v25  ;;  %v8829_v25 = vld [vmem:[#allocation75_spill] sm:$0xff] }
0x1b5e   : > { %v1279_v7 = vadd.f32 %v1263_v26, %v1214_v39  ;;  %v1267_v49 = vsel %vm1261_vm0, %v8820_v18, %v8821_v38  ;;  %v1280_v27 = vadd.f32 %v1264_v30, %v1215_v15  ;;  %v1281_v62 = vadd.f32 %v1265_v34, %v1216_v31  ;;  %v8831_v15 = vld [vmem:[#allocation76_spill] sm:$0xff]  ;;  %v8834_v26 = vld [vmem:[#allocation162_spill] sm:$0xff]  ;;  %v8835_v59 = vld [vmem:[#allocation167_spill] sm:$0xff] }
0x1b5f   : > { %v1268_v50 = vsel %vm1261_vm0, %v8821_v38, %v8822_v8  ;;  %v1269_v44 = vsel %vm1261_vm0, %v8822_v8, %v8823_v6  ;;  %v1282_v63 = vadd.f32 %v1266_v4, %v1217_v58  ;;  %v1327_v51 = vsel %vm1326_vm1, %v8825_v17, %v8824_v11  ;;  %v8836_v18 = vld [vmem:[#allocation83_spill] sm:$0xff] }
0x1b60   : > { %v1328_v28 = vsel %vm1326_vm1, %v8824_v11, %v8826_v10  ;;  %vm1391_vm2 = vcmask 891904   ;;  %v1283_v35 = vadd.f32 %v1267_v49, %v1218_v48  ;;  %v1329_v42 = vsel %vm1326_vm1, %v8826_v10, %v8827_v52  ;;  %v8838_v49 = vld [vmem:[#allocation84_spill] sm:$0xff]  ;;  %v8841_v11 = vld [vmem:[#allocation170_spill] sm:$0xff]  ;;  %v8842_v10 = vld [vmem:[#allocation91_spill] sm:$0xff] }
0x1b61   : > { %v1330_v53 = vsel %vm1326_vm1, %v8827_v52, %v8828_v0  ;;  %v1331_v39 = vsel %vm1326_vm1, %v8828_v0, %v8829_v25  ;;  %v1284_v54 = vadd.f32 %v1268_v50, %v1219_v2  ;;  %v1285_v21 = vadd.f32 %v1269_v44, %v1220_v47  ;;  %v8839_v50 = vld [vmem:[#allocation169_spill] sm:$0xff]  ;;  %v8844_v52 = vld [vmem:[#allocation176_spill] sm:$0xff] }
0x1b62   : > { %v1332_v29 = vsel %vm1326_vm1, %v8829_v25, %v8830_v23  ;;  %v1333_v14 = vsel %vm1326_vm1, %v8830_v23, %v8831_v15  ;;  %v1343_v37 = vadd.f32 %v1327_v51, %v1278_v61  ;;  %v1344_v56 = vadd.f32 %v1328_v28, %v1279_v7  ;;  %v8837_v7 = vld [vmem:[#allocation168_spill] sm:$0xff]  ;;  %v8840_v44 = vld [vmem:[#allocation85_spill] sm:$0xff]  ;;  %v8843_v28 = vld [vmem:[#allocation171_spill] sm:$0xff] }
0x1b63   : > { %v1334_v16 = vsel %vm1326_vm1, %v8831_v15, %v8832_v9  ;;  %v1392_v31 = vsel %vm1391_vm2, %v8834_v26, %v8833_v57  ;;  %v1345_v58 = vadd.f32 %v1329_v42, %v1280_v27  ;;  %v1346_v43 = vadd.f32 %v1330_v53, %v1281_v62  ;;  %v6752_v62 = vpop.permute.xlu0 %3599  ;;  %v8845_v0 = vld [vmem:[#allocation92_spill] sm:$0xff]  ;;  %v8847_v23 = vld [vmem:[#allocation93_spill] sm:$0xff] }
0x1b64   : > { %v1347_v30 = vadd.f32 %v1331_v39, %v1282_v63  ;;  %v1393_v34 = vsel %vm1391_vm2, %v8833_v57, %v8835_v59  ;;  %v1348_v48 = vadd.f32 %v1332_v29, %v1283_v35  ;;  %v1349_v2 = vadd.f32 %v1333_v14, %v1284_v54  ;;  %v8846_v54 = vld [vmem:[#allocation177_spill] sm:$0xff] }
0x1b65   : > { %v1394_v4 = vsel %vm1391_vm2, %v8835_v59, %v8836_v18  ;;  %vm1456_vm3 = vcmask 883712   ;;  %v1350_v47 = vadd.f32 %v1334_v16, %v1285_v21  ;;  %v1408_v61 = vadd.f32 %v1392_v31, %v1343_v37  ;;  %v8848_v31 = vld [vmem:[#allocation178_spill] sm:$0xff] }
0x1b66   : > { %v1395_v38 = vsel %vm1391_vm2, %v8836_v18, %v8837_v7  ;;  %v1396_v27 = vsel %vm1391_vm2, %v8837_v7, %v8838_v49  ;;  %v1409_v8 = vadd.f32 %v1393_v34, %v1344_v56  ;;  %v1397_v6 = vsel %vm1391_vm2, %v8838_v49, %v8839_v50  ;;  %v8849_v59 = vld [vmem:[#allocation94_spill] sm:$0xff]  ;;  %v8851_v18 = vld [vmem:[#allocation100_spill] sm:$0xff] }
0x1b67   : > { %v1398_v63 = vsel %vm1391_vm2, %v8839_v50, %v8840_v44  ;;  %v1399_v17 = vsel %vm1391_vm2, %v8840_v44, %v8841_v11  ;;  %v1410_v51 = vadd.f32 %v1394_v4, %v1345_v58  ;;  %v1457_v35 = vsel %vm1456_vm3, %v8843_v28, %v8842_v10  ;;  %v8852_v4 = vld [vmem:[#allocation180_spill] sm:$0xff] }
0x1b68   : > { %v1458_v42 = vsel %vm1456_vm3, %v8842_v10, %v8844_v52  ;;  %v1459_v53 = vsel %vm1456_vm3, %v8844_v52, %v8845_v0  ;;  %v1411_v25 = vadd.f32 %v1395_v38, %v1346_v43  ;;  %v1412_v39 = vadd.f32 %v1396_v27, %v1347_v30  ;;  %v8854_v38 = vld [vmem:[#allocation101_spill] sm:$0xff]  ;;  %v8855_v27 = vld [vmem:[#allocation186_spill] sm:$0xff]  ;;  %v8857_v10 = vld [vmem:[#allocation187_spill] sm:$0xff] }
0x1b69   : > { %v1460_v21 = vsel %vm1456_vm3, %v8845_v0, %v8846_v54  ;;  %v1461_v29 = vsel %vm1456_vm3, %v8846_v54, %v8847_v23  ;;  %v1413_v15 = vadd.f32 %v1397_v6, %v1348_v48  ;;  %v1414_v14 = vadd.f32 %v1398_v63, %v1349_v2  ;;  %v8850_v48 = vld [vmem:[#allocation179_spill] sm:$0xff]  ;;  %v8856_v6 = vld [vmem:[#allocation102_spill] sm:$0xff] }
0x1b6a   : > { %v1415_v37 = vadd.f32 %v1399_v17, %v1350_v47  ;;  %vm1521_vm4 = vcmask 875520   ;;  %v1473_v16 = vadd.f32 %v1457_v35, %v1408_v61  ;;  %v1474_v57 = vadd.f32 %v1458_v42, %v1409_v8  ;;  %v8853_v61 = vld [vmem:[#allocation185_spill] sm:$0xff] }
0x1b6b   : > { %v1475_v26 = vadd.f32 %v1459_v53, %v1410_v51  ;;  %v1462_v58 = vsel %vm1456_vm3, %v8847_v23, %v8848_v31  ;;  %v1476_v43 = vadd.f32 %v1460_v21, %v1411_v25  ;;  %v1477_v30 = vadd.f32 %v1461_v29, %v1412_v39  ;;  %v8858_v39 = vld [vmem:[#allocation103_spill] sm:$0xff]  ;;  %v8859_v21 = vld [vmem:[#allocation188_spill] sm:$0xff]  ;;  %v8860_v29 = vld [vmem:[#allocation109_spill] sm:$0xff] }
0x1b6c   : > { %v1463_v34 = vsel %vm1456_vm3, %v8848_v31, %v8849_v59  ;;  %v1464_v2 = vsel %vm1456_vm3, %v8849_v59, %v8850_v48  ;;  %v1522_v47 = vsel %vm1521_vm4, %v8852_v4, %v8851_v18  ;;  %v1523_v7 = vsel %vm1521_vm4, %v8851_v18, %v8853_v61  ;;  %v8862_v31 = vld [vmem:[#allocation194_spill] sm:$0xff] }
0x1b6d   : > { %v1524_v49 = vsel %vm1521_vm4, %v8853_v61, %v8854_v38  ;;  %v1525_v8 = vsel %vm1521_vm4, %v8854_v38, %v8855_v27  ;;  %v1478_v50 = vadd.f32 %v1462_v58, %v1413_v15  ;;  %v1526_v44 = vsel %vm1521_vm4, %v8855_v27, %v8856_v6  ;;  %v8861_v15 = vld [vmem:[#allocation189_spill] sm:$0xff]  ;;  %v8864_v58 = vld [vmem:[#allocation195_spill] sm:$0xff] }
0x1b6e   : > { %vm1586_vm5 = vcmask 867328   ;;  %vm3666_vm6 = vcmask 605184   ;;  %v1479_v17 = vadd.f32 %v1463_v34, %v1414_v14  ;;  %v1480_v51 = vadd.f32 %v1464_v2, %v1415_v37  ;;  %v8865_v34 = vld [vmem:[#allocation111_spill] sm:$0xff] }
0x1b6f   : > { %v1527_v28 = vsel %vm1521_vm4, %v8856_v6, %v8857_v10  ;;  %v1538_v52 = vadd.f32 %v1522_v47, %v1473_v16  ;;  %v1539_v42 = vadd.f32 %v1523_v7, %v1474_v57  ;;  %v1540_v0 = vadd.f32 %v1524_v49, %v1475_v26  ;;  %v8863_v57 = vld [vmem:[#allocation110_spill] sm:$0xff]  ;;  %v8866_v7 = vld [vmem:[#allocation196_spill] sm:$0xff] }
0x1b70   : > { %v1541_v53 = vadd.f32 %v1525_v8, %v1476_v43  ;;  %v1542_v25 = vadd.f32 %v1526_v44, %v1477_v30  ;;  %v1528_v54 = vsel %vm1521_vm4, %v8857_v10, %v8858_v39  ;;  %v1529_v23 = vsel %vm1521_vm4, %v8858_v39, %v8859_v21 }
0x1b71   : > { %v1587_v14 = vsel %vm1586_vm5, %v8861_v15, %v8860_v29  ;;  %v1543_v37 = vadd.f32 %v1527_v28, %v1478_v50  ;;  %v1588_v16 = vsel %vm1586_vm5, %v8860_v29, %v8862_v31  ;;  %v1589_v26 = vsel %vm1586_vm5, %v8862_v31, %v8863_v57  ;;  %v8867_v50 = vld [vmem:[#allocation112_spill] sm:$0xff]  ;;  %v8869_v28 = vld [vmem:[#allocation118_spill] sm:$0xff] }
0x1b72   : > { %v1590_v43 = vsel %vm1586_vm5, %v8863_v57, %v8864_v58  ;;  %v1591_v48 = vsel %vm1586_vm5, %v8864_v58, %v8865_v34  ;;  %vm1651_vm7 = vcmask 859136   ;;  %v1544_v4 = vadd.f32 %v1528_v54, %v1479_v17  ;;  %v8870_v17 = vld [vmem:[#allocation198_spill] sm:$0xff]  ;;  %v8873_v15 = vld [vmem:[#allocation204_spill] sm:$0xff]  ;;  %v8875_v58 = vld [vmem:[#allocation205_spill] sm:$0xff] }
0x1b73   : > { %v1545_v47 = vadd.f32 %v1529_v23, %v1480_v51  ;;  %v1603_v61 = vadd.f32 %v1587_v14, %v1538_v52  ;;  %v1592_v38 = vsel %vm1586_vm5, %v8865_v34, %v8866_v7  ;;  %v1604_v49 = vadd.f32 %v1588_v16, %v1539_v42  ;;  %v8871_v52 = vld [vmem:[#allocation203_spill] sm:$0xff]  ;;  %v8874_v31 = vld [vmem:[#allocation120_spill] sm:$0xff]  ;;  %v8877_v34 = vld [vmem:[#allocation206_spill] sm:$0xff] }
0x1b74   : > { %v1605_v27 = vadd.f32 %v1589_v26, %v1540_v0  ;;  %v1606_v8 = vadd.f32 %v1590_v43, %v1541_v53  ;;  %v1593_v6 = vsel %vm1586_vm5, %v8866_v7, %v8867_v50  ;;  %v1607_v44 = vadd.f32 %v1591_v48, %v1542_v25  ;;  %v8872_v23 = vld [vmem:[#allocation119_spill] sm:$0xff] }
0x1b75   : > { %v1652_v51 = vsel %vm1651_vm7, %v8870_v17, %v8869_v28  ;;  %v1653_v39 = vsel %vm1651_vm7, %v8869_v28, %v8871_v52  ;;  %v1608_v53 = vadd.f32 %v1592_v38, %v1543_v37  ;;  %vm1716_vm8 = vcmask 850944   ;;  %v8879_v7 = vld [vmem:[#allocation207_spill] sm:$0xff]  ;;  %v8882_v17 = vld [vmem:[#allocation213_spill] sm:$0xff] }
0x1b76   : > { %v1609_v21 = vadd.f32 %v1593_v6, %v1544_v4  ;;  %v1654_v29 = vsel %vm1651_vm7, %v8871_v52, %v8872_v23  ;;  %v1655_v14 = vsel %vm1651_vm7, %v8872_v23, %v8873_v15  ;;  %v1656_v37 = vsel %vm1651_vm7, %v8873_v15, %v8874_v31  ;;  %v8878_v4 = vld [vmem:[#allocation127_spill] sm:$0xff]  ;;  %v8883_v52 = vld [vmem:[#allocation129_spill] sm:$0xff] }
0x1b77   : > { %v1668_v57 = vadd.f32 %v1652_v51, %v1603_v61  ;;  %v1669_v26 = vadd.f32 %v1653_v39, %v1604_v49  ;;  %v1657_v43 = vsel %vm1651_vm7, %v8874_v31, %v8875_v58  ;;  %v1717_v38 = vsel %vm1716_vm8, %v8879_v7, %v8878_v4  ;;  %v8892_v7 = vld [vmem:[#allocation138_spill] sm:$0xff] }
0x1b78   : > { %v1670_v61 = vadd.f32 %v1654_v29, %v1605_v27  ;;  %v1671_v49 = vadd.f32 %v1655_v14, %v1606_v8  ;;  %v1672_v6 = vadd.f32 %v1656_v37, %v1607_v44  ;;  %vm1781_vm9 = vcmask 842752   ;;  %v8884_v8 = vld [vmem:[#allocation214_spill] sm:$0xff]  ;;  %v8886_v14 = vld [vmem:[#allocation215_spill] sm:$0xff]  ;;  %v8887_v37 = vld [vmem:[#allocation136_spill] sm:$0xff] }
0x1b79   : > { %v1721_v39 = vsel %vm1716_vm8, %v8882_v17, %v8883_v52  ;;  %v1733_v15 = vadd.f32 %v1717_v38, %v1668_v57  ;;  %v1722_v44 = vsel %vm1716_vm8, %v8883_v52, %v8884_v8  ;;  %vm1846_vm10 = vcmask 834560   ;;  %v8895_v52 = vld [vmem:[#allocation224_spill] sm:$0xff] }
0x1b7a   : > { %v1737_v57 = vadd.f32 %v1721_v39, %v1672_v6  ;;  %vm1911_vm11 = vcmask 826368   ;;  %vm1976_vm12 = vcmask 818176   ;;  %vm2041_vm13 = vcmask 809984  }
0x1b7b   : > { %vm2106_vm14 = vcmask 801792   ;;  %vm2171_vm15 = vcmask 793600   ;;  %vm2236_vm0 = vcmask 785408   ;;  %vm2301_vm1 = vcmask 777216  }
0x1b7c   : > { %vm2366_vm2 = vcmask 769024   ;;  %vm2431_vm3 = vcmask 760832   ;;  %vm2496_vm4 = vcmask 752640  }
0x1b80   : > { %v6778_v56 = vpop.permute.xlu1 %3650  ;;  %v6780_v9 = vpop.permute.xlu0 %3648 }
0x1b84   : > { %v3655_v63 = vpop.permute.xlu1 %3654  ;;  %v6806_v11 = vpop.permute.xlu0 %3652 }
0x1b85   : > { %v6813_v35 = vsel %vm3666_vm6, %v6806_v11, %v3655_v63 }
0x1b88   : > { %v3659_v30 = vpop.permute.xlu1 %3658  ;;  %v3657_v59 = vpop.permute.xlu0 %3656 }
0x1b89   : > { %v6837_v2 = vsel %vm3666_vm6, %v3655_v63, %v3657_v59  ;;  %v6840_v18 = vsel %vm3666_vm6, %v3657_v59, %v3659_v30  ;;  %v8868_v63 = vld [vmem:[#allocation197_spill] sm:$0xff] }
0x1b8a   : > { %v1594_v10 = vsel %vm1586_vm5, %v8867_v50, %v8868_v63  ;;  %v8880_v50 = vld [vmem:[#allocation212_spill] sm:$0xff]  ;;  %v1673_v63 = vadd.f32 %v1657_v43, %v1608_v53  ;;  %v8885_v53 = vld [vmem:[#allocation130_spill] sm:$0xff]  ;;  %vm2561_vm5 = vcmask 744448  }
0x1b8b   : > { %v1610_v16 = vadd.f32 %v1594_v10, %v1545_v47  ;;  %v1718_v47 = vsel %vm1716_vm8, %v8878_v4, %v8880_v50  ;;  %v8881_v10 = vld [vmem:[#allocation128_spill] sm:$0xff]  ;;  %v1723_v29 = vsel %vm1716_vm8, %v8884_v8, %v8885_v53  ;;  %v1724_v31 = vsel %vm1716_vm8, %v8885_v53, %v8886_v14 }
0x1b8c   : > { %v6857_v42 = vpop.permute.xlu1 %3662  ;;  %v3661_v0 = vpop.permute.xlu0 %3660  ;;  %v1719_v28 = vsel %vm1716_vm8, %v8880_v50, %v8881_v10  ;;  %v1720_v51 = vsel %vm1716_vm8, %v8881_v10, %v8882_v17  ;;  %v1734_v27 = vadd.f32 %v1718_v47, %v1669_v26  ;;  %v8889_v26 = vld [vmem:[#allocation221_spill] sm:$0xff]  ;;  %v1738_v50 = vadd.f32 %v1722_v44, %v1673_v63  ;;  %v8893_v10 = vld [vmem:[#allocation223_spill] sm:$0xff] }
0x1b8d   : > { %v6860_v54 = vsel %vm3666_vm6, %v3659_v30, %v3661_v0  ;;  %v6864_v25 = vsel %vm3666_vm6, %v3661_v0, %v6857_v42  ;;  %v8876_v30 = vld [vmem:[#allocation121_spill] sm:$0xff]  ;;  %v8894_v17 = vld [vmem:[#allocation139_spill] sm:$0xff]  ;;  %vm2691_vm8 = vcmask 728064  }
0x1b8e   : > { %v1658_v59 = vsel %vm1651_vm7, %v8875_v58, %v8876_v30  ;;  %v1659_v48 = vsel %vm1651_vm7, %v8876_v30, %v8877_v34  ;;  %v8888_v58 = vld [vmem:[#allocation216_spill] sm:$0xff]  ;;  %v1783_v30 = vsel %vm1781_vm9, %v8887_v37, %v8889_v26  ;;  %v1789_v39 = vsel %vm1781_vm9, %v8894_v17, %v8895_v52  ;;  %v8896_v63 = vld [vmem:[#allocation145_spill] sm:$0xff] }
0x1b8f   : > { %v1674_v0 = vadd.f32 %v1658_v59, %v1609_v21  ;;  %v1675_v23 = vadd.f32 %v1659_v48, %v1610_v16  ;;  %v1782_v43 = vsel %vm1781_vm9, %v8888_v58, %v8887_v37  ;;  %v1735_v21 = vadd.f32 %v1719_v28, %v1670_v61  ;;  %v8890_v59 = vld [vmem:[#allocation137_spill] sm:$0xff]  ;;  %v8891_v48 = vld [vmem:[#allocation222_spill] sm:$0xff] }
0x1b90   : > { %v1736_v16 = vadd.f32 %v1720_v51, %v1671_v49  ;;  %v1784_v34 = vsel %vm1781_vm9, %v8889_v26, %v8890_v59  ;;  %v1785_v4 = vsel %vm1781_vm9, %v8890_v59, %v8891_v48  ;;  %v1786_v38 = vsel %vm1781_vm9, %v8891_v48, %v8892_v7 }
0x1b91   : > { %v1739_v47 = vadd.f32 %v1723_v29, %v1674_v0  ;;  %v1740_v61 = vadd.f32 %v1724_v31, %v1675_v23  ;;  %v1798_v49 = vadd.f32 %v1782_v43, %v1733_v15  ;;  %v1799_v6 = vadd.f32 %v1783_v30, %v1734_v27  ;;  %v8897_v0 = vld [vmem:[#allocation225_spill] sm:$0xff]  ;;  %v8898_v27 = vld [vmem:[#allocation230_spill] sm:$0xff]  ;;  %v8901_v30 = vld [vmem:[#allocation147_spill] sm:$0xff] }
0x1b92   : > { %v1787_v28 = vsel %vm1781_vm9, %v8892_v7, %v8893_v10  ;;  %v1788_v51 = vsel %vm1781_vm9, %v8893_v10, %v8894_v17  ;;  %v1800_v8 = vadd.f32 %v1784_v34, %v1735_v21  ;;  %v1801_v53 = vadd.f32 %v1785_v4, %v1736_v16  ;;  %v8899_v29 = vld [vmem:[#allocation146_spill] sm:$0xff]  ;;  %v8902_v34 = vld [vmem:[#allocation232_spill] sm:$0xff] }
0x1b93   : > { %v1802_v14 = vadd.f32 %v1786_v38, %v1737_v57  ;;  %v1847_v23 = vsel %vm1846_vm10, %v8897_v0, %v8896_v63  ;;  %v1848_v44 = vsel %vm1846_vm10, %v8896_v63, %v8898_v27  ;;  %v1849_v31 = vsel %vm1846_vm10, %v8898_v27, %v8899_v29  ;;  %v8900_v57 = vld [vmem:[#allocation231_spill] sm:$0xff]  ;;  %v8906_v17 = vld [vmem:[#allocation234_spill] sm:$0xff] }
0x1b94   : > { %v1803_v43 = vadd.f32 %v1787_v28, %v1738_v50  ;;  %v1804_v21 = vadd.f32 %v1788_v51, %v1739_v47  ;;  %v1805_v16 = vadd.f32 %v1789_v39, %v1740_v61  ;;  %v1850_v26 = vsel %vm1846_vm10, %v8899_v29, %v8900_v57  ;;  %v8903_v50 = vld [vmem:[#allocation148_spill] sm:$0xff]  ;;  %v8904_v61 = vld [vmem:[#allocation233_spill] sm:$0xff]  ;;  %v8905_v28 = vld [vmem:[#allocation154_spill] sm:$0xff] }
0x1b95   : > { %v1851_v59 = vsel %vm1846_vm10, %v8900_v57, %v8901_v30  ;;  %v1852_v48 = vsel %vm1846_vm10, %v8901_v30, %v8902_v34  ;;  %v1863_v4 = vadd.f32 %v1847_v23, %v1798_v49  ;;  %v1864_v7 = vadd.f32 %v1848_v44, %v1799_v6  ;;  %v8907_v63 = vld [vmem:[#allocation239_spill] sm:$0xff]  ;;  %v8909_v44 = vld [vmem:[#allocation240_spill] sm:$0xff]  ;;  %v8911_v57 = vld [vmem:[#allocation241_spill] sm:$0xff] }
0x1b96   : > { %v1865_v38 = vadd.f32 %v1849_v31, %v1800_v8  ;;  %v1853_v47 = vsel %vm1846_vm10, %v8902_v34, %v8903_v50  ;;  %v1854_v10 = vsel %vm1846_vm10, %v8903_v50, %v8904_v61  ;;  %v1912_v51 = vsel %vm1911_vm11, %v8906_v17, %v8905_v28  ;;  %v8908_v23 = vld [vmem:[#allocation155_spill] sm:$0xff]  ;;  %v8910_v31 = vld [vmem:[#allocation156_spill] sm:$0xff] }
0x1b97   : > { %v1866_v6 = vadd.f32 %v1850_v26, %v1801_v53  ;;  %v1867_v39 = vadd.f32 %v1851_v59, %v1802_v14  ;;  %v1868_v8 = vadd.f32 %v1852_v48, %v1803_v43  ;;  %v1913_v0 = vsel %vm1911_vm11, %v8905_v28, %v8907_v63  ;;  %v8912_v59 = vld [vmem:[#allocation3_spill] sm:$0xff]  ;;  %v8913_v28 = vld [vmem:[#allocation157_spill] sm:$0xff]  ;;  %v8917_v17 = vld [vmem:[#allocation248_spill] sm:$0xff] }
0x1b98   : > { %v1914_v27 = vsel %vm1911_vm11, %v8907_v63, %v8908_v23  ;;  %v1915_v29 = vsel %vm1911_vm11, %v8908_v23, %v8909_v44  ;;  %v1869_v53 = vadd.f32 %v1853_v47, %v1804_v21  ;;  %v1870_v14 = vadd.f32 %v1854_v10, %v1805_v16  ;;  %v8914_v16 = vld [vmem:[#allocation242_spill] sm:$0xff]  ;;  %v8916_v47 = vld [vmem:[#allocation243_spill] sm:$0xff]  ;;  %v8920_v63 = vld [vmem:[#allocation165_spill] sm:$0xff] }
0x1b99   : > { %v6935_v15 = vpop.permute.xlu1 %3692  ;;  %v1929_v43 = vadd.f32 %v1913_v0, %v1864_v7  ;;  %v1917_v26 = vsel %vm1911_vm11, %v8910_v31, %v8911_v57  ;;  %v1930_v48 = vadd.f32 %v1914_v27, %v1865_v38  ;;  %v1931_v50 = vadd.f32 %v1915_v29, %v1866_v6  ;;  %v8915_v7 = vld [vmem:[#allocation163_spill] sm:$0xff]  ;;  %v8919_v6 = vld [vmem:[#allocation249_spill] sm:$0xff]  ;;  %v8921_v23 = vld [vmem:[#allocation250_spill] sm:$0xff] }
0x1b9a   : > { %v3696_v37 = vmul.f32 %v6935_v15, %v4747_v19  ;;  %v3695_v58 = vmul.f32 %v6935_v15, %v4740_v12  ;;  %v3698_v52 = vmul.f32 %v6935_v15, %v4742_v13  ;;  %v3697_v49 = vmul.f32 %v6935_v15, %v4756_v24  ;;  %v8923_v29 = vld [vmem:[#allocation4_spill] sm:$0xff] }
0x1b9b   : > { %v3700_v30 = vmul.f32 %v6935_v15, %v4749_v20  ;;  %v3699_v34 = vmul.f32 %v6935_v15, %v8912_v59  ;;  %v1918_v21 = vsel %vm1911_vm11, %v8911_v57, %v8913_v28  ;;  %v1977_v10 = vsel %vm1976_vm12, %v8916_v47, %v8915_v7 }
0x1b9c   : > { %3715 = vrot.lane.b32.xlu1 %v3696_v37, %s4675_s26  ;;  %3713 = vrot.lane.b32.xlu0 %v3695_v58, %s4675_s26  ;;  %v1916_v37 = vsel %vm1911_vm11, %v8909_v44, %v8910_v31  ;;  %v1928_v58 = vadd.f32 %v1912_v51, %v1863_v4  ;;  %v1919_v4 = vsel %vm1911_vm11, %v8913_v28, %v8914_v16  ;;  %v8922_v44 = vld [vmem:[#allocation2_spill] sm:$0xff]  ;;  %vm2626_vm7 = vcmask 736256  }
0x1b9d   : > { %v1932_v61 = vadd.f32 %v1916_v37, %v1867_v39  ;;  %v1978_v51 = vsel %vm1976_vm12, %v8915_v7, %v8917_v17  ;;  %v1933_v38 = vadd.f32 %v1917_v26, %v1868_v8  ;;  %v1981_v0 = vsel %vm1976_vm12, %v8919_v6, %v8920_v63  ;;  %v8924_v28 = vld [vmem:[#allocation166_spill] sm:$0xff]  ;;  %v8925_v7 = vld [vmem:[#allocation251_spill] sm:$0xff] }
0x1b9e   : > { %v1982_v27 = vsel %vm1976_vm12, %v8920_v63, %v8921_v23  ;;  %v3702_v8 = vmul.f32 %v6935_v15, %v8922_v44  ;;  %v3701_v31 = vmul.f32 %v6935_v15, %v8923_v29  ;;  %v1934_v37 = vadd.f32 %v1918_v21, %v1869_v53  ;;  %v8926_v53 = vld [vmem:[#allocation172_spill] sm:$0xff]  ;;  %v8929_v21 = vld [vmem:[#allocation173_spill] sm:$0xff] }
0x1b9f   : > { %v1935_v57 = vadd.f32 %v1919_v4, %v1870_v14  ;;  %v1993_v26 = vadd.f32 %v1977_v10, %v1928_v58  ;;  %v1983_v16 = vsel %vm1976_vm12, %v8921_v23, %v8924_v28  ;;  %v1984_v47 = vsel %vm1976_vm12, %v8924_v28, %v8925_v7  ;;  %v8927_v14 = vld [vmem:[#allocation252_spill] sm:$0xff]  ;;  %v8930_v10 = vld [vmem:[#allocation258_spill] sm:$0xff]  ;;  %v8933_v23 = vld [vmem:[#allocation259_spill] sm:$0xff] }
0x1ba0   : > { %3719 = vrot.lane.b32.xlu1 %v3698_v52, %s4675_s26  ;;  %3717 = vrot.lane.b32.xlu0 %v3697_v49, %s4675_s26  ;;  %v8918_v52 = vld [vmem:[#allocation164_spill] sm:$0xff]  ;;  %v2042_v58 = vsel %vm2041_vm13, %v8927_v14, %v8926_v53  ;;  %vm2756_vm9 = vcmask 719872   ;;  %vm2821_vm10 = vcmask 711680   ;;  %vm2886_vm11 = vcmask 703488  }
0x1ba1   : > { %v1979_v49 = vsel %vm1976_vm12, %v8917_v17, %v8918_v52  ;;  %v1980_v39 = vsel %vm1976_vm12, %v8918_v52, %v8919_v6  ;;  %v1997_v52 = vadd.f32 %v1981_v0, %v1932_v61  ;;  %v1998_v6 = vadd.f32 %v1982_v27, %v1933_v38  ;;  %v8935_v28 = vld [vmem:[#allocation260_spill] sm:$0xff] }
0x1ba2   : > { %v1996_v17 = vadd.f32 %v1980_v39, %v1931_v50  ;;  %v1999_v61 = vadd.f32 %v1983_v16, %v1934_v37  ;;  %v2000_v38 = vadd.f32 %v1984_v47, %v1935_v57  ;;  %v8932_v39 = vld [vmem:[#allocation174_spill] sm:$0xff]  ;;  %v2058_v0 = vadd.f32 %v2042_v58, %v1993_v26  ;;  %v8936_v47 = vld [vmem:[#allocation181_spill] sm:$0xff] }
0x1ba3   : > { %v2046_v63 = vsel %vm2041_vm13, %v8930_v10, %v8932_v39  ;;  %v2047_v27 = vsel %vm2041_vm13, %v8932_v39, %v8933_v23  ;;  %v8938_v58 = vld [vmem:[#allocation266_spill] sm:$0xff]  ;;  %vm2951_vm12 = vcmask 695296  }
0x1ba4   : > { %3723 = vrot.lane.b32.xlu1 %v3700_v30, %s4675_s26  ;;  %3721 = vrot.lane.b32.xlu0 %v3699_v34, %s4675_s26  ;;  %v1994_v30 = vadd.f32 %v1978_v51, %v1929_v43  ;;  %v1995_v34 = vadd.f32 %v1979_v49, %v1930_v48  ;;  %v8928_v43 = vld [vmem:[#allocation257_spill] sm:$0xff]  ;;  %v2045_v51 = vsel %vm2041_vm13, %v8929_v21, %v8930_v10 }
0x1ba5   : > { %v2043_v48 = vsel %vm2041_vm13, %v8926_v53, %v8928_v43  ;;  %v2044_v4 = vsel %vm2041_vm13, %v8928_v43, %v8929_v21  ;;  %v8931_v49 = vld [vmem:[#allocation5_spill] sm:$0xff]  ;;  %v2061_v26 = vadd.f32 %v2045_v51, %v1996_v17  ;;  %v2062_v7 = vadd.f32 %v2046_v63, %v1997_v52  ;;  %v8942_v51 = vld [vmem:[#allocation268_spill] sm:$0xff] }
0x1ba6   : > { %v3703_v50 = vmul.f32 %v6935_v15, %v8931_v49  ;;  %v7056_v15 = vld [vmem:[%s7948_s0] sm:$0xff]  ;;  %v2059_v37 = vadd.f32 %v2043_v48, %v1994_v30  ;;  %v2060_v57 = vadd.f32 %v2044_v4, %v1995_v34  ;;  %v8937_v53 = vld [vmem:[#allocation261_spill] sm:$0xff]  ;;  %v2108_v43 = vsel %vm2106_vm14, %v8936_v47, %v8938_v58  ;;  %v8940_v34 = vld [vmem:[#allocation267_spill] sm:$0xff] }
0x1ba7   : > { %v2107_v14 = vsel %vm2106_vm14, %v8937_v53, %v8936_v47  ;;  %v2063_v21 = vadd.f32 %v2047_v27, %v1998_v6  ;;  %v8941_v48 = vld [vmem:[#allocation183_spill] sm:$0xff]  ;;  %v8943_v63 = vld [vmem:[#allocation184_spill] sm:$0xff]  ;;  %v8944_v27 = vld [vmem:[#allocation269_spill] sm:$0xff] }
0x1ba8   : > { %3727 = vrot.lane.b32.xlu1 %v3702_v8, %s4675_s26  ;;  %3725 = vrot.lane.b32.xlu0 %v3701_v31, %s4675_s26  ;;  %v8934_v8 = vld [vmem:[#allocation175_spill] sm:$0xff]  ;;  %v2111_v4 = vsel %vm2106_vm14, %v8940_v34, %v8941_v48  ;;  %v2112_v39 = vsel %vm2106_vm14, %v8941_v48, %v8942_v51  ;;  %v2113_v6 = vsel %vm2106_vm14, %v8942_v51, %v8943_v63  ;;  %v8949_v51 = vld [vmem:[#allocation276_spill] sm:$0xff] }
0x1ba9   : > { %v2048_v31 = vsel %vm2041_vm13, %v8933_v23, %v8934_v8  ;;  %v2049_v16 = vsel %vm2041_vm13, %v8934_v8, %v8935_v28  ;;  %v2124_v23 = vadd.f32 %v2108_v43, %v2059_v37  ;;  %v2114_v8 = vsel %vm2106_vm14, %v8943_v63, %v8944_v27  ;;  %v8947_v53 = vld [vmem:[#allocation275_spill] sm:$0xff]  ;;  %v8951_v27 = vld [vmem:[#allocation277_spill] sm:$0xff] }
0x1baa   : > { %v2064_v10 = vadd.f32 %v2048_v31, %v1999_v61  ;;  %v2065_v52 = vadd.f32 %v2049_v16, %v2000_v38  ;;  %v2123_v61 = vadd.f32 %v2107_v14, %v2058_v0  ;;  %v8945_v31 = vld [vmem:[#allocation190_spill] sm:$0xff]  ;;  %v2127_v0 = vadd.f32 %v2111_v4, %v2062_v7  ;;  %v8952_v7 = vld [vmem:[#allocation193_spill] sm:$0xff]  ;;  %v8954_v4 = vld [vmem:[#allocation199_spill] sm:$0xff] }
0x1bab   : > { %v8946_v38 = vld [vmem:[#allocation270_spill] sm:$0xff]  ;;  %v2128_v37 = vadd.f32 %v2112_v39, %v2063_v21  ;;  %v2178_v21 = vsel %vm2171_vm15, %v8951_v27, %v8952_v7  ;;  %v8955_v39 = vld [vmem:[#allocation279_spill] sm:$0xff]  ;;  %vm3016_vm13 = vcmask 687104  }
0x1bac   : > { %3757 = vperm.xlu1 %4542, %v7056_v15   ;;  %3729 = vrot.lane.b32.xlu0 %v3703_v50, %s4675_s26  ;;  %v8939_v50 = vld [vmem:[#allocation182_spill] sm:$0xff]  ;;  %v2172_v28 = vsel %vm2171_vm15, %v8946_v38, %v8945_v31  ;;  %v2129_v14 = vadd.f32 %v2113_v6, %v2064_v10  ;;  %v2130_v43 = vadd.f32 %v2114_v8, %v2065_v52 }
0x1bad   : > { %v2109_v30 = vsel %vm2106_vm14, %v8938_v58, %v8939_v50  ;;  %v2110_v17 = vsel %vm2106_vm14, %v8939_v50, %v8940_v34  ;;  %v2173_v58 = vsel %vm2171_vm15, %v8945_v31, %v8947_v53  ;;  %v8948_v50 = vld [vmem:[#allocation191_spill] sm:$0xff]  ;;  %v2188_v48 = vadd.f32 %v2172_v28, %v2123_v61  ;;  %v8953_v10 = vld [vmem:[#allocation278_spill] sm:$0xff]  ;;  %v8956_v61 = vld [vmem:[#allocation284_spill] sm:$0xff] }
0x1bae   : > { %v2125_v16 = vadd.f32 %v2109_v30, %v2060_v57  ;;  %v2126_v47 = vadd.f32 %v2110_v17, %v2061_v26  ;;  %v2174_v34 = vsel %vm2171_vm15, %v8947_v53, %v8948_v50  ;;  %v2175_v63 = vsel %vm2171_vm15, %v8948_v50, %v8949_v51  ;;  %v8950_v57 = vld [vmem:[#allocation192_spill] sm:$0xff] }
0x1baf   : > { %v2176_v26 = vsel %vm2171_vm15, %v8949_v51, %v8950_v57  ;;  %v2189_v30 = vadd.f32 %v2173_v58, %v2124_v23  ;;  %v2177_v31 = vsel %vm2171_vm15, %v8950_v57, %v8951_v27  ;;  %v2179_v52 = vsel %vm2171_vm15, %v8952_v7, %v8953_v10  ;;  %v8957_v28 = vld [vmem:[#allocation200_spill] sm:$0xff]  ;;  %v8959_v57 = vld [vmem:[#allocation201_spill] sm:$0xff] }
0x1bb0   : > { %v2190_v17 = vadd.f32 %v2174_v34, %v2125_v16  ;;  %v2237_v6 = vsel %vm2236_vm0, %v8955_v39, %v8954_v4  ;;  %v2238_v23 = vsel %vm2236_vm0, %v8954_v4, %v8956_v61  ;;  %v2191_v8 = vadd.f32 %v2175_v63, %v2126_v47  ;;  %v8958_v34 = vld [vmem:[#allocation285_spill] sm:$0xff]  ;;  %v8960_v63 = vld [vmem:[#allocation286_spill] sm:$0xff]  ;;  %v8964_v39 = vld [vmem:[#allocation288_spill] sm:$0xff] }
0x1bb1   : > { %v2192_v38 = vadd.f32 %v2176_v26, %v2127_v0  ;;  %v2239_v16 = vsel %vm2236_vm0, %v8956_v61, %v8957_v28  ;;  %v4676_v53 = vmov 57   ;;  %v2193_v58 = vadd.f32 %v2177_v31, %v2128_v37  ;;  %v8961_v4 = vld [vmem:[#allocation202_spill] sm:$0xff] }
0x1bb2   : > { %4543 = vset.pattern.permute.xlu1 %v4676_v53  ;;  %v2194_v50 = vadd.f32 %v2178_v21, %v2129_v14  ;;  %v2240_v51 = vsel %vm2236_vm0, %v8957_v28, %v8958_v34  ;;  %v2241_v27 = vsel %vm2236_vm0, %v8958_v34, %v8959_v57  ;;  %v2195_v7 = vadd.f32 %v2179_v52, %v2130_v43  ;;  %v8962_v14 = vld [vmem:[#allocation287_spill] sm:$0xff]  ;;  %v8963_v21 = vld [vmem:[#allocation208_spill] sm:$0xff]  ;;  %v8967_v28 = vld [vmem:[#allocation294_spill] sm:$0xff] }
0x1bb3   : > { %v2253_v47 = vadd.f32 %v2237_v6, %v2188_v48  ;;  %v2254_v0 = vadd.f32 %v2238_v23, %v2189_v30  ;;  %v2242_v26 = vsel %vm2236_vm0, %v8959_v57, %v8960_v63  ;;  %v2255_v10 = vadd.f32 %v2239_v16, %v2190_v17  ;;  %v8965_v30 = vld [vmem:[#allocation293_spill] sm:$0xff]  ;;  %v8968_v53 = vld [vmem:[#allocation210_spill] sm:$0xff]  ;;  %v8969_v57 = vld [vmem:[#allocation295_spill] sm:$0xff] }
0x1bb4   : > { %v2243_v37 = vsel %vm2236_vm0, %v8960_v63, %v8961_v4  ;;  %v2244_v31 = vsel %vm2236_vm0, %v8961_v4, %v8962_v14  ;;  %v2302_v61 = vsel %vm2301_vm1, %v8964_v39, %v8963_v21  ;;  %v2256_v43 = vadd.f32 %v2240_v51, %v2191_v8  ;;  %v8966_v6 = vld [vmem:[#allocation209_spill] sm:$0xff]  ;;  %v8970_v14 = vld [vmem:[#allocation211_spill] sm:$0xff] }
0x1bb5   : > { %v2257_v48 = vadd.f32 %v2241_v27, %v2192_v38  ;;  %v2303_v52 = vsel %vm2301_vm1, %v8963_v21, %v8965_v30  ;;  %v2304_v17 = vsel %vm2301_vm1, %v8965_v30, %v8966_v6  ;;  %v2258_v23 = vadd.f32 %v2242_v26, %v2193_v58  ;;  %v8971_v26 = vld [vmem:[#allocation296_spill] sm:$0xff] }
0x1bb6   : > { %v2305_v16 = vsel %vm2301_vm1, %v8966_v6, %v8967_v28  ;;  %v2306_v34 = vsel %vm2301_vm1, %v8967_v28, %v8968_v53  ;;  %v2259_v8 = vadd.f32 %v2243_v37, %v2194_v50  ;;  %v2260_v38 = vadd.f32 %v2244_v31, %v2195_v7  ;;  %v8972_v6 = vld [vmem:[#allocation217_spill] sm:$0xff] }
0x1bb7   : > { %v2318_v51 = vadd.f32 %v2302_v61, %v2253_v47  ;;  %v2307_v27 = vsel %vm2301_vm1, %v8968_v53, %v8969_v57  ;;  %v2319_v63 = vadd.f32 %v2303_v52, %v2254_v0  ;;  %v2320_v4 = vadd.f32 %v2304_v17, %v2255_v10  ;;  %v8973_v50 = vld [vmem:[#allocation297_spill] sm:$0xff]  ;;  %v8974_v47 = vld [vmem:[#allocation302_spill] sm:$0xff]  ;;  %v8976_v61 = vld [vmem:[#allocation303_spill] sm:$0xff] }
0x1bb8   : > { %v2308_v58 = vsel %vm2301_vm1, %v8969_v57, %v8970_v14  ;;  %v2309_v21 = vsel %vm2301_vm1, %v8970_v14, %v8971_v26  ;;  %v2321_v39 = vadd.f32 %v2305_v16, %v2256_v43  ;;  %v2322_v30 = vadd.f32 %v2306_v34, %v2257_v48  ;;  %v8975_v10 = vld [vmem:[#allocation218_spill] sm:$0xff]  ;;  %v8977_v17 = vld [vmem:[#allocation219_spill] sm:$0xff]  ;;  %v8978_v16 = vld [vmem:[#allocation304_spill] sm:$0xff] }
0x1bb9   : > { %v2367_v7 = vsel %vm2366_vm2, %v8973_v50, %v8972_v6  ;;  %v2368_v37 = vsel %vm2366_vm2, %v8972_v6, %v8974_v47  ;;  %v2323_v0 = vadd.f32 %v2307_v27, %v2258_v23  ;;  %v2369_v31 = vsel %vm2366_vm2, %v8974_v47, %v8975_v10  ;;  %v8979_v57 = vld [vmem:[#allocation220_spill] sm:$0xff]  ;;  %v8980_v14 = vld [vmem:[#allocation305_spill] sm:$0xff]  ;;  %v8983_v50 = vld [vmem:[#allocation311_spill] sm:$0xff] }
0x1bba   : > { %v2370_v52 = vsel %vm2366_vm2, %v8975_v10, %v8976_v61  ;;  %v2324_v43 = vadd.f32 %v2308_v58, %v2259_v8  ;;  %v2325_v48 = vadd.f32 %v2309_v21, %v2260_v38  ;;  %v2371_v28 = vsel %vm2366_vm2, %v8976_v61, %v8977_v17  ;;  %v8981_v58 = vld [vmem:[#allocation226_spill] sm:$0xff] }
0x1bbb   : > { %v2372_v53 = vsel %vm2366_vm2, %v8977_v17, %v8978_v16  ;;  %v2383_v23 = vadd.f32 %v2367_v7, %v2318_v51  ;;  %v2384_v34 = vadd.f32 %v2368_v37, %v2319_v63  ;;  %v2373_v27 = vsel %vm2366_vm2, %v8978_v16, %v8979_v57  ;;  %v8982_v21 = vld [vmem:[#allocation306_spill] sm:$0xff]  ;;  %v8984_v7 = vld [vmem:[#allocation227_spill] sm:$0xff]  ;;  %v8985_v17 = vld [vmem:[#allocation312_spill] sm:$0xff] }
0x1bbc   : > { %v2374_v26 = vsel %vm2366_vm2, %v8979_v57, %v8980_v14  ;;  %v2385_v8 = vadd.f32 %v2369_v31, %v2320_v4  ;;  %v2386_v38 = vadd.f32 %v2370_v52, %v2321_v39  ;;  %v2432_v6 = vsel %vm2431_vm3, %v8982_v21, %v8981_v58  ;;  %v8986_v39 = vld [vmem:[#allocation228_spill] sm:$0xff]  ;;  %v8987_v57 = vld [vmem:[#allocation313_spill] sm:$0xff]  ;;  %v8991_v14 = vld [vmem:[#allocation315_spill] sm:$0xff] }
0x1bbd   : > { %v2433_v47 = vsel %vm2431_vm3, %v8981_v58, %v8983_v50  ;;  %v2387_v51 = vadd.f32 %v2371_v28, %v2322_v30  ;;  %v2388_v63 = vadd.f32 %v2372_v53, %v2323_v0  ;;  %v2434_v37 = vsel %vm2431_vm3, %v8983_v50, %v8984_v7  ;;  %v8988_v0 = vld [vmem:[#allocation229_spill] sm:$0xff]  ;;  %v8992_v58 = vld [vmem:[#allocation320_spill] sm:$0xff] }
0x1bbe   : > { %v2389_v10 = vadd.f32 %v2373_v27, %v2324_v43  ;;  %v2390_v61 = vadd.f32 %v2374_v26, %v2325_v48  ;;  %v2435_v4 = vsel %vm2431_vm3, %v8984_v7, %v8985_v17  ;;  %v2436_v31 = vsel %vm2431_vm3, %v8985_v17, %v8986_v39  ;;  %v8989_v48 = vld [vmem:[#allocation314_spill] sm:$0xff]  ;;  %v8990_v27 = vld [vmem:[#allocation235_spill] sm:$0xff]  ;;  %v8994_v7 = vld [vmem:[#allocation321_spill] sm:$0xff] }
0x1bbf   : > { %v2448_v52 = vadd.f32 %v2432_v6, %v2383_v23  ;;  %v2449_v16 = vadd.f32 %v2433_v47, %v2384_v34  ;;  %v2437_v30 = vsel %vm2431_vm3, %v8986_v39, %v8987_v57  ;;  %v2438_v28 = vsel %vm2431_vm3, %v8987_v57, %v8988_v0  ;;  %v8993_v6 = vld [vmem:[#allocation236_spill] sm:$0xff]  ;;  %v8995_v17 = vld [vmem:[#allocation237_spill] sm:$0xff] }
0x1bc0   : > { %v2450_v43 = vadd.f32 %v2434_v37, %v2385_v8  ;;  %v2439_v53 = vsel %vm2431_vm3, %v8988_v0, %v8989_v48  ;;  %v2497_v26 = vsel %vm2496_vm4, %v8991_v14, %v8990_v27  ;;  %v2498_v23 = vsel %vm2496_vm4, %v8990_v27, %v8992_v58  ;;  %v9000_v27 = vld [vmem:[#allocation324_spill] sm:$0xff] }
0x1bc1   : > { %v2451_v34 = vadd.f32 %v2435_v4, %v2386_v38  ;;  %v2452_v21 = vadd.f32 %v2436_v31, %v2387_v51  ;;  %v2499_v50 = vsel %vm2496_vm4, %v8992_v58, %v8993_v6  ;;  %v2453_v8 = vadd.f32 %v2437_v30, %v2388_v63  ;;  %v8996_v38 = vld [vmem:[#allocation322_spill] sm:$0xff] }
0x1bc2   : > { %v2454_v47 = vadd.f32 %v2438_v28, %v2389_v10  ;;  %v2500_v37 = vsel %vm2496_vm4, %v8993_v6, %v8994_v7  ;;  %v2501_v39 = vsel %vm2496_vm4, %v8994_v7, %v8995_v17  ;;  %v2455_v57 = vadd.f32 %v2439_v53, %v2390_v61  ;;  %v8997_v31 = vld [vmem:[#allocation238_spill] sm:$0xff]  ;;  %v8998_v10 = vld [vmem:[#allocation323_spill] sm:$0xff]  ;;  %v8999_v28 = vld [vmem:[#allocation244_spill] sm:$0xff] }
0x1bc3   : > { %v2513_v0 = vadd.f32 %v2497_v26, %v2448_v52  ;;  %v2514_v48 = vadd.f32 %v2498_v23, %v2449_v16  ;;  %v2502_v51 = vsel %vm2496_vm4, %v8995_v17, %v8996_v38  ;;  %v2515_v4 = vadd.f32 %v2499_v50, %v2450_v43  ;;  %v9001_v16 = vld [vmem:[#allocation329_spill] sm:$0xff]  ;;  %v9003_v23 = vld [vmem:[#allocation330_spill] sm:$0xff]  ;;  %v9005_v17 = vld [vmem:[#allocation331_spill] sm:$0xff] }
0x1bc4   : > { %v2503_v63 = vsel %vm2496_vm4, %v8996_v38, %v8997_v31  ;;  %v2504_v30 = vsel %vm2496_vm4, %v8997_v31, %v8998_v10  ;;  %v2562_v14 = vsel %vm2561_vm5, %v9000_v27, %v8999_v28  ;;  %v2516_v61 = vadd.f32 %v2500_v37, %v2451_v34  ;;  %v9002_v26 = vld [vmem:[#allocation245_spill] sm:$0xff]  ;;  %v9004_v50 = vld [vmem:[#allocation246_spill] sm:$0xff]  ;;  %v9006_v10 = vld [vmem:[#allocation247_spill] sm:$0xff] }
0x1bc5   : > { %v2517_v52 = vadd.f32 %v2501_v39, %v2452_v21  ;;  %v2563_v53 = vsel %vm2561_vm5, %v8999_v28, %v9001_v16  ;;  %v2564_v43 = vsel %vm2561_vm5, %v9001_v16, %v9002_v26  ;;  %v2518_v58 = vadd.f32 %v2502_v51, %v2453_v8  ;;  %v9007_v51 = vld [vmem:[#allocation332_spill] sm:$0xff] }
0x1bc6   : > { %v2565_v6 = vsel %vm2561_vm5, %v9002_v26, %v9003_v23  ;;  %v2566_v7 = vsel %vm2561_vm5, %v9003_v23, %v9004_v50  ;;  %v2519_v34 = vadd.f32 %v2503_v63, %v2454_v47  ;;  %v2520_v21 = vadd.f32 %v2504_v30, %v2455_v57  ;;  %v9008_v26 = vld [vmem:[#allocation253_spill] sm:$0xff] }
0x1bc7   : > { %v2578_v37 = vadd.f32 %v2562_v14, %v2513_v0  ;;  %v2567_v39 = vsel %vm2561_vm5, %v9004_v50, %v9005_v17  ;;  %v2579_v38 = vadd.f32 %v2563_v53, %v2514_v48  ;;  %v2580_v31 = vadd.f32 %v2564_v43, %v2515_v4  ;;  %v9009_v47 = vld [vmem:[#allocation333_spill] sm:$0xff]  ;;  %v9010_v0 = vld [vmem:[#allocation338_spill] sm:$0xff]  ;;  %v9012_v14 = vld [vmem:[#allocation339_spill] sm:$0xff] }
0x1bc8   : > { %v2568_v8 = vsel %vm2561_vm5, %v9005_v17, %v9006_v10  ;;  %v2569_v28 = vsel %vm2561_vm5, %v9006_v10, %v9007_v51  ;;  %v2581_v27 = vadd.f32 %v2565_v6, %v2516_v61  ;;  %v2582_v16 = vadd.f32 %v2566_v7, %v2517_v52  ;;  %v9011_v4 = vld [vmem:[#allocation254_spill] sm:$0xff]  ;;  %v9013_v43 = vld [vmem:[#allocation255_spill] sm:$0xff]  ;;  %v9014_v6 = vld [vmem:[#allocation340_spill] sm:$0xff] }
0x1bc9   : > { %v2627_v57 = vsel %vm2626_vm7, %v9009_v47, %v9008_v26  ;;  %v2628_v63 = vsel %vm2626_vm7, %v9008_v26, %v9010_v0  ;;  %v2583_v48 = vadd.f32 %v2567_v39, %v2518_v58  ;;  %v2629_v30 = vsel %vm2626_vm7, %v9010_v0, %v9011_v4  ;;  %v9015_v17 = vld [vmem:[#allocation256_spill] sm:$0xff]  ;;  %v9016_v10 = vld [vmem:[#allocation341_spill] sm:$0xff]  ;;  %v9019_v47 = vld [vmem:[#allocation347_spill] sm:$0xff] }
0x1bca   : > { %v2630_v53 = vsel %vm2626_vm7, %v9011_v4, %v9012_v14  ;;  %v2584_v61 = vadd.f32 %v2568_v8, %v2519_v34  ;;  %v2585_v52 = vadd.f32 %v2569_v28, %v2520_v21  ;;  %v2631_v23 = vsel %vm2626_vm7, %v9012_v14, %v9013_v43  ;;  %v9017_v8 = vld [vmem:[#allocation262_spill] sm:$0xff] }
0x1bcb   : > { %v2632_v50 = vsel %vm2626_vm7, %v9013_v43, %v9014_v6  ;;  %v2643_v58 = vadd.f32 %v2627_v57, %v2578_v37  ;;  %v2644_v7 = vadd.f32 %v2628_v63, %v2579_v38  ;;  %v2633_v39 = vsel %vm2626_vm7, %v9014_v6, %v9015_v17  ;;  %v9018_v28 = vld [vmem:[#allocation342_spill] sm:$0xff]  ;;  %v9020_v57 = vld [vmem:[#allocation263_spill] sm:$0xff]  ;;  %v9021_v43 = vld [vmem:[#allocation348_spill] sm:$0xff] }
0x1bcc   : > { %v2634_v51 = vsel %vm2626_vm7, %v9015_v17, %v9016_v10  ;;  %v2645_v34 = vadd.f32 %v2629_v30, %v2580_v31  ;;  %v2646_v21 = vadd.f32 %v2630_v53, %v2581_v27  ;;  %v2692_v26 = vsel %vm2691_vm8, %v9018_v28, %v9017_v8  ;;  %v9022_v27 = vld [vmem:[#allocation264_spill] sm:$0xff]  ;;  %v9023_v17 = vld [vmem:[#allocation349_spill] sm:$0xff]  ;;  %v9027_v10 = vld [vmem:[#allocation351_spill] sm:$0xff] }
0x1bcd   : > { %v2693_v0 = vsel %vm2691_vm8, %v9017_v8, %v9019_v47  ;;  %v2647_v37 = vadd.f32 %v2631_v23, %v2582_v16  ;;  %v2648_v38 = vadd.f32 %v2632_v50, %v2583_v48  ;;  %v2694_v63 = vsel %vm2691_vm8, %v9019_v47, %v9020_v57  ;;  %v9024_v48 = vld [vmem:[#allocation265_spill] sm:$0xff]  ;;  %v9028_v8 = vld [vmem:[#allocation356_spill] sm:$0xff] }
0x1bce   : > { %v2649_v4 = vadd.f32 %v2633_v39, %v2584_v61  ;;  %v2650_v14 = vadd.f32 %v2634_v51, %v2585_v52  ;;  %v2695_v31 = vsel %vm2691_vm8, %v9020_v57, %v9021_v43  ;;  %v2696_v30 = vsel %vm2691_vm8, %v9021_v43, %v9022_v27  ;;  %v9025_v52 = vld [vmem:[#allocation350_spill] sm:$0xff]  ;;  %v9026_v39 = vld [vmem:[#allocation271_spill] sm:$0xff]  ;;  %v9030_v57 = vld [vmem:[#allocation357_spill] sm:$0xff] }
0x1bcf   : > { %v2708_v53 = vadd.f32 %v2692_v26, %v2643_v58  ;;  %v2709_v6 = vadd.f32 %v2693_v0, %v2644_v7  ;;  %v2697_v16 = vsel %vm2691_vm8, %v9022_v27, %v9023_v17  ;;  %v2698_v23 = vsel %vm2691_vm8, %v9023_v17, %v9024_v48  ;;  %v9029_v26 = vld [vmem:[#allocation272_spill] sm:$0xff]  ;;  %v9031_v43 = vld [vmem:[#allocation273_spill] sm:$0xff] }
0x1bd0   : > { %v2710_v61 = vadd.f32 %v2694_v63, %v2645_v34  ;;  %v2699_v50 = vsel %vm2691_vm8, %v9024_v48, %v9025_v52  ;;  %v2757_v51 = vsel %vm2756_vm9, %v9027_v10, %v9026_v39  ;;  %v2758_v58 = vsel %vm2756_vm9, %v9026_v39, %v9028_v8  ;;  %v9036_v39 = vld [vmem:[#allocation360_spill] sm:$0xff] }
0x1bd1   : > { %v2711_v7 = vadd.f32 %v2695_v31, %v2646_v21  ;;  %v2712_v28 = vadd.f32 %v2696_v30, %v2647_v37  ;;  %v2759_v47 = vsel %vm2756_vm9, %v9028_v8, %v9029_v26  ;;  %v2713_v34 = vadd.f32 %v2697_v16, %v2648_v38  ;;  %v9032_v21 = vld [vmem:[#allocation358_spill] sm:$0xff] }
0x1bd2   : > { %v2714_v0 = vadd.f32 %v2698_v23, %v2649_v4  ;;  %v2760_v63 = vsel %vm2756_vm9, %v9029_v26, %v9030_v57  ;;  %v2761_v27 = vsel %vm2756_vm9, %v9030_v57, %v9031_v43  ;;  %v2715_v17 = vadd.f32 %v2699_v50, %v2650_v14  ;;  %v9033_v30 = vld [vmem:[#allocation274_spill] sm:$0xff]  ;;  %v9034_v4 = vld [vmem:[#allocation359_spill] sm:$0xff]  ;;  %v9035_v23 = vld [vmem:[#allocation280_spill] sm:$0xff] }
0x1bd3   : > { %v2773_v48 = vadd.f32 %v2757_v51, %v2708_v53  ;;  %v2774_v52 = vadd.f32 %v2758_v58, %v2709_v6  ;;  %v2762_v37 = vsel %vm2756_vm9, %v9031_v43, %v9032_v21  ;;  %v2775_v31 = vadd.f32 %v2759_v47, %v2710_v61  ;;  %v9037_v6 = vld [vmem:[#allocation365_spill] sm:$0xff]  ;;  %v9039_v58 = vld [vmem:[#allocation366_spill] sm:$0xff]  ;;  %v9041_v43 = vld [vmem:[#allocation367_spill] sm:$0xff] }
0x1bd4   : > { %v2763_v38 = vsel %vm2756_vm9, %v9032_v21, %v9033_v30  ;;  %v2764_v16 = vsel %vm2756_vm9, %v9033_v30, %v9034_v4  ;;  %v2822_v10 = vsel %vm2821_vm10, %v9036_v39, %v9035_v23  ;;  %v2776_v14 = vadd.f32 %v2760_v63, %v2711_v7  ;;  %v9038_v51 = vld [vmem:[#allocation281_spill] sm:$0xff]  ;;  %v9040_v47 = vld [vmem:[#allocation282_spill] sm:$0xff]  ;;  %v9042_v4 = vld [vmem:[#allocation283_spill] sm:$0xff] }
0x1bd5   : > { %v2777_v53 = vadd.f32 %v2761_v27, %v2712_v28  ;;  %v2823_v50 = vsel %vm2821_vm10, %v9035_v23, %v9037_v6  ;;  %v2824_v61 = vsel %vm2821_vm10, %v9037_v6, %v9038_v51  ;;  %v2778_v8 = vadd.f32 %v2762_v37, %v2713_v34  ;;  %v9043_v37 = vld [vmem:[#allocation368_spill] sm:$0xff] }
0x1bd6   : > { %v2825_v26 = vsel %vm2821_vm10, %v9038_v51, %v9039_v58  ;;  %v2826_v57 = vsel %vm2821_vm10, %v9039_v58, %v9040_v47  ;;  %v2779_v7 = vadd.f32 %v2763_v38, %v2714_v0  ;;  %v2780_v28 = vadd.f32 %v2764_v16, %v2715_v17  ;;  %v9044_v51 = vld [vmem:[#allocation289_spill] sm:$0xff] }
0x1bd7   : > { %v2838_v63 = vadd.f32 %v2822_v10, %v2773_v48  ;;  %v2827_v27 = vsel %vm2821_vm10, %v9040_v47, %v9041_v43  ;;  %v2839_v21 = vadd.f32 %v2823_v50, %v2774_v52  ;;  %v2840_v30 = vadd.f32 %v2824_v61, %v2775_v31  ;;  %v9045_v0 = vld [vmem:[#allocation369_spill] sm:$0xff]  ;;  %v9046_v48 = vld [vmem:[#allocation374_spill] sm:$0xff]  ;;  %v9048_v10 = vld [vmem:[#allocation375_spill] sm:$0xff] }
0x1bd8   : > { %v2828_v34 = vsel %vm2821_vm10, %v9041_v43, %v9042_v4  ;;  %v2829_v23 = vsel %vm2821_vm10, %v9042_v4, %v9043_v37  ;;  %v2841_v39 = vadd.f32 %v2825_v26, %v2776_v14  ;;  %v2842_v6 = vadd.f32 %v2826_v57, %v2777_v53  ;;  %v9047_v31 = vld [vmem:[#allocation290_spill] sm:$0xff]  ;;  %v9049_v61 = vld [vmem:[#allocation291_spill] sm:$0xff]  ;;  %v9050_v26 = vld [vmem:[#allocation376_spill] sm:$0xff] }
0x1bd9   : > { %v2887_v17 = vsel %vm2886_vm11, %v9045_v0, %v9044_v51  ;;  %v2888_v38 = vsel %vm2886_vm11, %v9044_v51, %v9046_v48  ;;  %v2843_v52 = vadd.f32 %v2827_v27, %v2778_v8  ;;  %v2889_v16 = vsel %vm2886_vm11, %v9046_v48, %v9047_v31  ;;  %v9051_v43 = vld [vmem:[#allocation292_spill] sm:$0xff]  ;;  %v9052_v4 = vld [vmem:[#allocation377_spill] sm:$0xff]  ;;  %v9055_v0 = vld [vmem:[#allocation379_spill] sm:$0xff] }
0x1bda   : > { %v2890_v50 = vsel %vm2886_vm11, %v9047_v31, %v9048_v10  ;;  %v2844_v14 = vadd.f32 %v2828_v34, %v2779_v7  ;;  %v2845_v53 = vadd.f32 %v2829_v23, %v2780_v28  ;;  %v2891_v58 = vsel %vm2886_vm11, %v9048_v10, %v9049_v61  ;;  %v9053_v34 = vld [vmem:[#allocation298_spill] sm:$0xff] }
0x1bdb   : > { %v2892_v47 = vsel %vm2886_vm11, %v9049_v61, %v9050_v26  ;;  %v2903_v8 = vadd.f32 %v2887_v17, %v2838_v63  ;;  %v2904_v57 = vadd.f32 %v2888_v38, %v2839_v21  ;;  %v2893_v27 = vsel %vm2886_vm11, %v9050_v26, %v9051_v43  ;;  %v9054_v23 = vld [vmem:[#allocation378_spill] sm:$0xff]  ;;  %v9056_v17 = vld [vmem:[#allocation299_spill] sm:$0xff]  ;;  %v9057_v61 = vld [vmem:[#allocation380_spill] sm:$0xff] }
0x1bdc   : > { %v2894_v37 = vsel %vm2886_vm11, %v9051_v43, %v9052_v4  ;;  %v2905_v7 = vadd.f32 %v2889_v16, %v2840_v30  ;;  %v2906_v28 = vadd.f32 %v2890_v50, %v2841_v39  ;;  %v2952_v51 = vsel %vm2951_vm12, %v9054_v23, %v9053_v34  ;;  %v9058_v39 = vld [vmem:[#allocation300_spill] sm:$0xff]  ;;  %v9059_v43 = vld [vmem:[#allocation381_spill] sm:$0xff] }
0x1bdd   : > { %v2953_v48 = vsel %vm2951_vm12, %v9053_v34, %v9055_v0  ;;  %v2907_v63 = vadd.f32 %v2891_v58, %v2842_v6  ;;  %v2908_v21 = vadd.f32 %v2892_v47, %v2843_v52  ;;  %v2954_v38 = vsel %vm2951_vm12, %v9055_v0, %v9056_v17  ;;  %v9060_v52 = vld [vmem:[#allocation301_spill] sm:$0xff]  ;;  %v9063_v4 = vld [vmem:[#allocation384_spill] sm:$0xff]  ;;  %v9064_v34 = vld [vmem:[#allocation386_spill] sm:$0xff] }
0x1bde   : > { %v2909_v31 = vadd.f32 %v2893_v27, %v2844_v14  ;;  %v2910_v10 = vadd.f32 %v2894_v37, %v2845_v53  ;;  %v2955_v30 = vsel %vm2951_vm12, %v9056_v17, %v9057_v61  ;;  %v2956_v16 = vsel %vm2951_vm12, %v9057_v61, %v9058_v39  ;;  %v9061_v53 = vld [vmem:[#allocation382_spill] sm:$0xff]  ;;  %v9062_v27 = vld [vmem:[#allocation307_spill] sm:$0xff]  ;;  %v9066_v17 = vld [vmem:[#allocation388_spill] sm:$0xff] }
0x1bdf   : > { %v2968_v50 = vadd.f32 %v2952_v51, %v2903_v8  ;;  %v2969_v26 = vadd.f32 %v2953_v48, %v2904_v57  ;;  %v2957_v6 = vsel %vm2951_vm12, %v9058_v39, %v9059_v43  ;;  %v2958_v58 = vsel %vm2951_vm12, %v9059_v43, %v9060_v52  ;;  %v9065_v51 = vld [vmem:[#allocation308_spill] sm:$0xff]  ;;  %v9067_v61 = vld [vmem:[#allocation309_spill] sm:$0xff] }
0x1be0   : > { %v2970_v14 = vadd.f32 %v2954_v38, %v2905_v7  ;;  %v2959_v47 = vsel %vm2951_vm12, %v9060_v52, %v9061_v53  ;;  %v3017_v37 = vsel %vm3016_vm13, %v9063_v4, %v9062_v27  ;;  %v3018_v8 = vsel %vm3016_vm13, %v9062_v27, %v9064_v34  ;;  %v9072_v27 = vld [vmem:[#allocation392_spill] sm:$0xff] }
0x1be1   : > { %v2971_v57 = vadd.f32 %v2955_v30, %v2906_v28  ;;  %v2972_v23 = vadd.f32 %v2956_v16, %v2907_v63  ;;  %v3019_v0 = vsel %vm3016_vm13, %v9064_v34, %v9065_v51  ;;  %vm3081_vm14 = vcmask 678912   ;;  %v9068_v28 = vld [vmem:[#allocation390_spill] sm:$0xff] }
0x1be2   : > { %v2973_v7 = vadd.f32 %v2957_v6, %v2908_v21  ;;  %v2974_v48 = vadd.f32 %v2958_v58, %v2909_v31  ;;  %v3020_v38 = vsel %vm3016_vm13, %v9065_v51, %v9066_v17  ;;  %v3021_v39 = vsel %vm3016_vm13, %v9066_v17, %v9067_v61  ;;  %v9069_v16 = vld [vmem:[#allocation310_spill] sm:$0xff]  ;;  %v9070_v31 = vld [vmem:[#allocation391_spill] sm:$0xff]  ;;  %v9071_v58 = vld [vmem:[#allocation316_spill] sm:$0xff] }
0x1be3   : > { %v2975_v43 = vadd.f32 %v2959_v47, %v2910_v10  ;;  %v3033_v52 = vadd.f32 %v3017_v37, %v2968_v50  ;;  %v3034_v53 = vadd.f32 %v3018_v8, %v2969_v26  ;;  %v3022_v63 = vsel %vm3016_vm13, %v9067_v61, %v9068_v28  ;;  %v9073_v26 = vld [vmem:[#allocation393_spill] sm:$0xff]  ;;  %v9075_v8 = vld [vmem:[#allocation394_spill] sm:$0xff]  ;;  %v9077_v61 = vld [vmem:[#allocation395_spill] sm:$0xff] }
0x1be4   : > { %v3035_v30 = vadd.f32 %v3019_v0, %v2970_v14  ;;  %v3023_v21 = vsel %vm3016_vm13, %v9068_v28, %v9069_v16  ;;  %v3024_v6 = vsel %vm3016_vm13, %v9069_v16, %v9070_v31  ;;  %v3082_v4 = vsel %vm3081_vm14, %v9072_v27, %v9071_v58  ;;  %v9074_v37 = vld [vmem:[#allocation317_spill] sm:$0xff]  ;;  %v9076_v0 = vld [vmem:[#allocation318_spill] sm:$0xff]  ;;  %v9078_v31 = vld [vmem:[#allocation319_spill] sm:$0xff] }
0x1be5   : > { %v3036_v10 = vadd.f32 %v3020_v38, %v2971_v57  ;;  %v3037_v50 = vadd.f32 %v3021_v39, %v2972_v23  ;;  %v3083_v47 = vsel %vm3081_vm14, %v9071_v58, %v9073_v26  ;;  %v3084_v14 = vsel %vm3081_vm14, %v9073_v26, %v9074_v37 }
0x1be6   : > { %v3038_v34 = vadd.f32 %v3022_v63, %v2973_v7  ;;  %v3085_v51 = vsel %vm3081_vm14, %v9074_v37, %v9075_v8  ;;  %v3086_v17 = vsel %vm3081_vm14, %v9075_v8, %v9076_v0  ;;  %vm3146_vm15 = vcmask 670720   ;;  %v9079_v63 = vld [vmem:[#allocation396_spill] sm:$0xff]  ;;  %v9080_v37 = vld [vmem:[#allocation325_spill] sm:$0xff] }
0x1be7   : > { %v3039_v57 = vadd.f32 %v3023_v21, %v2974_v48  ;;  %v3040_v23 = vadd.f32 %v3024_v6, %v2975_v43  ;;  %v3098_v38 = vadd.f32 %v3082_v4, %v3033_v52  ;;  %v3087_v39 = vsel %vm3081_vm14, %v9076_v0, %v9077_v61  ;;  %v9081_v48 = vld [vmem:[#allocation397_spill] sm:$0xff]  ;;  %v9082_v52 = vld [vmem:[#allocation398_spill] sm:$0xff]  ;;  %v9084_v4 = vld [vmem:[#allocation399_spill] sm:$0xff] }
0x1be8   : > { %v3099_v28 = vadd.f32 %v3083_v47, %v3034_v53  ;;  %v3100_v16 = vadd.f32 %v3084_v14, %v3035_v30  ;;  %v3088_v7 = vsel %vm3081_vm14, %v9077_v61, %v9078_v31  ;;  %v3089_v58 = vsel %vm3081_vm14, %v9078_v31, %v9079_v63  ;;  %v9083_v30 = vld [vmem:[#allocation326_spill] sm:$0xff]  ;;  %v9085_v14 = vld [vmem:[#allocation327_spill] sm:$0xff]  ;;  %v9087_v61 = vld [vmem:[#allocation328_spill] sm:$0xff] }
0x1be9   : > { %v3101_v27 = vadd.f32 %v3085_v51, %v3036_v10  ;;  %v3102_v26 = vadd.f32 %v3086_v17, %v3037_v50  ;;  %v3147_v43 = vsel %vm3146_vm15, %v9081_v48, %v9080_v37  ;;  %v3148_v21 = vsel %vm3146_vm15, %v9080_v37, %v9082_v52  ;;  %v9086_v51 = vld [vmem:[#allocation400_spill] sm:$0xff]  ;;  %v9088_v31 = vld [vmem:[#allocation401_spill] sm:$0xff]  ;;  %v9091_v48 = vld [vmem:[#allocation403_spill] sm:$0xff] }
0x1bea   : > { %v3103_v53 = vadd.f32 %v3087_v39, %v3038_v34  ;;  %v3149_v6 = vsel %vm3146_vm15, %v9082_v52, %v9083_v30  ;;  %v3150_v47 = vsel %vm3146_vm15, %v9083_v30, %v9084_v4  ;;  %vm3211_vm0 = vcmask 662528  }
0x1beb   : > { %v3104_v10 = vadd.f32 %v3088_v7, %v3039_v57  ;;  %v3105_v50 = vadd.f32 %v3089_v58, %v3040_v23  ;;  %v3151_v8 = vsel %vm3146_vm15, %v9084_v4, %v9085_v14  ;;  %v3152_v0 = vsel %vm3146_vm15, %v9085_v14, %v9086_v51  ;;  %v9089_v7 = vld [vmem:[#allocation334_spill] sm:$0xff]  ;;  %v9093_v14 = vld [vmem:[#allocation404_spill] sm:$0xff] }
0x1bec   : > { %v3163_v34 = vadd.f32 %v3147_v43, %v3098_v38  ;;  %v3164_v17 = vadd.f32 %v3148_v21, %v3099_v28  ;;  %v3153_v39 = vsel %vm3146_vm15, %v9086_v51, %v9087_v61  ;;  %v3154_v63 = vsel %vm3146_vm15, %v9087_v61, %v9088_v31  ;;  %v9090_v58 = vld [vmem:[#allocation402_spill] sm:$0xff]  ;;  %v9092_v43 = vld [vmem:[#allocation335_spill] sm:$0xff]  ;;  %v9095_v61 = vld [vmem:[#allocation405_spill] sm:$0xff] }
0x1bed   : > { %v3165_v57 = vadd.f32 %v3149_v6, %v3100_v16  ;;  %v3166_v23 = vadd.f32 %v3150_v47, %v3101_v27  ;;  %v3212_v37 = vsel %vm3211_vm0, %v9090_v58, %v9089_v7  ;;  %v3213_v52 = vsel %vm3211_vm0, %v9089_v7, %v9091_v48  ;;  %v9094_v27 = vld [vmem:[#allocation336_spill] sm:$0xff]  ;;  %v9099_v31 = vld [vmem:[#allocation407_spill] sm:$0xff] }
0x1bee   : > { %v3167_v38 = vadd.f32 %v3151_v8, %v3102_v26  ;;  %v3168_v28 = vadd.f32 %v3152_v0, %v3103_v53  ;;  %v3214_v21 = vsel %vm3211_vm0, %v9091_v48, %v9092_v43  ;;  %vm3276_vm1 = vcmask 654336   ;;  %v9096_v53 = vld [vmem:[#allocation337_spill] sm:$0xff]  ;;  %v9100_v7 = vld [vmem:[#allocation408_spill] sm:$0xff] }
0x1bef   : > { %v3169_v30 = vadd.f32 %v3153_v39, %v3104_v10  ;;  %v3170_v4 = vadd.f32 %v3154_v63, %v3105_v50  ;;  %v3215_v16 = vsel %vm3211_vm0, %v9092_v43, %v9093_v14  ;;  %v3216_v6 = vsel %vm3211_vm0, %v9093_v14, %v9094_v27  ;;  %v9097_v50 = vld [vmem:[#allocation406_spill] sm:$0xff]  ;;  %v9098_v39 = vld [vmem:[#allocation343_spill] sm:$0xff]  ;;  %v9102_v43 = vld [vmem:[#allocation409_spill] sm:$0xff] }
0x1bf0   : > { %v3228_v47 = vadd.f32 %v3212_v37, %v3163_v34  ;;  %v3229_v51 = vadd.f32 %v3213_v52, %v3164_v17  ;;  %v3217_v26 = vsel %vm3211_vm0, %v9094_v27, %v9095_v61  ;;  %v3218_v8 = vsel %vm3211_vm0, %v9095_v61, %v9096_v53  ;;  %v9101_v37 = vld [vmem:[#allocation344_spill] sm:$0xff]  ;;  %v9103_v14 = vld [vmem:[#allocation345_spill] sm:$0xff] }
0x1bf1   : > { %v3230_v10 = vadd.f32 %v3214_v21, %v3165_v57  ;;  %v3219_v0 = vsel %vm3211_vm0, %v9096_v53, %v9097_v50  ;;  %v3277_v63 = vsel %vm3276_vm1, %v9099_v31, %v9098_v39  ;;  %v3278_v34 = vsel %vm3276_vm1, %v9098_v39, %v9100_v7  ;;  %v9108_v39 = vld [vmem:[#allocation412_spill] sm:$0xff] }
0x1bf2   : > { %v3231_v17 = vadd.f32 %v3215_v16, %v3166_v23  ;;  %v3232_v58 = vadd.f32 %v3216_v6, %v3167_v38  ;;  %v3279_v48 = vsel %vm3276_vm1, %v9100_v7, %v9101_v37  ;;  %vm3341_vm2 = vcmask 646144   ;;  %v9104_v23 = vld [vmem:[#allocation410_spill] sm:$0xff] }
0x1bf3   : > { %v3233_v57 = vadd.f32 %v3217_v26, %v3168_v28  ;;  %v3234_v52 = vadd.f32 %v3218_v8, %v3169_v30  ;;  %v3280_v21 = vsel %vm3276_vm1, %v9101_v37, %v9102_v43  ;;  %v3281_v27 = vsel %vm3276_vm1, %v9102_v43, %v9103_v14  ;;  %v9105_v6 = vld [vmem:[#allocation346_spill] sm:$0xff]  ;;  %v9106_v30 = vld [vmem:[#allocation411_spill] sm:$0xff]  ;;  %v9107_v8 = vld [vmem:[#allocation352_spill] sm:$0xff] }
0x1bf4   : > { %v3235_v61 = vadd.f32 %v3219_v0, %v3170_v4  ;;  %v3293_v53 = vadd.f32 %v3277_v63, %v3228_v47  ;;  %v3294_v50 = vadd.f32 %v3278_v34, %v3229_v51  ;;  %v3282_v38 = vsel %vm3276_vm1, %v9103_v14, %v9104_v23  ;;  %v9109_v51 = vld [vmem:[#allocation414_spill] sm:$0xff]  ;;  %v9110_v63 = vld [vmem:[#allocation353_spill] sm:$0xff]  ;;  %v9111_v34 = vld [vmem:[#allocation416_spill] sm:$0xff] }
0x1bf5   : > { %v3295_v16 = vadd.f32 %v3279_v48, %v3230_v10  ;;  %v3283_v28 = vsel %vm3276_vm1, %v9104_v23, %v9105_v6  ;;  %v3284_v26 = vsel %vm3276_vm1, %v9105_v6, %v9106_v30  ;;  %v3342_v31 = vsel %vm3341_vm2, %v9108_v39, %v9107_v8  ;;  %v9112_v48 = vld [vmem:[#allocation354_spill] sm:$0xff]  ;;  %v9114_v30 = vld [vmem:[#allocation355_spill] sm:$0xff]  ;;  %v9115_v39 = vld [vmem:[#allocation420_spill] sm:$0xff] }
0x1bf6   : > { %v3296_v4 = vadd.f32 %v3280_v21, %v3231_v17  ;;  %v3297_v47 = vadd.f32 %v3281_v27, %v3232_v58  ;;  %v3343_v0 = vsel %vm3341_vm2, %v9107_v8, %v9109_v51  ;;  %v3344_v10 = vsel %vm3341_vm2, %v9109_v51, %v9110_v63  ;;  %v9113_v14 = vld [vmem:[#allocation418_spill] sm:$0xff] }
0x1bf7   : > { %v3298_v7 = vadd.f32 %v3282_v38, %v3233_v57  ;;  %v3345_v37 = vsel %vm3341_vm2, %v9110_v63, %v9111_v34  ;;  %v3346_v43 = vsel %vm3341_vm2, %v9111_v34, %v9112_v48  ;;  %vm3406_vm3 = vcmask 637952   ;;  %v9121_v63 = vld [vmem:[#allocation363_spill] sm:$0xff]  ;;  %v9122_v34 = vld [vmem:[#allocation370_spill] sm:$0xff] }
0x1bf8   : > { %v3299_v17 = vadd.f32 %v3283_v28, %v3234_v52  ;;  %v3300_v58 = vadd.f32 %v3284_v26, %v3235_v61  ;;  %v3358_v21 = vadd.f32 %v3342_v31, %v3293_v53  ;;  %v3347_v27 = vsel %vm3341_vm2, %v9112_v48, %v9113_v14  ;;  %v9116_v52 = vld [vmem:[#allocation361_spill] sm:$0xff]  ;;  %v9118_v26 = vld [vmem:[#allocation422_spill] sm:$0xff] }
0x1bf9   : > { %v3359_v23 = vadd.f32 %v3343_v0, %v3294_v50  ;;  %v3360_v6 = vadd.f32 %v3344_v10, %v3295_v16  ;;  %v3348_v57 = vsel %vm3341_vm2, %v9113_v14, %v9114_v30  ;;  %vm3471_vm4 = vcmask 629760   ;;  %v9117_v61 = vld [vmem:[#allocation421_spill] sm:$0xff]  ;;  %v9119_v16 = vld [vmem:[#allocation362_spill] sm:$0xff]  ;;  %v9124_v14 = vld [vmem:[#allocation424_spill] sm:$0xff] }
0x1bfa   : > { %v3361_v38 = vadd.f32 %v3345_v37, %v3296_v4  ;;  %v3362_v8 = vadd.f32 %v3346_v43, %v3297_v47  ;;  %v3349_v51 = vsel %vm3341_vm2, %v9114_v30, %v9115_v39  ;;  %v3407_v53 = vsel %vm3406_vm3, %v9117_v61, %v9116_v52  ;;  %v9120_v47 = vld [vmem:[#allocation423_spill] sm:$0xff] }
0x1bfb   : > { %v3363_v28 = vadd.f32 %v3347_v27, %v3298_v7  ;;  %v3408_v50 = vsel %vm3406_vm3, %v9116_v52, %v9118_v26  ;;  %v3409_v31 = vsel %vm3406_vm3, %v9118_v26, %v9119_v16  ;;  %vm3536_vm5 = vcmask 621568   ;;  %v9123_v7 = vld [vmem:[#allocation426_spill] sm:$0xff]  ;;  %v9126_v52 = vld [vmem:[#allocation383_spill] sm:$0xff] }
0x1bfc   : > { %v3364_v4 = vadd.f32 %v3348_v57, %v3299_v17  ;;  %v3410_v0 = vsel %vm3406_vm3, %v9119_v16, %v9120_v47  ;;  %v3411_v10 = vsel %vm3406_vm3, %v9120_v47, %v9121_v63  ;;  %v3472_v37 = vsel %vm3471_vm4, %v9123_v7, %v9122_v34  ;;  %v9125_v57 = vld [vmem:[#allocation364_spill] sm:$0xff] }
0x1bfd   : > { %v7561_v48 = vadd.f32 %v3349_v51, %v3300_v58  ;;  %v3423_v43 = vadd.f32 %v3407_v53, %v3358_v21  ;;  %v3412_v27 = vsel %vm3406_vm3, %v9121_v63, %v9124_v14  ;;  %vm3601_vm7 = vcmask 613376   ;;  %v9127_v53 = vld [vmem:[#allocation371_spill] sm:$0xff]  ;;  %v9130_v47 = vld [vmem:[#allocation372_spill] sm:$0xff]  ;;  %v7590_v63 = vpop.permute.xlu0 %3664 }
0x1bfe   : > { %v3424_v17 = vadd.f32 %v3408_v50, %v3359_v23  ;;  %v3425_v30 = vadd.f32 %v3409_v31, %v3360_v6  ;;  %v3413_v39 = vsel %vm3406_vm3, %v9124_v14, %v9125_v57  ;;  %v3537_v61 = vsel %vm3536_vm5, %v6443_v46, %v9126_v52  ;;  %v9128_v50 = vld [vmem:[#allocation413_spill] sm:$0xff] }
0x1bff   : > { %v3426_v26 = vadd.f32 %v3410_v0, %v3361_v38  ;;  %v3427_v16 = vadd.f32 %v3411_v10, %v3362_v8  ;;  %v3488_v58 = vadd.f32 %v3472_v37, %v3423_v43  ;;  %v3473_v21 = vsel %vm3471_vm4, %v9122_v34, %v6306_v33  ;;  %v9129_v8 = vld [vmem:[#allocation425_spill] sm:$0xff] }
0x1c00   : > { %v3428_v51 = vadd.f32 %v3412_v27, %v3363_v28  ;;  %v3474_v23 = vsel %vm3471_vm4, %v6306_v33, %v9127_v53  ;;  %v3475_v6 = vsel %vm3471_vm4, %v9127_v53, %v6344_v22  ;;  %v3602_v46 = vsel %vm3601_vm7, %v6612_v5, %v9128_v50  ;;  %v9131_v34 = vld [vmem:[#allocation385_spill] sm:$0xff] }
0x1c01   : > { %v3429_v38 = vadd.f32 %v3413_v39, %v3364_v4  ;;  %v3414_v31 = vsel %vm3406_vm3, %v9125_v57, %v9129_v8  ;;  %v3476_v28 = vsel %vm3471_vm4, %v6344_v22, %v9130_v47  ;;  %v3553_v0 = vadd.f32 %v3537_v61, %v3488_v58  ;;  %v9133_v57 = vld [vmem:[#allocation373_spill] sm:$0xff]  ;;  %v9134_v58 = vld [vmem:[#allocation387_spill] sm:$0xff] }
0x1c02   : > { %v3489_v33 = vadd.f32 %v3473_v21, %v3424_v17  ;;  %v3538_v10 = vsel %vm3536_vm5, %v9126_v52, %v6478_v32  ;;  %v3539_v5 = vsel %vm3536_vm5, %v6478_v32, %v9131_v34  ;;  %v3667_v4 = vsel %vm3666_vm6, %v6780_v9, %v6778_v56  ;;  %v9132_v17 = vld [vmem:[#allocation415_spill] sm:$0xff] }
0x1c03   : > { %v3490_v7 = vadd.f32 %v3474_v23, %v3425_v30  ;;  %v3491_v37 = vadd.f32 %v3475_v6, %v3426_v26  ;;  %v3618_v43 = vadd.f32 %v3602_v46, %v3553_v0  ;;  %vm3731_vm8 = vcmask 596992  }
0x1c04   : > { %v3492_v22 = vadd.f32 %v3476_v28, %v3427_v16  ;;  %v3477_v14 = vsel %vm3471_vm4, %v9130_v47, %v6382_v45  ;;  %v3603_v27 = vsel %vm3601_vm7, %v9128_v50, %v6647_v41  ;;  %v3604_v32 = vsel %vm3601_vm7, %v6647_v41, %v9132_v17  ;;  %v9135_v47 = vld [vmem:[#allocation417_spill] sm:$0xff] }
0x1c05   : > { %v3478_v9 = vsel %vm3471_vm4, %v6382_v45, %v9133_v57  ;;  %v3554_v30 = vadd.f32 %v3538_v10, %v3489_v33  ;;  %v3555_v39 = vadd.f32 %v3539_v5, %v3490_v7  ;;  %v3683_v52 = vadd.f32 %v3667_v4, %v3618_v43 }
0x1c06   : > { %v3540_v16 = vsel %vm3536_vm5, %v9131_v34, %v6516_v36  ;;  %v3541_v21 = vsel %vm3536_vm5, %v6516_v36, %v9134_v58  ;;  %v3668_v41 = vsel %vm3666_vm6, %v6778_v56, %v6806_v11  ;;  %v3493_v45 = vadd.f32 %v3477_v14, %v3428_v51  ;;  %v9137_v14 = vld [vmem:[#allocation419_spill] sm:$0xff] }
0x1c07   : > { %v3619_v23 = vadd.f32 %v3603_v27, %v3554_v30  ;;  %v3620_v6 = vadd.f32 %v3604_v32, %v3555_v39  ;;  %v3494_v46 = vadd.f32 %v3478_v9, %v3429_v38  ;;  %v3479_v8 = vsel %vm3471_vm4, %v9133_v57, %v6420_v3  ;;  %v9136_v3 = vld [vmem:[#allocation389_spill] sm:$0xff] }
0x1c08   : > { %v3605_v36 = vsel %vm3601_vm7, %v9132_v17, %v6682_v55  ;;  %v3606_v56 = vsel %vm3601_vm7, %v6682_v55, %v9135_v47  ;;  %v3556_v11 = vadd.f32 %v3540_v16, %v3491_v37  ;;  %v3557_v28 = vadd.f32 %v3541_v21, %v3492_v22 }
0x1c09   : > { %v3684_v51 = vadd.f32 %v3668_v41, %v3619_v23  ;;  %v3685_v0 = vadd.f32 %v6813_v35, %v3620_v6  ;;  %v3542_v38 = vsel %vm3536_vm5, %v9134_v58, %v6551_v60  ;;  %v3543_v34 = vsel %vm3536_vm5, %v6551_v60, %v9136_v3 }
0x1c0a   : > { %v3621_v55 = vadd.f32 %v3605_v36, %v3556_v11  ;;  %v3622_v7 = vadd.f32 %v3606_v56, %v3557_v28  ;;  %v3430_v35 = vadd.f32 %v3414_v31, %v7561_v48  ;;  %v3607_v22 = vsel %vm3601_vm7, %v9135_v47, %v6717_v1 }
0x1c0b   : > { %v3608_v60 = vsel %vm3601_vm7, %v6717_v1, %v9137_v14  ;;  %v3558_v27 = vadd.f32 %v3542_v38, %v3493_v45  ;;  %v3559_v17 = vadd.f32 %v3543_v34, %v3494_v46  ;;  %v3544_v48 = vsel %vm3536_vm5, %v9136_v3, %v6589_v40 }
0x1c0c   : > { %v3686_v32 = vadd.f32 %v6837_v2, %v3621_v55  ;;  %v3687_v57 = vadd.f32 %v6840_v18, %v3622_v7  ;;  %v3495_v39 = vadd.f32 %v3479_v8, %v3430_v35  ;;  %v3609_v2 = vsel %vm3601_vm7, %v9137_v14, %v6752_v62 }
0x1c0d   : > { %v3674_v40 = vsel %vm3666_vm6, %v6857_v42, %v7590_v63  ;;  %v4678_v38 = vmov 58   ;;  %v4679_v3 = vmov 59   ;;  %vm3796_vm6 = vcmask 588800  }
0x1c0e   : > { %v3716_v61 = vpop.permute.xlu1 %3715  ;;  %v3714_v26 = vpop.permute.xlu0 %3713  ;;  %v3560_v18 = vadd.f32 %v3544_v48, %v3495_v39  ;;  %4545 = vset.pattern.permute.xlu0 %v4679_v3  ;;  %vm3861_vm9 = vcmask 580608   ;;  %vm3926_vm10 = vcmask 572416   ;;  %vm3991_vm11 = vcmask 564224  }
0x1c0f   : > { %v3732_v53 = vsel %vm3731_vm8, %v3714_v26, %v3716_v61  ;;  %v3624_v26 = vadd.f32 %v3608_v60, %v3559_v17  ;;  %vm4056_vm12 = vcmask 556032   ;;  %vm4121_vm13 = vcmask 547840  }
0x1c10   : > { %v7623_v50 = vadd.f32 %v3732_v53, %v3683_v52  ;;  %v3625_v6 = vadd.f32 %v3609_v2, %v3560_v18  ;;  %vm4186_vm14 = vcmask 539648   ;;  %vm4251_vm15 = vcmask 531456  }
0x1c11   : > { %v3689_v21 = vadd.f32 %v6864_v25, %v3624_v26 }
0x1c12   : > { %v3720_v33 = vpop.permute.xlu1 %3719  ;;  %v3718_v10 = vpop.permute.xlu0 %3717  ;;  %v3690_v36 = vadd.f32 %v3674_v40, %v3625_v6  ;;  %v4555_v40 = vld [vmem:[%s7948_s0] sm:$0xff]  ;;  %v4683_v6 = vmov 61  }
0x1c13   : > { %v3733_v5 = vsel %vm3731_vm8, %v3716_v61, %v3718_v10  ;;  %v3734_v4 = vsel %vm3731_vm8, %v3718_v10, %v3720_v33  ;;  %v3623_v61 = vadd.f32 %v3607_v22, %v3558_v27 }
0x1c14   : > { %v7643_v37 = vadd.f32 %v3733_v5, %v3684_v51  ;;  %v7645_v43 = vadd.f32 %v3734_v4, %v3685_v0 }
0x1c15   : > { %v3688_v58 = vadd.f32 %v6860_v54, %v3623_v61 }
0x1c16   : > { %v3724_v9 = vpop.permute.xlu1 %3723  ;;  %v3722_v30 = vpop.permute.xlu0 %3721 }
0x1c17   : > { %v3735_v31 = vsel %vm3731_vm8, %v3720_v33, %v3722_v30  ;;  %v3736_v52 = vsel %vm3731_vm8, %v3722_v30, %v3724_v9 }
0x1c18   : > { %v3751_v1 = vadd.f32 %v3735_v31, %v3686_v32  ;;  %v3752_v16 = vadd.f32 %v3736_v52, %v3687_v57 }
0x1c1a   : > { %v3728_v41 = vpop.permute.xlu1 %3727  ;;  %v3726_v53 = vpop.permute.xlu0 %3725 }
0x1c1b   : > { %v3737_v45 = vsel %vm3731_vm8, %v3724_v9, %v3726_v53  ;;  %v3738_v23 = vsel %vm3731_vm8, %v3726_v53, %v3728_v41 }
0x1c1c   : > { %v3753_v46 = vadd.f32 %v3737_v45, %v3688_v58  ;;  %v3754_v8 = vadd.f32 %v3738_v23, %v3689_v21  ;;  %v4681_v45 = vmov 60   ;;  %v4682_v23 = vmov 62  }
0x1c1e   : > { %v3730_v62 = vpop.permute.xlu0 %3729 }
0x1c1f   : > { %v3739_v47 = vsel %vm3731_vm8, %v3728_v41, %v3730_v62 }
0x1c20   : > { %v3755_v54 = vadd.f32 %v3739_v47, %v3690_v36 }
0x1c27   : > { %v3758_v56 = vpop.permute.xlu1 %3757 }
0x1c28   : > { %v3761_v25 = vmul.f32 %v3758_v56, %v4747_v19  ;;  %v3760_v11 = vmul.f32 %v3758_v56, %v4740_v12  ;;  %v3763_v42 = vmul.f32 %v3758_v56, %v4742_v13  ;;  %v3762_v63 = vmul.f32 %v3758_v56, %v4756_v24 }
0x1c29   : > { %v3765_v28 = vmul.f32 %v3758_v56, %v4749_v20  ;;  %v3764_v51 = vmul.f32 %v3758_v56, %v8912_v59  ;;  %v3767_v0 = vmul.f32 %v3758_v56, %v8922_v44  ;;  %v3766_v33 = vmul.f32 %v3758_v56, %v8923_v29 }
0x1c2a   : > { %3780 = vrot.lane.b32.xlu1 %v3761_v25, %s4677_s29  ;;  %3778 = vrot.lane.b32.xlu0 %v3760_v11, %s4677_s29  ;;  %v3768_v10 = vmul.f32 %v3758_v56, %v8931_v49 }
0x1c2e   : > { %3784 = vrot.lane.b32.xlu1 %v3763_v42, %s4677_s29  ;;  %3782 = vrot.lane.b32.xlu0 %v3762_v63, %s4677_s29 }
0x1c32   : > { %3788 = vrot.lane.b32.xlu1 %v3765_v28, %s4677_s29  ;;  %3786 = vrot.lane.b32.xlu0 %v3764_v51, %s4677_s29 }
0x1c36   : > { %3792 = vrot.lane.b32.xlu1 %v3767_v0, %s4677_s29  ;;  %3790 = vrot.lane.b32.xlu0 %v3766_v33, %s4677_s29 }
0x1c3a   : > { %3822 = vperm.xlu1 %4543, %v7056_v15   ;;  %3794 = vrot.lane.b32.xlu0 %v3768_v10, %s4677_s29 }
0x1c3e   : > { %4544 = vset.pattern.permute.xlu1 %v4678_v38 }
0x1c9c   : > { %v3781_v34 = vpop.permute.xlu1 %3780  ;;  %v3779_v5 = vpop.permute.xlu0 %3778 }
0x1c9d   : > { %v3797_v4 = vsel %vm3796_vm6, %v3779_v5, %v3781_v34 }
0x1c9e   : > { %v7684_v55 = vadd.f32 %v3797_v4, %v7623_v50 }
0x1ca0   : > { %v3785_v7 = vpop.permute.xlu1 %3784  ;;  %v3783_v35 = vpop.permute.xlu0 %3782 }
0x1ca1   : > { %v3798_v22 = vsel %vm3796_vm6, %v3781_v34, %v3783_v35  ;;  %v3799_v14 = vsel %vm3796_vm6, %v3783_v35, %v3785_v7 }
0x1ca2   : > { %v7689_v15 = vadd.f32 %v3798_v22, %v7643_v37  ;;  %v3815_v60 = vadd.f32 %v3799_v14, %v7645_v43 }
0x1ca4   : > { %v3789_v27 = vpop.permute.xlu1 %3788  ;;  %v3787_v17 = vpop.permute.xlu0 %3786 }
0x1ca5   : > { %v3800_v32 = vsel %vm3796_vm6, %v3785_v7, %v3787_v17  ;;  %v3801_v57 = vsel %vm3796_vm6, %v3787_v17, %v3789_v27 }
0x1ca6   : > { %v7694_v9 = vadd.f32 %v3800_v32, %v3751_v1  ;;  %v3817_v50 = vadd.f32 %v3801_v57, %v3752_v16 }
0x1ca8   : > { %v3793_v30 = vpop.permute.xlu1 %3792  ;;  %v3791_v39 = vpop.permute.xlu0 %3790 }
0x1ca9   : > { %v3802_v48 = vsel %vm3796_vm6, %v3789_v27, %v3791_v39  ;;  %v3803_v31 = vsel %vm3796_vm6, %v3791_v39, %v3793_v30 }
0x1caa   : > { %v3818_v52 = vadd.f32 %v3802_v48, %v3753_v46  ;;  %v7698_v37 = vadd.f32 %v3803_v31, %v3754_v8  ;;  %v4684_v8 = vmov 63  }
0x1cac   : > { %v3795_v61 = vpop.permute.xlu0 %3794 }
0x1cad   : > { %v3804_v43 = vsel %vm3796_vm6, %v3793_v30, %v3795_v61 }
0x1cae   : > { %v7701_v26 = vadd.f32 %v3804_v43, %v3755_v54 }
0x1cb5   : > { %v3823_v2 = vpop.permute.xlu1 %3822 }
0x1cb6   : > { %v3826_v18 = vmul.f32 %v3823_v2, %v4747_v19  ;;  %v3825_v1 = vmul.f32 %v3823_v2, %v4740_v12  ;;  %v3828_v16 = vmul.f32 %v3823_v2, %v4742_v13  ;;  %v3827_v58 = vmul.f32 %v3823_v2, %v4756_v24 }
0x1cb7   : > { %v3830_v21 = vmul.f32 %v3823_v2, %v4749_v20  ;;  %v3829_v41 = vmul.f32 %v3823_v2, %v8912_v59  ;;  %v3831_v53 = vmul.f32 %v3823_v2, %v8923_v29  ;;  %v3833_v46 = vmul.f32 %v3823_v2, %v8931_v49 }
0x1cb8   : > { %3845 = vrot.lane.b32.xlu1 %v3826_v18, %s4680_s30  ;;  %3843 = vrot.lane.b32.xlu0 %v3825_v1, %s4680_s30  ;;  %v3832_v36 = vmul.f32 %v3823_v2, %v8922_v44 }
0x1cbc   : > { %3849 = vrot.lane.b32.xlu1 %v3828_v16, %s4680_s30  ;;  %3847 = vrot.lane.b32.xlu0 %v3827_v58, %s4680_s30 }
0x1cc0   : > { %3853 = vrot.lane.b32.xlu1 %v3830_v21, %s4680_s30  ;;  %3851 = vrot.lane.b32.xlu0 %v3829_v41, %s4680_s30 }
0x1cc4   : > { %3887 = vperm.xlu1 %4544, %v4555_v40   ;;  %3855 = vrot.lane.b32.xlu0 %v3831_v53, %s4680_s30 }
0x1cc8   : > { %4546 = vset.pattern.permute.xlu1 %v4681_v45  ;;  %3952 = vperm.xlu0 %4545, %v4555_v40  }
0x1cc9   : > { %4017 = vperm.xlu1 %4546, %v4555_v40  }
0x1ccc   : > { %4548 = vset.pattern.permute.xlu0 %v4682_v23 }
0x1ccd   : > { %4547 = vset.pattern.permute.xlu1 %v4683_v6  ;;  %4147 = vperm.xlu0 %4548, %v4555_v40  }
0x1cce   : > { %4082 = vperm.xlu1 %4547, %v4555_v40  }
0x1cd1   : > { %3859 = vrot.lane.b32.xlu0 %v3833_v46, %s4680_s30 }
0x1cd2   : > { %4549 = vset.pattern.permute.xlu1 %v4684_v8  ;;  %4550 = vset.pattern.permute.xlu0 %v4684_v8 }
0x1cd3   : > { %4212 = vperm.xlu1 %4549, %v4555_v40  }
0x1cd7   : > { %3857 = vrot.lane.b32.xlu1 %v3832_v36, %s4680_s30 }
0x1d2a   : > { %v3846_v62 = vpop.permute.xlu1 %3845  ;;  %v3844_v47 = vpop.permute.xlu0 %3843 }
0x1d2b   : > { %v3862_v54 = vsel %vm3861_vm9, %v3844_v47, %v3846_v62 }
0x1d2c   : > { %v7726_v56 = vadd.f32 %v3862_v54, %v7684_v55 }
0x1d2e   : > { %v3850_v25 = vpop.permute.xlu1 %3849  ;;  %v3848_v11 = vpop.permute.xlu0 %3847 }
0x1d2f   : > { %v3863_v42 = vsel %vm3861_vm9, %v3846_v62, %v3848_v11  ;;  %v3864_v63 = vsel %vm3861_vm9, %v3848_v11, %v3850_v25 }
0x1d30   : > { %v7731_v28 = vadd.f32 %v3863_v42, %v7689_v15  ;;  %v7733_v51 = vadd.f32 %v3864_v63, %v3815_v60 }
0x1d32   : > { %v3854_v0 = vpop.permute.xlu1 %3853  ;;  %v3852_v33 = vpop.permute.xlu0 %3851 }
0x1d33   : > { %v3865_v10 = vsel %vm3861_vm9, %v3850_v25, %v3852_v33  ;;  %v3866_v38 = vsel %vm3861_vm9, %v3852_v33, %v3854_v0 }
0x1d34   : > { %v7738_v3 = vadd.f32 %v3865_v10, %v7694_v9  ;;  %v7740_v34 = vadd.f32 %v3866_v38, %v3817_v50 }
0x1d36   : > { %v3856_v5 = vpop.permute.xlu0 %3855 }
0x1d37   : > { %v3867_v4 = vsel %vm3861_vm9, %v3854_v0, %v3856_v5 }
0x1d38   : > { %v7743_v55 = vadd.f32 %v3867_v4, %v3818_v52 }
0x1d3f   : > { %v3888_v7 = vpop.permute.xlu1 %3887 }
0x1d40   : > { %v3890_v35 = vmul.f32 %v3888_v7, %v4740_v12  ;;  %v3891_v22 = vmul.f32 %v3888_v7, %v4747_v19  ;;  %v3892_v14 = vmul.f32 %v3888_v7, %v4756_v24  ;;  %v3893_v60 = vmul.f32 %v3888_v7, %v4742_v13 }
0x1d41   : > { %v3894_v27 = vmul.f32 %v3888_v7, %v8912_v59  ;;  %v3895_v17 = vmul.f32 %v3888_v7, %v4749_v20  ;;  %v3896_v57 = vmul.f32 %v3888_v7, %v8923_v29  ;;  %v3897_v9 = vmul.f32 %v3888_v7, %v8922_v44 }
0x1d42   : > { %3908 = vrot.lane.b32.xlu1 %v3890_v35, %s4685_s5  ;;  %3910 = vrot.lane.b32.xlu0 %v3891_v22, %s4685_s5  ;;  %v3898_v48 = vmul.f32 %v3888_v7, %v8931_v49 }
0x1d43   : > { %v3953_v50 = vpop.permute.xlu0 %3952 }
0x1d44   : > { %v4018_v15 = vpop.permute.xlu1 %4017  ;;  %v3955_v39 = vmul.f32 %v3953_v50, %v4740_v12  ;;  %v3956_v43 = vmul.f32 %v3953_v50, %v4747_v19  ;;  %v3957_v2 = vmul.f32 %v3953_v50, %v4756_v24  ;;  %v3958_v18 = vmul.f32 %v3953_v50, %v4742_v13 }
0x1d45   : > { %v3959_v1 = vmul.f32 %v3953_v50, %v8912_v59  ;;  %v3960_v16 = vmul.f32 %v3953_v50, %v4749_v20  ;;  %v3961_v58 = vmul.f32 %v3953_v50, %v8923_v29  ;;  %v3963_v21 = vmul.f32 %v3953_v50, %v8931_v49 }
0x1d46   : > { %3912 = vrot.lane.b32.xlu1 %v3892_v14, %s4685_s5  ;;  %3914 = vrot.lane.b32.xlu0 %v3893_v60, %s4685_s5  ;;  %v4020_v41 = vmul.f32 %v4018_v15, %v4740_v12  ;;  %v4021_v53 = vmul.f32 %v4018_v15, %v4747_v19  ;;  %v4022_v40 = vmul.f32 %v4018_v15, %v4756_v24 }
0x1d47   : > { %v4023_v45 = vmul.f32 %v4018_v15, %v4742_v13  ;;  %v4024_v23 = vmul.f32 %v4018_v15, %v8912_v59  ;;  %v4025_v6 = vmul.f32 %v4018_v15, %v4749_v20  ;;  %v4026_v46 = vmul.f32 %v4018_v15, %v8923_v29 }
0x1d48   : > { %v4027_v8 = vmul.f32 %v4018_v15, %v8922_v44  ;;  %v4028_v62 = vmul.f32 %v4018_v15, %v8931_v49  ;;  %v4148_v10 = vpop.permute.xlu0 %4147 }
0x1d49   : > { %v7751_v32 = vpop.permute.xlu1 %4082  ;;  %v4151_v38 = vmul.f32 %v4148_v10, %v4747_v19  ;;  %v4153_v4 = vmul.f32 %v4148_v10, %v4742_v13  ;;  %v4152_v7 = vmul.f32 %v4148_v10, %v4756_v24  ;;  %v4155_v35 = vmul.f32 %v4148_v10, %v4749_v20 }
0x1d4a   : > { %3916 = vrot.lane.b32.xlu1 %v3894_v27, %s4685_s5  ;;  %3918 = vrot.lane.b32.xlu0 %v3895_v17, %s4685_s5  ;;  %v4085_v36 = vmul.f32 %v7751_v32, %v4740_v12  ;;  %v4086_v47 = vmul.f32 %v7751_v32, %v4747_v19  ;;  %v4087_v54 = vmul.f32 %v7751_v32, %v4756_v24 }
0x1d4b   : > { %v4088_v25 = vmul.f32 %v7751_v32, %v4742_v13  ;;  %v4089_v11 = vmul.f32 %v7751_v32, %v8912_v59  ;;  %v4090_v42 = vmul.f32 %v7751_v32, %v4749_v20  ;;  %v4091_v63 = vmul.f32 %v7751_v32, %v8923_v29 }
0x1d4c   : > { %v4092_v0 = vmul.f32 %v7751_v32, %v8922_v44  ;;  %v4093_v33 = vmul.f32 %v7751_v32, %v8931_v49  ;;  %v4154_v22 = vmul.f32 %v4148_v10, %v8912_v59  ;;  %v4157_v14 = vmul.f32 %v4148_v10, %v8922_v44 }
0x1d4d   : > { %v4156_v15 = vmul.f32 %v4148_v10, %v8923_v29  ;;  %v4158_v27 = vmul.f32 %v4148_v10, %v8931_v49 }
0x1d4e   : > { %3920 = vrot.lane.b32.xlu1 %v3896_v57, %s4685_s5  ;;  %v7755_v30 = vpop.permute.xlu1 %4212  ;;  %3922 = vrot.lane.b32.xlu0 %v3897_v9, %s4685_s5 }
0x1d4f   : > { %v4215_v60 = vmul.f32 %v7755_v30, %v4740_v12  ;;  %v4217_v17 = vmul.f32 %v7755_v30, %v4756_v24  ;;  %v4216_v32 = vmul.f32 %v7755_v30, %v4747_v19  ;;  %v4219_v57 = vmul.f32 %v7755_v30, %v8912_v59  ;;  %v3860_v59 = vpop.permute.xlu0 %3859 }
0x1d50   : > { %v4218_v9 = vmul.f32 %v7755_v30, %v4742_v13  ;;  %v4223_v19 = vmul.f32 %v7755_v30, %v8931_v49  ;;  %v4222_v24 = vmul.f32 %v7755_v30, %v8922_v44 }
0x1d52   : > { %3924 = vrot.lane.b32.xlu1 %v3898_v48, %s4685_s5  ;;  %v7759_v31 = vpop.permute.xlu1 %3857  ;;  %3973 = vrot.lane.b32.xlu0 %v3955_v39, %s4686_s6 }
0x1d53   : > { %v3868_v52 = vsel %vm3861_vm9, %v3856_v5, %v7759_v31  ;;  %v4150_v5 = vmul.f32 %v4148_v10, %v4740_v12  ;;  %v4221_v12 = vmul.f32 %v7755_v30, %v8923_v29 }
0x1d54   : > { %v7764_v61 = vadd.f32 %v3868_v52, %v7698_v37  ;;  %v3962_v37 = vmul.f32 %v3953_v50, %v8922_v44  ;;  %v4220_v50 = vmul.f32 %v7755_v30, %v4749_v20 }
0x1d56   : > { %3975 = vrot.lane.b32.xlu1 %v3956_v43, %s4686_s6  ;;  %3977 = vrot.lane.b32.xlu0 %v3957_v2, %s4686_s6 }
0x1d5a   : > { %3979 = vrot.lane.b32.xlu1 %v3958_v18, %s4686_s6  ;;  %3981 = vrot.lane.b32.xlu0 %v3959_v1, %s4686_s6 }
0x1d5e   : > { %3983 = vrot.lane.b32.xlu1 %v3960_v16, %s4686_s6  ;;  %3985 = vrot.lane.b32.xlu0 %v3961_v58, %s4686_s6 }
0x1d62   : > { %3987 = vrot.lane.b32.xlu1 %v3962_v37, %s4686_s6  ;;  %3989 = vrot.lane.b32.xlu0 %v3963_v21, %s4686_s6 }
0x1d66   : > { %4038 = vrot.lane.b32.xlu1 %v4020_v41, %s4687_s7  ;;  %4040 = vrot.lane.b32.xlu0 %v4021_v53, %s4687_s7  ;;  %v3869_v41 = vsel %vm3861_vm9, %v7759_v31, %v3860_v59 }
0x1d6a   : > { %4042 = vrot.lane.b32.xlu1 %v4022_v40, %s4687_s7  ;;  %4044 = vrot.lane.b32.xlu0 %v4023_v45, %s4687_s7  ;;  %v3885_v45 = vadd.f32 %v3869_v41, %v7701_v26 }
0x1d6e   : > { %4046 = vrot.lane.b32.xlu1 %v4024_v23, %s4687_s7  ;;  %4048 = vrot.lane.b32.xlu0 %v4025_v6, %s4687_s7 }
0x1d72   : > { %4050 = vrot.lane.b32.xlu1 %v4026_v46, %s4687_s7  ;;  %4052 = vrot.lane.b32.xlu0 %v4027_v8, %s4687_s7 }
0x1d76   : > { %4054 = vrot.lane.b32.xlu1 %v4028_v62, %s4687_s7  ;;  %4103 = vrot.lane.b32.xlu0 %v4085_v36, %s4688_s8 }
0x1d7a   : > { %4105 = vrot.lane.b32.xlu1 %v4086_v47, %s4688_s8  ;;  %4107 = vrot.lane.b32.xlu0 %v4087_v54, %s4688_s8 }
0x1d7e   : > { %4109 = vrot.lane.b32.xlu1 %v4088_v25, %s4688_s8  ;;  %4111 = vrot.lane.b32.xlu0 %v4089_v11, %s4688_s8 }
0x1d82   : > { %4113 = vrot.lane.b32.xlu1 %v4090_v42, %s4688_s8  ;;  %4115 = vrot.lane.b32.xlu0 %v4091_v63, %s4688_s8 }
0x1d86   : > { %4117 = vrot.lane.b32.xlu1 %v4092_v0, %s4688_s8  ;;  %4119 = vrot.lane.b32.xlu0 %v4093_v33, %s4688_s8 }
0x1d8a   : > { %4170 = vrot.lane.b32.xlu0 %v4151_v38, %s4689_s11  ;;  %4168 = vrot.lane.b32.xlu1 %v4150_v5, %s4689_s11 }
0x1d8e   : > { %4174 = vrot.lane.b32.xlu0 %v4153_v4, %s4689_s11  ;;  %4172 = vrot.lane.b32.xlu1 %v4152_v7, %s4689_s11 }
0x1d92   : > { %4178 = vrot.lane.b32.xlu0 %v4155_v35, %s4689_s11  ;;  %4176 = vrot.lane.b32.xlu1 %v4154_v22, %s4689_s11 }
0x1d96   : > { %4182 = vrot.lane.b32.xlu0 %v4157_v14, %s4689_s11  ;;  %4180 = vrot.lane.b32.xlu1 %v4156_v15, %s4689_s11 }
0x1d9a   : > { %4233 = vrot.lane.b32.xlu0 %v4215_v60, %s4690_s12  ;;  %4184 = vrot.lane.b32.xlu1 %v4158_v27, %s4689_s11 }
0x1d9e   : > { %4237 = vrot.lane.b32.xlu0 %v4217_v17, %s4690_s12  ;;  %4235 = vrot.lane.b32.xlu1 %v4216_v32, %s4690_s12 }
0x1da2   : > { %4241 = vrot.lane.b32.xlu0 %v4219_v57, %s4690_s12  ;;  %4239 = vrot.lane.b32.xlu1 %v4218_v9, %s4690_s12 }
0x1da6   : > { %4245 = vrot.lane.b32.xlu0 %v4221_v12, %s4690_s12  ;;  %4243 = vrot.lane.b32.xlu1 %v4220_v50, %s4690_s12 }
0x1daa   : > { %4249 = vrot.lane.b32.xlu0 %v4223_v19, %s4690_s12  ;;  %4247 = vrot.lane.b32.xlu1 %v4222_v24, %s4690_s12 }
0x1db4   : > { %v3909_v13 = vpop.permute.xlu1 %3908  ;;  %v3911_v39 = vpop.permute.xlu0 %3910 }
0x1db5   : > { %v3927_v48 = vsel %vm3926_vm10, %v3909_v13, %v3911_v39 }
0x1db6   : > { %v3943_v29 = vadd.f32 %v3927_v48, %v7726_v56 }
0x1db8   : > { %v3913_v52 = vpop.permute.xlu1 %3912  ;;  %v3915_v20 = vpop.permute.xlu0 %3914 }
0x1db9   : > { %v3928_v43 = vsel %vm3926_vm10, %v3911_v39, %v3913_v52  ;;  %v3929_v2 = vsel %vm3926_vm10, %v3913_v52, %v3915_v20 }
0x1dba   : > { %v3944_v49 = vadd.f32 %v3928_v43, %v7731_v28  ;;  %v3945_v44 = vadd.f32 %v3929_v2, %v7733_v51 }
0x1dbc   : > { %v3917_v30 = vpop.permute.xlu1 %3916  ;;  %v3919_v18 = vpop.permute.xlu0 %3918 }
0x1dbd   : > { %v3930_v1 = vsel %vm3926_vm10, %v3915_v20, %v3917_v30  ;;  %v3931_v16 = vsel %vm3926_vm10, %v3917_v30, %v3919_v18 }
0x1dbe   : > { %v3946_v58 = vadd.f32 %v3930_v1, %v7738_v3  ;;  %v3947_v56 = vadd.f32 %v3931_v16, %v7740_v34 }
0x1dc0   : > { %v3921_v37 = vpop.permute.xlu1 %3920  ;;  %v3923_v21 = vpop.permute.xlu0 %3922 }
0x1dc1   : > { %v3932_v53 = vsel %vm3926_vm10, %v3919_v18, %v3921_v37  ;;  %v3933_v28 = vsel %vm3926_vm10, %v3921_v37, %v3923_v21 }
0x1dc2   : > { %v3948_v51 = vadd.f32 %v3932_v53, %v7743_v55  ;;  %v3949_v40 = vadd.f32 %v3933_v28, %v7764_v61 }
0x1dc4   : > { %v3925_v23 = vpop.permute.xlu1 %3924  ;;  %v3974_v6 = vpop.permute.xlu0 %3973 }
0x1dc5   : > { %v3934_v3 = vsel %vm3926_vm10, %v3923_v21, %v3925_v23 }
0x1dc6   : > { %v3950_v34 = vadd.f32 %v3934_v3, %v3885_v45 }
0x1dc8   : > { %v3976_v46 = vpop.permute.xlu1 %3975  ;;  %v3978_v8 = vpop.permute.xlu0 %3977 }
0x1dc9   : > { %v3992_v31 = vsel %vm3991_vm11, %v3974_v6, %v3976_v46  ;;  %v3993_v36 = vsel %vm3991_vm11, %v3976_v46, %v3978_v8 }
0x1dca   : > { %v4008_v62 = vadd.f32 %v3992_v31, %v3943_v29  ;;  %v4009_v47 = vadd.f32 %v3993_v36, %v3944_v49 }
0x1dcc   : > { %v3980_v54 = vpop.permute.xlu1 %3979  ;;  %v3982_v55 = vpop.permute.xlu0 %3981 }
0x1dcd   : > { %v3994_v61 = vsel %vm3991_vm11, %v3978_v8, %v3980_v54  ;;  %v3995_v26 = vsel %vm3991_vm11, %v3980_v54, %v3982_v55 }
0x1dce   : > { %v4010_v25 = vadd.f32 %v3994_v61, %v3945_v44  ;;  %v7850_v11 = vadd.f32 %v3995_v26, %v3946_v58 }
0x1dd0   : > { %v3984_v42 = vpop.permute.xlu1 %3983  ;;  %v3986_v63 = vpop.permute.xlu0 %3985 }
0x1dd1   : > { %v3996_v0 = vsel %vm3991_vm11, %v3982_v55, %v3984_v42  ;;  %v3997_v33 = vsel %vm3991_vm11, %v3984_v42, %v3986_v63 }
0x1dd2   : > { %v7854_v10 = vadd.f32 %v3996_v0, %v3947_v56  ;;  %v7856_v38 = vadd.f32 %v3997_v33, %v3948_v51 }
0x1dd4   : > { %v3988_v5 = vpop.permute.xlu1 %3987  ;;  %v3990_v4 = vpop.permute.xlu0 %3989 }
0x1dd5   : > { %v3998_v7 = vsel %vm3991_vm11, %v3986_v63, %v3988_v5  ;;  %v3999_v35 = vsel %vm3991_vm11, %v3988_v5, %v3990_v4 }
0x1dd6   : > { %v7860_v22 = vadd.f32 %v3998_v7, %v3949_v40  ;;  %v7862_v14 = vadd.f32 %v3999_v35, %v3950_v34 }
0x1dd8   : > { %v4039_v15 = vpop.permute.xlu1 %4038  ;;  %v4041_v60 = vpop.permute.xlu0 %4040 }
0x1dd9   : > { %v4057_v58 = vsel %vm4056_vm12, %v4039_v15, %v4041_v60 }
0x1dda   : > { %v4073_v41 = vadd.f32 %v4057_v58, %v4008_v62 }
0x1ddc   : > { %v4043_v27 = vpop.permute.xlu1 %4042  ;;  %v4045_v17 = vpop.permute.xlu0 %4044 }
0x1ddd   : > { %v4058_v56 = vsel %vm4056_vm12, %v4041_v60, %v4043_v27  ;;  %v4059_v28 = vsel %vm4056_vm12, %v4043_v27, %v4045_v17 }
0x1dde   : > { %v4074_v53 = vadd.f32 %v4058_v56, %v4009_v47  ;;  %v4075_v46 = vadd.f32 %v4059_v28, %v4010_v25 }
0x1de0   : > { %v4047_v32 = vpop.permute.xlu1 %4046  ;;  %v4049_v57 = vpop.permute.xlu0 %4048 }
0x1de1   : > { %v4060_v45 = vsel %vm4056_vm12, %v4045_v17, %v4047_v32  ;;  %v4061_v8 = vsel %vm4056_vm12, %v4047_v32, %v4049_v57 }
0x1de2   : > { %v4076_v62 = vadd.f32 %v4060_v45, %v7850_v11  ;;  %v4077_v7 = vadd.f32 %v4061_v8, %v7854_v10 }
0x1de4   : > { %v7864_v9 = vpop.permute.xlu1 %4050  ;;  %v7866_v12 = vpop.permute.xlu0 %4052 }
0x1de5   : > { %v4062_v47 = vsel %vm4056_vm12, %v4049_v57, %v7864_v9  ;;  %v4063_v35 = vsel %vm4056_vm12, %v7864_v9, %v7866_v12 }
0x1de6   : > { %v4078_v27 = vadd.f32 %v4062_v47, %v7856_v38 }
0x1de8   : > { %v7868_v50 = vpop.permute.xlu1 %4054  ;;  %v4104_v19 = vpop.permute.xlu0 %4103 }
0x1de9   : > { %v4064_v17 = vsel %vm4056_vm12, %v7866_v12, %v7868_v50 }
0x1dec   : > { %v4106_v24 = vpop.permute.xlu1 %4105  ;;  %v4108_v59 = vpop.permute.xlu0 %4107 }
0x1ded   : > { %v4122_v37 = vsel %vm4121_vm13, %v4104_v19, %v4106_v24  ;;  %v4123_v21 = vsel %vm4121_vm13, %v4106_v24, %v4108_v59 }
0x1dee   : > { %v4138_v3 = vadd.f32 %v4122_v37, %v4073_v41  ;;  %v4139_v34 = vadd.f32 %v4123_v21, %v4074_v53 }
0x1df0   : > { %v4110_v13 = vpop.permute.xlu1 %4109  ;;  %v4112_v39 = vpop.permute.xlu0 %4111 }
0x1df1   : > { %v4124_v31 = vsel %vm4121_vm13, %v4108_v59, %v4110_v13  ;;  %v4125_v36 = vsel %vm4121_vm13, %v4110_v13, %v4112_v39 }
0x1df2   : > { %v4140_v0 = vadd.f32 %v4124_v31, %v4075_v46  ;;  %v4141_v33 = vadd.f32 %v4125_v36, %v4076_v62 }
0x1df4   : > { %v4114_v48 = vpop.permute.xlu1 %4113  ;;  %v7870_v29 = vpop.permute.xlu0 %4115 }
0x1df5   : > { %v4126_v15 = vsel %vm4121_vm13, %v4112_v39, %v4114_v48  ;;  %v4127_v60 = vsel %vm4121_vm13, %v4114_v48, %v7870_v29 }
0x1df6   : > { %v4142_v13 = vadd.f32 %v4126_v15, %v4077_v7  ;;  %v4143_v39 = vadd.f32 %v4127_v60, %v4078_v27 }
0x1df8   : > { %v7872_v52 = vpop.permute.xlu1 %4117  ;;  %v7874_v20 = vpop.permute.xlu0 %4119 }
0x1df9   : > { %v4128_v48 = vsel %vm4121_vm13, %v7870_v29, %v7872_v52 }
0x1dfc   : > { %v4169_v43 = vpop.permute.xlu1 %4168  ;;  %v4171_v2 = vpop.permute.xlu0 %4170 }
0x1dfd   : > { %v4187_v23 = vsel %vm4186_vm14, %v4169_v43, %v4171_v2  ;;  %v4129_v43 = vsel %vm4121_vm13, %v7872_v52, %v7874_v20 }
0x1dfe   : > { %v4203_v54 = vadd.f32 %v4187_v23, %v4138_v3 }
0x1e00   : > { %v4173_v49 = vpop.permute.xlu1 %4172  ;;  %v4175_v44 = vpop.permute.xlu0 %4174 }
0x1e01   : > { %v4188_v6 = vsel %vm4186_vm14, %v4171_v2, %v4173_v49  ;;  %v4189_v42 = vsel %vm4186_vm14, %v4173_v49, %v4175_v44  ;;  %v4079_v2 = vadd.f32 %v4063_v35, %v7860_v22  ;;  %v4080_v49 = vadd.f32 %v4064_v17, %v7862_v14 }
0x1e02   : > { %v4204_v55 = vadd.f32 %v4188_v6, %v4139_v34  ;;  %v4205_v32 = vadd.f32 %v4189_v42, %v4140_v0 }
0x1e03   : > { %v4144_v14 = vadd.f32 %v4128_v48, %v4079_v2  ;;  %v4145_v20 = vadd.f32 %v4129_v43, %v4080_v49 }
0x1e04   : > { %v4177_v30 = vpop.permute.xlu1 %4176  ;;  %v4179_v18 = vpop.permute.xlu0 %4178 }
0x1e05   : > { %v4190_v63 = vsel %vm4186_vm14, %v4175_v44, %v4177_v30  ;;  %v4191_v9 = vsel %vm4186_vm14, %v4177_v30, %v4179_v18 }
0x1e06   : > { %v4206_v57 = vadd.f32 %v4190_v63, %v4141_v33  ;;  %v4207_v44 = vadd.f32 %v4191_v9, %v4142_v13 }
0x1e08   : > { %v7877_v1 = vpop.permute.xlu1 %4180  ;;  %v7879_v16 = vpop.permute.xlu0 %4182 }
0x1e09   : > { %v4192_v24 = vsel %vm4186_vm14, %v4179_v18, %v7877_v1  ;;  %v4193_v29 = vsel %vm4186_vm14, %v7877_v1, %v7879_v16 }
0x1e0a   : > { %v4208_v30 = vadd.f32 %v4192_v24, %v4143_v39  ;;  %v4209_v41 = vadd.f32 %v4193_v29, %v4144_v14 }
0x1e0c   : > { %v4185_v51 = vpop.permute.xlu1 %4184  ;;  %v4234_v40 = vpop.permute.xlu0 %4233 }
0x1e0d   : > { %v4194_v56 = vsel %vm4186_vm14, %v7879_v16, %v4185_v51 }
0x1e0e   : > { %v4210_v53 = vadd.f32 %v4194_v56, %v4145_v20 }
0x1e10   : > { %v4236_v61 = vpop.permute.xlu1 %4235  ;;  %v4238_v26 = vpop.permute.xlu0 %4237 }
0x1e11   : > { %v4252_v25 = vsel %vm4251_vm15, %v4234_v40, %v4236_v61  ;;  %v4253_v11 = vsel %vm4251_vm15, %v4236_v61, %v4238_v26 }
0x1e12   : > { %v4268_v5 = vadd.f32 %v4252_v25, %v4203_v54  ;;  %v4269_v4 = vadd.f32 %v4253_v11, %v4204_v55 }
0x1e14   : > { %4276 = vst [vmem:[%s7900_s16] sm:$0xff] %v4268_v5  ;;  %4277 = vst [vmem:[%s7900_s16 + $0x8] sm:$0xff] %v4269_v4  ;;  %v4240_v10 = vpop.permute.xlu1 %4239  ;;  %v4242_v19 = vpop.permute.xlu0 %4241 }
0x1e15   : > { %v4254_v59 = vsel %vm4251_vm15, %v4238_v26, %v4240_v10  ;;  %v4255_v38 = vsel %vm4251_vm15, %v4240_v10, %v4242_v19 }
0x1e16   : > { %v4270_v12 = vadd.f32 %v4254_v59, %v4205_v32  ;;  %v4271_v50 = vadd.f32 %v4255_v38, %v4206_v57 }
0x1e18   : > { %4278 = vst [vmem:[%s7900_s16 + $0x10] sm:$0xff] %v4270_v12  ;;  %4279 = vst [vmem:[%s7900_s16 + $0x18] sm:$0xff] %v4271_v50  ;;  %v4244_v18 = vpop.permute.xlu1 %4243  ;;  %v4246_v58 = vpop.permute.xlu0 %4245 }
0x1e19   : > { %v4256_v52 = vsel %vm4251_vm15, %v4242_v19, %v4244_v18  ;;  %v4257_v22 = vsel %vm4251_vm15, %v4244_v18, %v4246_v58 }
0x1e1a   : > { %v4272_v37 = vadd.f32 %v4256_v52, %v4207_v44  ;;  %v4273_v21 = vadd.f32 %v4257_v22, %v4208_v30 }
0x1e1c   : > { %4280 = vst [vmem:[%s7900_s16 + $0x20] sm:$0xff] %v4272_v37  ;;  %4281 = vst [vmem:[%s7900_s16 + $0x28] sm:$0xff] %v4273_v21  ;;  %v4248_v28 = vpop.permute.xlu1 %4247  ;;  %v4250_v40 = vpop.permute.xlu0 %4249 }
0x1e1d   : > { %v4258_v1 = vsel %vm4251_vm15, %v4246_v58, %v4248_v28  ;;  %v4259_v16 = vsel %vm4251_vm15, %v4248_v28, %v4250_v40 }
0x1e1e   : > { %v4274_v51 = vadd.f32 %v4258_v1, %v4209_v41  ;;  %v4275_v45 = vadd.f32 %v4259_v16, %v4210_v53 }
0x1e20   : > { %4282 = vst [vmem:[%s7900_s16 + $0x30] sm:$0xff] %v4274_v51  ;;  %4283 = vst [vmem:[%s7900_s16 + $0x38] sm:$0xff] %v4275_v45 }
0x1e21 PF: > { %s12_s9 = sadd.s32 1, %s4562_s9  }
0x1e22   : > { %p9_p5 = scmp.ge.s32.totalorder %s12_s9, 4  }
0x1e24   :  { %11 = sbr.rel (!%p9_p5) target bundleno = 1 (0x1), region = 58 }

</bundles_post_ra>
